<compile_context>
chip_gen: v5e
topology: v5e:2x2
jax: 0.10.0
libtpu: 0.0.40
codegen_flags: <defaults>
</compile_context>

<pallas_src>
import numpy as np

import jax
import jax.numpy as jnp
from jax import lax
from jax.experimental import pallas as pl
from jax.experimental.pallas import tpu as pltpu

# ----------------------- model hyper-parameters -----------------------------
NUM_ANCHORS = 1000          # hard-coded in the ONNX forward (eye(1000), 20/12)
FMAP_H = 12
FMAP_W = 20
ANCHOR_FEAT_CH = 8          # anchor_feat_channels
N_OFFSETS = 36              # reg_layer out = N_OFFSETS + 1, anchors = 5 + N_OFFSETS
BACKBONE_CH = 16            # synthetic backbone output channels
FEAT_DIM = ANCHOR_FEAT_CH * FMAP_H          # 96
CAT_DIM = 2 * FEAT_DIM                      # 192
NPROP = 5 + N_OFFSETS                       # 41 = 2 cls + 2 anchor-xy + 37 reg

# -------------------------- padded kernel geometry ---------------------------
M_PAD = 1024    # anchors padded 1000 -> 1024
N_PAD = 1024    # attention columns padded 999 -> 1024
F_PAD = 128     # anchor feature dim padded 96 -> 128
TM = 128        # row tile: 8 grid steps
NEG = -1e30     # effective -inf for padded / masked softmax columns


# ------------------------- fused Pallas head kernel --------------------------
def _laneatt_head_kernel(baf_ref, w_att_ref, b_att_ref,
                         w_h_att_ref, w_h_baf_ref, b_h_ref,
                         anch_ref, o_ref):
    """One 128-anchor row tile of the fully fused LaneATT head.

    baf_ref   : (M_PAD, F_PAD) bf16  VMEM-resident masked anchor features
    w_att_ref : (F_PAD, N_PAD) bf16  attention weight (transposed, padded)
    b_att_ref : (1, N_PAD)     f32   attention bias, padded cols = -1e30
    w_h_*_ref : (F_PAD, NPROP) bf16  fused cls+reg head weight halves, laid
                                     out in proposal-column order
                                     (cols 0:2 cls, 2:4 zero, 4: reg)
    b_h_ref   : (1, NPROP)     f32   fused head bias (same layout)
    anch_ref  : (TM, NPROP)    f32   anchors row tile
    o_ref     : (TM, NPROP)    f32   reg_proposals row tile
    """
    row0 = pl.multiple_of(pl.program_id(0) * TM, TM)
    baf_tile = baf_ref[pl.ds(row0, TM), :]                       # (TM, F_PAD) bf16

    # --- attention scores + row softmax (padded columns -> weight exactly 0) -
    scores = jnp.dot(baf_tile, w_att_ref[...],
                     preferred_element_type=jnp.float32) + b_att_ref[...]
    m = jnp.max(scores, axis=-1, keepdims=True)
    e = jnp.exp(scores - m)
    att = e * pl.reciprocal(jnp.sum(e, axis=-1, keepdims=True), approx=True)

    # --- non-diagonal attention-matrix tile, built with an XLU roll ----------
    #     row i, col j:  j < i -> att[i, j];  j == i -> 0;  j > i -> att[i, j-1]
    rolled = pltpu.roll(att, shift=1, axis=1)        # rolled[:, j] = att[:, j-1]
    rows = row0 + lax.broadcasted_iota(jnp.int32, (TM, N_PAD), 0)
    cols = lax.broadcasted_iota(jnp.int32, (TM, N_PAD), 1)
    att_mat = jnp.where(cols < rows, att,
                        jnp.where(cols == rows, 0.0, rolled))    # (TM, N_PAD) f32

    # --- attention features: att_mat @ baf (padded rows/cols contribute 0) ---
    att_feats = jnp.dot(att_mat.astype(jnp.bfloat16), baf_ref[...],
                        preferred_element_type=jnp.float32)      # (TM, F_PAD) f32

    # --- fused cls+reg head, output already in proposal column layout --------
    heads = (jnp.dot(att_feats.astype(jnp.bfloat16), w_h_att_ref[...],
                     preferred_element_type=jnp.float32)
             + jnp.dot(baf_tile, w_h_baf_ref[...],
                       preferred_element_type=jnp.float32)
             + b_h_ref[...])                                     # (TM, NPROP) f32

    # --- epilogue: 2-way cls softmax on cols 0:2, anchors added to cols 2: ---
    pcol = lax.broadcasted_iota(jnp.int32, (TM, NPROP), 1)
    is_cls = pcol < 2
    cmax = jnp.max(jnp.where(is_cls, heads, NEG), axis=-1, keepdims=True)
    ce = jnp.exp(jnp.where(is_cls, heads, cmax) - cmax)
    csum = jnp.sum(jnp.where(is_cls, ce, 0.0), axis=-1, keepdims=True)
    o_ref[...] = jnp.where(is_cls, ce / csum, anch_ref[...] + heads)


def fused_attention_head(baf_p, prep):
    """Single pallas_call covering everything downstream of the anchor features."""
    return pl.pallas_call(
        _laneatt_head_kernel,
        out_shape=jax.ShapeDtypeStruct((M_PAD, NPROP), jnp.float32),
        grid=(M_PAD // TM,),
        in_specs=[
            pl.BlockSpec((M_PAD, F_PAD), lambda i: (0, 0)),   # baf (resident)
            pl.BlockSpec((F_PAD, N_PAD), lambda i: (0, 0)),   # attention weight
            pl.BlockSpec((1, N_PAD), lambda i: (0, 0)),       # attention bias
            pl.BlockSpec((F_PAD, NPROP), lambda i: (0, 0)),   # head weight (att half)
            pl.BlockSpec((F_PAD, NPROP), lambda i: (0, 0)),   # head weight (baf half)
            pl.BlockSpec((1, NPROP), lambda i: (0, 0)),       # head bias
            pl.BlockSpec((TM, NPROP), lambda i: (i, 0)),      # anchors row tile
        ],
        out_specs=pl.BlockSpec((TM, NPROP), lambda i: (i, 0)),
        compiler_params=pltpu.CompilerParams(
            dimension_semantics=("parallel",),
            vmem_limit_bytes=32 * 1024 * 1024),
    )(baf_p, prep["w_att_p"], prep["b_att_p"], prep["w_h_att"],
      prep["w_h_baf"], prep["b_h"], prep["anchors_p"])


# --------------------------- XLA feature prologue ----------------------------
def _features(x, prep):
    """Backbone conv + 1x1 conv + anchor-cut gather + invalid-mask multiply.

    These are tiny (im2col GEMMs of ~240x27x16) and fuse better in XLA than as
    standalone pallas_calls (per perf review)."""
    feat = lax.conv_general_dilated(x, prep["w_fe"], window_strides=(2, 2),
                                    padding=((1, 1), (1, 1)),
                                    dimension_numbers=("NCHW", "OIHW", "NCHW"))
    feat = jnp.maximum(feat + prep["b_fe"][None, :, None, None], 0.0)
    feat = lax.conv_general_dilated(feat, prep["w_c1"], window_strides=(1, 1),
                                    padding=((0, 0), (0, 0)),
                                    dimension_numbers=("NCHW", "OIHW", "NCHW"))
    feat = feat + prep["b_c1"][None, :, None, None]

    flat = feat[0].reshape(-1)                                   # (C*H*W,) = 1920
    baf = flat[prep["cut_idx"]].reshape(NUM_ANCHORS, FEAT_DIM)   # (1000, 96)
    return baf * prep["valid_mask"]          # * logical_not(invalid_mask)


# ------------------------------ forward passes --------------------------------
def laneatt_forward(x, prep):
    baf = _features(x, prep)                                     # (1000, 96) f32
    baf_p = jnp.zeros((M_PAD, F_PAD), jnp.float32)
    baf_p = baf_p.at[:NUM_ANCHORS, :FEAT_DIM].set(baf).astype(jnp.bfloat16)
    props_p = fused_attention_head(baf_p, prep)                  # (1024, 41) f32
    return props_p[:NUM_ANCHORS]


def laneatt_forward_ref(x, prep, params, anchors):
    """Pure-JAX reference (f32, no Pallas) for correctness checking."""
    baf = _features(x, prep)
    scores = baf @ params["w_att"].T + params["b_att"]
    attention = jax.nn.softmax(scores, axis=1)
    i = jnp.arange(NUM_ANCHORS)[:, None]
    j = jnp.arange(NUM_ANCHORS)[None, :]
    src = jnp.clip(jnp.where(j < i, j, j - 1), 0, NUM_ANCHORS - 2)
    att_mat = jnp.where(j == i, 0.0, jnp.take_along_axis(attention, src, axis=1))
    att_feats = att_mat @ baf
    cat = jnp.concatenate([att_feats, baf], axis=1)
    cls_logits = cat @ params["w_cls"].T + params["b_cls"]
    reg = cat @ params["w_reg"].T + params["b_reg"]
    cls_sm = jax.nn.softmax(cls_logits, axis=1)
    return jnp.concatenate([cls_sm, anchors[:, 2:4], anchors[:, 4:] + reg], axis=1)


# --------------------------- deterministic setup ------------------------------
def build_params():
    key = jax.random.PRNGKey(0)
    ks = jax.random.split(key, 12)
    p = {
        "w_fe": jax.random.normal(ks[0], (BACKBONE_CH, 3, 3, 3), jnp.float32) * 0.1,
        "b_fe": jax.random.normal(ks[1], (BACKBONE_CH,), jnp.float32) * 0.01,
        "w_c1": jax.random.normal(ks[2], (ANCHOR_FEAT_CH, BACKBONE_CH, 1, 1), jnp.float32) * 0.1,
        "b_c1": jax.random.normal(ks[3], (ANCHOR_FEAT_CH,), jnp.float32) * 0.01,
        "w_att": jax.random.normal(ks[4], (NUM_ANCHORS - 1, FEAT_DIM), jnp.float32) * 0.05,
        "b_att": jax.random.normal(ks[5], (NUM_ANCHORS - 1,), jnp.float32) * 0.01,
        "w_cls": jax.random.normal(ks[6], (2, CAT_DIM), jnp.float32) * 0.05,
        "b_cls": jax.random.normal(ks[7], (2,), jnp.float32) * 0.01,
        "w_reg": jax.random.normal(ks[8], (N_OFFSETS + 1, CAT_DIM), jnp.float32) * 0.05,
        "b_reg": jax.random.normal(ks[9], (N_OFFSETS + 1,), jnp.float32) * 0.01,
    }
    anchors = jax.random.normal(ks[10], (NUM_ANCHORS, 5 + N_OFFSETS), jnp.float32)
    return p, anchors


def build_consts():
    # Deterministic synthetic anchor-cut indices, ordered (anchor, channel, y)
    # to match .view(1000, C_af, fmap_h, 1).
    a = np.arange(NUM_ANCHORS)[:, None, None]
    c = np.arange(ANCHOR_FEAT_CH)[None, :, None]
    y = np.arange(FMAP_H)[None, None, :]
    shp = (NUM_ANCHORS, ANCHOR_FEAT_CH, FMAP_H)
    cut_xs = np.broadcast_to((a * 7 + y * 3) % FMAP_W, shp).reshape(-1).astype(np.int32)
    cut_ys = np.broadcast_to(y, shp).reshape(-1).astype(np.int32)
    cut_zs = np.broadcast_to(c, shp).reshape(-1).astype(np.int32)
    invalid = np.broadcast_to(y > (a % (FMAP_H + 1)), shp).astype(np.float32)
    return {
        "cut_xs": jnp.asarray(cut_xs),
        "cut_ys": jnp.asarray(cut_ys),
        "cut_zs": jnp.asarray(cut_zs),
        "invalid_mask": jnp.asarray(invalid.reshape(NUM_ANCHORS, FEAT_DIM)),
    }


def prepare_inputs(params, anchors, consts):
    """Pad / transpose / cast weights once (outside jit) into kernel layout."""
    f32 = jnp.float32
    w_att_p = jnp.zeros((F_PAD, N_PAD), f32)
    w_att_p = w_att_p.at[:FEAT_DIM, :NUM_ANCHORS - 1].set(params["w_att"].T)
    b_att_p = jnp.full((1, N_PAD), NEG, f32)
    b_att_p = b_att_p.at[0, :NUM_ANCHORS - 1].set(params["b_att"])

    # Fused cls+reg head laid out directly in proposal-column order:
    #   cols 0:2 cls logits, cols 2:4 zero (anchor x/y), cols 4:41 reg.
    w_h = jnp.zeros((CAT_DIM, NPROP), f32)
    w_h = w_h.at[:, 0:2].set(params["w_cls"].T)
    w_h = w_h.at[:, 4:].set(params["w_reg"].T)
    b_h = jnp.zeros((1, NPROP), f32)
    b_h = b_h.at[0, 0:2].set(params["b_cls"])
    b_h = b_h.at[0, 4:].set(params["b_reg"])
    w_h_att = jnp.zeros((F_PAD, NPROP), f32).at[:FEAT_DIM].set(w_h[:FEAT_DIM])
    w_h_baf = jnp.zeros((F_PAD, NPROP), f32).at[:FEAT_DIM].set(w_h[FEAT_DIM:])

    anchors_p = jnp.zeros((M_PAD, NPROP), f32).at[:NUM_ANCHORS].set(anchors)

    cut_idx = (consts["cut_xs"] + FMAP_W * consts["cut_ys"]
               + FMAP_H * FMAP_W * consts["cut_zs"])
    valid_mask = 1.0 - consts["invalid_mask"]

    return {
        "w_fe": params["w_fe"], "b_fe": params["b_fe"],
        "w_c1": params["w_c1"], "b_c1": params["b_c1"],
        "cut_idx": cut_idx, "valid_mask": valid_mask,
        "w_att_p": w_att_p.astype(jnp.bfloat16),
        "b_att_p": b_att_p,
        "w_h_att": w_h_att.astype(jnp.bfloat16),
        "w_h_baf": w_h_baf.astype(jnp.bfloat16),
        "b_h": b_h,
        "anchors_p": anchors_p,
    }


# ---------------------------------- main --------------------------------------
if __name__ == "__main__":
    params, anchors = build_params()
    consts = build_consts()
    prep = prepare_inputs(params, anchors, consts)

    # Input image, NCHW; 3x3 stride-2 pad-1 backbone conv maps (24,40)->(12,20).
    x = jax.random.normal(jax.random.PRNGKey(0), (1, 3, 2 * FMAP_H, 2 * FMAP_W),
                          jnp.float32)

    fwd = jax.jit(laneatt_forward)
    out = jax.block_until_ready(fwd(x, prep))

    assert out.shape == (NUM_ANCHORS, 2 + 2 + N_OFFSETS + 1), out.shape
    assert bool(jnp.all(jnp.isfinite(out)))
    # cls softmax rows must sum to 1
    assert bool(jnp.allclose(jnp.sum(out[:, :2], axis=1), 1.0, atol=1e-4))

    # Pure-JAX reference check (bf16 MXU operands + approx reciprocal give
    # errors well below 1e-2 at these magnitudes).
    ref = jax.block_until_ready(
        jax.jit(laneatt_forward_ref)(x, prep, params, anchors))
    max_err = float(jnp.max(jnp.abs(out - ref)))
    assert max_err < 3e-2, max_err

    print("KERNEL_OK")
</pallas_src>

<mosaic_0001>
module attributes {stable_mosaic.version = 11 : i64} {
  func.func @_laneatt_head_kernel(%arg0: i32, %arg1: memref<1024x128xbf16, #tpu.memory_space<vmem>>, %arg2: memref<128x1024xbf16, #tpu.memory_space<vmem>>, %arg3: memref<1x1024xf32, #tpu.memory_space<vmem>>, %arg4: memref<128x41xbf16, #tpu.memory_space<vmem>>, %arg5: memref<128x41xbf16, #tpu.memory_space<vmem>>, %arg6: memref<1x41xf32, #tpu.memory_space<vmem>>, %arg7: memref<128x41xf32, #tpu.memory_space<vmem>>, %arg8: memref<128x41xf32, #tpu.memory_space<vmem>>) attributes {dimension_semantics = [#tpu.dimension_semantics<parallel>], iteration_bounds = array<i64: 8>, scalar_prefetch = 0 : i64, scratch_operands = 0 : i64, tpu.core_type = #tpu.core_type<tc>, window_params = [{pipeline_mode = #tpu.pipeline_mode<synchronous>, transform_indices = @transform_0, window_bounds = array<i64: 1024, 128>}, {pipeline_mode = #tpu.pipeline_mode<synchronous>, transform_indices = @transform_1, window_bounds = array<i64: 128, 1024>}, {pipeline_mode = #tpu.pipeline_mode<synchronous>, transform_indices = @transform_2, window_bounds = array<i64: 1, 1024>}, {pipeline_mode = #tpu.pipeline_mode<synchronous>, transform_indices = @transform_3, window_bounds = array<i64: 128, 41>}, {pipeline_mode = #tpu.pipeline_mode<synchronous>, transform_indices = @transform_4, window_bounds = array<i64: 128, 41>}, {pipeline_mode = #tpu.pipeline_mode<synchronous>, transform_indices = @transform_5, window_bounds = array<i64: 1, 41>}, {transform_indices = @transform_6, window_bounds = array<i64: 128, 41>}, {transform_indices = @transform_7, window_bounds = array<i64: 128, 41>}]} {
    %c128_i32 = arith.constant 128 : i32
    %0 = arith.muli %arg0, %c128_i32 : i32
    %1 = tpu.assume_multiple %0, 128 : i32
    %2 = arith.index_cast %1 : i32 to index
    %c0 = arith.constant 0 : index
    %3 = vector.load %arg1[%2, %c0] : memref<1024x128xbf16, #tpu.memory_space<vmem>>, vector<128x128xbf16>
    %c0_0 = arith.constant 0 : index
    %c0_1 = arith.constant 0 : index
    %4 = vector.load %arg2[%c0_0, %c0_1] : memref<128x1024xbf16, #tpu.memory_space<vmem>>, vector<128x1024xbf16>
    %cst = arith.constant dense<0.000000e+00> : vector<128x1024xf32>
    %5 = tpu.matmul %3, %4, %cst {dimension_numbers = #tpu.dot_dimension_numbers<[1], [0], [0], [1], [0, 0, 1, 1], [], []>} : vector<128x128xbf16>, vector<128x1024xbf16>, vector<128x1024xf32> -> vector<128x1024xf32>
    %c0_2 = arith.constant 0 : index
    %c0_3 = arith.constant 0 : index
    %6 = vector.load %arg3[%c0_2, %c0_3] : memref<1x1024xf32, #tpu.memory_space<vmem>>, vector<1x1024xf32>
    %7 = vector.broadcast %6 : vector<1x1024xf32> to vector<128x1024xf32>
    %8 = arith.addf %5, %7 : vector<128x1024xf32>
    %cst_4 = arith.constant dense<0xFF800000> : vector<128xf32>
    %9 = vector.multi_reduction <maximumf>, %8, %cst_4 [1] : vector<128x1024xf32> to vector<128xf32>
    %10 = vector.shape_cast %9 : vector<128xf32> to vector<128x1xf32>
    %11 = vector.broadcast %10 : vector<128x1xf32> to vector<128x1024xf32>
    %12 = arith.subf %8, %11 : vector<128x1024xf32>
    %13 = math.exp %12 : vector<128x1024xf32>
    %cst_5 = arith.constant dense<0.000000e+00> : vector<128xf32>
    %14 = vector.multi_reduction <add>, %13, %cst_5 [1] : vector<128x1024xf32> to vector<128xf32>
    %15 = vector.shape_cast %14 : vector<128xf32> to vector<128x1xf32>
    %16 = tpu.reciprocal %15 {approx = true} : vector<128x1xf32> -> vector<128x1xf32>
    %17 = vector.broadcast %16 : vector<128x1xf32> to vector<128x1024xf32>
    %18 = arith.mulf %13, %17 : vector<128x1024xf32>
    %c1_i32 = arith.constant 1 : i32
    %19 = tpu.dynamic_rotate %18 by %c1_i32 dim 1 : vector<128x1024xf32>, i32 -> vector<128x1024xf32>
    %20 = tpu.iota {dimensions = array<i32: 0>} : vector<128x1024xi32>
    %21 = vector.broadcast %1 : i32 to vector<128x1024xi32>
    %22 = arith.addi %21, %20 : vector<128x1024xi32>
    %23 = tpu.iota {dimensions = array<i32: 1>} : vector<128x1024xi32>
    %24 = arith.cmpi slt, %23, %22 : vector<128x1024xi32>
    %25 = arith.cmpi eq, %23, %22 : vector<128x1024xi32>
    %cst_6 = arith.constant 0.000000e+00 : f32
    %26 = vector.broadcast %cst_6 : f32 to vector<128x1024xf32>
    %27 = arith.select %25, %26, %19 : vector<128x1024xi1>, vector<128x1024xf32>
    %28 = arith.select %24, %18, %27 : vector<128x1024xi1>, vector<128x1024xf32>
    %29 = arith.truncf %28 : vector<128x1024xf32> to vector<128x1024xbf16>
    %c0_7 = arith.constant 0 : index
    %c0_8 = arith.constant 0 : index
    %30 = vector.load %arg1[%c0_7, %c0_8] : memref<1024x128xbf16, #tpu.memory_space<vmem>>, vector<1024x128xbf16>
    %cst_9 = arith.constant dense<0.000000e+00> : vector<128x128xf32>
    %31 = tpu.matmul %29, %30, %cst_9 {dimension_numbers = #tpu.dot_dimension_numbers<[1], [0], [0], [1], [0, 0, 1, 1], [], []>} : vector<128x1024xbf16>, vector<1024x128xbf16>, vector<128x128xf32> -> vector<128x128xf32>
    %32 = arith.truncf %31 : vector<128x128xf32> to vector<128x128xbf16>
    %c0_10 = arith.constant 0 : index
    %c0_11 = arith.constant 0 : index
    %33 = vector.load %arg4[%c0_10, %c0_11] : memref<128x41xbf16, #tpu.memory_space<vmem>>, vector<128x41xbf16>
    %cst_12 = arith.constant dense<0.000000e+00> : vector<128x41xf32>
    %34 = tpu.matmul %32, %33, %cst_12 {dimension_numbers = #tpu.dot_dimension_numbers<[1], [0], [0], [1], [0, 0, 1, 1], [], []>} : vector<128x128xbf16>, vector<128x41xbf16>, vector<128x41xf32> -> vector<128x41xf32>
    %c0_13 = arith.constant 0 : index
    %c0_14 = arith.constant 0 : index
    %35 = vector.load %arg5[%c0_13, %c0_14] : memref<128x41xbf16, #tpu.memory_space<vmem>>, vector<128x41xbf16>
    %cst_15 = arith.constant dense<0.000000e+00> : vector<128x41xf32>
    %36 = tpu.matmul %3, %35, %cst_15 {dimension_numbers = #tpu.dot_dimension_numbers<[1], [0], [0], [1], [0, 0, 1, 1], [], []>} : vector<128x128xbf16>, vector<128x41xbf16>, vector<128x41xf32> -> vector<128x41xf32>
    %37 = arith.addf %34, %36 : vector<128x41xf32>
    %c0_16 = arith.constant 0 : index
    %c0_17 = arith.constant 0 : index
    %38 = vector.load %arg6[%c0_16, %c0_17] : memref<1x41xf32, #tpu.memory_space<vmem>>, vector<1x41xf32>
    %39 = vector.broadcast %38 : vector<1x41xf32> to vector<128x41xf32>
    %40 = arith.addf %37, %39 : vector<128x41xf32>
    %41 = tpu.iota {dimensions = array<i32: 1>} : vector<128x41xi32>
    %c2_i32 = arith.constant 2 : i32
    %42 = vector.broadcast %c2_i32 : i32 to vector<128x41xi32>
    %43 = arith.cmpi slt, %41, %42 : vector<128x41xi32>
    %cst_18 = arith.constant -1.000000e+30 : f32
    %44 = vector.broadcast %cst_18 : f32 to vector<128x41xf32>
    %45 = arith.select %43, %40, %44 : vector<128x41xi1>, vector<128x41xf32>
    %cst_19 = arith.constant dense<0xFF800000> : vector<128xf32>
    %46 = vector.multi_reduction <maximumf>, %45, %cst_19 [1] : vector<128x41xf32> to vector<128xf32>
    %47 = vector.shape_cast %46 : vector<128xf32> to vector<128x1xf32>
    %48 = vector.shape_cast %47 : vector<128x1xf32> to vector<128x1xf32>
    %49 = vector.broadcast %48 : vector<128x1xf32> to vector<128x41xf32>
    %50 = arith.select %43, %40, %49 : vector<128x41xi1>, vector<128x41xf32>
    %51 = vector.broadcast %47 : vector<128x1xf32> to vector<128x41xf32>
    %52 = arith.subf %50, %51 : vector<128x41xf32>
    %53 = math.exp %52 : vector<128x41xf32>
    %cst_20 = arith.constant 0.000000e+00 : f32
    %54 = vector.broadcast %cst_20 : f32 to vector<128x41xf32>
    %55 = arith.select %43, %53, %54 : vector<128x41xi1>, vector<128x41xf32>
    %cst_21 = arith.constant dense<0.000000e+00> : vector<128xf32>
    %56 = vector.multi_reduction <add>, %55, %cst_21 [1] : vector<128x41xf32> to vector<128xf32>
    %57 = vector.shape_cast %56 : vector<128xf32> to vector<128x1xf32>
    %58 = vector.broadcast %57 : vector<128x1xf32> to vector<128x41xf32>
    %59 = arith.divf %53, %58 : vector<128x41xf32>
    %c0_22 = arith.constant 0 : index
    %c0_23 = arith.constant 0 : index
    %60 = vector.load %arg7[%c0_22, %c0_23] : memref<128x41xf32, #tpu.memory_space<vmem>>, vector<128x41xf32>
    %61 = arith.addf %60, %40 : vector<128x41xf32>
    %62 = arith.select %43, %59, %61 : vector<128x41xi1>, vector<128x41xf32>
    %c0_24 = arith.constant 0 : index
    %c0_25 = arith.constant 0 : index
    %63 = vector.load %arg8[%c0_24, %c0_25] : memref<128x41xf32, #tpu.memory_space<vmem>>, vector<128x41xf32>
    tpu.vector_store %arg8[%c0_24, %c0_25], %62 {strides = array<i32>} : memref<128x41xf32, #tpu.memory_space<vmem>>, vector<128x41xf32>,
    return
  }
  func.func @transform_0(%arg0: i32) -> (i32, i32) {
    %c0_i32 = arith.constant 0 : i32
    %c0_i32_0 = arith.constant 0 : i32
    %c0_i32_1 = arith.constant 0 : i32
    return %c0_i32, %c0_i32_0 : i32, i32
  }
  func.func @transform_1(%arg0: i32) -> (i32, i32) {
    %c0_i32 = arith.constant 0 : i32
    %c0_i32_0 = arith.constant 0 : i32
    %c0_i32_1 = arith.constant 0 : i32
    return %c0_i32, %c0_i32_0 : i32, i32
  }
  func.func @transform_2(%arg0: i32) -> (i32, i32) {
    %c0_i32 = arith.constant 0 : i32
    %c0_i32_0 = arith.constant 0 : i32
    %c0_i32_1 = arith.constant 0 : i32
    return %c0_i32, %c0_i32_0 : i32, i32
  }
  func.func @transform_3(%arg0: i32) -> (i32, i32) {
    %c0_i32 = arith.constant 0 : i32
    %c0_i32_0 = arith.constant 0 : i32
    %c0_i32_1 = arith.constant 0 : i32
    return %c0_i32, %c0_i32_0 : i32, i32
  }
  func.func @transform_4(%arg0: i32) -> (i32, i32) {
    %c0_i32 = arith.constant 0 : i32
    %c0_i32_0 = arith.constant 0 : i32
    %c0_i32_1 = arith.constant 0 : i32
    return %c0_i32, %c0_i32_0 : i32, i32
  }
  func.func @transform_5(%arg0: i32) -> (i32, i32) {
    %c0_i32 = arith.constant 0 : i32
    %c0_i32_0 = arith.constant 0 : i32
    %c0_i32_1 = arith.constant 0 : i32
    return %c0_i32, %c0_i32_0 : i32, i32
  }
  func.func @transform_6(%arg0: i32) -> (i32, i32) {
    %c0_i32 = arith.constant 0 : i32
    %c0_i32_0 = arith.constant 0 : i32
    return %arg0, %c0_i32 : i32, i32
  }
  func.func @transform_7(%arg0: i32) -> (i32, i32) {
    %c0_i32 = arith.constant 0 : i32
    %c0_i32_0 = arith.constant 0 : i32
    return %arg0, %c0_i32 : i32, i32
  }
}

</mosaic_0001>

<bundles_post_ra>
// kernel: squeeze.1
= control target key start
LH: loop header
LB: loop body
LE: loop exit
PB: predicated region body
PF: predicated region fallthrough
CT: control target
= control target key end

     0   :  { %s12_s6 = smov 3  ;;  %vm16_vm0 = vcmask 1042434   ;;  %s19_s7 = smov 3  ;;  %vm25_vm1 = vcmask 31744   ;;  %vm53_vm2 = vcmask 97280   ;;  %vm49_vm3 = vcmask 64512   ;;  %s891_s0 = inlined_call_operand.vmem [shape: f32[1,8,12,20], index: 0, kind: input, shape index: {}]   ;;  %s892_s1 = inlined_call_operand.vmem [shape: f32[1920], index: 1, kind: output, shape index: {}]  }
   0x1   :  { %v387_v0 = vld [vmem:[%s891_s0 + $0x17] ss:$44 sm:%s12_s6]   ;;  %s59_s16 = smov 3  ;;  %v399_v5 = vld [vmem:[%s891_s0 + $0x73] sm:$0x4]   ;;  %s66_s21 = smov 3 }
   0x2   :  { %v388_v1 = vld [vmem:[%s891_s0 + $0x69] sm:$0x4]   ;;  %v398_v7 = vld [vmem:[%s891_s0 + $0x21] ss:$40 sm:%s59_s16]   ;;  %v401_v8 = vld [vmem:[%s891_s0 + $0x73] sm:$0x4]  }
   0x3   :  { %v390_v2 = vld [vmem:[%s891_s0 + $0x69] sm:$0x4]   ;;  %v17_v3 = vsel %vm16_vm0, %v388_v1, %v387_v0  ;;  %v64_v10 = vsel %vm16_vm0, %v399_v5, %v398_v7  ;;  %v400_v11 = vld [vmem:[%s891_s0 + $0x21] ss:$40 sm:%s66_s21]   ;;  %s36_s26 = smov 3  ;;  %s43_s29 = smov 3 }
   0x4   :  { %v389_v4 = vld [vmem:[%s891_s0 + $0x17] ss:$44 sm:%s19_s7]   ;;  %v394_v12 = vld [vmem:[%s891_s0 + $0x58] sm:$0x4]   ;;  %s509_s30 = smov 124   ;;  %v71_v13 = vsel %vm16_vm0, %v401_v8, %v400_v11  ;;  %s83_s8 = smov 3 }
   0x5   :  { %v24_v6 = vsel %vm16_vm0, %v390_v2, %v389_v4  ;;  %v393_v14 = vld [vmem:[%s891_s0 + $0x6] ss:$44 sm:%s36_s26]   ;;  %v73_v16 = vsel %vm53_vm2, %v71_v13, %v64_v10  ;;  %v405_v18 = vld [vmem:[%s891_s0 + $0x62] sm:$0x4]   ;;  %s90_s11 = smov 3  ;;  %s510_s12 = smov 116  }
   0x6   :  { %v26_v9 = vsel %vm25_vm1, %v24_v6, %v17_v3  ;;  %v396_v15 = vld [vmem:[%s891_s0 + $0x58] sm:$0x4]   ;;  %74 = vrot.lane.b32.xlu1 %v73_v16, %s510_s12  ;;  %v41_v19 = vsel %vm16_vm0, %v394_v12, %v393_v14  ;;  %v404_v21 = vld [vmem:[%s891_s0 + $0x10] ss:$40 sm:%s83_s8]   ;;  %vm29_vm4 = vcmask 130048   ;;  %s107_s21 = smov 3 }
   0x7   :  { %27 = vrot.lane.b32.xlu0 %v26_v9, %s509_s30  ;;  %v395_v17 = vld [vmem:[%s891_s0 + $0x6] ss:$44 sm:%s43_s29]   ;;  %v407_v22 = vld [vmem:[%s891_s0 + $0x62] sm:$0x4]   ;;  %v88_v24 = vsel %vm16_vm0, %v405_v18, %v404_v21  ;;  %s131_s22 = smov 3  ;;  %s511_s25 = smov 120  }
   0x8   :  { %v48_v20 = vsel %vm16_vm0, %v396_v15, %v395_v17  ;;  %v406_v23 = vld [vmem:[%s891_s0 + $0x10] ss:$40 sm:%s90_s11]   ;;  %v411_v27 = vld [vmem:[%s891_s0 + $0x79] sm:$0x4]   ;;  %s142_s26 = smov 3  ;;  %s512_s27 = smov 108  }
   0x9   :  { %v95_v25 = vsel %vm16_vm0, %v407_v22, %v406_v23  ;;  %v50_v26 = vsel %vm49_vm3, %v48_v20, %v41_v19  ;;  %v410_v29 = vld [vmem:[%s891_s0 + $0x27] ss:$44 sm:%s107_s21]   ;;  %s119_s28 = smov 3  ;;  %s513_s29 = smov 112   ;;  %v416_v31 = vld [vmem:[%s891_s0 + $0x5] ss:$44 sm:%s131_s22]  }
   0xa   :  { %v97_v28 = vsel %vm29_vm4, %v95_v25, %v88_v24  ;;  %v112_v30 = vsel %vm16_vm0, %v411_v27, %v410_v29  ;;  %v417_v32 = vld [vmem:[%s891_s0 + $0x57] sm:$0x4]   ;;  %v413_v33 = vld [vmem:[%s891_s0 + $0x16] ss:$44 sm:%s119_s28]   ;;  %v419_v36 = vld [vmem:[%s891_s0 + $0x72] sm:$0x4]  }
   0xb   :  { %113 = vrot.lane.b32.xlu2 %v112_v30, %s512_s27  ;;  %v414_v34 = vld [vmem:[%s891_s0 + $0x68] sm:$0x4]   ;;  %v418_v35 = vld [vmem:[%s891_s0 + $0x20] ss:$40 sm:%s142_s26]   ;;  %v136_v37 = vsel %vm16_vm0, %v417_v32, %v416_v31  ;;  %s161_s13 = smov 3  ;;  %s514_s14 = smov 100  }
   0xc   :  { %v124_v38 = vsel %vm16_vm0, %v414_v34, %v413_v33  ;;  %v147_v39 = vsel %vm16_vm0, %v419_v36, %v418_v35  ;;  %s173_s15 = smov 3  ;;  %s515_s16 = smov 104   ;;  %v423_v40 = vld [vmem:[%s891_s0 + $0x26] ss:$44 sm:%s161_s13]   ;;  %v427_v43 = vld [vmem:[%s891_s0 + $0x67] sm:$0x4]  }
   0xd   :  { %s516_s17 = smov 96   ;;  %v424_v41 = vld [vmem:[%s891_s0 + $0x78] sm:$0x4]   ;;  %v426_v42 = vld [vmem:[%s891_s0 + $0x15] ss:$44 sm:%s173_s15]   ;;  %s308_s28 = smov 3 }
   0xe   :  { %98 = vrot.lane.b32.xlu1 %v97_v28, %s513_s29  ;;  %v166_v44 = vsel %vm16_vm0, %v424_v41, %v423_v40  ;;  %v421_v45 = vld [vmem:[%s891_s0 + $0xb] ss:$44 sm:$0x7]   ;;  %v178_v46 = vsel %vm16_vm0, %v427_v43, %v426_v42  ;;  %s517_s29 = smov 88   ;;  %s185_s30 = smov 3  ;;  %vm4_vm5 = vcmask 162816  }
   0xf   :  { %51 = vrot.lane.b32.xlu0 %v50_v26, %s511_s25  ;;  %s518_s2 = smov 92   ;;  %s519_s3 = smov 84   ;;  %v459_v47 = vld [vmem:[%s891_s0 + $0x23] ss:$40 sm:%s308_s28]   ;;  %v460_v48 = vld [vmem:[%s891_s0 + $0x75] sm:$0x4]  }
  0x10   :  { %v429_v49 = vld [vmem:[%s891_s0 + $0x4] ss:$44 sm:%s185_s30]   ;;  %v668_v51 = vsel %vm16_vm0, %v460_v48, %v459_v47  ;;  %v431_v52 = vld [vmem:[%s891_s0 + $0x1b] ss:$44 sm:$0x7]   ;;  %s520_s18 = smov 76  }
  0x11   :  { %v430_v50 = vld [vmem:[%s891_s0 + $0x56] sm:$0x4]   ;;  %v433_v54 = vld [vmem:[%s891_s0 + $0xa] ss:$44 sm:$0x7]   ;;  %s210_s19 = smov 3 }
  0x12   :  { %v190_v53 = vsel %vm16_vm0, %v430_v50, %v429_v49  ;;  %s234_s22 = smov 3  ;;  %s521_s23 = smov 80   ;;  %v463_v56 = vld [vmem:[%s891_s0 + $0x64] sm:$0x4]   ;;  %v439_v58 = vld [vmem:[%s891_s0 + $0x66] sm:$0x4]  }
  0x13   :  { %125 = vrot.lane.b32.xlu2 %v124_v38, %s515_s16  ;;  %s522_s26 = smov 72   ;;  %v435_v60 = vld [vmem:[%s891_s0 + $0x25] ss:$44 sm:%s210_s19]   ;;  %v442_v63 = vld [vmem:[%s891_s0 + $0x55] sm:$0x4]   ;;  %s350_s10 = smov 3 }
  0x14   :  { %v436_v61 = vld [vmem:[%s891_s0 + $0x77] sm:$0x4]   ;;  %v441_v62 = vld [vmem:[%s891_s0 + $0x3] ss:$40 sm:%s234_s22]   ;;  %s374_s11 = smov 3  ;;  %s523_s12 = smov 64  }
  0x15   :  { %v215_v1 = vsel %vm16_vm0, %v436_v61, %v435_v60  ;;  %v239_v2 = vsel %vm16_vm0, %v442_v63, %v441_v62  ;;  %s259_s13 = smov 3  ;;  %v469_v3 = vld [vmem:[%s891_s0 + $0x7] ss:$44 sm:%s350_s10]   ;;  %s525_s19 = smov 60   ;;  %v475_v6 = vld [vmem:[%s891_s0 + $0x11] ss:$40 sm:%s374_s11]  }
  0x16   :  { %148 = vrot.lane.b32.xlu1 %v147_v39, %s516_s17  ;;  %s222_s17 = smov 3  ;;  %v470_v4 = vld [vmem:[%s891_s0 + $0x59] sm:$0x4]   ;;  %v476_v7 = vld [vmem:[%s891_s0 + $0x63] sm:$0x4]   ;;  %s283_s30 = smov 3 }
  0x17   :  { %137 = vrot.lane.b32.xlu0 %v136_v37, %s514_s14  ;;  %s320_s14 = smov 3  ;;  %v438_v57 = vld [vmem:[%s891_s0 + $0x14] ss:$44 sm:%s222_s17]   ;;  %v355_v5 = vsel %vm16_vm0, %v470_v4, %v469_v3  ;;  %v379_v8 = vsel %vm16_vm0, %v476_v7, %v475_v6  ;;  %v445_v11 = vld [vmem:[%s891_s0 + $0x9] ss:$44 sm:$0x7]  }
  0x18   :  { %v462_v55 = vld [vmem:[%s891_s0 + $0x12] ss:$40 sm:%s320_s14]   ;;  %v227_v0 = vsel %vm16_vm0, %v439_v58, %v438_v57  ;;  %s524_s14 = smov 68   ;;  %v447_v9 = vld [vmem:[%s891_s0 + $0x24] ss:$44 sm:%s259_s13]   ;;  %s362_s5 = smov 3 }
  0x19   :  { %v325_v59 = vsel %vm16_vm0, %v463_v56, %v462_v55  ;;  %v448_v10 = vld [vmem:[%s891_s0 + $0x76] sm:$0x4]   ;;  %v443_v12 = vld [vmem:[%s891_s0 + $0x1a] ss:$44 sm:$0x7]   ;;  %s526_s6 = smov 52  }
  0x1a   :  { %v264_v13 = vsel %vm16_vm0, %v448_v10, %v447_v9  ;;  %v453_v14 = vld [vmem:[%s891_s0 + $0x2] ss:$40 sm:%s283_s30]   ;;  %s271_s9 = smov 3  ;;  %v466_v16 = vld [vmem:[%s891_s0 + $0x53] sm:$0x4]   ;;  %s528_s17 = smov 48  }
  0x1b   :  { %155 = vrot.lane.b32.xlu2 %v421_v45, %s518_s2  ;;  %s332_s2 = smov 3  ;;  %v472_v17 = vld [vmem:[%s891_s0 + $0x22] ss:$40 sm:%s362_s5]   ;;  %v454_v18 = vld [vmem:[%s891_s0 + $0x54] sm:$0x4]   ;;  %s529_s28 = smov 40  }
  0x1c   :  { %v465_v15 = vld [vmem:[%s891_s0 + $0x1] ss:$40 sm:%s332_s2]   ;;  %v473_v20 = vld [vmem:[%s891_s0 + $0x74] sm:$0x4]   ;;  %v451_v22 = vld [vmem:[%s891_s0 + $0x65] sm:$0x4]   ;;  %v288_v24 = vsel %vm16_vm0, %v454_v18, %v453_v14 }
  0x1d   :  { %v337_v19 = vsel %vm16_vm0, %v466_v16, %v465_v15  ;;  %v450_v21 = vld [vmem:[%s891_s0 + $0x13] ss:$40 sm:%s271_s9]   ;;  %v367_v23 = vsel %vm16_vm0, %v473_v20, %v472_v17  ;;  %v455_v26 = vld [vmem:[%s891_s0 + $0x19] ss:$44 sm:$0x7]   ;;  %s531_s30 = smov 36  }
  0x1e   :  { %179 = vrot.lane.b32.xlu1 %v178_v46, %s519_s3  ;;  %v276_v25 = vsel %vm16_vm0, %v451_v22, %v450_v21  ;;  %v457_v27 = vld [vmem:[%s891_s0 + $0x8] ss:$44 sm:$0x7]   ;;  %s532_s4 = smov 28   ;;  %s533_s5 = smov 32   ;;  %vm32_vm6 = vcmask 1048544  }
  0x1f   :  { %167 = vrot.lane.b32.xlu0 %v166_v44, %s517_s29  ;;  %s530_s29 = smov 44   ;;  %v467_v28 = vld [vmem:[%s891_s0 + $0x18] ss:$44 sm:$0x7]   ;;  %s535_s9 = smov 16   ;;  %vm79_vm7 = vcmask 1048480  }
  0x20   :  { %s536_s10 = smov 20   ;;  %s537_s11 = smov 12   ;;  %v385_v30 = vld [vmem:[%s891_s0 + $0x54] sm:$0x1]   ;;  %vm115_vm8 = vcmask 1048416   ;;  %vm56_vm9 = vcmask 1048512  }
  0x21   :  { %s539_s13 = smov 8   ;;  %386 = vst.msk [vmem:[%s892_s1 + $0xa] sm:$0x1] %vm4_vm5, %v385_v30   ;;  %vm103_vm10 = vcmask 1048448   ;;  %vm127_vm11 = vcmask 1015616   ;;  %vm157_vm12 = vcmask 917216  }
  0x22   :  { %vm139_vm13 = vcmask 982816   ;;  %vm193_vm14 = vcmask 818816   ;;  %vm150_vm15 = vcmask 950016   ;;  %vm169_vm0 = vcmask 884416  }
  0x23   :  { %191 = vrot.lane.b32.xlu2 %v190_v53, %s521_s23 }
  0x26   :  { %204 = vrot.lane.b32.xlu1 %v433_v54, %s522_s26 }
  0x27   :  { %197 = vrot.lane.b32.xlu0 %v431_v52, %s520_s18 }
  0x2b   :  { %216 = vrot.lane.b32.xlu2 %v215_v1, %s524_s14  ;;  %s2_s14 = smov 3 }
  0x2c   :  { %v3_v29 = vld [vmem:[%s891_s0] ss:$40 sm:%s2_s14]  }
  0x2d   :  { %5 = vst.msk [vmem:[%s892_s1] ss:$5 sm:$0x3] %vm4_vm5, %v3_v29   ;;  %vm206_vm5 = vcmask 753216  }
  0x2e   :  { %240 = vrot.lane.b32.xlu1 %v239_v2, %s525_s19 }
  0x2f   :  { %228 = vrot.lane.b32.xlu0 %v227_v0, %s523_s12  ;;  %s527_s12 = smov 56  }
  0x33   :  { %246 = vrot.lane.b32.xlu2 %v443_v12, %s527_s12  ;;  %s538_s12 = smov 4  }
  0x36   :  { %265 = vrot.lane.b32.xlu1 %v264_v13, %s528_s17 }
  0x37   :  { %253 = vrot.lane.b32.xlu0 %v445_v11, %s526_s6  ;;  %s534_s6 = smov 24  }
  0x3b   :  { %277 = vrot.lane.b32.xlu2 %v276_v25, %s530_s29 }
  0x3e   :  { %295 = vrot.lane.b32.xlu1 %v455_v26, %s531_s30 }
  0x3f   :  { %289 = vrot.lane.b32.xlu0 %v288_v24, %s529_s28 }
  0x43   :  { %302 = vrot.lane.b32.xlu2 %v457_v27, %s533_s5 }
  0x46   :  { %326 = vrot.lane.b32.xlu1 %v325_v59, %s534_s6 }
  0x47   :  { %314 = vrot.lane.b32.xlu0 %v668_v51, %s532_s4 }
  0x4b   :  { %338 = vrot.lane.b32.xlu2 %v337_v19, %s536_s10 }
  0x4e   :  { %356 = vrot.lane.b32.xlu1 %v355_v5, %s537_s11 }
  0x4f   :  { %344 = vrot.lane.b32.xlu0 %v467_v28, %s535_s9 }
  0x53   :  { %368 = vrot.lane.b32.xlu2 %v367_v23, %s539_s13 }
  0x57   :  { %380 = vrot.lane.b32.xlu0 %v379_v8, %s538_s12 }
  0x65   :  { %v114_v31 = vpop.permute.xlu2 %113  }
  0x6d   :  { %v126_v32 = vpop.permute.xlu2 %125  }
  0x75   :  { %v156_v34 = vpop.permute.xlu2 %155  }
  0x78   :  { %v75_v35 = vpop.permute.xlu1 %74  }
  0x79   :  { %v28_v33 = vpop.permute.xlu0 %27   ;;  %402 = vst.msk [vmem:[%s892_s1 + $0x4] ss:$5 sm:$0x7] %vm49_vm3, %v75_v35   ;;  %vm199_vm3 = vcmask 786016  }
  0x7a   :  { %391 = vst.msk [vmem:[%s892_s1 + $0x3] ss:$5 sm:$0x7] %vm29_vm4, %v28_v33   ;;  %vm248_vm4 = vcmask 622016  }
  0x7b   :  { %392 = vst.msk [vmem:[%s892_s1 + $0x2] ss:$5 sm:$0x7] %vm32_vm6, %v28_v33   ;;  %vm230_vm6 = vcmask 687616  }
  0x7c   :  { %403 = vst.msk [vmem:[%s892_s1 + $0x3] ss:$5 sm:$0x7] %vm79_vm7, %v75_v35   ;;  %vm279_vm7 = vcmask 523616  }
  0x7d   :  { %412 = vst.msk [vmem:[%s892_s1 + $0x4] ss:$5 sm:$0x7] %vm115_vm8, %v114_v31   ;;  %v192_v37 = vpop.permute.xlu2 %191   ;;  %vm242_vm8 = vcmask 654816  }
  0x80   :  { %v99_v38 = vpop.permute.xlu1 %98  }
  0x81   :  { %v52_v36 = vpop.permute.xlu0 %51   ;;  %408 = vst.msk [vmem:[%s892_s1 + $0x2] ss:$5 sm:$0x7] %vm25_vm1, %v99_v38   ;;  %vm218_vm1 = vcmask 720416  }
  0x82   :  { %397 = vst.msk [vmem:[%s892_s1 + $0x1] ss:$5 sm:$0x7] %vm53_vm2, %v52_v36   ;;  %vm181_vm2 = vcmask 851616  }
  0x83   :  { %57 = vst.msk [vmem:[%s892_s1] ss:$5 sm:$0x7] %vm56_vm9, %v52_v36   ;;  %vm255_vm9 = vcmask 589216  }
  0x84   :  { %409 = vst.msk [vmem:[%s892_s1 + $0x1] ss:$5 sm:$0x7] %vm103_vm10, %v99_v38   ;;  %vm304_vm10 = vcmask 425216  }
  0x85   :  { %415 = vst.msk [vmem:[%s892_s1 + $0x2] ss:$5 sm:$0x7] %vm127_vm11, %v126_v32   ;;  %v217_v40 = vpop.permute.xlu2 %216   ;;  %vm267_vm11 = vcmask 556416  }
  0x86   :  { %422 = vst.msk [vmem:[%s892_s1 + $0x1] ss:$5 sm:$0x7] %vm157_vm12, %v156_v34   ;;  %vm291_vm12 = vcmask 490816  }
  0x88   :  { %v149_v41 = vpop.permute.xlu1 %148  }
  0x89   :  { %v138_v39 = vpop.permute.xlu0 %137   ;;  %420 = vst.msk [vmem:[%s892_s1 + $0x3] ss:$5 sm:$0x7] %vm150_vm15, %v149_v41   ;;  %vm316_vm15 = vcmask 392416  }
  0x8a   :  { %140 = vst.msk [vmem:[%s892_s1] ss:$5 sm:$0x7] %vm139_vm13, %v138_v39   ;;  %vm340_vm13 = vcmask 326816  }
  0x8b   :  { %194 = vst.msk [vmem:[%s892_s1] ss:$5 sm:$0x7] %vm193_vm14, %v192_v37   ;;  %vm297_vm14 = vcmask 458016  }
  0x8d   :  { %v247_v43 = vpop.permute.xlu2 %246  }
  0x90   :  { %v180_v44 = vpop.permute.xlu1 %179  }
  0x91   :  { %v168_v42 = vpop.permute.xlu0 %167   ;;  %428 = vst.msk [vmem:[%s892_s1 + $0x2] ss:$5 sm:$0x7] %vm181_vm2, %v180_v44   ;;  %vm346_vm2 = vcmask 294016  }
  0x92   :  { %425 = vst.msk [vmem:[%s892_s1 + $0x4] ss:$5 sm:$0x7] %vm169_vm0, %v168_v42   ;;  %vm370_vm0 = vcmask 228416  }
  0x93   :  { %437 = vst.msk [vmem:[%s892_s1 + $0x4] ss:$5 sm:$0x7] %vm218_vm1, %v217_v40   ;;  %vm328_vm1 = vcmask 359616  }
  0x95   :  { %v278_v46 = vpop.permute.xlu2 %277  }
  0x98   :  { %v205_v47 = vpop.permute.xlu1 %204  }
  0x99   :  { %v198_v45 = vpop.permute.xlu0 %197   ;;  %434 = vst.msk [vmem:[%s892_s1 + $0x1] ss:$5 sm:$0x7] %vm206_vm5, %v205_v47  }
  0x9a   :  { %432 = vst.msk [vmem:[%s892_s1 + $0x3] ss:$5 sm:$0x7] %vm199_vm3, %v198_v45   ;;  %vm358_vm3 = vcmask 261216  }
  0x9b   :  { %444 = vst.msk [vmem:[%s892_s1 + $0x3] ss:$5 sm:$0x7] %vm248_vm4, %v247_v43   ;;  %vm382_vm4 = vcmask 195616  }
  0x9d   :  { %v303_v49 = vpop.permute.xlu2 %302  }
  0xa0   :  { %v241_v50 = vpop.permute.xlu1 %240  }
  0xa1   :  { %v229_v48 = vpop.permute.xlu0 %228   ;;  %243 = vst.msk [vmem:[%s892_s1] ss:$5 sm:$0x7] %vm242_vm8, %v241_v50  }
  0xa2   :  { %440 = vst.msk [vmem:[%s892_s1 + $0x2] ss:$5 sm:$0x7] %vm230_vm6, %v229_v48  }
  0xa3   :  { %452 = vst.msk [vmem:[%s892_s1 + $0x2] ss:$5 sm:$0x7] %vm279_vm7, %v278_v46  }
  0xa5   :  { %v339_v52 = vpop.permute.xlu2 %338  }
  0xa8   :  { %v266_v53 = vpop.permute.xlu1 %265  }
  0xa9   :  { %v254_v51 = vpop.permute.xlu0 %253   ;;  %449 = vst.msk [vmem:[%s892_s1 + $0x4] ss:$5 sm:$0x7] %vm267_vm11, %v266_v53  }
  0xaa   :  { %446 = vst.msk [vmem:[%s892_s1 + $0x1] ss:$5 sm:$0x7] %vm255_vm9, %v254_v51  }
  0xab   :  { %458 = vst.msk [vmem:[%s892_s1 + $0x1] ss:$5 sm:$0x7] %vm304_vm10, %v303_v49  }
  0xad   :  { %v369_v55 = vpop.permute.xlu2 %368  }
  0xb0   :  { %v296_v56 = vpop.permute.xlu1 %295  }
  0xb1   :  { %v290_v54 = vpop.permute.xlu0 %289   ;;  %456 = vst.msk [vmem:[%s892_s1 + $0x3] ss:$5 sm:$0x7] %vm297_vm14, %v296_v56  }
  0xb2   :  { %292 = vst.msk [vmem:[%s892_s1] ss:$5 sm:$0x7] %vm291_vm12, %v290_v54  }
  0xb3   :  { %341 = vst.msk [vmem:[%s892_s1] ss:$5 sm:$0x7] %vm340_vm13, %v339_v52  }
  0xb8   :  { %v327_v58 = vpop.permute.xlu1 %326  }
  0xb9   :  { %v315_v57 = vpop.permute.xlu0 %314   ;;  %464 = vst.msk [vmem:[%s892_s1 + $0x2] ss:$5 sm:$0x7] %vm328_vm1, %v327_v58  }
  0xba   :  { %461 = vst.msk [vmem:[%s892_s1 + $0x4] ss:$5 sm:$0x7] %vm316_vm15, %v315_v57  }
  0xbb   :  { %474 = vst.msk [vmem:[%s892_s1 + $0x4] ss:$5 sm:$0x7] %vm370_vm0, %v369_v55  }
  0xc0   :  { %v357_v60 = vpop.permute.xlu1 %356  }
  0xc1   :  { %v345_v59 = vpop.permute.xlu0 %344   ;;  %471 = vst.msk [vmem:[%s892_s1 + $0x1] ss:$5 sm:$0x7] %vm358_vm3, %v357_v60  }
  0xc2   :  { %468 = vst.msk [vmem:[%s892_s1 + $0x3] ss:$5 sm:$0x7] %vm346_vm2, %v345_v59  }
  0xc9   :  { %v381_v61 = vpop.permute.xlu0 %380  }
  0xca   :  { %477 = vst.msk [vmem:[%s892_s1 + $0x2] ss:$5 sm:$0x7] %vm382_vm4, %v381_v61  }

// kernel: laneatt_forward.1
= control target key start
LH: loop header
LB: loop body
LE: loop exit
PB: predicated region body
PF: predicated region fallthrough
CT: control target
= control target key end

     0   :  { %s6207_s24 = smov 0   ;;  %s11159_s0 = inlined_call_operand.vmem [shape: bf16[1024,128], index: 0, kind: input, shape index: {}]   ;;  %s11160_s1 = inlined_call_operand.vmem [shape: bf16[128,1024], index: 1, kind: input, shape index: {}]   ;;  %s11161_s2 = inlined_call_operand.vmem [shape: f32[1,1024], index: 2, kind: input, shape index: {}]   ;;  %s11162_s3 = inlined_call_operand.vmem [shape: bf16[128,41], index: 3, kind: input, shape index: {}]   ;;  %s11163_s4 = inlined_call_operand.vmem [shape: bf16[128,41], index: 4, kind: input, shape index: {}]   ;;  %s11164_s5 = inlined_call_operand.vmem [shape: f32[1,41], index: 5, kind: input, shape index: {}]   ;;  %s11165_s6 = inlined_call_operand.vmem [shape: f32[1024,41], index: 6, kind: input, shape index: {}]   ;;  %s11166_s7 = inlined_call_operand.vmem [shape: f32[1024,41], index: 7, kind: output, shape index: {}]  }
   0x1 LB: > { %s4679_s25 = sadd.s32 4294967295, %s6164_s24   ;;  %p4683_p0 = scmp.ge.s32.totalorder %s6164_s24, 1  ;;  %s6164_s24 = sphi %s6207_s24, %s17_s24  }
   0x2   : > { %p238_p1 = scmp.lt.s32.totalorder %s6164_s24, 9 }
   0x4   : > { %p239_p2 = pnand %p4683_p0, %p238_p1 }
   0x6   : > { %242 = sbr.rel (%p239_p2) target bundleno = 1706 (0x6aa), region = 48 }
   0xb   : > { %v4948_v0 = vld [vmem:[%s11160_s1 + $0x1c0] sm:$0xf]  ;;  %v5364_v2 = vld [vmem:[%s11160_s1 + $0x1c4] sm:$0xf]  ;;  %s6289_s9 = sshll.u32 %s4679_s25, 7  ;;  %s6166_s14 = smov 1  }
   0xc   : > { %v5368_v1 = vld [vmem:[%s11160_s1 + $0x1dc] sm:$0xf0]  ;;  %v4950_v4 = vld [vmem:[%s11160_s1 + $0x1e0] sm:$0xf0]  ;;  %s283_s18 = sshra.s32 %s6289_s9, 3  ;;  %s4684_s26 = sshll.u32 %s4679_s25, 4 }
   0xd   : > { %v4949_v3 = vor.u32 %v5368_v1, %v4948_v0  ;;  %v4916_v5 = vld [vmem:[%s11160_s1 + $0x180] sm:$0xf]  ;;  %v4953_v7 = vor.u32 %v5364_v2, %v4950_v4  ;;  %v5356_v8 = vld [vmem:[%s11160_s1 + $0x184] sm:$0xf]  ;;  %s4689_s27 = sshll.u32 %s283_s18, 2  ;;  %p271_p3 = scmp.lt.s32.totalorder %s4684_s26, 127 }
   0xe   : > { %v5360_v6 = vld [vmem:[%s11160_s1 + $0x19c] sm:$0xf0]  ;;  %v4918_v9 = vld [vmem:[%s11160_s1 + $0x1a0] sm:$0xf0]  ;;  %v4956_v46 = vld [vmem:[%s11160_s1 + $0x1c8] sm:$0xf]  ;;  %s6331_s18 = scalar_lea.vmem %s11159_s0, %s4689_s27 }
   0xf   : > { %5452 = vmatpush.bf16.msra.mxu2 %v4949_v3  ;;  %v4917_v10 = vor.u32 %v5360_v6, %v4916_v5  ;;  %753 = vmatpush.bf16.msra.mxu0 %v4949_v3  ;;  %v4921_v11 = vor.u32 %v5356_v8, %v4918_v9  ;;  %v4884_v12 = vld [vmem:[%s11160_s1 + $0x140] sm:$0xf]  ;;  %v5348_v14 = vld [vmem:[%s11160_s1 + $0x144] sm:$0xf]  ;;  %v5369_v47 = vld [vmem:[%s11160_s1 + $0x1e4] sm:$0xf0] }
  0x10   : > { %5460 = vmatpush.bf16.msra.mxu3 %v4953_v7  ;;  %v5352_v13 = vld [vmem:[%s11160_s1 + $0x15c] sm:$0xf0]  ;;  %802 = vmatpush.bf16.msra.mxu1 %v4953_v7  ;;  %v4886_v15 = vld [vmem:[%s11160_s1 + $0x160] sm:$0xf0]  ;;  %v5365_v48 = vld [vmem:[%s11160_s1 + $0x1cc] sm:$0xf]  ;;  %v4957_v52 = vor.u32 %v5369_v47, %v4956_v46 }
  0x11   : > { %v4885_v16 = vor.u32 %v5352_v13, %v4884_v12  ;;  %v4889_v17 = vor.u32 %v5348_v14, %v4886_v15  ;;  %v4852_v18 = vld [vmem:[%s11160_s1 + $0x100] sm:$0xf]  ;;  %v5340_v20 = vld [vmem:[%s11160_s1 + $0x104] sm:$0xf]  ;;  %v4958_v49 = vld [vmem:[%s11160_s1 + $0x1e8] sm:$0xf0] }
  0x12   : > { %v5344_v19 = vld [vmem:[%s11160_s1 + $0x11c] sm:$0xf0]  ;;  %v4854_v21 = vld [vmem:[%s11160_s1 + $0x120] sm:$0xf0]  ;;  %v4961_v53 = vor.u32 %v5365_v48, %v4958_v49  ;;  %v4924_v54 = vld [vmem:[%s11160_s1 + $0x188] sm:$0xf] }
  0x13   : > { %5453 = vmatpush.bf16.msra.mxu2 %v4917_v10  ;;  %754 = vmatpush.bf16.msra.mxu0 %v4917_v10  ;;  %v4853_v22 = vor.u32 %v5344_v19, %v4852_v18  ;;  %v4857_v23 = vor.u32 %v5340_v20, %v4854_v21  ;;  %v4820_v24 = vld [vmem:[%s11160_s1 + $0xc0] sm:$0xf]  ;;  %v5332_v26 = vld [vmem:[%s11160_s1 + $0xc4] sm:$0xf]  ;;  %v5361_v55 = vld [vmem:[%s11160_s1 + $0x1a4] sm:$0xf0] }
  0x14   : > { %5461 = vmatpush.bf16.msra.mxu3 %v4921_v11  ;;  %803 = vmatpush.bf16.msra.mxu1 %v4921_v11  ;;  %v5336_v25 = vld [vmem:[%s11160_s1 + $0xdc] sm:$0xf0]  ;;  %v4822_v27 = vld [vmem:[%s11160_s1 + $0xe0] sm:$0xf0]  ;;  %v5357_v56 = vld [vmem:[%s11160_s1 + $0x18c] sm:$0xf]  ;;  %v4925_v60 = vor.u32 %v5361_v55, %v4924_v54 }
  0x15   : > { %v4821_v28 = vor.u32 %v5336_v25, %v4820_v24  ;;  %v4825_v29 = vor.u32 %v5332_v26, %v4822_v27  ;;  %v4788_v30 = vld [vmem:[%s11160_s1 + $0x80] sm:$0xf]  ;;  %v5324_v32 = vld [vmem:[%s11160_s1 + $0x84] sm:$0xf]  ;;  %v4926_v59 = vld [vmem:[%s11160_s1 + $0x1a8] sm:$0xf0] }
  0x16   : > { %v5328_v31 = vld [vmem:[%s11160_s1 + $0x9c] sm:$0xf0]  ;;  %v4790_v33 = vld [vmem:[%s11160_s1 + $0xa0] sm:$0xf0]  ;;  %v4929_v61 = vor.u32 %v5357_v56, %v4926_v59  ;;  %v4892_v62 = vld [vmem:[%s11160_s1 + $0x148] sm:$0xf] }
  0x17   : > { %5454 = vmatpush.bf16.msra.mxu2 %v4885_v16  ;;  %755 = vmatpush.bf16.msra.mxu0 %v4885_v16  ;;  %v4789_v34 = vor.u32 %v5328_v31, %v4788_v30  ;;  %v4793_v35 = vor.u32 %v5324_v32, %v4790_v33  ;;  %v4756_v36 = vld [vmem:[%s11160_s1 + $0x40] sm:$0xf]  ;;  %v5316_v38 = vld [vmem:[%s11160_s1 + $0x44] sm:$0xf]  ;;  %v5353_v63 = vld [vmem:[%s11160_s1 + $0x164] sm:$0xf0] }
  0x18   : > { %5462 = vmatpush.bf16.msra.mxu3 %v4889_v17  ;;  %804 = vmatpush.bf16.msra.mxu1 %v4889_v17  ;;  %v5320_v37 = vld [vmem:[%s11160_s1 + $0x5c] sm:$0xf0]  ;;  %v4758_v39 = vld [vmem:[%s11160_s1 + $0x60] sm:$0xf0]  ;;  %v5349_v0 = vld [vmem:[%s11160_s1 + $0x14c] sm:$0xf]  ;;  %v4893_v2 = vor.u32 %v5353_v63, %v4892_v62 }
  0x19   : > { %v4757_v40 = vor.u32 %v5320_v37, %v4756_v36  ;;  %v4724_v41 = vld [vmem:[%s11160_s1] sm:$0xf]  ;;  %v4761_v42 = vor.u32 %v5316_v38, %v4758_v39  ;;  %v5308_v44 = vld [vmem:[%s11160_s1 + $0x4] sm:$0xf]  ;;  %v4894_v1 = vld [vmem:[%s11160_s1 + $0x168] sm:$0xf0] }
  0x1a   : > { %v5312_v43 = vld [vmem:[%s11160_s1 + $0x1c] sm:$0xf0]  ;;  %v4726_v45 = vld [vmem:[%s11160_s1 + $0x20] sm:$0xf0]  ;;  %v4860_v3 = vld [vmem:[%s11160_s1 + $0x108] sm:$0xf]  ;;  %v4897_v4 = vor.u32 %v5349_v0, %v4894_v1 }
  0x1b   : > { %5455 = vmatpush.bf16.msra.mxu2 %v4853_v22  ;;  %756 = vmatpush.bf16.msra.mxu0 %v4853_v22  ;;  %v4725_v50 = vor.u32 %v5312_v43, %v4724_v41  ;;  %v4729_v51 = vor.u32 %v5308_v44, %v4726_v45  ;;  %v6343_v57 = vld [vmem:[%s6331_s18 + $0x20] sm:$0xff]  ;;  %v5345_v5 = vld [vmem:[%s11160_s1 + $0x124] sm:$0xf0]  ;;  %v5341_v6 = vld [vmem:[%s11160_s1 + $0x10c] sm:$0xf]  ;;  %s12151_s26 = smov (!%p271_p3, %s4684_s26), 127 }
  0x1c   : > { %5463 = vmatpush.bf16.msra.mxu3 %v4857_v23  ;;  %805 = vmatpush.bf16.msra.mxu1 %v4857_v23  ;;  %v6346_v58 = vld [vmem:[%s6331_s18] sm:$0xff]  ;;  %v4862_v7 = vld [vmem:[%s11160_s1 + $0x128] sm:$0xf0]  ;;  %v4964_v8 = vld [vmem:[%s11160_s1 + $0x1d0] sm:$0xf]  ;;  %v4861_v15 = vor.u32 %v5345_v5, %v4860_v3  ;;  %s4685_s27 = sshll.u32 %s12151_s26, 3 }
  0x1d   : > { %v5370_v9 = vld [vmem:[%s11160_s1 + $0x1ec] sm:$0xf0]  ;;  %v5366_v10 = vld [vmem:[%s11160_s1 + $0x1d4] sm:$0xf]  ;;  %v4865_v17 = vor.u32 %v5341_v6, %v4862_v7  ;;  %v4828_v18 = vld [vmem:[%s11160_s1 + $0xc8] sm:$0xf]  ;;  %s11037_s29 = scalar_lea.vmem %s11165_s6, %s4685_s27  ;;  %s11044_s10 = scalar_lea.vmem %s11166_s7, %s4685_s27 }
  0x1e   : > { %v4965_v11 = vor.u32 %v5370_v9, %v4964_v8  ;;  %v4966_v12 = vld [vmem:[%s11160_s1 + $0x1f0] sm:$0xf0]  ;;  %v4932_v13 = vld [vmem:[%s11160_s1 + $0x190] sm:$0xf]  ;;  %v5337_v19 = vld [vmem:[%s11160_s1 + $0xe4] sm:$0xf0] }
  0x1f   : > { %5456 = vmatpush.bf16.msra.mxu2 %v4821_v28  ;;  %757 = vmatpush.bf16.msra.mxu0 %v4821_v28  ;;  %v5362_v14 = vld [vmem:[%s11160_s1 + $0x1ac] sm:$0xf0]  ;;  %v4969_v16 = vor.u32 %v5366_v10, %v4966_v12  ;;  %v5333_v21 = vld [vmem:[%s11160_s1 + $0xcc] sm:$0xf]  ;;  %v4829_v23 = vor.u32 %v5337_v19, %v4828_v18  ;;  %v4796_v26 = vld [vmem:[%s11160_s1 + $0x88] sm:$0xf] }
  0x20   : > { %5464 = vmatpush.bf16.msra.mxu3 %v4825_v29  ;;  %806 = vmatpush.bf16.msra.mxu1 %v4825_v29  ;;  %v4933_v20 = vor.u32 %v5362_v14, %v4932_v13  ;;  %v4830_v22 = vld [vmem:[%s11160_s1 + $0xe8] sm:$0xf0]  ;;  %v5329_v27 = vld [vmem:[%s11160_s1 + $0xa4] sm:$0xf0]  ;;  %v5358_v33 = vld [vmem:[%s11160_s1 + $0x194] sm:$0xf] }
  0x21   : > { %v6410_v24 = vld [vmem:[%s6331_s18 + $0x28] sm:$0xff]  ;;  %v4833_v25 = vor.u32 %v5333_v21, %v4830_v22  ;;  %v4797_v31 = vor.u32 %v5329_v27, %v4796_v26  ;;  %v4900_v41 = vld [vmem:[%s11160_s1 + $0x150] sm:$0xf]  ;;  %v5350_v45 = vld [vmem:[%s11160_s1 + $0x154] sm:$0xf] }
  0x22   : > { %v6419_v28 = vld [vmem:[%s6331_s18 + $0x8] sm:$0xff]  ;;  %v4902_v46 = vld [vmem:[%s11160_s1 + $0x170] sm:$0xf0]  ;;  %v4868_v47 = vld [vmem:[%s11160_s1 + $0x110] sm:$0xf] }
  0x23   : > { %5457 = vmatpush.bf16.msra.mxu2 %v4789_v34  ;;  %758 = vmatpush.bf16.msra.mxu0 %v4789_v34  ;;  %v5325_v29 = vld [vmem:[%s11160_s1 + $0x8c] sm:$0xf]  ;;  %v4934_v34 = vld [vmem:[%s11160_s1 + $0x1b0] sm:$0xf0]  ;;  %v4764_v36 = vld [vmem:[%s11160_s1 + $0x48] sm:$0xf]  ;;  %v4905_v48 = vor.u32 %v5350_v45, %v4902_v46 }
  0x24   : > { %5465 = vmatpush.bf16.msra.mxu3 %v4793_v35  ;;  %807 = vmatpush.bf16.msra.mxu1 %v4793_v35  ;;  %v4798_v30 = vld [vmem:[%s11160_s1 + $0xa8] sm:$0xf0]  ;;  %v4937_v35 = vor.u32 %v5358_v33, %v4934_v34  ;;  %v5321_v37 = vld [vmem:[%s11160_s1 + $0x64] sm:$0xf0]  ;;  %v5346_v49 = vld [vmem:[%s11160_s1 + $0x12c] sm:$0xf0] }
  0x25   : > { %v4801_v32 = vor.u32 %v5325_v29, %v4798_v30  ;;  %v5317_v38 = vld [vmem:[%s11160_s1 + $0x4c] sm:$0xf]  ;;  %v4765_v39 = vor.u32 %v5321_v37, %v4764_v36  ;;  %v4870_v54 = vld [vmem:[%s11160_s1 + $0x130] sm:$0xf0]  ;;  %v5338_v63 = vld [vmem:[%s11160_s1 + $0xec] sm:$0xf0] }
  0x26   : > { %v5309_v56 = vld [vmem:[%s11160_s1 + $0xc] sm:$0xf]  ;;  %v5334_v0 = vld [vmem:[%s11160_s1 + $0xd4] sm:$0xf]  ;;  %v4804_v3 = vld [vmem:[%s11160_s1 + $0x90] sm:$0xf] }
  0x27   : > { %5458 = vmatpush.bf16.msra.mxu2 %v4757_v40  ;;  %759 = vmatpush.bf16.msra.mxu0 %v4757_v40  ;;  %v4766_v40 = vld [vmem:[%s11160_s1 + $0x68] sm:$0xf0]  ;;  %v4838_v1 = vld [vmem:[%s11160_s1 + $0xf0] sm:$0xf0]  ;;  %v4972_v12 = vld [vmem:[%s11160_s1 + $0x1d8] sm:$0xf] }
  0x28   : > { %5466 = vmatpush.bf16.msra.mxu3 %v4761_v42  ;;  %808 = vmatpush.bf16.msra.mxu1 %v4761_v42  ;;  %v5354_v42 = vld [vmem:[%s11160_s1 + $0x16c] sm:$0xf0]  ;;  %v4769_v43 = vor.u32 %v5317_v38, %v4766_v40  ;;  %v4734_v59 = vld [vmem:[%s11160_s1 + $0x28] sm:$0xf0]  ;;  %v4841_v5 = vor.u32 %v5334_v0, %v4838_v1  ;;  %v5326_v9 = vld [vmem:[%s11160_s1 + $0x94] sm:$0xf] }
  0x29   : > { %v4901_v44 = vor.u32 %v5354_v42, %v4900_v41  ;;  %v4737_v62 = vor.u32 %v5309_v56, %v4734_v59  ;;  %v6504_v6 = vld [vmem:[%s6331_s18 + $0x30] sm:$0xff]  ;;  %v5371_v13 = vld [vmem:[%s11160_s1 + $0x1f4] sm:$0xf0]  ;;  %v5367_v14 = vld [vmem:[%s11160_s1 + $0x1dc] sm:$0xf] }
  0x2a   : > { %v6507_v7 = vld [vmem:[%s6331_s18 + $0x10] sm:$0xff]  ;;  %v6559_v33 = vld [vmem:[%s6331_s18 + $0x18] sm:$0xff] }
  0x2b   : > { %5459 = vmatpush.bf16.msra.mxu2 %v4725_v50  ;;  %760 = vmatpush.bf16.msra.mxu0 %v4725_v50  ;;  %v4732_v50 = vld [vmem:[%s11160_s1 + $0x8] sm:$0xf]  ;;  %v4806_v10 = vld [vmem:[%s11160_s1 + $0xb0] sm:$0xf0]  ;;  %v5322_v18 = vld [vmem:[%s11160_s1 + $0x6c] sm:$0xf0] }
  0x2c   : > { %5467 = vmatpush.bf16.msra.mxu3 %v4729_v51  ;;  %809 = vmatpush.bf16.msra.mxu1 %v4729_v51  ;;  %v5313_v51 = vld [vmem:[%s11160_s1 + $0x24] sm:$0xf0]  ;;  %v5318_v21 = vld [vmem:[%s11160_s1 + $0x54] sm:$0xf]  ;;  %v5314_v26 = vld [vmem:[%s11160_s1 + $0x2c] sm:$0xf0] }
  0x2d   : > { %v4733_v55 = vor.u32 %v5313_v51, %v4732_v50  ;;  %v4774_v22 = vld [vmem:[%s11160_s1 + $0x70] sm:$0xf0]  ;;  %v4940_v34 = vld [vmem:[%s11160_s1 + $0x198] sm:$0xf]  ;;  %v5359_v36 = vld [vmem:[%s11160_s1 + $0x19c] sm:$0xf] }
  0x2e   : > { %781 = vmatmul.bf16.vlgmr.msra.gmra.mxu2 %v6343_v57  ;;  %761 = vmatmul.bf16.vlgmr.msra.gmra.mxu0 %v6346_v58  ;;  %v5310_v27 = vld [vmem:[%s11160_s1 + $0x14] sm:$0xf]  ;;  %v4942_v38 = vld [vmem:[%s11160_s1 + $0x1b8] sm:$0xf0]  ;;  %v4908_v40 = vld [vmem:[%s11160_s1 + $0x158] sm:$0xf] }
  0x2f   : > { %851 = vmatpush.bf16.msrb.mxu2 %v4957_v52  ;;  %830 = vmatmul.bf16.vlgmr.msra.gmra.mxu3 %v6343_v57  ;;  %v4869_v52 = vor.u32 %v5346_v49, %v4868_v47  ;;  %v4742_v29 = vld [vmem:[%s11160_s1 + $0x30] sm:$0xf0]  ;;  %v5355_v41 = vld [vmem:[%s11160_s1 + $0x174] sm:$0xf0]  ;;  %v5351_v42 = vld [vmem:[%s11160_s1 + $0x15c] sm:$0xf] }
  0x30   : > { %900 = vmatpush.bf16.msrb.mxu3 %v4961_v53  ;;  %810 = vmatmul.bf16.vlgmr.msra.gmra.mxu1 %v6346_v58  ;;  %v5342_v53 = vld [vmem:[%s11160_s1 + $0x114] sm:$0xf]  ;;  %v4876_v46 = vld [vmem:[%s11160_s1 + $0x118] sm:$0xf]  ;;  %v4878_v50 = vld [vmem:[%s11160_s1 + $0x138] sm:$0xf0] }
  0x31   : > { %949 = vmatpush.bf16.msrb.mxu0 %v4965_v11  ;;  %998 = vmatpush.bf16.msrb.mxu1 %v4969_v16  ;;  %v4809_v11 = vor.u32 %v5326_v9, %v4806_v10  ;;  %v4974_v16 = vld [vmem:[%s11160_s1 + $0x1f8] sm:$0xf0]  ;;  %v5347_v47 = vld [vmem:[%s11160_s1 + $0x134] sm:$0xf0] }
  0x32   : > { %v4977_v19 = vor.u32 %v5367_v14, %v4974_v16  ;;  %v4877_v49 = vor.u32 %v5347_v47, %v4876_v46  ;;  %v4846_v56 = vld [vmem:[%s11160_s1 + $0xf8] sm:$0xf0] }
  0x33   : > { %852 = vmatpush.bf16.msrb.mxu2 %v4925_v60  ;;  %v4836_v60 = vld [vmem:[%s11160_s1 + $0xd0] sm:$0xf]  ;;  %v4814_v0 = vld [vmem:[%s11160_s1 + $0xb8] sm:$0xf0] }
  0x34   : > { %901 = vmatpush.bf16.msrb.mxu3 %v4929_v61  ;;  %v4873_v61 = vor.u32 %v5342_v53, %v4870_v54  ;;  %v5339_v53 = vld [vmem:[%s11160_s1 + $0xf4] sm:$0xf0]  ;;  %v5335_v54 = vld [vmem:[%s11160_s1 + $0xdc] sm:$0xf] }
  0x35   : > { %950 = vmatpush.bf16.msrb.mxu0 %v4933_v20  ;;  %999 = vmatpush.bf16.msrb.mxu1 %v4937_v35  ;;  %v5363_v35 = vld [vmem:[%s11160_s1 + $0x1b4] sm:$0xf0]  ;;  %v4849_v59 = vor.u32 %v5335_v54, %v4846_v56  ;;  %v5319_v9 = vld [vmem:[%s11160_s1 + $0x5c] sm:$0xf] }
  0x36   : > { %v4941_v37 = vor.u32 %v5363_v35, %v4940_v34 }
  0x37   : > { %853 = vmatpush.bf16.msrb.mxu2 %v4893_v2  ;;  %v4837_v2 = vor.u32 %v5338_v63, %v4836_v60  ;;  %v4812_v60 = vld [vmem:[%s11160_s1 + $0x98] sm:$0xf] }
  0x38   : > { %902 = vmatpush.bf16.msrb.mxu3 %v4897_v4  ;;  %v5330_v4 = vld [vmem:[%s11160_s1 + $0xac] sm:$0xf0] }
  0x39   : > { %951 = vmatpush.bf16.msrb.mxu0 %v4901_v44  ;;  %1000 = vmatpush.bf16.msrb.mxu1 %v4905_v48  ;;  %v4805_v8 = vor.u32 %v5330_v4, %v4804_v3  ;;  %v4910_v44 = vld [vmem:[%s11160_s1 + $0x178] sm:$0xf0] }
  0x3a   : > { %v4913_v45 = vor.u32 %v5351_v42, %v4910_v44  ;;  %v5343_v48 = vld [vmem:[%s11160_s1 + $0x11c] sm:$0xf] }
  0x3b   : > { %854 = vmatpush.bf16.msrb.mxu2 %v4861_v15  ;;  %v4973_v15 = vor.u32 %v5371_v13, %v4972_v12  ;;  %v4881_v51 = vor.u32 %v5343_v48, %v4878_v50 }
  0x3c   : > { %903 = vmatpush.bf16.msrb.mxu3 %v4865_v17  ;;  %v4772_v17 = vld [vmem:[%s11160_s1 + $0x50] sm:$0xf] }
  0x3d   : > { %952 = vmatpush.bf16.msrb.mxu0 %v4869_v52  ;;  %1001 = vmatpush.bf16.msrb.mxu1 %v4873_v61  ;;  %v4773_v20 = vor.u32 %v5322_v18, %v4772_v17  ;;  %v4844_v52 = vld [vmem:[%s11160_s1 + $0xd8] sm:$0xf] }
  0x3e   : > { %786 = vmatmul.bf16.gmra.mxu2 %v6410_v24  ;;  %766 = vmatmul.bf16.gmra.mxu0 %v6419_v28  ;;  %v5331_v61 = vld [vmem:[%s11160_s1 + $0xb4] sm:$0xf0] }
  0x3f   : > { %855 = vmatpush.bf16.msrb.mxu2 %v4829_v23  ;;  %835 = vmatmul.bf16.gmra.mxu3 %v6410_v24  ;;  %v4740_v23 = vld [vmem:[%s11160_s1 + $0x10] sm:$0xf]  ;;  %v4813_v63 = vor.u32 %v5331_v61, %v4812_v60 }
  0x40   : > { %904 = vmatpush.bf16.msrb.mxu3 %v4833_v25  ;;  %815 = vmatmul.bf16.gmra.mxu1 %v6419_v28  ;;  %v4777_v25 = vor.u32 %v5318_v21, %v4774_v22  ;;  %v4741_v30 = vor.u32 %v5314_v26, %v4740_v23  ;;  %v4748_v21 = vld [vmem:[%s11160_s1 + $0x18] sm:$0xf]  ;;  %v5311_v23 = vld [vmem:[%s11160_s1 + $0x1c] sm:$0xf] }
  0x41   : > { %953 = vmatpush.bf16.msrb.mxu0 %v4837_v2  ;;  %1002 = vmatpush.bf16.msrb.mxu1 %v4841_v5  ;;  %v6644_v2 = vld [vmem:[%s11161_s2] sm:$0xff]  ;;  %v4780_v5 = vld [vmem:[%s11160_s1 + $0x58] sm:$0xf]  ;;  %v4750_v26 = vld [vmem:[%s11160_s1 + $0x38] sm:$0xf0] }
  0x42   : > { %v6648_v3 = vperm.slane %v6644_v2, 0  ;;  %v6651_v4 = vperm.slane %v6644_v2, 1  ;;  %v5315_v22 = vld [vmem:[%s11160_s1 + $0x34] sm:$0xf0] }
  0x43   : > { %856 = vmatpush.bf16.msrb.mxu2 %v4797_v31  ;;  %v4745_v31 = vor.u32 %v5310_v27, %v4742_v29  ;;  %v4753_v29 = vor.u32 %v5311_v23, %v4750_v26 }
  0x44   : > { %905 = vmatpush.bf16.msrb.mxu3 %v4801_v32  ;;  %v6556_v32 = vld [vmem:[%s6331_s18 + $0x38] sm:$0xff] }
  0x45   : > { %954 = vmatpush.bf16.msrb.mxu0 %v4805_v8  ;;  %1003 = vmatpush.bf16.msrb.mxu1 %v4809_v11  ;;  %v5323_v8 = vld [vmem:[%s11160_s1 + $0x74] sm:$0xf0]  ;;  %v4782_v11 = vld [vmem:[%s11160_s1 + $0x78] sm:$0xf0] }
  0x46   : > { %v4781_v10 = vor.u32 %v5323_v8, %v4780_v5  ;;  %v4785_v13 = vor.u32 %v5319_v9, %v4782_v11 }
  0x47   : > { %857 = vmatpush.bf16.msrb.mxu2 %v4765_v39  ;;  %v4945_v39 = vor.u32 %v5359_v36, %v4942_v38 }
  0x48   : > { %906 = vmatpush.bf16.msrb.mxu3 %v4769_v43  ;;  %v4909_v43 = vor.u32 %v5355_v41, %v4908_v40 }
  0x49   : > { %955 = vmatpush.bf16.msrb.mxu0 %v4773_v20  ;;  %1004 = vmatpush.bf16.msrb.mxu1 %v4777_v25  ;;  %v4749_v25 = vor.u32 %v5315_v22, %v4748_v21 }
  0x4b   : > { %858 = vmatpush.bf16.msrb.mxu2 %v4733_v55  ;;  %v4845_v55 = vor.u32 %v5339_v53, %v4844_v52 }
  0x4c   : > { %907 = vmatpush.bf16.msrb.mxu3 %v4737_v62  ;;  %v5327_v62 = vld [vmem:[%s11160_s1 + $0x9c] sm:$0xf] }
  0x4d   : > { %956 = vmatpush.bf16.msrb.mxu0 %v4741_v30  ;;  %1005 = vmatpush.bf16.msrb.mxu1 %v4745_v31  ;;  %v4817_v1 = vor.u32 %v5327_v62, %v4814_v0 }
  0x4e   : > { %791 = vmatmul.bf16.gmra.mxu2 %v6504_v6  ;;  %771 = vmatmul.bf16.gmra.mxu0 %v6507_v7 }
  0x4f   : > { %840 = vmatmul.bf16.gmra.mxu3 %v6504_v6  ;;  %1047 = vmatpush.bf16.msra.mxu2 %v4973_v15 }
  0x50   : > { %820 = vmatmul.bf16.gmra.mxu1 %v6507_v7  ;;  %1096 = vmatpush.bf16.msra.mxu3 %v4977_v19 }
  0x53   : > { %1048 = vmatpush.bf16.msra.mxu2 %v4941_v37 }
  0x54   : > { %1097 = vmatpush.bf16.msra.mxu3 %v4945_v39 }
  0x57   : > { %1049 = vmatpush.bf16.msra.mxu2 %v4909_v43 }
  0x58   : > { %1098 = vmatpush.bf16.msra.mxu3 %v4913_v45 }
  0x5b   : > { %1050 = vmatpush.bf16.msra.mxu2 %v4877_v49 }
  0x5c   : > { %1099 = vmatpush.bf16.msra.mxu3 %v4881_v51 }
  0x5e   : > { %796 = vmatmul.bf16.gmra.mxu2 %v6556_v32  ;;  %776 = vmatmul.bf16.gmra.mxu0 %v6559_v33 }
  0x5f   : > { %845 = vmatmul.bf16.gmra.mxu3 %v6556_v32  ;;  %1051 = vmatpush.bf16.msra.mxu2 %v4845_v55 }
  0x60   : > { %825 = vmatmul.bf16.gmra.mxu1 %v6559_v33  ;;  %1100 = vmatpush.bf16.msra.mxu3 %v4849_v59 }
  0x63   : > { %1052 = vmatpush.bf16.msra.mxu2 %v4813_v63 }
  0x64   : > { %1101 = vmatpush.bf16.msra.mxu3 %v4817_v1 }
  0x67   : > { %1053 = vmatpush.bf16.msra.mxu2 %v4781_v10 }
  0x68   : > { %1102 = vmatpush.bf16.msra.mxu3 %v4785_v13 }
  0x6b   : > { %1054 = vmatpush.bf16.msra.mxu2 %v4749_v25 }
  0x6c   : > { %1103 = vmatpush.bf16.msra.mxu3 %v4753_v29 }
  0x6e   : > { %859 = vmatmul.bf16.vlgmr.msrb.gmra.mxu2 %v6346_v58  ;;  %957 = vmatmul.bf16.vlgmr.msrb.gmra.mxu0 %v6346_v58 }
  0x6f   : > { %908 = vmatmul.bf16.vlgmr.msrb.gmra.mxu3 %v6346_v58 }
  0x70   : > { %1006 = vmatmul.bf16.vlgmr.msrb.gmra.mxu1 %v6346_v58 }
  0x7e   : > { %864 = vmatmul.bf16.gmra.mxu2 %v6419_v28  ;;  %962 = vmatmul.bf16.gmra.mxu0 %v6419_v28 }
  0x7f   : > { %913 = vmatmul.bf16.gmra.mxu3 %v6419_v28 }
  0x80   : > { %1011 = vmatmul.bf16.gmra.mxu1 %v6419_v28 }
  0x8e   : > { %869 = vmatmul.bf16.gmra.mxu2 %v6507_v7  ;;  %967 = vmatmul.bf16.gmra.mxu0 %v6507_v7 }
  0x8f   : > { %918 = vmatmul.bf16.gmra.mxu3 %v6507_v7 }
  0x90   : > { %1016 = vmatmul.bf16.gmra.mxu1 %v6507_v7 }
  0x9e   : > { %874 = vmatmul.bf16.gmra.mxu2 %v6559_v33  ;;  %972 = vmatmul.bf16.gmra.mxu0 %v6559_v33 }
  0x9f   : > { %923 = vmatmul.bf16.gmra.mxu3 %v6559_v33 }
  0xa0   : > { %1021 = vmatmul.bf16.gmra.mxu1 %v6559_v33 }
  0xab   : > { %v762_v59 = vpop.f32.mrf.mxu0 }
  0xad   : > { %v811_v62 = vpop.f32.mrf.mxu1 }
  0xae   : > { %879 = vmatmul.bf16.gmra.mxu2 %v6343_v57  ;;  %977 = vmatmul.bf16.gmra.mxu0 %v6343_v57 }
  0xaf   : > { %928 = vmatmul.bf16.gmra.mxu3 %v6343_v57 }
  0xb0   : > { %1026 = vmatmul.bf16.gmra.mxu1 %v6343_v57 }
  0xb1   : > { %v782_v12 = vpop.f32.mrf.mxu2 }
  0xb2   : > { %v6669_v14 = vadd.f32 %v782_v12, %v6648_v3  ;;  %v831_v15 = vpop.f32.mrf.mxu3 }
  0xb3   : > { %v6672_v16 = vadd.f32 %v831_v15, %v6651_v4  ;;  %v764_v1 = vpop.f32.mrf.mxu0 }
  0xb5   : > { %11495 = vst [vmem:[#allocation2_spill] sm:$0xff] %v6672_v16 }
  0xb9   : > { %v784_v17 = vpop.f32.mrf.mxu2 }
  0xba   : > { %v6675_v18 = vadd.f32 %v784_v17, %v6648_v3  ;;  %v833_v19 = vpop.f32.mrf.mxu3 }
  0xbb   : > { %v6678_v20 = vadd.f32 %v833_v19, %v6651_v4  ;;  %v6760_v9 = vpop.f32.mrf.mxu0 }
  0xbc   : > { %11496 = vst [vmem:[#allocation3_spill] sm:$0xff] %v6675_v18 }
  0xbd   : > { %11497 = vst [vmem:[#allocation4_spill] sm:$0xff] %v6678_v20 }
  0xbe   : > { %884 = vmatmul.bf16.gmra.mxu2 %v6410_v24  ;;  %982 = vmatmul.bf16.gmra.mxu0 %v6410_v24 }
  0xbf   : > { %933 = vmatmul.bf16.gmra.mxu3 %v6410_v24 }
  0xc0   : > { %1031 = vmatmul.bf16.gmra.mxu1 %v6410_v24 }
  0xc1   : > { %v787_v27 = vpop.f32.mrf.mxu2 }
  0xc2   : > { %v6697_v30 = vadd.f32 %v787_v27, %v6648_v3  ;;  %v836_v31 = vpop.f32.mrf.mxu3 }
  0xc3   : > { %v6700_v34 = vadd.f32 %v836_v31, %v6651_v4  ;;  %v6770_v12 = vpop.f32.mrf.mxu0 }
  0xc4   : > { %11498 = vst [vmem:[#allocation5_spill] sm:$0xff] %v6697_v30 }
  0xc5   : > { %11499 = vst [vmem:[#allocation6_spill] sm:$0xff] %v6700_v34 }
  0xc9   : > { %v789_v35 = vpop.f32.mrf.mxu2 }
  0xca   : > { %v6703_v36 = vadd.f32 %v789_v35, %v6648_v3  ;;  %v838_v37 = vpop.f32.mrf.mxu3 }
  0xcb   : > { %v6706_v38 = vadd.f32 %v838_v37, %v6651_v4  ;;  %v6780_v19 = vpop.f32.mrf.mxu0 }
  0xcc   : > { %11500 = vst [vmem:[#allocation7_spill] sm:$0xff] %v6703_v36 }
  0xcd   : > { %11501 = vst [vmem:[#allocation8_spill] sm:$0xff] %v6706_v38 }
  0xce   : > { %889 = vmatmul.bf16.gmra.mxu2 %v6504_v6  ;;  %987 = vmatmul.bf16.gmra.mxu0 %v6504_v6 }
  0xcf   : > { %938 = vmatmul.bf16.gmra.mxu3 %v6504_v6 }
  0xd0   : > { %1036 = vmatmul.bf16.gmra.mxu1 %v6504_v6 }
  0xd1   : > { %v792_v39 = vpop.f32.mrf.mxu2 }
  0xd2   : > { %v6713_v40 = vadd.f32 %v792_v39, %v6648_v3  ;;  %v841_v41 = vpop.f32.mrf.mxu3 }
  0xd3   : > { %v6716_v42 = vadd.f32 %v841_v41, %v6651_v4  ;;  %v6792_v26 = vpop.f32.mrf.mxu0 }
  0xd4   : > { %11502 = vst [vmem:[#allocation9_spill] sm:$0xff] %v6713_v40  ;;  %v6835_v40 = vadd.f32 %v762_v59, %v6648_v3 }
  0xd5   : > { %11503 = vst [vmem:[#allocation10_spill] sm:$0xff] %v6716_v42  ;;  %v6838_v42 = vadd.f32 %v811_v62, %v6651_v4  ;;  %v6854_v62 = vperm.slane %v6644_v2, 3 }
  0xd6   : > { %11516 = vst [vmem:[#allocation23_spill] sm:$0xff] %v6835_v40 }
  0xd7   : > { %11517 = vst [vmem:[#allocation24_spill] sm:$0xff] %v6838_v42 }
  0xd9   : > { %v794_v43 = vpop.f32.mrf.mxu2 }
  0xda   : > { %v6719_v44 = vadd.f32 %v794_v43, %v6648_v3  ;;  %v843_v45 = vpop.f32.mrf.mxu3 }
  0xdb   : > { %v6722_v46 = vadd.f32 %v843_v45, %v6651_v4  ;;  %v6802_v31 = vpop.f32.mrf.mxu0 }
  0xdc   : > { %11504 = vst [vmem:[#allocation11_spill] sm:$0xff] %v6719_v44 }
  0xdd   : > { %11505 = vst [vmem:[#allocation12_spill] sm:$0xff] %v6722_v46 }
  0xde   : > { %894 = vmatmul.bf16.gmra.mxu2 %v6556_v32  ;;  %992 = vmatmul.bf16.gmra.mxu0 %v6556_v32 }
  0xdf   : > { %943 = vmatmul.bf16.gmra.mxu3 %v6556_v32 }
  0xe0   : > { %1041 = vmatmul.bf16.gmra.mxu1 %v6556_v32 }
  0xe1   : > { %v797_v47 = vpop.f32.mrf.mxu2 }
  0xe2   : > { %v6729_v48 = vadd.f32 %v797_v47, %v6648_v3  ;;  %v846_v49 = vpop.f32.mrf.mxu3 }
  0xe3   : > { %v6732_v50 = vadd.f32 %v846_v49, %v6651_v4  ;;  %v6811_v41 = vpop.f32.mrf.mxu0 }
  0xe4   : > { %11506 = vst [vmem:[#allocation13_spill] sm:$0xff] %v6729_v48 }
  0xe5   : > { %11507 = vst [vmem:[#allocation14_spill] sm:$0xff] %v6732_v50 }
  0xe9   : > { %v799_v51 = vpop.f32.mrf.mxu2 }
  0xea   : > { %v6735_v52 = vadd.f32 %v799_v51, %v6648_v3  ;;  %v848_v53 = vpop.f32.mrf.mxu3 }
  0xeb   : > { %v6738_v54 = vadd.f32 %v848_v53, %v6651_v4  ;;  %v958_v47 = vpop.f32.mrf.mxu0 }
  0xec   : > { %11508 = vst [vmem:[#allocation15_spill] sm:$0xff] %v6735_v52 }
  0xed   : > { %11509 = vst [vmem:[#allocation16_spill] sm:$0xff] %v6738_v54 }
  0xee   : > { %1055 = vmatmul.bf16.vlgmr.msra.gmra.mxu2 %v6346_v58 }
  0xef   : > { %1104 = vmatmul.bf16.vlgmr.msra.gmra.mxu3 %v6346_v58  ;;  %v813_v58 = vpop.f32.mrf.mxu1 }
  0xf1   : > { %v6742_v55 = vpop.f32.mrf.mxu2 }
  0xf2   : > { %v6744_v56 = vpop.f32.mrf.mxu3 }
  0xf7   : > { %v6764_v10 = vpop.f32.mrf.mxu1 }
  0xf9   : > { %v6746_v60 = vpop.f32.mrf.mxu2 }
  0xfa   : > { %v6748_v61 = vpop.f32.mrf.mxu3 }
  0xfe   : > { %1060 = vmatmul.bf16.gmra.mxu2 %v6419_v28 }
  0xff   : > { %1109 = vmatmul.bf16.gmra.mxu3 %v6419_v28  ;;  %v6776_v17 = vpop.f32.mrf.mxu1 }
 0x101   : > { %v6752_v63 = vpop.f32.mrf.mxu2 }
 0x102   : > { %v6754_v0 = vpop.f32.mrf.mxu3 }
 0x107   : > { %v6786_v22 = vpop.f32.mrf.mxu1 }
 0x109   : > { %v6756_v5 = vpop.f32.mrf.mxu2 }
 0x10a   : > { %v6758_v8 = vpop.f32.mrf.mxu3 }
 0x10e   : > { %1065 = vmatmul.bf16.gmra.mxu2 %v6507_v7 }
 0x10f   : > { %1114 = vmatmul.bf16.gmra.mxu3 %v6507_v7  ;;  %v6795_v27 = vpop.f32.mrf.mxu1 }
 0x111   : > { %v6766_v11 = vpop.f32.mrf.mxu2 }
 0x112   : > { %v6768_v28 = vpop.f32.mrf.mxu3 }
 0x117   : > { %v6804_v35 = vpop.f32.mrf.mxu1 }
 0x119   : > { %v6772_v13 = vpop.f32.mrf.mxu2 }
 0x11a   : > { %v6774_v15 = vpop.f32.mrf.mxu3 }
 0x11e   : > { %1070 = vmatmul.bf16.gmra.mxu2 %v6559_v33 }
 0x11f   : > { %1119 = vmatmul.bf16.gmra.mxu3 %v6559_v33  ;;  %v6818_v45 = vpop.f32.mrf.mxu1 }
 0x121   : > { %v6782_v7 = vpop.f32.mrf.mxu2 }
 0x122   : > { %v6784_v21 = vpop.f32.mrf.mxu3 }
 0x127   : > { %v1007_v53 = vpop.f32.mrf.mxu1 }
 0x129   : > { %v6788_v23 = vpop.f32.mrf.mxu2 }
 0x12a   : > { %v6790_v25 = vpop.f32.mrf.mxu3 }
 0x12e   : > { %1075 = vmatmul.bf16.gmra.mxu2 %v6343_v57 }
 0x12f   : > { %1124 = vmatmul.bf16.gmra.mxu3 %v6343_v57  ;;  %v1009_v48 = vpop.f32.mrf.mxu1 }
 0x131   : > { %v6798_v33 = vpop.f32.mrf.mxu2 }
 0x132   : > { %v6800_v29 = vpop.f32.mrf.mxu3 }
 0x139   : > { %v6806_v37 = vpop.f32.mrf.mxu2 }
 0x13a   : > { %v6808_v39 = vpop.f32.mrf.mxu3 }
 0x13e   : > { %1080 = vmatmul.bf16.gmra.mxu2 %v6410_v24 }
 0x13f   : > { %1129 = vmatmul.bf16.gmra.mxu3 %v6410_v24  ;;  %v960_v24 = vpop.f32.mrf.mxu0 }
 0x141   : > { %v6814_v43 = vpop.f32.mrf.mxu2 }
 0x142   : > { %v6816_v57 = vpop.f32.mrf.mxu3 }
 0x147   : > { %v963_v46 = vpop.f32.mrf.mxu0 }
 0x149   : > { %v6820_v49 = vpop.f32.mrf.mxu2 }
 0x14a   : > { %11510 = vst [vmem:[#allocation17_spill] sm:$0xff] %v6820_v49  ;;  %v6822_v51 = vpop.f32.mrf.mxu3 }
 0x14b   : > { %11511 = vst [vmem:[#allocation18_spill] sm:$0xff] %v6822_v51  ;;  %v6841_v51 = vperm.slane %v6644_v2, 2 }
 0x14d   : > { %v6851_v59 = vadd.f32 %v6742_v55, %v6841_v51  ;;  %v6870_v55 = vperm.slane %v6644_v2, 4 }
 0x14e   : > { %1085 = vmatmul.bf16.gmra.mxu2 %v6504_v6 }
 0x14f   : > { %1134 = vmatmul.bf16.gmra.mxu3 %v6504_v6  ;;  %v1012_v6 = vpop.f32.mrf.mxu1  ;;  %11519 = vst [vmem:[#allocation26_spill] sm:$0xff] %v6851_v59 }
 0x151   : > { %v6826_v52 = vpop.f32.mrf.mxu2 }
 0x152   : > { %11512 = vst [vmem:[#allocation19_spill] sm:$0xff] %v6826_v52  ;;  %v6828_v54 = vpop.f32.mrf.mxu3  ;;  %v6859_v52 = vadd.f32 %v764_v1, %v6648_v3 }
 0x153   : > { %11513 = vst [vmem:[#allocation20_spill] sm:$0xff] %v6828_v54 }
 0x154   : > { %11521 = vst [vmem:[#allocation28_spill] sm:$0xff] %v6859_v52 }
 0x157   : > { %v1014_v38 = vpop.f32.mrf.mxu1 }
 0x159   : > { %v6830_v50 = vpop.f32.mrf.mxu2 }
 0x15a   : > { %11514 = vst [vmem:[#allocation21_spill] sm:$0xff] %v6830_v50  ;;  %v6832_v44 = vpop.f32.mrf.mxu3 }
 0x15b   : > { %11515 = vst [vmem:[#allocation22_spill] sm:$0xff] %v6832_v44  ;;  %v1145_v44 = vmax.f32 %v6835_v40, %v6838_v42  ;;  %v6867_v42 = vadd.f32 %v6744_v56, %v6854_v62  ;;  %v965_v40 = vpop.f32.mrf.mxu0  ;;  %v6885_v56 = vadd.f32 %v6746_v60, %v6841_v51  ;;  %v6903_v60 = vperm.slane %v6644_v2, 6 }
 0x15d   : > { %11523 = vst [vmem:[#allocation30_spill] sm:$0xff] %v6867_v42 }
 0x15e   : > { %1090 = vmatmul.bf16.gmra.mxu2 %v6556_v32  ;;  %11526 = vst [vmem:[#allocation33_spill] sm:$0xff] %v6885_v56 }
 0x15f   : > { %1139 = vmatmul.bf16.gmra.mxu3 %v6556_v32  ;;  %v6862_v32 = vadd.f32 %v813_v58, %v6651_v4  ;;  %v6878_v58 = vadd.f32 %v958_v47, %v6870_v55 }
 0x161   : > { %v6845_v54 = vpop.f32.mrf.mxu2  ;;  %11522 = vst [vmem:[#allocation29_spill] sm:$0xff] %v6862_v32  ;;  %v1154_v36 = vmax.f32 %v6859_v52, %v6862_v32  ;;  %v6891_v32 = vadd.f32 %v6760_v9, %v6648_v3  ;;  %v6910_v9 = vadd.f32 %v6748_v61, %v6854_v62 }
 0x162   : > { %11518 = vst [vmem:[#allocation25_spill] sm:$0xff] %v6845_v54  ;;  %v6856_v50 = vpop.f32.mrf.mxu3  ;;  %v1146_v54 = vmax.f32 %v1145_v44, %v6851_v59  ;;  %v6881_v44 = vperm.slane %v6644_v2, 5 }
 0x163   : > { %11520 = vst [vmem:[#allocation27_spill] sm:$0xff] %v6856_v50 }
 0x164   : > { %v1147_v1 = vmax.f32 %v1146_v54, %v6867_v42  ;;  %11525 = vst [vmem:[#allocation32_spill] sm:$0xff] %v6878_v58  ;;  %v6895_v54 = vadd.f32 %v6764_v10, %v6651_v4  ;;  %v6899_v52 = vadd.f32 %v1007_v53, %v6881_v44  ;;  %v1155_v42 = vmax.f32 %v1154_v36, %v6885_v56  ;;  %v968_v53 = vpop.f32.mrf.mxu0 }
 0x165   : > { %11528 = vst [vmem:[#allocation35_spill] sm:$0xff] %v6891_v32 }
 0x166   : > { %11529 = vst [vmem:[#allocation36_spill] sm:$0xff] %v6895_v54  ;;  %v1148_v47 = vmax.f32 %v1147_v1, %v6878_v58  ;;  %v1163_v10 = vmax.f32 %v6891_v32, %v6895_v54  ;;  %v6915_v1 = vadd.f32 %v960_v24, %v6870_v55  ;;  %v1156_v56 = vmax.f32 %v1155_v42, %v6910_v9 }
 0x167   : > { %11530 = vst [vmem:[#allocation37_spill] sm:$0xff] %v6910_v9  ;;  %v6932_v54 = vadd.f32 %v6770_v12, %v6648_v3  ;;  %v6936_v42 = vadd.f32 %v6776_v17, %v6651_v4  ;;  %v6951_v17 = vadd.f32 %v963_v46, %v6870_v55 }
 0x168   : > { %v1149_v36 = vmax.f32 %v1148_v47, %v6899_v52  ;;  %v1017_v47 = vpop.f32.mrf.mxu1 }
 0x169   : > { %v6874_v50 = vpop.f32.mrf.mxu2  ;;  %11532 = vst [vmem:[#allocation39_spill] sm:$0xff] %v6932_v54  ;;  %v1172_v12 = vmax.f32 %v6932_v54, %v6936_v42 }
 0x16a   : > { %11524 = vst [vmem:[#allocation31_spill] sm:$0xff] %v6874_v50  ;;  %v6887_v59 = vpop.f32.mrf.mxu3 }
 0x16b   : > { %11527 = vst [vmem:[#allocation34_spill] sm:$0xff] %v6887_v59  ;;  %v6906_v59 = vperm.slane %v6644_v2, 7  ;;  %v6921_v2 = vadd.f32 %v6752_v63, %v6841_v51  ;;  %v6939_v63 = vadd.f32 %v1009_v48, %v6881_v44 }
 0x16c   : > { %11533 = vst [vmem:[#allocation40_spill] sm:$0xff] %v6936_v42  ;;  %v6968_v42 = vadd.f32 %v6780_v19, %v6648_v3 }
 0x16d   : > { %11531 = vst [vmem:[#allocation38_spill] sm:$0xff] %v6921_v2  ;;  %v1164_v32 = vmax.f32 %v1163_v10, %v6921_v2  ;;  %v6957_v10 = vadd.f32 %v6756_v5, %v6841_v51 }
 0x16e   : > { %11534 = vst [vmem:[#allocation41_spill] sm:$0xff] %v6951_v17 }
 0x16f   : > { %11535 = vst [vmem:[#allocation42_spill] sm:$0xff] %v6957_v10 }
 0x170   : > { %11536 = vst [vmem:[#allocation43_spill] sm:$0xff] %v6968_v42  ;;  %v1019_v54 = vpop.f32.mrf.mxu1 }
 0x171   : > { %v1056_v58 = vpop.f32.mrf.mxu2 }
 0x172   : > { %v6924_v50 = vadd.f32 %v1056_v58, %v6903_v60  ;;  %v1105_v61 = vpop.f32.mrf.mxu3  ;;  %v1157_v58 = vmax.f32 %v1156_v56, %v6915_v1 }
 0x173   : > { %v6927_v49 = vadd.f32 %v1105_v61, %v6906_v59  ;;  %v6945_v61 = vadd.f32 %v6754_v0, %v6854_v62 }
 0x174   : > { %v1150_v24 = vmax.f32 %v1149_v36, %v6924_v50  ;;  %v1158_v9 = vmax.f32 %v1157_v58, %v6939_v63  ;;  %v6976_v58 = vadd.f32 %v1012_v6, %v6881_v44 }
 0x175   : > { %v1165_v56 = vmax.f32 %v1164_v32, %v6945_v61  ;;  %v6972_v32 = vadd.f32 %v6786_v22, %v6651_v4  ;;  %v6987_v22 = vadd.f32 %v965_v40, %v6870_v55  ;;  %v7004_v40 = vadd.f32 %v6792_v26, %v6648_v3 }
 0x176   : > { %v1151_v36 = vmax.f32 %v1150_v24, %v6927_v49 }
 0x177   : > { %11537 = vst [vmem:[#allocation44_spill] sm:$0xff] %v6972_v32  ;;  %v1166_v5 = vmax.f32 %v1165_v56, %v6951_v17  ;;  %v1181_v19 = vmax.f32 %v6968_v42, %v6972_v32 }
 0x178   : > { %1152 = vmax.xlane.f32.xlu0 %v1151_v36  ;;  %v970_v36 = vpop.f32.mrf.mxu0  ;;  %11539 = vst [vmem:[#allocation46_spill] sm:$0xff] %v7004_v40 }
 0x179   : > { %v1058_v48 = vpop.f32.mrf.mxu2  ;;  %v1167_v6 = vmax.f32 %v1166_v5, %v6976_v58  ;;  %v7008_v5 = vadd.f32 %v6795_v27, %v6651_v4  ;;  %v7023_v27 = vadd.f32 %v968_v53, %v6870_v55 }
 0x17a   : > { %v6960_v0 = vadd.f32 %v1058_v48, %v6903_v60  ;;  %v1107_v24 = vpop.f32.mrf.mxu3  ;;  %v1173_v48 = vmax.f32 %v1172_v12, %v6957_v10  ;;  %v6993_v12 = vadd.f32 %v6766_v11, %v6841_v51  ;;  %v7011_v11 = vadd.f32 %v1014_v38, %v6881_v44  ;;  %v1022_v38 = vpop.f32.mrf.mxu1 }
 0x17b   : > { %v6963_v2 = vadd.f32 %v1107_v24, %v6906_v59  ;;  %11540 = vst [vmem:[#allocation47_spill] sm:$0xff] %v7008_v5  ;;  %v1190_v26 = vmax.f32 %v7004_v40, %v7008_v5  ;;  %v7040_v5 = vadd.f32 %v6802_v31, %v6648_v3 }
 0x17c   : > { %v1159_v46 = vmax.f32 %v1158_v9, %v6960_v0  ;;  %v6982_v9 = vadd.f32 %v6758_v8, %v6854_v62  ;;  %v1182_v42 = vmax.f32 %v1181_v19, %v6993_v12  ;;  %11541 = vst [vmem:[#allocation48_spill] sm:$0xff] %v7023_v27  ;;  %v7029_v19 = vadd.f32 %v6772_v13, %v6841_v51 }
 0x17e   : > { %v1160_v24 = vmax.f32 %v1159_v46, %v6963_v2  ;;  %11538 = vst [vmem:[#allocation45_spill] sm:$0xff] %v6982_v9  ;;  %v1174_v17 = vmax.f32 %v1173_v48, %v6982_v9 }
 0x17f   : > { %11542 = vst [vmem:[#allocation49_spill] sm:$0xff] %v7029_v19 }
 0x180   : > { %1161 = vmax.xlane.f32.xlu0 %v1160_v24  ;;  %v973_v48 = vpop.f32.mrf.mxu0 }
 0x181   : > { %v1061_v56 = vpop.f32.mrf.mxu2 }
 0x182   : > { %v6996_v46 = vadd.f32 %v1061_v56, %v6903_v60  ;;  %v1110_v8 = vpop.f32.mrf.mxu3  ;;  %v1175_v56 = vmax.f32 %v1174_v17, %v6987_v22 }
 0x183   : > { %v6999_v24 = vadd.f32 %v1110_v8, %v6906_v59  ;;  %v7017_v8 = vadd.f32 %v6768_v28, %v6854_v62 }
 0x184   : > { %v1168_v32 = vmax.f32 %v1167_v6, %v6996_v46  ;;  %v1176_v10 = vmax.f32 %v1175_v56, %v7011_v11  ;;  %v7048_v56 = vadd.f32 %v1017_v47, %v6881_v44 }
 0x185   : > { %v1183_v17 = vmax.f32 %v1182_v42, %v7017_v8  ;;  %v7044_v42 = vadd.f32 %v6804_v35, %v6651_v4  ;;  %v7059_v35 = vadd.f32 %v970_v36, %v6870_v55 }
 0x186   : > { %v1169_v6 = vmax.f32 %v1168_v32, %v6999_v24 }
 0x187   : > { %11543 = vst [vmem:[#allocation50_spill] sm:$0xff] %v7044_v42  ;;  %v1184_v13 = vmax.f32 %v1183_v17, %v7023_v27  ;;  %v1199_v31 = vmax.f32 %v7040_v5, %v7044_v42  ;;  %v7076_v42 = vadd.f32 %v6811_v41, %v6648_v3 }
 0x188   : > { %1170 = vmax.xlane.f32.xlu1 %v1169_v6  ;;  %v975_v40 = vpop.f32.mrf.mxu0 }
 0x189   : > { %v1063_v9 = vpop.f32.mrf.mxu2  ;;  %v1185_v47 = vmax.f32 %v1184_v13, %v7048_v56  ;;  %11544 = vst [vmem:[#allocation51_spill] sm:$0xff] %v7076_v42  ;;  %v7080_v13 = vadd.f32 %v6818_v45, %v6651_v4  ;;  %v7095_v4 = vadd.f32 %v973_v48, %v6870_v55 }
 0x18a   : > { %v7032_v28 = vadd.f32 %v1063_v9, %v6903_v60  ;;  %v1112_v32 = vpop.f32.mrf.mxu3  ;;  %v1191_v9 = vmax.f32 %v1190_v26, %v7029_v19  ;;  %v7065_v26 = vadd.f32 %v6782_v7, %v6841_v51  ;;  %v7083_v7 = vadd.f32 %v1019_v54, %v6881_v44 }
 0x18b   : > { %v7035_v6 = vadd.f32 %v1112_v32, %v6906_v59  ;;  %11545 = vst [vmem:[#allocation52_spill] sm:$0xff] %v7080_v13  ;;  %v1208_v3 = vmax.f32 %v7076_v42, %v7080_v13 }
 0x18c   : > { %v1177_v53 = vmax.f32 %v1176_v10, %v7032_v28  ;;  %v7054_v10 = vadd.f32 %v6774_v15, %v6854_v62 }
 0x18e   : > { %v1178_v32 = vmax.f32 %v1177_v53, %v7035_v6  ;;  %v1192_v27 = vmax.f32 %v1191_v9, %v7054_v10 }
 0x190   : > { %1179 = vmax.xlane.f32.xlu1 %v1178_v32  ;;  %v1024_v32 = vpop.f32.mrf.mxu1  ;;  %v1193_v9 = vmax.f32 %v1192_v27, %v7059_v35  ;;  %v978_v41 = vpop.f32.mrf.mxu0 }
 0x191   : > { %v1066_v17 = vpop.f32.mrf.mxu2 }
 0x192   : > { %v7068_v53 = vadd.f32 %v1066_v17, %v6903_v60  ;;  %v1115_v15 = vpop.f32.mrf.mxu3  ;;  %v1200_v17 = vmax.f32 %v1199_v31, %v7065_v26  ;;  %v1194_v54 = vmax.f32 %v1193_v9, %v7083_v7  ;;  %v7101_v31 = vadd.f32 %v6788_v23, %v6841_v51 }
 0x193   : > { %v7071_v19 = vadd.f32 %v1115_v15, %v6906_v59  ;;  %v7089_v15 = vadd.f32 %v6784_v21, %v6854_v62  ;;  %v7112_v9 = vadd.f32 %v1022_v38, %v6881_v44  ;;  %v7127_v38 = vadd.f32 %v6798_v33, %v6841_v51 }
 0x194   : > { %v1186_v36 = vmax.f32 %v1185_v47, %v7068_v53  ;;  %11547 = vst [vmem:[#allocation54_spill] sm:$0xff] %v7101_v31 }
 0x195   : > { %11546 = vst [vmem:[#allocation53_spill] sm:$0xff] %v7089_v15  ;;  %v1201_v27 = vmax.f32 %v1200_v17, %v7089_v15  ;;  %v1209_v17 = vmax.f32 %v1208_v3, %v7101_v31 }
 0x196   : > { %v1187_v47 = vmax.f32 %v1186_v36, %v7071_v19  ;;  %11548 = vst [vmem:[#allocation55_spill] sm:$0xff] %v7112_v9 }
 0x197   : > { %v1202_v42 = vmax.f32 %v1201_v27, %v7095_v4  ;;  %11550 = vst [vmem:[#allocation57_spill] sm:$0xff] %v7127_v38 }
 0x198   : > { %1188 = vmax.xlane.f32.xlu2 %v1187_v47  ;;  %v1027_v13 = vpop.f32.mrf.mxu1  ;;  %v980_v31 = vpop.f32.mrf.mxu0 }
 0x199   : > { %v1068_v45 = vpop.f32.mrf.mxu2 }
 0x19a   : > { %v7104_v21 = vadd.f32 %v1068_v45, %v6903_v60  ;;  %v1117_v36 = vpop.f32.mrf.mxu3  ;;  %v7118_v45 = vadd.f32 %v6790_v25, %v6854_v62 }
 0x19b   : > { %v7107_v47 = vadd.f32 %v1117_v36, %v6906_v59  ;;  %v7121_v36 = vadd.f32 %v975_v40, %v6870_v55  ;;  %v1217_v40 = vmax.f32 %v6669_v14, %v6672_v16 }
 0x19c   : > { %v1195_v48 = vmax.f32 %v1194_v54, %v7104_v21  ;;  %11549 = vst [vmem:[#allocation56_spill] sm:$0xff] %v7118_v45  ;;  %v1203_v54 = vmax.f32 %v1202_v42, %v7112_v9  ;;  %v1210_v27 = vmax.f32 %v1209_v17, %v7118_v45  ;;  %v7139_v42 = vadd.f32 %v1024_v32, %v6881_v44 }
 0x19d   : > { %v1218_v33 = vmax.f32 %v1217_v40, %v7127_v38  ;;  %v7149_v9 = vadd.f32 %v978_v41, %v6870_v55  ;;  %v1226_v41 = vmax.f32 %v6675_v18, %v6678_v20 }
 0x19e   : > { %v1196_v23 = vmax.f32 %v1195_v48, %v7107_v47  ;;  %v1211_v17 = vmax.f32 %v1210_v27, %v7121_v36  ;;  %v7155_v27 = vadd.f32 %v6806_v37, %v6841_v51 }
 0x1a0   : > { %1197 = vmax.xlane.f32.xlu2 %v1196_v23  ;;  %11552 = vst [vmem:[#allocation59_spill] sm:$0xff] %v7155_v27  ;;  %v983_v38 = vpop.f32.mrf.mxu0  ;;  %v1227_v37 = vmax.f32 %v1226_v41, %v7155_v27 }
 0x1a1   : > { %v1071_v15 = vpop.f32.mrf.mxu2  ;;  %v7205_v27 = vadd.f32 %v983_v38, %v6870_v55  ;;  %v11565_v38 = vld [vmem:[#allocation7_spill] sm:$0xff] }
 0x1a2   : > { %v7130_v3 = vadd.f32 %v1071_v15, %v6903_v60  ;;  %v1120_v48 = vpop.f32.mrf.mxu3  ;;  %v7145_v15 = vadd.f32 %v6800_v29, %v6854_v62 }
 0x1a3   : > { %v7133_v25 = vadd.f32 %v1120_v48, %v6906_v59  ;;  %v1029_v48 = vpop.f32.mrf.mxu1  ;;  %11559 = vst [vmem:[#allocation66_spill] sm:$0xff] %v7205_v27 }
 0x1a4   : > { %v1204_v23 = vmax.f32 %v1203_v54, %v7130_v3  ;;  %11551 = vst [vmem:[#allocation58_spill] sm:$0xff] %v7145_v15  ;;  %v1212_v54 = vmax.f32 %v1211_v17, %v7139_v42  ;;  %v1219_v32 = vmax.f32 %v1218_v33, %v7145_v15  ;;  %v7168_v33 = vadd.f32 %v1027_v13, %v6881_v44 }
 0x1a5   : > { %v7174_v15 = vadd.f32 %v6808_v39, %v6854_v62  ;;  %v7183_v13 = vadd.f32 %v6814_v43, %v6841_v51 }
 0x1a6   : > { %v1205_v45 = vmax.f32 %v1204_v23, %v7133_v25  ;;  %v1220_v17 = vmax.f32 %v1219_v32, %v7149_v9 }
 0x1a7   : > { %11553 = vst [vmem:[#allocation60_spill] sm:$0xff] %v7174_v15  ;;  %v1228_v32 = vmax.f32 %v1227_v37, %v7174_v15 }
 0x1a8   : > { %1206 = vmax.xlane.f32.xlu0 %v1205_v45  ;;  %v1221_v18 = vmax.f32 %v1220_v17, %v7168_v33  ;;  %11555 = vst [vmem:[#allocation62_spill] sm:$0xff] %v7183_v13  ;;  %v7195_v17 = vadd.f32 %v1029_v48, %v6881_v44 }
 0x1a9   : > { %v1073_v16 = vpop.f32.mrf.mxu2 }
 0x1aa   : > { %v7158_v40 = vadd.f32 %v1073_v16, %v6903_v60  ;;  %v1122_v29 = vpop.f32.mrf.mxu3  ;;  %11557 = vst [vmem:[#allocation64_spill] sm:$0xff] %v7195_v17 }
 0x1ab   : > { %v7161_v23 = vadd.f32 %v1122_v29, %v6906_v59  ;;  %v7177_v29 = vadd.f32 %v980_v31, %v6870_v55  ;;  %v1032_v20 = vpop.f32.mrf.mxu1  ;;  %v1235_v31 = vmax.f32 %v6697_v30, %v6700_v34 }
 0x1ac   : > { %v1213_v45 = vmax.f32 %v1212_v54, %v7158_v40 }
 0x1ad   : > { %11554 = vst [vmem:[#allocation61_spill] sm:$0xff] %v7177_v29  ;;  %v1229_v37 = vmax.f32 %v1228_v32, %v7177_v29  ;;  %v1236_v43 = vmax.f32 %v1235_v31, %v7183_v13  ;;  %v11560_v32 = vld [vmem:[#allocation17_spill] sm:$0xff] }
 0x1ae   : > { %v1214_v16 = vmax.f32 %v1213_v45, %v7161_v23  ;;  %v7211_v30 = vadd.f32 %v11560_v32, %v6841_v51 }
 0x1b0   : > { %1215 = vmax.xlane.f32.xlu1 %v1214_v16  ;;  %11561 = vst [vmem:[#allocation17_spill] sm:$0xff] %v7211_v30 }
 0x1b1   : > { %v1076_v54 = vpop.f32.mrf.mxu2 }
 0x1b2   : > { %v7186_v41 = vadd.f32 %v1076_v54, %v6903_v60  ;;  %v1125_v45 = vpop.f32.mrf.mxu3  ;;  %v7201_v54 = vadd.f32 %v6816_v57, %v6854_v62 }
 0x1b3   : > { %v7189_v39 = vadd.f32 %v1125_v45, %v6906_v59  ;;  %v985_v45 = vpop.f32.mrf.mxu0  ;;  %v1034_v13 = vpop.f32.mrf.mxu1 }
 0x1b4   : > { %v1222_v16 = vmax.f32 %v1221_v18, %v7186_v41  ;;  %11558 = vst [vmem:[#allocation65_spill] sm:$0xff] %v7201_v54  ;;  %v1230_v18 = vmax.f32 %v1229_v37, %v7195_v17  ;;  %v1237_v48 = vmax.f32 %v1236_v43, %v7201_v54  ;;  %v7224_v43 = vadd.f32 %v1032_v20, %v6881_v44  ;;  %v11567_v54 = vld [vmem:[#allocation18_spill] sm:$0xff]  ;;  %v11570_v20 = vld [vmem:[#allocation19_spill] sm:$0xff] }
 0x1b5   : > { %11556 = vst [vmem:[#allocation63_spill] sm:$0xff] %v7189_v39  ;;  %v7230_v17 = vadd.f32 %v11567_v54, %v6854_v62 }
 0x1b6   : > { %v1223_v15 = vmax.f32 %v1222_v16, %v7189_v39  ;;  %v1238_v37 = vmax.f32 %v1237_v48, %v7205_v27  ;;  %11566 = vst [vmem:[#allocation69_spill] sm:$0xff] %v7224_v43  ;;  %v7239_v27 = vadd.f32 %v11570_v20, %v6841_v51 }
 0x1b7   : > { %11568 = vst [vmem:[#allocation18_spill] sm:$0xff] %v7230_v17 }
 0x1b8   : > { %1224 = vmax.xlane.f32.xlu2 %v1223_v15  ;;  %v11564_v15 = vld [vmem:[#allocation8_spill] sm:$0xff]  ;;  %11571 = vst [vmem:[#allocation19_spill] sm:$0xff] %v7239_v27 }
 0x1b9   : > { %v1078_v34 = vpop.f32.mrf.mxu2  ;;  %v1244_v29 = vmax.f32 %v11565_v38, %v11564_v15 }
 0x1ba   : > { %v7214_v31 = vadd.f32 %v1078_v34, %v6903_v60  ;;  %v1127_v57 = vpop.f32.mrf.mxu3 }
 0x1bb   : > { %v7217_v16 = vadd.f32 %v1127_v57, %v6906_v59  ;;  %v1245_v32 = vmax.f32 %v1244_v29, %v7211_v30  ;;  %v7233_v57 = vadd.f32 %v985_v45, %v6870_v55  ;;  %v988_v15 = vpop.f32.mrf.mxu0  ;;  %v11575_v45 = vld [vmem:[#allocation9_spill] sm:$0xff] }
 0x1bc   : > { %11562 = vst [vmem:[#allocation67_spill] sm:$0xff] %v7214_v31  ;;  %v1231_v39 = vmax.f32 %v1230_v18, %v7214_v31  ;;  %v1239_v18 = vmax.f32 %v1238_v37, %v7224_v43  ;;  %v7251_v37 = vadd.f32 %v1034_v13, %v6881_v44  ;;  %v7261_v31 = vadd.f32 %v988_v15, %v6870_v55  ;;  %v11584_v15 = vld [vmem:[#allocation11_spill] sm:$0xff] }
 0x1bd   : > { %11563 = vst [vmem:[#allocation68_spill] sm:$0xff] %v7217_v16  ;;  %v1246_v48 = vmax.f32 %v1245_v32, %v7230_v17  ;;  %v1037_v32 = vpop.f32.mrf.mxu1 }
 0x1be   : > { %v1232_v34 = vmax.f32 %v1231_v39, %v7217_v16  ;;  %11569 = vst [vmem:[#allocation70_spill] sm:$0xff] %v7233_v57 }
 0x1bf   : > { %11576 = vst [vmem:[#allocation73_spill] sm:$0xff] %v7251_v37  ;;  %v1247_v17 = vmax.f32 %v1246_v48, %v7233_v57 }
 0x1c0   : > { %1233 = vmax.xlane.f32.xlu0 %v1232_v34  ;;  %v11574_v34 = vld [vmem:[#allocation10_spill] sm:$0xff]  ;;  %11579 = vst [vmem:[#allocation74_spill] sm:$0xff] %v7261_v31 }
 0x1c1   : > { %v1081_v38 = vpop.f32.mrf.mxu2  ;;  %v1253_v30 = vmax.f32 %v11575_v45, %v11574_v34  ;;  %v11580_v45 = vld [vmem:[#allocation21_spill] sm:$0xff] }
 0x1c2   : > { %v7242_v29 = vadd.f32 %v1081_v38, %v6903_v60  ;;  %v1130_v39 = vpop.f32.mrf.mxu3  ;;  %v11577_v38 = vld [vmem:[#allocation20_spill] sm:$0xff]  ;;  %v7267_v48 = vadd.f32 %v11580_v45, %v6841_v51 }
 0x1c3   : > { %v7245_v54 = vadd.f32 %v1130_v39, %v6906_v59  ;;  %v1254_v20 = vmax.f32 %v1253_v30, %v7239_v27  ;;  %v7257_v43 = vadd.f32 %v11577_v38, %v6854_v62  ;;  %v990_v27 = vpop.f32.mrf.mxu0 }
 0x1c4   : > { %11572 = vst [vmem:[#allocation71_spill] sm:$0xff] %v7242_v29  ;;  %v1240_v16 = vmax.f32 %v1239_v18, %v7242_v29  ;;  %v1248_v18 = vmax.f32 %v1247_v17, %v7251_v37  ;;  %v11586_v37 = vld [vmem:[#allocation22_spill] sm:$0xff] }
 0x1c5   : > { %11573 = vst [vmem:[#allocation72_spill] sm:$0xff] %v7245_v54  ;;  %v1255_v13 = vmax.f32 %v1254_v20, %v7257_v43  ;;  %v7280_v20 = vadd.f32 %v1037_v32, %v6881_v44  ;;  %v7286_v29 = vadd.f32 %v11586_v37, %v6854_v62  ;;  %v11589_v32 = vld [vmem:[#allocation25_spill] sm:$0xff] }
 0x1c6   : > { %11578 = vst [vmem:[#allocation20_spill] sm:$0xff] %v7257_v43  ;;  %v1241_v39 = vmax.f32 %v1240_v16, %v7245_v54  ;;  %v1039_v43 = vpop.f32.mrf.mxu1 }
 0x1c7   : > { %11581 = vst [vmem:[#allocation21_spill] sm:$0xff] %v7267_v48  ;;  %v1256_v17 = vmax.f32 %v1255_v13, %v7261_v31 }
 0x1c8   : > { %1242 = vmax.xlane.f32.xlu0 %v1241_v39  ;;  %v11583_v39 = vld [vmem:[#allocation12_spill] sm:$0xff]  ;;  %11585 = vst [vmem:[#allocation76_spill] sm:$0xff] %v7280_v20 }
 0x1c9   : > { %v1083_v34 = vpop.f32.mrf.mxu2  ;;  %v1262_v57 = vmax.f32 %v11584_v15, %v11583_v39  ;;  %11587 = vst [vmem:[#allocation22_spill] sm:$0xff] %v7286_v29  ;;  %v7295_v15 = vadd.f32 %v11589_v32, %v6841_v51 }
 0x1ca   : > { %v7270_v30 = vadd.f32 %v1083_v34, %v6903_v60  ;;  %v1132_v38 = vpop.f32.mrf.mxu3 }
 0x1cb   : > { %v7273_v16 = vadd.f32 %v1132_v38, %v6906_v59  ;;  %v1263_v45 = vmax.f32 %v1262_v57, %v7267_v48  ;;  %v7289_v38 = vadd.f32 %v990_v27, %v6870_v55  ;;  %11590 = vst [vmem:[#allocation25_spill] sm:$0xff] %v7295_v15  ;;  %v11593_v48 = vld [vmem:[#allocation13_spill] sm:$0xff] }
 0x1cc   : > { %v1249_v54 = vmax.f32 %v1248_v18, %v7270_v30  ;;  %v1257_v18 = vmax.f32 %v1256_v17, %v7280_v20  ;;  %v7307_v17 = vadd.f32 %v1039_v43, %v6881_v44 }
 0x1cd   : > { %11582 = vst [vmem:[#allocation75_spill] sm:$0xff] %v7273_v16  ;;  %v1264_v13 = vmax.f32 %v1263_v45, %v7286_v29  ;;  %v993_v45 = vpop.f32.mrf.mxu0 }
 0x1ce   : > { %v1250_v34 = vmax.f32 %v1249_v54, %v7273_v16  ;;  %11588 = vst [vmem:[#allocation77_spill] sm:$0xff] %v7289_v38  ;;  %v7317_v16 = vadd.f32 %v993_v45, %v6870_v55  ;;  %v11601_v45 = vld [vmem:[#allocation15_spill] sm:$0xff] }
 0x1cf   : > { %11594 = vst [vmem:[#allocation79_spill] sm:$0xff] %v7307_v17  ;;  %v1265_v29 = vmax.f32 %v1264_v13, %v7289_v38  ;;  %v11598_v13 = vld [vmem:[#allocation31_spill] sm:$0xff] }
 0x1d0   : > { %1251 = vmax.xlane.f32.xlu1 %v1250_v34  ;;  %v11592_v34 = vld [vmem:[#allocation14_spill] sm:$0xff]  ;;  %11597 = vst [vmem:[#allocation80_spill] sm:$0xff] %v7317_v16  ;;  %v7323_v38 = vadd.f32 %v11598_v13, %v6841_v51 }
 0x1d1   : > { %v1086_v39 = vpop.f32.mrf.mxu2  ;;  %v1271_v27 = vmax.f32 %v11593_v48, %v11592_v34  ;;  %v1042_v34 = vpop.f32.mrf.mxu1  ;;  %v1266_v43 = vmax.f32 %v1265_v29, %v7307_v17 }
 0x1d2   : > { %v7298_v57 = vadd.f32 %v1086_v39, %v6903_v60  ;;  %v1135_v54 = vpop.f32.mrf.mxu3  ;;  %v11595_v39 = vld [vmem:[#allocation27_spill] sm:$0xff]  ;;  %11599 = vst [vmem:[#allocation31_spill] sm:$0xff] %v7323_v38 }
 0x1d3   : > { %v7301_v37 = vadd.f32 %v1135_v54, %v6906_v59  ;;  %v1272_v32 = vmax.f32 %v1271_v27, %v7295_v15  ;;  %v7313_v20 = vadd.f32 %v11595_v39, %v6854_v62 }
 0x1d4   : > { %v1258_v31 = vmax.f32 %v1257_v18, %v7298_v57 }
 0x1d5   : > { %11591 = vst [vmem:[#allocation78_spill] sm:$0xff] %v7301_v37  ;;  %v1273_v48 = vmax.f32 %v1272_v32, %v7313_v20  ;;  %v7336_v32 = vadd.f32 %v1042_v34, %v6881_v44 }
 0x1d6   : > { %11596 = vst [vmem:[#allocation27_spill] sm:$0xff] %v7313_v20  ;;  %v1259_v54 = vmax.f32 %v1258_v31, %v7301_v37  ;;  %v11603_v20 = vld [vmem:[#allocation34_spill] sm:$0xff] }
 0x1d7   : > { %v1274_v29 = vmax.f32 %v1273_v48, %v7317_v16  ;;  %11602 = vst [vmem:[#allocation81_spill] sm:$0xff] %v7336_v32  ;;  %v7342_v17 = vadd.f32 %v11603_v20, %v6854_v62 }
 0x1d8   : > { %1260 = vmax.xlane.f32.xlu1 %v1259_v54  ;;  %v11600_v54 = vld [vmem:[#allocation16_spill] sm:$0xff] }
 0x1d9   : > { %v1088_v18 = vpop.f32.mrf.mxu2  ;;  %v1280_v15 = vmax.f32 %v11601_v45, %v11600_v54  ;;  %11604 = vst [vmem:[#allocation34_spill] sm:$0xff] %v7342_v17  ;;  %v1275_v54 = vmax.f32 %v1274_v29, %v7336_v32  ;;  %v1044_v16 = vpop.f32.mrf.mxu1 }
 0x1da   : > { %v7326_v27 = vadd.f32 %v1088_v18, %v6903_v60  ;;  %v1137_v39 = vpop.f32.mrf.mxu3  ;;  %v995_v18 = vpop.f32.mrf.mxu0 }
 0x1db   : > { %v7329_v31 = vadd.f32 %v1137_v39, %v6906_v59  ;;  %v1281_v51 = vmax.f32 %v1280_v15, %v7323_v38  ;;  %v7347_v48 = vadd.f32 %v995_v18, %v6870_v55 }
 0x1dc   : > { %v1267_v37 = vmax.f32 %v1266_v43, %v7326_v27 }
 0x1dd   : > { %v1282_v43 = vmax.f32 %v1281_v51, %v7342_v17  ;;  %11605 = vst [vmem:[#allocation82_spill] sm:$0xff] %v7347_v48  ;;  %v11615_v17 = vld [vmem:[#allocation32_spill] sm:$0xff] }
 0x1de   : > { %v1268_v13 = vmax.f32 %v1267_v37, %v7329_v31 }
 0x1df   : > { %v1283_v20 = vmax.f32 %v1282_v43, %v7347_v48  ;;  %v11612_v43 = vld [vmem:[#allocation24_spill] sm:$0xff] }
 0x1e0   : > { %1269 = vmax.xlane.f32.xlu2 %v1268_v13  ;;  %v7358_v13 = vadd.f32 %v1044_v16, %v6881_v44  ;;  %v11613_v16 = vld [vmem:[#allocation26_spill] sm:$0xff] }
 0x1e1   : > { %v1091_v39 = vpop.f32.mrf.mxu2 }
 0x1e2   : > { %v7350_v34 = vadd.f32 %v1091_v39, %v6903_v60  ;;  %v1140_v15 = vpop.f32.mrf.mxu3  ;;  %11608 = vst [vmem:[#allocation85_spill] sm:$0xff] %v7358_v13  ;;  %v1284_v51 = vmax.f32 %v1283_v20, %v7358_v13 }
 0x1e3   : > { %v7353_v37 = vadd.f32 %v1140_v15, %v6906_v59 }
 0x1e4   : > { %11606 = vst [vmem:[#allocation83_spill] sm:$0xff] %v7350_v34  ;;  %v1276_v62 = vmax.f32 %v1275_v54, %v7350_v34  ;;  %v11611_v54 = vld [vmem:[#allocation23_spill] sm:$0xff] }
 0x1e5   : > { %11607 = vst [vmem:[#allocation84_spill] sm:$0xff] %v7353_v37 }
 0x1e6   : > { %v1277_v29 = vmax.f32 %v1276_v62, %v7353_v37 }
 0x1e8   : > { %1278 = vmax.xlane.f32.xlu2 %v1277_v29  ;;  %v11614_v29 = vld [vmem:[#allocation30_spill] sm:$0xff] }
 0x1e9   : > { %v1093_v55 = vpop.f32.mrf.mxu2 }
 0x1ea   : > { %v7363_v18 = vadd.f32 %v1093_v55, %v6903_v60  ;;  %v1142_v39 = vpop.f32.mrf.mxu3 }
 0x1eb   : > { %v7366_v15 = vadd.f32 %v1142_v39, %v6906_v59  ;;  %v1153_v32 = vpop.xlane.xlu0 %1152 }
 0x1ec   : > { %11609 = vst [vmem:[#allocation86_spill] sm:$0xff] %v7363_v18  ;;  %v1289_v34 = vsub.f32 %v11611_v54, %v1153_v32  ;;  %v1290_v48 = vsub.f32 %v11612_v43, %v1153_v32  ;;  %v1285_v44 = vmax.f32 %v1284_v51, %v7363_v18  ;;  %v1291_v62 = vsub.f32 %v11613_v16, %v1153_v32  ;;  %v11617_v18 = vld [vmem:[#allocation29_spill] sm:$0xff] }
 0x1ed   : > { %11610 = vst [vmem:[#allocation87_spill] sm:$0xff] %v7366_v15  ;;  %v1292_v37 = vsub.f32 %v11614_v29, %v1153_v32  ;;  %v1293_v20 = vsub.f32 %v11615_v17, %v1153_v32  ;;  %v1294_v60 = vsub.f32 %v6899_v52, %v1153_v32  ;;  %v1295_v39 = vsub.f32 %v6924_v50, %v1153_v32  ;;  %v11618_v50 = vld [vmem:[#allocation33_spill] sm:$0xff] }
 0x1ee   : > { %v1417_v55 = vmul.f32 1.442695, %v1289_v34  ;;  %v1419_v13 = vmul.f32 1.442695, %v1290_v48  ;;  %v1286_v59 = vmax.f32 %v1285_v44, %v7366_v15  ;;  %v1296_v54 = vsub.f32 %v6927_v49, %v1153_v32  ;;  %v11616_v34 = vld [vmem:[#allocation28_spill] sm:$0xff]  ;;  %v11619_v49 = vld [vmem:[#allocation37_spill] sm:$0xff] }
 0x1ef   : > { %v1421_v38 = vmul.f32 1.442695, %v1291_v62  ;;  %v1423_v43 = vmul.f32 1.442695, %v1292_v37  ;;  %v1425_v51 = vmul.f32 1.442695, %v1293_v20 }
 0x1f0   : > { %1287 = vmax.xlane.f32.xlu0 %v1286_v59  ;;  %5798 = vpow2.f32 %v1417_v55  ;;  %v1427_v16 = vmul.f32 1.442695, %v1294_v60  ;;  %v1429_v29 = vmul.f32 1.442695, %v1295_v39  ;;  %v1431_v52 = vmul.f32 1.442695, %v1296_v54 }
 0x1f1   : > { %5800 = vpow2.f32 %v1419_v13 }
 0x1f2   : > { %5802 = vpow2.f32 %v1421_v38 }
 0x1f3   : > { %v1162_v17 = vpop.xlane.xlu0 %1161  ;;  %5804 = vpow2.f32 %v1423_v43 }
 0x1f4   : > { %v1297_v48 = vsub.f32 %v11616_v34, %v1162_v17  ;;  %v1298_v44 = vsub.f32 %v11617_v18, %v1162_v17  ;;  %5806 = vpow2.f32 %v1425_v51  ;;  %v1299_v15 = vsub.f32 %v11618_v50, %v1162_v17  ;;  %v11624_v34 = vld [vmem:[#allocation35_spill] sm:$0xff] }
 0x1f5   : > { %5808 = vpow2.f32 %v1427_v16  ;;  %v1300_v32 = vsub.f32 %v11619_v49, %v1162_v17  ;;  %v1301_v37 = vsub.f32 %v6915_v1, %v1162_v17  ;;  %v1302_v13 = vsub.f32 %v6939_v63, %v1162_v17 }
 0x1f6   : > { %v7384_v62 = vpop.eup %5798  ;;  %v1433_v38 = vmul.f32 1.442695, %v1297_v48  ;;  %v1435_v20 = vmul.f32 1.442695, %v1298_v44  ;;  %5810 = vpow2.f32 %v1429_v29  ;;  %v1303_v60 = vsub.f32 %v6960_v0, %v1162_v17  ;;  %v11625_v44 = vld [vmem:[#allocation36_spill] sm:$0xff] }
 0x1f7   : > { %v7387_v55 = vpop.eup %5800  ;;  %5812 = vpow2.f32 %v1431_v52  ;;  %v1304_v18 = vsub.f32 %v6963_v2, %v1162_v17  ;;  %v1437_v59 = vmul.f32 1.442695, %v1299_v15  ;;  %v1439_v39 = vmul.f32 1.442695, %v1300_v32 }
 0x1f8   : > { %v7390_v54 = vpop.eup %5802  ;;  %v1673_v1 = vadd.f32 %v7387_v55, %v7384_v62  ;;  %5814 = vpow2.f32 %v1433_v38  ;;  %v1441_v63 = vmul.f32 1.442695, %v1301_v37  ;;  %v1443_v51 = vmul.f32 1.442695, %v1302_v13  ;;  %v11626_v37 = vld [vmem:[#allocation38_spill] sm:$0xff] }
 0x1f9   : > { %v7394_v43 = vpop.eup %5804  ;;  %5816 = vpow2.f32 %v1435_v20  ;;  %v1445_v29 = vmul.f32 1.442695, %v1303_v60  ;;  %v1447_v17 = vmul.f32 1.442695, %v1304_v18  ;;  %v11627_v20 = vld [vmem:[#allocation41_spill] sm:$0xff] }
 0x1fa   : > { %11620 = vst [vmem:[#allocation23_spill] sm:$0xff] %v7394_v43  ;;  %v7396_v16 = vpop.eup %5806  ;;  %v1674_v0 = vadd.f32 %v7390_v54, %v1673_v1  ;;  %5818 = vpow2.f32 %v1437_v59 }
 0x1fb   : > { %11621 = vst [vmem:[#allocation24_spill] sm:$0xff] %v7396_v16  ;;  %v7399_v2 = vpop.eup %5808  ;;  %v1171_v15 = vpop.xlane.xlu1 %1170  ;;  %5820 = vpow2.f32 %v1439_v39 }
 0x1fc   : > { %11622 = vst [vmem:[#allocation26_spill] sm:$0xff] %v7399_v2  ;;  %v7401_v52 = vpop.eup %5810  ;;  %v1305_v48 = vsub.f32 %v11624_v34, %v1171_v15  ;;  %v1306_v50 = vsub.f32 %v11625_v44, %v1171_v15  ;;  %v1675_v49 = vadd.f32 %v7394_v43, %v1674_v0  ;;  %5822 = vpow2.f32 %v1441_v63 }
 0x1fd   : > { %11623 = vst [vmem:[#allocation30_spill] sm:$0xff] %v7401_v52  ;;  %v7406_v32 = vpop.eup %5812  ;;  %5824 = vpow2.f32 %v1443_v51  ;;  %v1307_v13 = vsub.f32 %v11626_v37, %v1171_v15  ;;  %v1308_v38 = vsub.f32 %v6945_v61, %v1171_v15  ;;  %v1309_v60 = vsub.f32 %v11627_v20, %v1171_v15 }
 0x1fe   : > { %v7411_v59 = vpop.eup %5814  ;;  %v1449_v18 = vmul.f32 1.442695, %v1305_v48  ;;  %v1451_v39 = vmul.f32 1.442695, %v1306_v50  ;;  %v1676_v1 = vadd.f32 %v7396_v16, %v1675_v49  ;;  %5826 = vpow2.f32 %v1445_v29  ;;  %v11631_v16 = vld [vmem:[#allocation39_spill] sm:$0xff] }
 0x1ff   : > { %v7414_v34 = vpop.eup %5816  ;;  %5828 = vpow2.f32 %v1447_v17  ;;  %v1310_v63 = vsub.f32 %v6976_v58, %v1171_v15  ;;  %v1311_v51 = vsub.f32 %v6996_v46, %v1171_v15  ;;  %v1312_v0 = vsub.f32 %v6999_v24, %v1171_v15 }
 0x200   : > { %v7419_v44 = vpop.eup %5818  ;;  %v1677_v61 = vadd.f32 %v7399_v2, %v1676_v1  ;;  %v1682_v48 = vadd.f32 %v7414_v34, %v7411_v59  ;;  %5830 = vpow2.f32 %v1449_v18  ;;  %v1453_v50 = vmul.f32 1.442695, %v1307_v13 }
 0x201   : > { %v7424_v49 = vpop.eup %5820  ;;  %5832 = vpow2.f32 %v1451_v39  ;;  %v1455_v29 = vmul.f32 1.442695, %v1308_v38  ;;  %v1457_v17 = vmul.f32 1.442695, %v1309_v60  ;;  %v1459_v24 = vmul.f32 1.442695, %v1310_v63 }
 0x202   : > { %v7426_v37 = vpop.eup %5822  ;;  %v1678_v58 = vadd.f32 %v7401_v52, %v1677_v61  ;;  %v1683_v46 = vadd.f32 %v7419_v44, %v1682_v48  ;;  %5834 = vpow2.f32 %v1453_v50  ;;  %v1461_v1 = vmul.f32 1.442695, %v1311_v51  ;;  %v11632_v38 = vld [vmem:[#allocation40_spill] sm:$0xff]  ;;  %v11633_v63 = vld [vmem:[#allocation42_spill] sm:$0xff]  ;;  %v11634_v50 = vld [vmem:[#allocation45_spill] sm:$0xff] }
 0x203   : > { %11628 = vst [vmem:[#allocation32_spill] sm:$0xff] %v7426_v37  ;;  %v7430_v15 = vpop.eup %5824  ;;  %v1180_v20 = vpop.xlane.xlu1 %1179  ;;  %5836 = vpow2.f32 %v1455_v29  ;;  %v1463_v18 = vmul.f32 1.442695, %v1312_v0 }
 0x204   : > { %11629 = vst [vmem:[#allocation28_spill] sm:$0xff] %v7430_v15  ;;  %v7432_v13 = vpop.eup %5826  ;;  %v1313_v39 = vsub.f32 %v11631_v16, %v1180_v20  ;;  %v1314_v60 = vsub.f32 %v11632_v38, %v1180_v20  ;;  %v1679_v2 = vadd.f32 %v7406_v32, %v1678_v58  ;;  %v1684_v61 = vadd.f32 %v7424_v49, %v1683_v46 }
 0x205   : > { %11630 = vst [vmem:[#allocation29_spill] sm:$0xff] %v7432_v13  ;;  %v7438_v52 = vpop.eup %5828  ;;  %5838 = vpow2.f32 %v1457_v17  ;;  %v1315_v48 = vsub.f32 %v11633_v63, %v1180_v20  ;;  %v1316_v45 = vsub.f32 %v11634_v50, %v1180_v20  ;;  %v1317_v51 = vsub.f32 %v6987_v22, %v1180_v20 }
 0x206   : > { %v7443_v0 = vpop.eup %5830  ;;  %v1465_v29 = vmul.f32 1.442695, %v1313_v39  ;;  %v1467_v43 = vmul.f32 1.442695, %v1314_v60  ;;  %1680 = vadd.xlane.f32.xlu1 %v1679_v2  ;;  %v1685_v16 = vadd.f32 %v7426_v37, %v1684_v61  ;;  %5840 = vpow2.f32 %v1459_v24  ;;  %v11637_v37 = vld [vmem:[#allocation43_spill] sm:$0xff] }
 0x207   : > { %v7446_v58 = vpop.eup %5832  ;;  %5842 = vpow2.f32 %v1461_v1  ;;  %v1318_v46 = vsub.f32 %v7011_v11, %v1180_v20  ;;  %v1319_v17 = vsub.f32 %v7032_v28, %v1180_v20  ;;  %v1469_v39 = vmul.f32 1.442695, %v1315_v48 }
 0x208   : > { %v7450_v38 = vpop.eup %5834  ;;  %v1686_v63 = vadd.f32 %v7430_v15, %v1685_v16  ;;  %5844 = vpow2.f32 %v1463_v18  ;;  %v1691_v22 = vadd.f32 %v7446_v58, %v7443_v0  ;;  %v1320_v24 = vsub.f32 %v7035_v6, %v1180_v20 }
 0x209   : > { %v7455_v2 = vpop.eup %5836  ;;  %5846 = vpow2.f32 %v1465_v29  ;;  %v1471_v60 = vmul.f32 1.442695, %v1316_v45  ;;  %v1473_v28 = vmul.f32 1.442695, %v1317_v51  ;;  %v1475_v18 = vmul.f32 1.442695, %v1318_v46 }
 0x20a   : > { %v1687_v1 = vadd.f32 %v7432_v13, %v1686_v63  ;;  %v1692_v11 = vadd.f32 %v7450_v38, %v1691_v22  ;;  %5848 = vpow2.f32 %v1467_v43  ;;  %v1477_v16 = vmul.f32 1.442695, %v1319_v17  ;;  %v11638_v45 = vld [vmem:[#allocation44_spill] sm:$0xff] }
 0x20b   : > { %v7460_v61 = vpop.eup %5838  ;;  %v7462_v50 = vpop.xlane.xlu2 %1188  ;;  %5850 = vpow2.f32 %v1469_v39  ;;  %v1479_v63 = vmul.f32 1.442695, %v1320_v24 }
 0x20c   : > { %11635 = vst [vmem:[#allocation33_spill] sm:$0xff] %v7460_v61  ;;  %v7464_v48 = vpop.eup %5840  ;;  %v1321_v6 = vsub.f32 %v11637_v37, %v7462_v50  ;;  %v1322_v20 = vsub.f32 %v11638_v45, %v7462_v50  ;;  %v1688_v29 = vadd.f32 %v7438_v52, %v1687_v1  ;;  %v1693_v43 = vadd.f32 %v7455_v2, %v1692_v11 }
 0x20d   : > { %11636 = vst [vmem:[#allocation37_spill] sm:$0xff] %v7464_v48  ;;  %v7472_v51 = vpop.eup %5842  ;;  %5852 = vpow2.f32 %v1471_v60  ;;  %v1323_v46 = vsub.f32 %v6993_v12, %v7462_v50  ;;  %v1324_v39 = vsub.f32 %v7017_v8, %v7462_v50  ;;  %v11640_v60 = vld [vmem:[#allocation48_spill] sm:$0xff] }
 0x20e   : > { %11639 = vst [vmem:[#allocation35_spill] sm:$0xff] %v7472_v51  ;;  %v7476_v17 = vpop.eup %5844  ;;  %v1481_v22 = vmul.f32 1.442695, %v1321_v6  ;;  %1689 = vadd.xlane.f32.xlu2 %v1688_v29  ;;  %v1694_v37 = vadd.f32 %v7460_v61, %v1693_v43  ;;  %5854 = vpow2.f32 %v1473_v28  ;;  %v1483_v11 = vmul.f32 1.442695, %v1322_v20  ;;  %v11642_v61 = vld [vmem:[#allocation46_spill] sm:$0xff] }
 0x20f   : > { %v7481_v1 = vpop.eup %5846  ;;  %5856 = vpow2.f32 %v1475_v18  ;;  %v1325_v24 = vsub.f32 %v11640_v60, %v7462_v50  ;;  %v1326_v6 = vsub.f32 %v7048_v56, %v7462_v50  ;;  %v1327_v28 = vsub.f32 %v7068_v53, %v7462_v50  ;;  %v11643_v53 = vld [vmem:[#allocation47_spill] sm:$0xff] }
 0x210   : > { %v7485_v45 = vpop.eup %5848  ;;  %v1695_v12 = vadd.f32 %v7464_v48, %v1694_v37  ;;  %5858 = vpow2.f32 %v1477_v16  ;;  %v1485_v18 = vmul.f32 1.442695, %v1323_v46  ;;  %v1487_v43 = vmul.f32 1.442695, %v1324_v39 }
 0x211   : > { %v7490_v29 = vpop.eup %5850  ;;  %5860 = vpow2.f32 %v1479_v63  ;;  %v1700_v8 = vadd.f32 %v7485_v45, %v7481_v1  ;;  %v1489_v37 = vmul.f32 1.442695, %v1325_v24  ;;  %v1493_v13 = vmul.f32 1.442695, %v1327_v28 }
 0x212   : > { %v1696_v20 = vadd.f32 %v7472_v51, %v1695_v12  ;;  %5862 = vpow2.f32 %v1481_v22  ;;  %v1491_v22 = vmul.f32 1.442695, %v1326_v6 }
 0x213   : > { %v7497_v60 = vpop.eup %5852  ;;  %v7499_v16 = vpop.xlane.xlu2 %1197  ;;  %v1701_v56 = vadd.f32 %v7490_v29, %v1700_v8  ;;  %5864 = vpow2.f32 %v1483_v11  ;;  %v11645_v11 = vld [vmem:[#allocation49_spill] sm:$0xff] }
 0x214   : > { %v7502_v63 = vpop.eup %5854  ;;  %v1329_v48 = vsub.f32 %v11642_v61, %v7499_v16  ;;  %v1330_v46 = vsub.f32 %v11643_v53, %v7499_v16  ;;  %v1697_v12 = vadd.f32 %v7476_v17, %v1696_v20  ;;  %5866 = vpow2.f32 %v1485_v18 }
 0x215   : > { %11641 = vst [vmem:[#allocation36_spill] sm:$0xff] %v7502_v63  ;;  %v7509_v39 = vpop.eup %5856  ;;  %v1702_v51 = vadd.f32 %v7497_v60, %v1701_v56  ;;  %v1331_v24 = vsub.f32 %v11645_v11, %v7499_v16  ;;  %v1328_v61 = vsub.f32 %v7071_v19, %v7462_v50  ;;  %5868 = vpow2.f32 %v1487_v43  ;;  %v11647_v11 = vld [vmem:[#allocation50_spill] sm:$0xff] }
 0x216   : > { %11644 = vst [vmem:[#allocation38_spill] sm:$0xff] %v7509_v39  ;;  %v7514_v8 = vpop.eup %5858  ;;  %v1497_v15 = vmul.f32 1.442695, %v1329_v48  ;;  %1698 = vadd.xlane.f32.xlu2 %v1697_v12  ;;  %v1499_v6 = vmul.f32 1.442695, %v1330_v46  ;;  %5870 = vpow2.f32 %v1489_v37  ;;  %v1332_v28 = vsub.f32 %v7054_v10, %v7499_v16 }
 0x217   : > { %11646 = vst [vmem:[#allocation41_spill] sm:$0xff] %v7514_v8  ;;  %v7518_v53 = vpop.eup %5860  ;;  %v1703_v20 = vadd.f32 %v7502_v63, %v1702_v51  ;;  %5872 = vpow2.f32 %v1491_v22  ;;  %v1333_v48 = vsub.f32 %v7059_v35, %v7499_v16  ;;  %v1334_v50 = vsub.f32 %v7083_v7, %v7499_v16 }
 0x218   : > { %v7523_v18 = vpop.eup %5862  ;;  %5874 = vpow2.f32 %v1493_v13  ;;  %v1501_v43 = vmul.f32 1.442695, %v1331_v24  ;;  %v1495_v51 = vmul.f32 1.442695, %v1328_v61  ;;  %v1335_v12 = vsub.f32 %v7104_v21, %v7499_v16 }
 0x219   : > { %v7527_v56 = vpop.eup %5864  ;;  %v1704_v19 = vadd.f32 %v7509_v39, %v1703_v20  ;;  %5876 = vpow2.f32 %v1497_v15  ;;  %v1503_v13 = vmul.f32 1.442695, %v1332_v28  ;;  %v1505_v61 = vmul.f32 1.442695, %v1333_v48 }
 0x21a   : > { %v1709_v37 = vadd.f32 %v7527_v56, %v7523_v18  ;;  %v7534_v10 = vpop.eup %5866  ;;  %5878 = vpow2.f32 %v1499_v6 }
 0x21b   : > { %v7536_v46 = vpop.xlane.xlu0 %1206  ;;  %v1705_v35 = vadd.f32 %v7514_v8, %v1704_v19  ;;  %v7541_v22 = vpop.eup %5868  ;;  %5880 = vpow2.f32 %v1501_v43  ;;  %v1507_v8 = vmul.f32 1.442695, %v1334_v50  ;;  %v11651_v43 = vld [vmem:[#allocation53_spill] sm:$0xff] }
 0x21c   : > { %v1337_v7 = vsub.f32 %v7040_v5, %v7536_v46  ;;  %v1338_v24 = vsub.f32 %v11647_v11, %v7536_v46  ;;  %v1710_v15 = vadd.f32 %v7534_v10, %v1709_v37  ;;  %v7548_v20 = vpop.eup %5870  ;;  %v1339_v21 = vsub.f32 %v7065_v26, %v7536_v46 }
 0x21d   : > { %11648 = vst [vmem:[#allocation39_spill] sm:$0xff] %v7548_v20  ;;  %v1706_v19 = vadd.f32 %v7518_v53, %v1705_v35  ;;  %v7553_v6 = vpop.eup %5872  ;;  %5882 = vpow2.f32 %v1495_v51  ;;  %v1336_v11 = vsub.f32 %v7107_v47, %v7499_v16  ;;  %v1340_v50 = vsub.f32 %v11651_v43, %v7536_v46 }
 0x21e   : > { %11649 = vst [vmem:[#allocation40_spill] sm:$0xff] %v7553_v6  ;;  %v1513_v28 = vmul.f32 1.442695, %v1337_v7  ;;  %v1711_v5 = vadd.f32 %v7541_v22, %v1710_v15  ;;  %v7558_v37 = vpop.eup %5874  ;;  %v1515_v48 = vmul.f32 1.442695, %v1338_v24  ;;  %5884 = vpow2.f32 %v1503_v13 }
 0x21f   : > { %11650 = vst [vmem:[#allocation42_spill] sm:$0xff] %v7558_v37  ;;  %1707 = vadd.xlane.f32.xlu0 %v1706_v19  ;;  %v7562_v35 = vpop.eup %5876  ;;  %5886 = vpow2.f32 %v1505_v61  ;;  %v1509_v7 = vmul.f32 1.442695, %v1335_v12  ;;  %v1341_v47 = vsub.f32 %v7095_v4, %v7536_v46  ;;  %v1517_v16 = vmul.f32 1.442695, %v1339_v21  ;;  %v11652_v12 = vld [vmem:[#allocation55_spill] sm:$0xff] }
 0x220   : > { %v1712_v26 = vadd.f32 %v7548_v20, %v1711_v5  ;;  %v7565_v51 = vpop.eup %5878  ;;  %5888 = vpow2.f32 %v1507_v8  ;;  %v1511_v15 = vmul.f32 1.442695, %v1336_v11  ;;  %v1342_v61 = vsub.f32 %v11652_v12, %v7536_v46 }
 0x221   : > { %v1718_v13 = vadd.f32 %v7565_v51, %v7562_v35  ;;  %5890 = vpow2.f32 %v1513_v28  ;;  %v7572_v19 = vpop.eup %5880  ;;  %v1519_v8 = vmul.f32 1.442695, %v1340_v50  ;;  %v1343_v11 = vsub.f32 %v7130_v3, %v7536_v46  ;;  %v11657_v3 = vld [vmem:[#allocation52_spill] sm:$0xff] }
 0x222   : > { %v1713_v24 = vadd.f32 %v7553_v6, %v1712_v26  ;;  %5892 = vpow2.f32 %v1515_v48  ;;  %v11654_v26 = vld [vmem:[#allocation51_spill] sm:$0xff]  ;;  %v1521_v6 = vmul.f32 1.442695, %v1341_v47 }
 0x223   : > { %v7574_v43 = vpop.xlane.xlu1 %1215  ;;  %v7578_v5 = vpop.eup %5882  ;;  %5894 = vpow2.f32 %v1509_v7  ;;  %v1719_v21 = vadd.f32 %v7572_v19, %v1718_v13  ;;  %v1344_v7 = vsub.f32 %v7133_v25, %v7536_v46 }
 0x224   : > { %11653 = vst [vmem:[#allocation45_spill] sm:$0xff] %v7578_v5  ;;  %v1714_v4 = vadd.f32 %v7558_v37, %v1713_v24  ;;  %v7584_v28 = vpop.eup %5884  ;;  %v1345_v20 = vsub.f32 %v11654_v26, %v7574_v43  ;;  %5896 = vpow2.f32 %v1517_v16  ;;  %v1346_v13 = vsub.f32 %v11657_v3, %v7574_v43 }
 0x225   : > { %v7588_v12 = vpop.eup %5886  ;;  %5898 = vpow2.f32 %v1511_v15  ;;  %v1720_v50 = vadd.f32 %v7584_v28, %v1719_v21  ;;  %v1523_v37 = vmul.f32 1.442695, %v1342_v61  ;;  %v1525_v16 = vmul.f32 1.442695, %v1343_v11  ;;  %v11659_v21 = vld [vmem:[#allocation54_spill] sm:$0xff]  ;;  %v11661_v11 = vld [vmem:[#allocation56_spill] sm:$0xff] }
 0x226   : > { %11655 = vst [vmem:[#allocation43_spill] sm:$0xff] %v7588_v12  ;;  %v1715_v48 = vadd.f32 %v7578_v5, %v1714_v4  ;;  %v7594_v24 = vpop.eup %5888  ;;  %5900 = vpow2.f32 %v1519_v8  ;;  %v1529_v15 = vmul.f32 1.442695, %v1345_v20  ;;  %v1347_v25 = vsub.f32 %v11659_v21, %v7574_v43 }
 0x227   : > { %11656 = vst [vmem:[#allocation44_spill] sm:$0xff] %v7594_v24  ;;  %v7598_v26 = vpop.eup %5890  ;;  %v1721_v47 = vadd.f32 %v7588_v12, %v1720_v50  ;;  %5902 = vpow2.f32 %v1521_v6  ;;  %v1527_v3 = vmul.f32 1.442695, %v1344_v7  ;;  %v1348_v50 = vsub.f32 %v11661_v11, %v7574_v43 }
 0x228   : > { %11658 = vst [vmem:[#allocation48_spill] sm:$0xff] %v7598_v26  ;;  %1716 = vadd.xlane.f32.xlu0 %v1715_v48  ;;  %v7601_v4 = vpop.eup %5892  ;;  %v1531_v48 = vmul.f32 1.442695, %v1346_v13  ;;  %5904 = vpow2.f32 %v1523_v37  ;;  %v1349_v12 = vsub.f32 %v7121_v36, %v7574_v43  ;;  %v1533_v13 = vmul.f32 1.442695, %v1347_v25 }
 0x229   : > { %v7605_v46 = vpop.eup %5894  ;;  %v1722_v63 = vadd.f32 %v7594_v24, %v1721_v47  ;;  %v1727_v61 = vadd.f32 %v7601_v4, %v7598_v26  ;;  %5906 = vpow2.f32 %v1525_v16  ;;  %v1350_v24 = vsub.f32 %v7139_v42, %v7574_v43 }
 0x22a   : > { %11660 = vst [vmem:[#allocation46_spill] sm:$0xff] %v7605_v46  ;;  %v7610_v8 = vpop.eup %5896  ;;  %5908 = vpow2.f32 %v1529_v15  ;;  %v1535_v16 = vmul.f32 1.442695, %v1348_v50  ;;  %v1537_v42 = vmul.f32 1.442695, %v1349_v12 }
 0x22b   : > { %v7614_v20 = vpop.eup %5898  ;;  %v7616_v6 = vpop.xlane.xlu2 %1224  ;;  %v1723_v21 = vadd.f32 %v7605_v46, %v1722_v63  ;;  %v1728_v47 = vadd.f32 %v7610_v8, %v1727_v61  ;;  %5910 = vpow2.f32 %v1527_v3  ;;  %v11665_v61 = vld [vmem:[#allocation2_spill] sm:$0xff]  ;;  %v1351_v3 = vsub.f32 %v7158_v40, %v7574_v43 }
 0x22c   : > { %11662 = vst [vmem:[#allocation47_spill] sm:$0xff] %v7614_v20  ;;  %v7620_v7 = vpop.eup %5900  ;;  %v1353_v63 = vsub.f32 %v6669_v14, %v7616_v6  ;;  %5912 = vpow2.f32 %v1531_v48  ;;  %v1354_v36 = vsub.f32 %v11665_v61, %v7616_v6  ;;  %v1539_v14 = vmul.f32 1.442695, %v1350_v24  ;;  %v11668_v48 = vld [vmem:[#allocation57_spill] sm:$0xff] }
 0x22d   : > { %11663 = vst [vmem:[#allocation49_spill] sm:$0xff] %v7620_v7  ;;  %v1724_v37 = vadd.f32 %v7614_v20, %v1723_v21  ;;  %v1729_v11 = vadd.f32 %v7620_v7, %v1728_v47  ;;  %v7628_v39 = vpop.eup %5902  ;;  %5914 = vpow2.f32 %v1533_v13  ;;  %v1355_v50 = vsub.f32 %v11668_v48, %v7616_v6 }
 0x22e   : > { %11664 = vst [vmem:[#allocation50_spill] sm:$0xff] %v7628_v39  ;;  %v7635_v25 = vpop.eup %5904  ;;  %5916 = vpow2.f32 %v1535_v16  ;;  %v1547_v12 = vmul.f32 1.442695, %v1354_v36  ;;  %v1541_v48 = vmul.f32 1.442695, %v1351_v3  ;;  %v11672_v3 = vld [vmem:[#allocation4_spill] sm:$0xff] }
 0x22f   : > { %1725 = vadd.xlane.f32.xlu1 %v1724_v37  ;;  %v1730_v15 = vadd.f32 %v7628_v39, %v1729_v11  ;;  %11666 = vst [vmem:[#allocation53_spill] sm:$0xff] %v7635_v25  ;;  %v7639_v21 = vpop.eup %5906  ;;  %v1545_v37 = vmul.f32 1.442695, %v1353_v63  ;;  %v1352_v11 = vsub.f32 %v7161_v23, %v7574_v43  ;;  %5918 = vpow2.f32 %v1537_v42 }
 0x230   : > { %11667 = vst [vmem:[#allocation55_spill] sm:$0xff] %v7639_v21  ;;  %v7644_v46 = vpop.eup %5908  ;;  %v1357_v63 = vsub.f32 %v7149_v9, %v7616_v6  ;;  %5920 = vpow2.f32 %v1539_v14  ;;  %v1549_v16 = vmul.f32 1.442695, %v1355_v50  ;;  %v1359_v50 = vsub.f32 %v7186_v41, %v7616_v6 }
 0x231   : > { %v1731_v47 = vadd.f32 %v7635_v25, %v1730_v15  ;;  %v7650_v40 = vpop.eup %5910  ;;  %v11670_v15 = vld [vmem:[#allocation58_spill] sm:$0xff]  ;;  %v1358_v25 = vsub.f32 %v7168_v33, %v7616_v6  ;;  %v1543_v42 = vmul.f32 1.442695, %v1352_v11  ;;  %5922 = vpow2.f32 %v1545_v37 }
 0x232   : > { %11669 = vst [vmem:[#allocation51_spill] sm:$0xff] %v7650_v40  ;;  %v1356_v24 = vsub.f32 %v11670_v15, %v7616_v6  ;;  %v7655_v39 = vpop.eup %5912  ;;  %5924 = vpow2.f32 %v1547_v12 }
 0x233   : > { %v7646_v61 = vpop.xlane.xlu0 %1233  ;;  %v1732_v13 = vadd.f32 %v7639_v21, %v1731_v47  ;;  %v1736_v43 = vadd.f32 %v7655_v39, %v7644_v46  ;;  %v7664_v36 = vpop.eup %5914  ;;  %v11671_v47 = vld [vmem:[#allocation3_spill] sm:$0xff]  ;;  %5926 = vpow2.f32 %v1541_v48  ;;  %v1555_v11 = vmul.f32 1.442695, %v1358_v25 }
 0x234   : > { %v1361_v15 = vsub.f32 %v11671_v47, %v7646_v61  ;;  %v1362_v9 = vsub.f32 %v11672_v3, %v7646_v61  ;;  %v7671_v14 = vpop.eup %5916  ;;  %v11674_v21 = vld [vmem:[#allocation63_spill] sm:$0xff]  ;;  %v1553_v47 = vmul.f32 1.442695, %v1357_v63  ;;  %5928 = vpow2.f32 %v1549_v16 }
 0x235   : > { %v1733_v23 = vadd.f32 %v7650_v40, %v1732_v13  ;;  %v1737_v33 = vadd.f32 %v7664_v36, %v1736_v43  ;;  %v1551_v13 = vmul.f32 1.442695, %v1356_v24  ;;  %11673 = vst [vmem:[#allocation52_spill] sm:$0xff] %v7671_v14  ;;  %v1360_v40 = vsub.f32 %v11674_v21, %v7616_v6  ;;  %v7680_v43 = vpop.eup %5918  ;;  %v11678_v6 = vld [vmem:[#allocation60_spill] sm:$0xff] }
 0x236   : > { %11676 = vst [vmem:[#allocation54_spill] sm:$0xff] %v7680_v43  ;;  %v1561_v12 = vmul.f32 1.442695, %v1361_v15  ;;  %5930 = vpow2.f32 %v1543_v42  ;;  %v7682_v24 = vpop.eup %5920  ;;  %v1563_v48 = vmul.f32 1.442695, %v1362_v9  ;;  %v1364_v21 = vsub.f32 %v11678_v6, %v7646_v61  ;;  %v11684_v6 = vld [vmem:[#allocation5_spill] sm:$0xff] }
 0x237   : > { %1734 = vadd.xlane.f32.xlu1 %v1733_v23  ;;  %v1738_v37 = vadd.f32 %v7671_v14, %v1737_v33  ;;  %v11675_v23 = vld [vmem:[#allocation59_spill] sm:$0xff]  ;;  %11677 = vst [vmem:[#allocation56_spill] sm:$0xff] %v7682_v24  ;;  %5932 = vpow2.f32 %v1551_v13  ;;  %v7689_v63 = vpop.eup %5922  ;;  %v1557_v25 = vmul.f32 1.442695, %v1359_v50  ;;  %v1559_v16 = vmul.f32 1.442695, %v1360_v40 }
 0x238   : > { %v1363_v3 = vsub.f32 %v11675_v23, %v7646_v61  ;;  %11679 = vst [vmem:[#allocation2_spill] sm:$0xff] %v7689_v63  ;;  %5934 = vpow2.f32 %v1553_v47  ;;  %v11680_v33 = vld [vmem:[#allocation61_spill] sm:$0xff]  ;;  %v7693_v42 = vpop.eup %5924  ;;  %v11682_v23 = vld [vmem:[#allocation64_spill] sm:$0xff]  ;;  %v11685_v50 = vld [vmem:[#allocation67_spill] sm:$0xff] }
 0x239   : > { %v1739_v41 = vadd.f32 %v7680_v43, %v1738_v37  ;;  %v1365_v15 = vsub.f32 %v11680_v33, %v7646_v61  ;;  %11681 = vst [vmem:[#allocation57_spill] sm:$0xff] %v7693_v42  ;;  %5936 = vpow2.f32 %v1555_v11  ;;  %v1366_v37 = vsub.f32 %v11682_v23, %v7646_v61  ;;  %v7698_v43 = vpop.eup %5926  ;;  %v11687_v11 = vld [vmem:[#allocation6_spill] sm:$0xff] }
 0x23a   : > { %v1565_v13 = vmul.f32 1.442695, %v1363_v3  ;;  %11683 = vst [vmem:[#allocation58_spill] sm:$0xff] %v7698_v43  ;;  %v1745_v40 = vadd.f32 %v7693_v42, %v7689_v63  ;;  %v1367_v47 = vsub.f32 %v11685_v50, %v7646_v61  ;;  %5938 = vpow2.f32 %v1561_v12  ;;  %v7706_v33 = vpop.eup %5928  ;;  %v11689_v63 = vld [vmem:[#allocation68_spill] sm:$0xff] }
 0x23b   : > { %v7684_v7 = vpop.xlane.xlu0 %1242  ;;  %v1740_v9 = vadd.f32 %v7682_v24, %v1739_v41  ;;  %11686 = vst [vmem:[#allocation3_spill] sm:$0xff] %v7706_v33  ;;  %5940 = vpow2.f32 %v1563_v48  ;;  %v1567_v3 = vmul.f32 1.442695, %v1364_v21  ;;  %v1368_v42 = vsub.f32 %v11689_v63, %v7646_v61  ;;  %v11694_v63 = vld [vmem:[#allocation65_spill] sm:$0xff] }
 0x23c   : > { %v1369_v14 = vsub.f32 %v11684_v6, %v7684_v7  ;;  %v1370_v41 = vsub.f32 %v11687_v11, %v7684_v7  ;;  %v7711_v24 = vpop.eup %5930  ;;  %5942 = vpow2.f32 %v1557_v25  ;;  %v1746_v6 = vadd.f32 %v7706_v33, %v1745_v40  ;;  %v11691_v11 = vld [vmem:[#allocation62_spill] sm:$0xff] }
 0x23d   : > { %v1741_v23 = vadd.f32 %v7698_v43, %v1740_v9  ;;  %11688 = vst [vmem:[#allocation4_spill] sm:$0xff] %v7711_v24  ;;  %v1569_v5 = vmul.f32 1.442695, %v1365_v15  ;;  %v7716_v50 = vpop.eup %5932  ;;  %5944 = vpow2.f32 %v1565_v13  ;;  %v1571_v20 = vmul.f32 1.442695, %v1366_v37 }
 0x23e   : > { %11690 = vst [vmem:[#allocation63_spill] sm:$0xff] %v7716_v50  ;;  %v1371_v9 = vsub.f32 %v11691_v11, %v7684_v7  ;;  %v7721_v48 = vpop.eup %5934  ;;  %v1577_v21 = vmul.f32 1.442695, %v1369_v14  ;;  %5946 = vpow2.f32 %v1559_v16  ;;  %v1747_v25 = vadd.f32 %v7716_v50, %v1746_v6  ;;  %v11696_v14 = vld [vmem:[#allocation66_spill] sm:$0xff] }
 0x23f   : > { %v1742_v12 = vadd.f32 %v7711_v24, %v1741_v23  ;;  %11692 = vst [vmem:[#allocation59_spill] sm:$0xff] %v7721_v48  ;;  %v7726_v40 = vpop.eup %5936  ;;  %v1579_v61 = vmul.f32 1.442695, %v1370_v41  ;;  %5948 = vpow2.f32 %v1567_v3  ;;  %v1372_v15 = vsub.f32 %v11694_v63, %v7684_v7  ;;  %v11698_v41 = vld [vmem:[#allocation69_spill] sm:$0xff]  ;;  %v11700_v63 = vld [vmem:[#allocation7_spill] sm:$0xff] }
 0x240   : > { %11693 = vst [vmem:[#allocation60_spill] sm:$0xff] %v7726_v40  ;;  %v7730_v37 = vpop.eup %5938  ;;  %v1748_v13 = vadd.f32 %v7721_v48, %v1747_v25  ;;  %5950 = vpow2.f32 %v1569_v5  ;;  %v1573_v23 = vmul.f32 1.442695, %v1367_v47  ;;  %v1373_v11 = vsub.f32 %v11696_v14, %v7684_v7  ;;  %v11703_v14 = vld [vmem:[#allocation71_spill] sm:$0xff]  ;;  %v11706_v24 = vld [vmem:[#allocation17_spill] sm:$0xff] }
 0x241   : > { %1743 = vadd.xlane.f32.xlu2 %v1742_v12  ;;  %11695 = vst [vmem:[#allocation61_spill] sm:$0xff] %v7730_v37  ;;  %v7735_v16 = vpop.eup %5940  ;;  %5952 = vpow2.f32 %v1571_v20  ;;  %v1575_v6 = vmul.f32 1.442695, %v1368_v42  ;;  %v1374_v12 = vsub.f32 %v11698_v41, %v7684_v7  ;;  %v1581_v3 = vmul.f32 1.442695, %v1371_v9  ;;  %v11702_v20 = vld [vmem:[#allocation8_spill] sm:$0xff] }
 0x242   : > { %11697 = vst [vmem:[#allocation64_spill] sm:$0xff] %v7735_v16  ;;  %v7739_v33 = vpop.eup %5942  ;;  %v1749_v25 = vadd.f32 %v7726_v40, %v1748_v13  ;;  %v1754_v5 = vadd.f32 %v7735_v16, %v7730_v37  ;;  %5954 = vpow2.f32 %v1577_v21  ;;  %v1375_v41 = vsub.f32 %v11703_v14, %v7684_v7  ;;  %v11705_v21 = vld [vmem:[#allocation72_spill] sm:$0xff] }
 0x243   : > { %v7723_v43 = vpop.xlane.xlu1 %1251  ;;  %11699 = vst [vmem:[#allocation5_spill] sm:$0xff] %v7739_v33  ;;  %v7746_v47 = vpop.eup %5944  ;;  %5956 = vpow2.f32 %v1579_v61  ;;  %v1583_v9 = vmul.f32 1.442695, %v1372_v15  ;;  %v1585_v40 = vmul.f32 1.442695, %v1373_v11  ;;  %v1376_v16 = vsub.f32 %v11705_v21, %v7684_v7  ;;  %v11709_v7 = vld [vmem:[#allocation18_spill] sm:$0xff] }
 0x244   : > { %v1377_v50 = vsub.f32 %v11700_v63, %v7723_v43  ;;  %11701 = vst [vmem:[#allocation67_spill] sm:$0xff] %v7746_v47  ;;  %v1378_v42 = vsub.f32 %v11702_v20, %v7723_v43  ;;  %v7752_v48 = vpop.eup %5946  ;;  %v1750_v63 = vadd.f32 %v7739_v33, %v1749_v25  ;;  %5958 = vpow2.f32 %v1573_v23  ;;  %v11713_v21 = vld [vmem:[#allocation73_spill] sm:$0xff] }
 0x245   : > { %11704 = vst [vmem:[#allocation6_spill] sm:$0xff] %v7752_v48  ;;  %v1755_v13 = vadd.f32 %v7746_v47, %v1754_v5  ;;  %v7756_v37 = vpop.eup %5948  ;;  %5960 = vpow2.f32 %v1581_v3  ;;  %v1587_v20 = vmul.f32 1.442695, %v1374_v12  ;;  %v1379_v14 = vsub.f32 %v11706_v24, %v7723_v43 }
 0x246   : > { %v7762_v61 = vpop.eup %5950  ;;  %v1593_v15 = vmul.f32 1.442695, %v1377_v50  ;;  %v1751_v26 = vadd.f32 %v7752_v48, %v1750_v63  ;;  %5962 = vpow2.f32 %v1575_v6  ;;  %v1595_v11 = vmul.f32 1.442695, %v1378_v42  ;;  %v11711_v6 = vld [vmem:[#allocation70_spill] sm:$0xff] }
 0x247   : > { %11707 = vst [vmem:[#allocation68_spill] sm:$0xff] %v7762_v61  ;;  %v1756_v23 = vadd.f32 %v7756_v37, %v1755_v13  ;;  %v7766_v25 = vpop.eup %5952  ;;  %5964 = vpow2.f32 %v1583_v9  ;;  %v1380_v12 = vsub.f32 %v11709_v7, %v7723_v43  ;;  %v1589_v50 = vmul.f32 1.442695, %v1375_v41  ;;  %v11715_v7 = vld [vmem:[#allocation9_spill] sm:$0xff] }
 0x248   : > { %11708 = vst [vmem:[#allocation62_spill] sm:$0xff] %v7766_v25  ;;  %v7772_v3 = vpop.eup %5954  ;;  %1752 = vadd.xlane.f32.xlu1 %v1751_v26  ;;  %5966 = vpow2.f32 %v1585_v40  ;;  %v1381_v63 = vsub.f32 %v11711_v6, %v7723_v43  ;;  %v1591_v42 = vmul.f32 1.442695, %v1376_v16  ;;  %v1382_v9 = vsub.f32 %v11713_v21, %v7723_v43 }
 0x249   : > { %11710 = vst [vmem:[#allocation65_spill] sm:$0xff] %v7772_v3  ;;  %v1757_v24 = vadd.f32 %v7762_v61, %v1756_v23  ;;  %v7777_v13 = vpop.eup %5956  ;;  %5968 = vpow2.f32 %v1587_v20  ;;  %v1597_v33 = vmul.f32 1.442695, %v1379_v14  ;;  %v11716_v20 = vld [vmem:[#allocation10_spill] sm:$0xff]  ;;  %v1383_v6 = vsub.f32 %v7270_v30, %v7723_v43 }
 0x24a   : > { %11712 = vst [vmem:[#allocation66_spill] sm:$0xff] %v7777_v13  ;;  %v7781_v47 = vpop.eup %5958  ;;  %v1763_v40 = vadd.f32 %v7777_v13, %v7772_v3  ;;  %5970 = vpow2.f32 %v1593_v15  ;;  %v1599_v14 = vmul.f32 1.442695, %v1380_v12  ;;  %v1601_v61 = vmul.f32 1.442695, %v1381_v63  ;;  %v11719_v15 = vld [vmem:[#allocation75_spill] sm:$0xff] }
 0x24b   : > { %v7768_v5 = vpop.xlane.xlu1 %1260  ;;  %11714 = vst [vmem:[#allocation69_spill] sm:$0xff] %v7781_v47  ;;  %v1758_v23 = vadd.f32 %v7766_v25, %v1757_v24  ;;  %v7788_v41 = vpop.eup %5960  ;;  %5972 = vpow2.f32 %v1595_v11  ;;  %v1384_v3 = vsub.f32 %v11719_v15, %v7723_v43  ;;  %v11720_v13 = vld [vmem:[#allocation19_spill] sm:$0xff]  ;;  %v11723_v43 = vld [vmem:[#allocation20_spill] sm:$0xff] }
 0x24c   : > { %v1385_v26 = vsub.f32 %v11715_v7, %v7768_v5  ;;  %v1386_v16 = vsub.f32 %v11716_v20, %v7768_v5  ;;  %v7794_v21 = vpop.eup %5962  ;;  %5974 = vpow2.f32 %v1589_v50  ;;  %v1764_v24 = vadd.f32 %v7788_v41, %v1763_v40  ;;  %v11727_v15 = vld [vmem:[#allocation76_spill] sm:$0xff] }
 0x24d   : > { %11717 = vst [vmem:[#allocation7_spill] sm:$0xff] %v7794_v21  ;;  %v1759_v7 = vadd.f32 %v7781_v47, %v1758_v23  ;;  %v7798_v25 = vpop.eup %5964  ;;  %5976 = vpow2.f32 %v1597_v33  ;;  %v1603_v20 = vmul.f32 1.442695, %v1382_v9  ;;  %v1387_v30 = vsub.f32 %v11720_v13, %v7768_v5 }
 0x24e   : > { %11718 = vst [vmem:[#allocation8_spill] sm:$0xff] %v7798_v25  ;;  %v7804_v11 = vpop.eup %5966  ;;  %v1609_v12 = vmul.f32 1.442695, %v1385_v26  ;;  %5978 = vpow2.f32 %v1591_v42  ;;  %v1765_v50 = vadd.f32 %v7798_v25, %v1764_v24  ;;  %v1611_v63 = vmul.f32 1.442695, %v1386_v16  ;;  %v11725_v42 = vld [vmem:[#allocation74_spill] sm:$0xff] }
 0x24f   : > { %11721 = vst [vmem:[#allocation71_spill] sm:$0xff] %v7804_v11  ;;  %v1760_v48 = vadd.f32 %v7794_v21, %v1759_v7  ;;  %v7808_v23 = vpop.eup %5968  ;;  %5980 = vpow2.f32 %v1599_v14  ;;  %v1388_v33 = vsub.f32 %v11723_v43, %v7768_v5  ;;  %v1605_v26 = vmul.f32 1.442695, %v1383_v6  ;;  %v11729_v43 = vld [vmem:[#allocation11_spill] sm:$0xff] }
 0x250   : > { %11722 = vst [vmem:[#allocation72_spill] sm:$0xff] %v7808_v23  ;;  %v7814_v9 = vpop.eup %5970  ;;  %v1766_v13 = vadd.f32 %v7804_v11, %v1765_v50  ;;  %5982 = vpow2.f32 %v1601_v61  ;;  %v1389_v7 = vsub.f32 %v11725_v42, %v7768_v5  ;;  %v1607_v16 = vmul.f32 1.442695, %v1384_v3 }
 0x251   : > { %11724 = vst [vmem:[#allocation17_spill] sm:$0xff] %v7814_v9  ;;  %1761 = vadd.xlane.f32.xlu0 %v1760_v48  ;;  %v7819_v24 = vpop.eup %5972  ;;  %5984 = vpow2.f32 %v1603_v20  ;;  %v1390_v14 = vsub.f32 %v11727_v15, %v7768_v5  ;;  %v1613_v47 = vmul.f32 1.442695, %v1387_v30  ;;  %v11730_v20 = vld [vmem:[#allocation12_spill] sm:$0xff]  ;;  %v1391_v42 = vsub.f32 %v7298_v57, %v7768_v5 }
 0x252   : > { %11726 = vst [vmem:[#allocation18_spill] sm:$0xff] %v7819_v24  ;;  %v7823_v25 = vpop.eup %5974  ;;  %v1767_v50 = vadd.f32 %v7808_v23, %v1766_v13  ;;  %v1772_v61 = vadd.f32 %v7819_v24, %v7814_v9  ;;  %5986 = vpow2.f32 %v1609_v12  ;;  %v1615_v30 = vmul.f32 1.442695, %v1388_v33  ;;  %v11731_v12 = vld [vmem:[#allocation78_spill] sm:$0xff]  ;;  %v11732_v24 = vld [vmem:[#allocation21_spill] sm:$0xff] }
 0x253   : > { %v7810_v40 = vpop.xlane.xlu2 %1269  ;;  %11728 = vst [vmem:[#allocation70_spill] sm:$0xff] %v7823_v25  ;;  %v7830_v6 = vpop.eup %5976  ;;  %5988 = vpow2.f32 %v1611_v63  ;;  %v1617_v11 = vmul.f32 1.442695, %v1389_v7  ;;  %v1392_v9 = vsub.f32 %v11731_v12, %v7768_v5 }
 0x254   : > { %v1393_v48 = vsub.f32 %v11729_v43, %v7810_v40  ;;  %v1394_v3 = vsub.f32 %v11730_v20, %v7810_v40  ;;  %v7836_v15 = vpop.eup %5978  ;;  %v1768_v43 = vadd.f32 %v7823_v25, %v1767_v50  ;;  %5990 = vpow2.f32 %v1605_v26 }
 0x255   : > { %v1773_v13 = vadd.f32 %v7830_v6, %v1772_v61  ;;  %v7840_v23 = vpop.eup %5980  ;;  %5992 = vpow2.f32 %v1613_v47  ;;  %v1619_v20 = vmul.f32 1.442695, %v1390_v14  ;;  %v1395_v57 = vsub.f32 %v11732_v24, %v7810_v40  ;;  %v11735_v61 = vld [vmem:[#allocation22_spill] sm:$0xff] }
 0x256   : > { %v7846_v63 = vpop.eup %5982  ;;  %v1625_v33 = vmul.f32 1.442695, %v1393_v48  ;;  %v1769_v21 = vadd.f32 %v7836_v15, %v1768_v43  ;;  %5994 = vpow2.f32 %v1607_v16  ;;  %v1627_v7 = vmul.f32 1.442695, %v1394_v3  ;;  %v11736_v16 = vld [vmem:[#allocation77_spill] sm:$0xff] }
 0x257   : > { %11733 = vst [vmem:[#allocation73_spill] sm:$0xff] %v7846_v63  ;;  %v1774_v26 = vadd.f32 %v7840_v23, %v1773_v13  ;;  %v7850_v50 = vpop.eup %5984  ;;  %5996 = vpow2.f32 %v1615_v30  ;;  %v1396_v5 = vsub.f32 %v11735_v61, %v7810_v40  ;;  %v1621_v14 = vmul.f32 1.442695, %v1391_v42 }
 0x258   : > { %11734 = vst [vmem:[#allocation9_spill] sm:$0xff] %v7850_v50  ;;  %v7854_v47 = vpop.eup %5986  ;;  %1770 = vadd.xlane.f32.xlu1 %v1769_v21  ;;  %5998 = vpow2.f32 %v1617_v11  ;;  %v1397_v43 = vsub.f32 %v11736_v16, %v7810_v40  ;;  %v1629_v13 = vmul.f32 1.442695, %v1395_v57  ;;  %v1623_v30 = vmul.f32 1.442695, %v1392_v9  ;;  %v11738_v11 = vld [vmem:[#allocation79_spill] sm:$0xff] }
 0x259   : > { %v1775_v24 = vadd.f32 %v7846_v63, %v1774_v26  ;;  %v7857_v48 = vpop.eup %5988  ;;  %6000 = vpow2.f32 %v1619_v20  ;;  %v1398_v42 = vsub.f32 %v11738_v11, %v7810_v40  ;;  %v1631_v20 = vmul.f32 1.442695, %v1396_v5 }
 0x25a   : > { %v7861_v12 = vpop.eup %5990  ;;  %v1781_v61 = vadd.f32 %v7857_v48, %v7854_v47  ;;  %6002 = vpow2.f32 %v1625_v33  ;;  %v1399_v9 = vsub.f32 %v7326_v27, %v7810_v40  ;;  %v1633_v33 = vmul.f32 1.442695, %v1397_v43 }
 0x25b   : > { %11737 = vst [vmem:[#allocation10_spill] sm:$0xff] %v7861_v12  ;;  %v1776_v3 = vadd.f32 %v7850_v50, %v1775_v24  ;;  %v7866_v21 = vpop.eup %5992  ;;  %6004 = vpow2.f32 %v1627_v7 }
 0x25c   : > { %v7870_v26 = vpop.eup %5994  ;;  %6006 = vpow2.f32 %v1621_v14  ;;  %v1782_v16 = vadd.f32 %v7866_v21, %v1781_v61  ;;  %v1400_v14 = vsub.f32 %v7329_v31, %v7810_v40 }
 0x25d   : > { %v1777_v57 = vadd.f32 %v7861_v12, %v1776_v3  ;;  %v7874_v24 = vpop.eup %5996  ;;  %6008 = vpow2.f32 %v1629_v13  ;;  %v1635_v3 = vmul.f32 1.442695, %v1398_v42  ;;  %v1637_v13 = vmul.f32 1.442695, %v1399_v9 }
 0x25e   : > { %v7878_v25 = vpop.eup %5998  ;;  %6010 = vpow2.f32 %v1623_v30  ;;  %v1783_v7 = vadd.f32 %v7874_v24, %v1782_v16  ;;  %v1639_v31 = vmul.f32 1.442695, %v1400_v14 }
 0x25f   : > { %11739 = vst [vmem:[#allocation75_spill] sm:$0xff] %v7878_v25  ;;  %v1778_v11 = vadd.f32 %v7870_v26, %v1777_v57  ;;  %v7882_v5 = vpop.eup %6000  ;;  %6012 = vpow2.f32 %v1631_v20 }
 0x260   : > { %11740 = vst [vmem:[#allocation19_spill] sm:$0xff] %v7882_v5  ;;  %v7886_v61 = vpop.eup %6002  ;;  %v1784_v27 = vadd.f32 %v7878_v25, %v1783_v7  ;;  %6014 = vpow2.f32 %v1633_v33 }
 0x261   : > { %1779 = vadd.xlane.f32.xlu0 %v1778_v11  ;;  %v7889_v43 = vpop.eup %6004  ;;  %6016 = vpow2.f32 %v1635_v3 }
 0x262   : > { %v7891_v57 = vpop.eup %6006  ;;  %v1785_v30 = vadd.f32 %v7882_v5, %v1784_v27  ;;  %v1790_v16 = vadd.f32 %v7889_v43, %v7886_v61  ;;  %6018 = vpow2.f32 %v1637_v13  ;;  %v11756_v5 = vld [vmem:[#allocation15_spill] sm:$0xff] }
 0x263   : > { %11741 = vst [vmem:[#allocation20_spill] sm:$0xff] %v7891_v57  ;;  %v7896_v12 = vpop.eup %6008  ;;  %6020 = vpow2.f32 %v1639_v31 }
 0x264   : > { %v7898_v40 = vpop.eup %6010  ;;  %v1786_v42 = vadd.f32 %v7891_v57, %v1785_v30  ;;  %v1791_v20 = vadd.f32 %v7896_v12, %v1790_v16 }
 0x265   : > { %v7902_v11 = vpop.eup %6012 }
 0x266   : > { %v1787_v9 = vadd.f32 %v7898_v40, %v1786_v42  ;;  %v1792_v33 = vadd.f32 %v7902_v11, %v1791_v20  ;;  %v7906_v7 = vpop.eup %6014  ;;  %v7918_v42 = vpop.xlane.xlu2 %1278 }
 0x267   : > { %11742 = vst [vmem:[#allocation74_spill] sm:$0xff] %v7906_v7  ;;  %v7909_v14 = vpop.eup %6016 }
 0x268   : > { %1788 = vadd.xlane.f32.xlu2 %v1787_v9  ;;  %v1793_v3 = vadd.f32 %v7906_v7, %v1792_v33  ;;  %11743 = vst [vmem:[#allocation76_spill] sm:$0xff] %v7909_v14  ;;  %v7912_v30 = vpop.eup %6018  ;;  %v11749_v7 = vld [vmem:[#allocation23_spill] sm:$0xff] }
 0x269   : > { %11744 = vst [vmem:[#allocation11_spill] sm:$0xff] %v7912_v30  ;;  %v7915_v57 = vpop.eup %6020 }
 0x26a   : > { %v1794_v27 = vadd.f32 %v7909_v14, %v1793_v3 }
 0x26c   : > { %v1795_v16 = vadd.f32 %v7912_v30, %v1794_v27 }
 0x26e   : > { %v1796_v13 = vadd.f32 %v7915_v57, %v1795_v16 }
 0x270   : > { %1797 = vadd.xlane.f32.xlu0 %v1796_v13 }
 0x279   : > { %v1681_v20 = vpop.xlane.xlu1 %1680 }
 0x27a   : > { %6022 = vrcp.f32 %v1681_v20 }
 0x280   : > { %v7920_v9 = vpop.eup %6022 }
 0x281   : > { %v1690_v31 = vpop.xlane.xlu2 %1689  ;;  %11745 = vst [vmem:[#allocation12_spill] sm:$0xff] %v7920_v9  ;;  %v7926_v3 = vmul.f32 %v7920_v9, %v7384_v62  ;;  %v7930_v27 = vmul.f32 %v7920_v9, %v7387_v55  ;;  %v7942_v20 = vmul.f32 %v7920_v9, %v7390_v54  ;;  %v7969_v30 = vmul.f32 %v7920_v9, %v7406_v32 }
 0x282   : > { %6024 = vrcp.f32 %v1690_v31  ;;  %v7948_v31 = vpop.xlane.xlu0 %1287 }
 0x283   : > { %11748 = vst [vmem:[#allocation22_spill] sm:$0xff] %v7969_v30 }
 0x288   : > { %v7922_v33 = vpop.eup %6024 }
 0x289   : > { %11746 = vst [vmem:[#allocation78_spill] sm:$0xff] %v7922_v33  ;;  %v7934_v16 = vmul.f32 %v7922_v33, %v7411_v59  ;;  %v7938_v13 = vmul.f32 %v7922_v33, %v7414_v34  ;;  %v7946_v62 = vmul.f32 %v7922_v33, %v7419_v44  ;;  %v1699_v54 = vpop.xlane.xlu2 %1698  ;;  %v7961_v44 = vmul.f32 %v7922_v33, %v7438_v52 }
 0x28a   : > { %v7965_v25 = vmul.f32 %v7922_v33, %v7424_v49  ;;  %6026 = vrcp.f32 %v1699_v54 }
 0x28b   : > { %v5487_v55 = vpack.i.bf16 %v7934_v16, %v7926_v3  ;;  %v5477_v59 = vpack.i.bf16 %v7938_v13, %v7930_v27  ;;  %v5482_v34 = vpack.i.bf16 %v7946_v62, %v7942_v20  ;;  %11747 = vst [vmem:[#allocation21_spill] sm:$0xff] %v7961_v44 }
 0x28d   : > { %5488 = vrot.lane.b32.xlu2 %v5487_v55, %s6166_s14  ;;  %5478 = vrot.lane.b32.xlu0 %v5477_v59, %s6166_s14  ;;  %v7973_v55 = vmul.f32 %v7920_v9, %v11749_v7 }
 0x28e   : > { %5483 = vrot.lane.b32.xlu1 %v5482_v34, %s6166_s14  ;;  %v5497_v34 = vpack.i.bf16 %v7961_v44, %v7969_v30 }
 0x28f   : > { %v5492_v52 = vpack.i.bf16 %v7965_v25, %v7973_v55 }
 0x290   : > { %v7981_v49 = vpop.eup %6026 }
 0x291   : > { %11750 = vst [vmem:[#allocation77_spill] sm:$0xff] %v7981_v49  ;;  %v7987_v7 = vmul.f32 %v7981_v49, %v7446_v58  ;;  %v8002_v30 = vmul.f32 %v7981_v49, %v7450_v38 }
 0x292   : > { %v1708_v59 = vpop.xlane.xlu0 %1707 }
 0x293   : > { %6028 = vrcp.f32 %v1708_v59 }
 0x295   : > { %5498 = vrot.lane.b32.xlu2 %v5497_v34, %s6166_s14  ;;  %5493 = vrot.lane.b32.xlu0 %v5492_v52, %s6166_s14 }
 0x299   : > { %v7983_v32 = vpop.eup %6028 }
 0x29a   : > { %11751 = vst [vmem:[#allocation79_spill] sm:$0xff] %v7983_v32  ;;  %v7991_v54 = vmul.f32 %v7983_v32, %v7485_v45  ;;  %v7998_v52 = vmul.f32 %v7983_v32, %v7490_v29 }
 0x29b   : > { %v1717_v34 = vpop.xlane.xlu0 %1716 }
 0x29c   : > { %v5502_v59 = vpack.i.bf16 %v7991_v54, %v7987_v7  ;;  %6030 = vrcp.f32 %v1717_v34  ;;  %v5507_v45 = vpack.i.bf16 %v7998_v52, %v8002_v30  ;;  %v8017_v34 = vmul.f32 %v7981_v49, %v7443_v0 }
 0x29d   : > { %v1409_v0 = vsub.f32 %v11756_v5, %v7948_v31  ;;  %v8050_v5 = vmul.f32 %v7983_v32, %v7497_v60  ;;  %v8063_v60 = vmul.f32 %v7983_v32, %v7518_v53 }
 0x29e   : > { %5503 = vrot.lane.b32.xlu2 %v5502_v59, %s6166_s14  ;;  %v8011_v59 = vmul.f32 %v7983_v32, %v7481_v1 }
 0x29f   : > { %11759 = vst [vmem:[#allocation15_spill] sm:$0xff] %v8063_v60 }
 0x2a0   : > { %v5512_v14 = vpack.i.bf16 %v8011_v59, %v8017_v34 }
 0x2a2   : > { %v1726_v58 = vpop.xlane.xlu1 %1725  ;;  %v8007_v44 = vpop.eup %6030 }
 0x2a3   : > { %6032 = vrcp.f32 %v1726_v58  ;;  %11752 = vst [vmem:[#allocation23_spill] sm:$0xff] %v8007_v44  ;;  %v8021_v38 = vmul.f32 %v8007_v44, %v7534_v10  ;;  %v11757_v10 = vld [vmem:[#allocation16_spill] sm:$0xff] }
 0x2a4   : > { %v1410_v63 = vsub.f32 %v11757_v10, %v7948_v31  ;;  %v8054_v10 = vmul.f32 %v7981_v49, %v7455_v2  ;;  %v11760_v2 = vld [vmem:[#allocation34_spill] sm:$0xff] }
 0x2a6   : > { %5508 = vrot.lane.b32.xlu2 %v5507_v45, %s6166_s14  ;;  %v8029_v45 = vmul.f32 %v8007_v44, %v7523_v18  ;;  %v1659_v50 = vmul.f32 1.442695, %v1410_v63  ;;  %v5517_v33 = vpack.i.bf16 %v8050_v5, %v8054_v10  ;;  %v1412_v63 = vsub.f32 %v11760_v2, %v7948_v31 }
 0x2a8   : > { %11754 = vst [vmem:[#allocation89_spill] sm:$0xff] %v8029_v45 }
 0x2a9   : > { %v8013_v29 = vpop.eup %6032 }
 0x2aa   : > { %11753 = vst [vmem:[#allocation88_spill] sm:$0xff] %v8013_v29  ;;  %v8025_v58 = vmul.f32 %v8013_v29, %v7572_v19  ;;  %v8033_v1 = vmul.f32 %v8013_v29, %v7562_v35  ;;  %v1657_v35 = vmul.f32 1.442695, %v1409_v0  ;;  %v1735_v9 = vpop.xlane.xlu1 %1734 }
 0x2ac   : > { %11755 = vst [vmem:[#allocation90_spill] sm:$0xff] %v8033_v1  ;;  %v5532_v19 = vpack.i.bf16 %v8025_v58, %v8021_v38  ;;  %v5537_v18 = vpack.i.bf16 %v8033_v1, %v8029_v45  ;;  %6034 = vpow2.f32 %v1657_v35  ;;  %v11765_v35 = vld [vmem:[#allocation82_spill] sm:$0xff] }
 0x2ad   : > { %6036 = vpow2.f32 %v1659_v50 }
 0x2ae   : > { %5513 = vrot.lane.b32.xlu2 %v5512_v14, %s6166_s14  ;;  %5533 = vrot.lane.b32.xlu1 %v5532_v19, %s6166_s14  ;;  %v11758_v14 = vld [vmem:[#allocation31_spill] sm:$0xff]  ;;  %6038 = vrcp.f32 %v1735_v9  ;;  %v5379_v9 = vld [vmem:[%s11159_s0 + $0x38] sm:$0xff] }
 0x2af   : > { %5538 = vrot.lane.b32.xlu0 %v5537_v18, %s6166_s14  ;;  %v1411_v1 = vsub.f32 %v11758_v14, %v7948_v31  ;;  %v8071_v14 = vmul.f32 %v7981_v49, %v7476_v17  ;;  %3477 = vmatpush.bf16.msra.mxu0 %v5379_v9 }
 0x2b1   : > { %v1661_v19 = vmul.f32 1.442695, %v1411_v1  ;;  %11762 = vst [vmem:[#allocation31_spill] sm:$0xff] %v8071_v14  ;;  %v5522_v53 = vpack.i.bf16 %v8063_v60, %v8071_v14  ;;  %v1413_v1 = vsub.f32 %v11765_v35, %v7948_v31  ;;  %v8112_v14 = vmul.f32 %v8007_v44, %v7527_v56 }
 0x2b2   : > { %v8067_v18 = vpop.eup %6034 }
 0x2b3   : > { %11761 = vst [vmem:[#allocation16_spill] sm:$0xff] %v8067_v18  ;;  %v8073_v50 = vpop.eup %6036 }
 0x2b4   : > { %v1744_v0 = vpop.xlane.xlu2 %1743  ;;  %11763 = vst [vmem:[#allocation34_spill] sm:$0xff] %v8073_v50  ;;  %v1808_v60 = vadd.f32 %v8073_v50, %v8067_v18 }
 0x2b5   : > { %6040 = vrcp.f32 %v1744_v0  ;;  %v1663_v0 = vmul.f32 1.442695, %v1412_v63  ;;  %v11769_v63 = vld [vmem:[#allocation85_spill] sm:$0xff] }
 0x2b6   : > { %5518 = vrot.lane.b32.xlu2 %v5517_v33, %s6166_s14  ;;  %v8078_v33 = vpop.eup %6038  ;;  %6042 = vpow2.f32 %v1661_v19  ;;  %v8099_v19 = vmul.f32 %v8013_v29, %v7565_v51  ;;  %v1414_v9 = vsub.f32 %v11769_v63, %v7948_v31  ;;  %v11771_v63 = vld [vmem:[#allocation86_spill] sm:$0xff] }
 0x2b7   : > { %11764 = vst [vmem:[#allocation91_spill] sm:$0xff] %v8078_v33  ;;  %v8089_v17 = vmul.f32 %v8078_v33, %v7601_v4  ;;  %6044 = vpow2.f32 %v1663_v0  ;;  %v1415_v18 = vsub.f32 %v11771_v63, %v7948_v31  ;;  %v8137_v63 = vmul.f32 %v8013_v29, %v7584_v28 }
 0x2b8   : > { %v5527_v0 = vpack.i.bf16 %v8099_v19, %v8112_v14  ;;  %v1667_v50 = vmul.f32 1.442695, %v1414_v9  ;;  %v11776_v9 = vld [vmem:[#allocation87_spill] sm:$0xff] }
 0x2b9   : > { %11767 = vst [vmem:[#allocation92_spill] sm:$0xff] %v8089_v17 }
 0x2ba   : > { %11775 = vst [vmem:[#allocation96_spill] sm:$0xff] %v8137_v63 }
 0x2bb   : > { %v8084_v2 = vpop.eup %6040 }
 0x2bc   : > { %11766 = vst [vmem:[#allocation82_spill] sm:$0xff] %v8084_v2  ;;  %v8093_v49 = vmul.f32 %v8084_v2, %v7655_v39  ;;  %v5378_v39 = vld [vmem:[%s11159_s0 + $0x30] sm:$0xff]  ;;  %v8108_v35 = vpop.eup %6042  ;;  %v8125_v56 = vmul.f32 %v8084_v2, %v7664_v36  ;;  %v1669_v36 = vmul.f32 1.442695, %v1415_v18  ;;  %v5387_v18 = vld [vmem:[%s11159_s0 + $0x78] sm:$0xff] }
 0x2bd   : > { %11770 = vst [vmem:[#allocation85_spill] sm:$0xff] %v8108_v35  ;;  %v1809_v51 = vadd.f32 %v8108_v35, %v1808_v60  ;;  %3478 = vmatpush.bf16.msra.mxu0 %v5378_v39  ;;  %v8132_v60 = vmul.f32 %v8078_v33, %v7610_v8  ;;  %v5376_v8 = vld [vmem:[%s11159_s0 + $0x20] sm:$0xff]  ;;  %3526 = vmatpush.bf16.msra.mxu1 %v5387_v18  ;;  %v5374_v18 = vld [vmem:[%s11159_s0 + $0x10] sm:$0xff] }
 0x2be   : > { %5523 = vrot.lane.b32.xlu2 %v5522_v53, %s6166_s14  ;;  %11768 = vst [vmem:[#allocation93_spill] sm:$0xff] %v8093_v49  ;;  %v1665_v53 = vmul.f32 1.442695, %v1413_v1  ;;  %v5552_v4 = vpack.i.bf16 %v8093_v49, %v8089_v17  ;;  %v5377_v1 = vld [vmem:[%s11159_s0 + $0x28] sm:$0xff] }
 0x2bf   : > { %11772 = vst [vmem:[#allocation86_spill] sm:$0xff] %v8125_v56  ;;  %v5557_v35 = vpack.i.bf16 %v8125_v56, %v8132_v60  ;;  %v11813_v56 = vld [vmem:[#allocation83_spill] sm:$0xff] }
 0x2c0   : > { %5553 = vrot.lane.b32.xlu1 %v5552_v4, %s6166_s14  ;;  %6046 = vpow2.f32 %v1665_v53  ;;  %v8127_v4 = vpop.eup %6044  ;;  %11774 = vst [vmem:[#allocation95_spill] sm:$0xff] %v8132_v60  ;;  %v1416_v53 = vsub.f32 %v11776_v9, %v7948_v31  ;;  %v5375_v31 = vld [vmem:[%s11159_s0 + $0x18] sm:$0xff]  ;;  %v5394_v9 = vld [vmem:[%s11159_s0 + $0xb0] sm:$0xff] }
 0x2c1   : > { %11773 = vst [vmem:[#allocation94_spill] sm:$0xff] %v8127_v4  ;;  %v1810_v39 = vadd.f32 %v8127_v4, %v1809_v51  ;;  %3479 = vmatpush.bf16.msra.mxu0 %v5377_v1  ;;  %6048 = vpow2.f32 %v1667_v50  ;;  %v8150_v51 = vmul.f32 %v8007_v44, %v7541_v22  ;;  %v5395_v50 = vld [vmem:[%s11159_s0 + $0xb8] sm:$0xff]  ;;  %v8167_v1 = vmul.f32 %v8084_v2, %v7644_v46 }
 0x2c2   : > { %6050 = vpow2.f32 %v1669_v36  ;;  %3575 = vmatpush.bf16.msrb.mxu2 %v5395_v50  ;;  %v11780_v36 = vld [vmem:[#allocation48_spill] sm:$0xff]  ;;  %v11782_v50 = vld [vmem:[#allocation47_spill] sm:$0xff]  ;;  %v11784_v4 = vld [vmem:[#allocation13_spill] sm:$0xff] }
 0x2c3   : > { %v5542_v22 = vpack.i.bf16 %v8137_v63, %v8150_v51  ;;  %11778 = vst [vmem:[#allocation97_spill] sm:$0xff] %v8167_v1  ;;  %v1401_v32 = vsub.f32 %v11784_v4, %v7918_v42 }
 0x2c5   : > { %3480 = vmatpush.bf16.msra.mxu0 %v5376_v8 }
 0x2c6   : > { %5528 = vrot.lane.b32.xlu2 %v5527_v0, %s6166_s14  ;;  %v8146_v0 = vpop.eup %6046  ;;  %3576 = vmatpush.bf16.msrb.mxu2 %v5394_v9 }
 0x2c7   : > { %11777 = vst [vmem:[#allocation87_spill] sm:$0xff] %v8146_v0  ;;  %v1811_v28 = vadd.f32 %v8146_v0, %v1810_v39  ;;  %v5386_v39 = vld [vmem:[%s11159_s0 + $0x70] sm:$0xff]  ;;  %v8175_v8 = vpop.eup %6048  ;;  %v8188_v0 = vmul.f32 %v8013_v29, %v11782_v50  ;;  %v1641_v50 = vmul.f32 1.442695, %v1401_v32  ;;  %v5393_v32 = vld [vmem:[%s11159_s0 + $0xa8] sm:$0xff] }
 0x2c8   : > { %5558 = vrot.lane.b32.xlu1 %v5557_v35, %s6166_s14  ;;  %v1671_v35 = vmul.f32 1.442695, %v1416_v53  ;;  %11779 = vst [vmem:[#allocation98_spill] sm:$0xff] %v8175_v8  ;;  %v8180_v53 = vmul.f32 %v8078_v33, %v11780_v36  ;;  %3527 = vmatpush.bf16.msra.mxu1 %v5386_v39  ;;  %v8194_v36 = vpop.eup %6050  ;;  %v11789_v39 = vld [vmem:[#allocation52_spill] sm:$0xff] }
 0x2c9   : > { %v1812_v46 = vadd.f32 %v8175_v8, %v1811_v28  ;;  %3481 = vmatpush.bf16.msra.mxu0 %v5375_v31  ;;  %11783 = vst [vmem:[#allocation47_spill] sm:$0xff] %v8188_v0  ;;  %v11786_v28 = vld [vmem:[#allocation14_spill] sm:$0xff]  ;;  %v11787_v8 = vld [vmem:[#allocation45_spill] sm:$0xff]  ;;  %v8208_v9 = vmul.f32 %v8084_v2, %v11789_v39 }
 0x2ca   : > { %11781 = vst [vmem:[#allocation48_spill] sm:$0xff] %v8180_v53  ;;  %6052 = vpow2.f32 %v1671_v35  ;;  %v1402_v31 = vsub.f32 %v11786_v28, %v7918_v42  ;;  %v8200_v49 = vmul.f32 %v8007_v44, %v11787_v8  ;;  %v5373_v8 = vld [vmem:[%s11159_s0 + $0x8] sm:$0xff]  ;;  %v5372_v39 = vld [vmem:[%s11159_s0] sm:$0xff]  ;;  %3577 = vmatpush.bf16.msrb.mxu2 %v5393_v32  ;;  %v1753_v44 = vpop.xlane.xlu1 %1752 }
 0x2cb   : > { %11785 = vst [vmem:[#allocation13_spill] sm:$0xff] %v8194_v36  ;;  %v1813_v35 = vadd.f32 %v8194_v36, %v1812_v46  ;;  %v5385_v46 = vld [vmem:[%s11159_s0 + $0x68] sm:$0xff]  ;;  %v1762_v36 = vpop.xlane.xlu0 %1761  ;;  %6054 = vpow2.f32 %v1641_v50 }
 0x2cc   : > { %11788 = vst [vmem:[#allocation14_spill] sm:$0xff] %v8200_v49  ;;  %v5547_v4 = vpack.i.bf16 %v8188_v0, %v8200_v49  ;;  %v1643_v28 = vmul.f32 1.442695, %v1402_v31  ;;  %3528 = vmatpush.bf16.msra.mxu1 %v5385_v46  ;;  %v5384_v0 = vld [vmem:[%s11159_s0 + $0x60] sm:$0xff]  ;;  %v11794_v49 = vld [vmem:[#allocation25_spill] sm:$0xff]  ;;  %v5402_v46 = vld [vmem:[%s11159_s0 + $0xf0] sm:$0xff] }
 0x2cd   : > { %3482 = vmatpush.bf16.msra.mxu0 %v5374_v18  ;;  %11790 = vst [vmem:[#allocation45_spill] sm:$0xff] %v8208_v9  ;;  %v11792_v18 = vld [vmem:[#allocation49_spill] sm:$0xff]  ;;  %v11795_v32 = vld [vmem:[#allocation27_spill] sm:$0xff] }
 0x2ce   : > { %5543 = vrot.lane.b32.xlu2 %v5542_v22, %s6166_s14  ;;  %v5562_v22 = vpack.i.bf16 %v8167_v1, %v8180_v53  ;;  %6056 = vpow2.f32 %v1643_v28  ;;  %v5391_v28 = vld [vmem:[%s11159_s0 + $0x98] sm:$0xff] }
 0x2cf   : > { %6058 = vrcp.f32 %v1762_v36 }
 0x2d0   : > { %5563 = vrot.lane.b32.xlu1 %v5562_v22, %s6166_s14  ;;  %v8210_v29 = vpop.eup %6052  ;;  %v8224_v22 = vmul.f32 %v8078_v33, %v11792_v18  ;;  %v1403_v18 = vsub.f32 %v11794_v49, %v7918_v42  ;;  %3529 = vmatpush.bf16.msra.mxu1 %v5384_v0  ;;  %v5383_v49 = vld [vmem:[%s11159_s0 + $0x58] sm:$0xff]  ;;  %6060 = vrcp.f32 %v1753_v44  ;;  %v5401_v0 = vld [vmem:[%s11159_s0 + $0xe8] sm:$0xff]  ;;  %v5382_v44 = vld [vmem:[%s11159_s0 + $0x50] sm:$0xff] }
 0x2d1   : > { %11791 = vst [vmem:[#allocation52_spill] sm:$0xff] %v8210_v29  ;;  %v1814_v31 = vadd.f32 %v8210_v29, %v1813_v35  ;;  %3483 = vmatpush.bf16.msra.mxu0 %v5373_v8  ;;  %v5392_v8 = vld [vmem:[%s11159_s0 + $0xa0] sm:$0xff]  ;;  %v8262_v36 = vpop.eup %6054 }
 0x2d2   : > { %11793 = vst [vmem:[#allocation49_spill] sm:$0xff] %v8224_v22  ;;  %v5567_v35 = vpack.i.bf16 %v8208_v9, %v8224_v22  ;;  %v1645_v50 = vmul.f32 1.442695, %v1403_v18  ;;  %3578 = vmatpush.bf16.msrb.mxu2 %v5392_v8  ;;  %v2217_v8 = vlaneseq }
 0x2d3   : > { %11798 = vst [vmem:[#allocation27_spill] sm:$0xff] %v8262_v36 }
 0x2d4   : > { %3530 = vmatpush.bf16.msra.mxu1 %v5383_v49  ;;  %6062 = vpow2.f32 %v1645_v50  ;;  %v5400_v49 = vld [vmem:[%s11159_s0 + $0xe0] sm:$0xff]  ;;  %v1780_v53 = vpop.xlane.xlu0 %1779  ;;  %v8357_v45 = vand.u32 127, %v2217_v8 }
 0x2d5   : > { %3484 = vmatpush.bf16.msra.mxu0 %v5372_v39  ;;  %v11799_v39 = vld [vmem:[#allocation51_spill] sm:$0xff] }
 0x2d6   : > { %5548 = vrot.lane.b32.xlu2 %v5547_v4, %s6166_s14  ;;  %v5403_v4 = vld [vmem:[%s11159_s0 + $0xf8] sm:$0xff]  ;;  %v8266_v18 = vmul.f32 %v8078_v33, %v11799_v39  ;;  %3579 = vmatpush.bf16.msrb.mxu2 %v5391_v28  ;;  %v5390_v39 = vld [vmem:[%s11159_s0 + $0x90] sm:$0xff]  ;;  %v1771_v28 = vpop.xlane.xlu1 %1770  ;;  %vm2219_vm0 = vcmp.lt.s32.totalorder %v8357_v45, 1 }
 0x2d7   : > { %3624 = vmatpush.bf16.msrb.mxu3 %v5403_v4  ;;  %v11796_v4 = vld [vmem:[#allocation4_spill] sm:$0xff] }
 0x2d8   : > { %5568 = vrot.lane.b32.xlu1 %v5567_v35, %s6166_s14  ;;  %v8254_v29 = vmul.f32 %v8084_v2, %v11796_v4  ;;  %11800 = vst [vmem:[#allocation4_spill] sm:$0xff] %v8266_v18  ;;  %v8268_v35 = vpop.eup %6056  ;;  %3531 = vmatpush.bf16.msra.mxu1 %v5382_v44 }
 0x2d9   : > { %1815 = vadd.xlane.f32.xlu0 %v1814_v31  ;;  %v1404_v31 = vsub.f32 %v11795_v32, %v7918_v42  ;;  %11801 = vst [vmem:[#allocation51_spill] sm:$0xff] %v8268_v35  ;;  %v8282_v33 = vpop.eup %6058 }
 0x2da   : > { %11797 = vst [vmem:[#allocation25_spill] sm:$0xff] %v8254_v29  ;;  %v5572_v1 = vpack.i.bf16 %v8254_v29, %v8266_v18  ;;  %v8290_v50 = vpop.eup %6060  ;;  %v11803_v18 = vld [vmem:[#allocation64_spill] sm:$0xff]  ;;  %3580 = vmatpush.bf16.msrb.mxu2 %v5390_v39  ;;  %v5399_v39 = vld [vmem:[%s11159_s0 + $0xd8] sm:$0xff] }
 0x2db   : > { %3625 = vmatpush.bf16.msrb.mxu3 %v5402_v46  ;;  %v8270_v32 = vpop.xlane.xlu2 %1788  ;;  %v11802_v46 = vld [vmem:[#allocation80_spill] sm:$0xff]  ;;  %v1647_v2 = vmul.f32 1.442695, %v1404_v31  ;;  %v1799_v31 = vadd.f32 %v8268_v35, %v8262_v36  ;;  %v8298_v9 = vpop.eup %6062  ;;  %v11807_v35 = vld [vmem:[#allocation57_spill] sm:$0xff] }
 0x2dc   : > { %v1405_v4 = vsub.f32 %v11802_v46, %v7918_v42  ;;  %v8292_v46 = vshrl.u32 %v2217_v8, 7  ;;  %11805 = vst [vmem:[#allocation64_spill] sm:$0xff] %v8298_v9  ;;  %v8304_v22 = vmul.f32 %v8290_v50, %v11807_v35 }
 0x2dd   : > { %6064 = vpow2.f32 %v1647_v2  ;;  %v11809_v2 = vld [vmem:[#allocation61_spill] sm:$0xff] }
 0x2de   : > { %v1649_v29 = vmul.f32 1.442695, %v1405_v4  ;;  %6066 = vrcp.f32 %v1780_v53  ;;  %v8308_v44 = vmul.f32 %v8282_v33, %v11809_v2  ;;  %v5381_v4 = vld [vmem:[%s11159_s0 + $0x48] sm:$0xff] }
 0x2df   : > { %3626 = vmatpush.bf16.msrb.mxu3 %v5401_v0  ;;  %v8296_v0 = vmul.f32 %v8282_v33, %v11803_v18  ;;  %6068 = vrcp.f32 %v1771_v28  ;;  %v1800_v18 = vadd.f32 %v8298_v9, %v1799_v31  ;;  %v5389_v53 = vld [vmem:[%s11159_s0 + $0x88] sm:$0xff]  ;;  %v8324_v28 = vstv %s6289_s9  ;;  %3532 = vmatpush.bf16.msra.mxu1 %v5381_v4  ;;  %v5380_v9 = vld [vmem:[%s11159_s0 + $0x40] sm:$0xff]  ;;  %v5398_v4 = vld [vmem:[%s11159_s0 + $0xd0] sm:$0xff] }
 0x2e0   : > { %5573 = vrot.lane.b32.xlu1 %v5572_v1, %s6166_s14  ;;  %v11806_v1 = vld [vmem:[#allocation81_spill] sm:$0xff]  ;;  %11810 = vst [vmem:[#allocation57_spill] sm:$0xff] %v8308_v44  ;;  %6070 = vpow2.f32 %v1649_v29  ;;  %3581 = vmatpush.bf16.msrb.mxu2 %v5389_v53  ;;  %v1407_v29 = vsub.f32 %v11813_v56, %v7918_v42  ;;  %v11815_v56 = vld [vmem:[#allocation84_spill] sm:$0xff]  ;;  %v8361_v63 = vadd.s32 %v8324_v28, %v8292_v46 }
 0x2e1   : > { %11804 = vst [vmem:[#allocation80_spill] sm:$0xff] %v8296_v0  ;;  %v1406_v36 = vsub.f32 %v11806_v1, %v7918_v42  ;;  %v5577_v31 = vpack.i.bf16 %v8296_v0, %v8304_v22  ;;  %v11811_v1 = vld [vmem:[#allocation2_spill] sm:$0xff] }
 0x2e2   : > { %11808 = vst [vmem:[#allocation81_spill] sm:$0xff] %v8304_v22  ;;  %v8330_v2 = vmul.f32 %v8290_v50, %v11811_v1  ;;  %v5388_v0 = vld [vmem:[%s11159_s0 + $0x80] sm:$0xff]  ;;  %v8350_v1 = vmul.f32 %v8282_v33, %v7756_v37  ;;  %v11818_v37 = vld [vmem:[#allocation63_spill] sm:$0xff]  ;;  %v1653_v8 = vmul.f32 1.442695, %v1407_v29  ;;  %vm2517_vm1 = vcmp.eq.s32.totalorder %v8357_v45, %v8361_v63 }
 0x2e3   : > { %3627 = vmatpush.bf16.msrb.mxu3 %v5400_v49  ;;  %v2350_v49 = vadd.s32 8, %v8292_v46  ;;  %v8335_v17 = vpop.eup %6064  ;;  %v1651_v60 = vmul.f32 1.442695, %v1406_v36  ;;  %v1408_v36 = vsub.f32 %v11815_v56, %v7918_v42  ;;  %11816 = vst [vmem:[#allocation83_spill] sm:$0xff] %v8361_v63  ;;  %v8371_v42 = vmul.f32 %v8290_v50, %v11818_v37  ;;  %3533 = vmatpush.bf16.msra.mxu1 %v5380_v9 }
 0x2e4   : > { %11812 = vst [vmem:[#allocation61_spill] sm:$0xff] %v8335_v17  ;;  %v5587_v53 = vpack.i.bf16 %v8308_v44, %v8330_v2  ;;  %v8355_v22 = vpop.eup %6066  ;;  %3582 = vmatpush.bf16.msrb.mxu2 %v5388_v0  ;;  %vm2389_vm3 = vcmp.lt.s32.totalorder %v8357_v45, %v8361_v63 }
 0x2e5   : > { %11814 = vst [vmem:[#allocation2_spill] sm:$0xff] %v8350_v1  ;;  %v8366_v44 = vpop.eup %6068  ;;  %6072 = vpow2.f32 %v1651_v60  ;;  %v5592_v56 = vpack.i.bf16 %v8350_v1, %v8371_v42  ;;  %v1655_v37 = vmul.f32 1.442695, %v1408_v36 }
 0x2e6   : > { %v8394_v0 = vmul.f32 %v8366_v44, %v7788_v41  ;;  %6074 = vpow2.f32 %v1653_v8  ;;  %v5396_v41 = vld [vmem:[%s11159_s0 + $0xc0] sm:$0xff] }
 0x2e7   : > { %v8320_v35 = vpop.permute.xlu2 %5488  ;;  %3628 = vmatpush.bf16.msrb.mxu3 %v5399_v39  ;;  %v1801_v39 = vadd.f32 %v8335_v17, %v1800_v18  ;;  %v8373_v18 = vpop.eup %6070  ;;  %6076 = vpow2.f32 %v1655_v37 }
 0x2e8   : > { %5578 = vrot.lane.b32.xlu1 %v5577_v31, %s6166_s14  ;;  %v8364_v31 = vadd.s32 %v8324_v28, %v2350_v49  ;;  %11819 = vst [vmem:[#allocation63_spill] sm:$0xff] %v8373_v18  ;;  %v5397_v49 = vld [vmem:[%s11159_s0 + $0xc8] sm:$0xff]  ;;  %v11369_v29 = vunpack.i.l.bf16 %v8320_v35 }
 0x2e9   : > { %v1802_v9 = vadd.f32 %v8373_v18, %v1801_v39  ;;  %11822 = vst [vmem:[#allocation101_spill] sm:$0xff] %v8394_v0  ;;  %v1798_v39 = vpop.xlane.xlu0 %1797 }
 0x2ea   : > { %11817 = vst [vmem:[#allocation84_spill] sm:$0xff] %v8364_v31  ;;  %vm2525_vm2 = vcmp.eq.s32.totalorder %v8357_v45, %v8364_v31  ;;  %vm2397_vm4 = vcmp.lt.s32.totalorder %v8357_v45, %v8364_v31  ;;  %6078 = vrcp.f32 %v1798_v39 }
 0x2eb   : > { %3629 = vmatpush.bf16.msrb.mxu3 %v5398_v4  ;;  %v8422_v1 = vpop.eup %6072  ;;  %6080 = vrcp.f32 %v8270_v32  ;;  %v8465_v32 = vadd.s32 128, %v8357_v45 }
 0x2ec   : > { %11824 = vst [vmem:[#allocation102_spill] sm:$0xff] %v8422_v1 }
 0x2ed   : > { %5588 = vrot.lane.b32.xlu0 %v5587_v53, %s6166_s14  ;;  %v8382_v53 = vmul.f32 %v8355_v22, %v7830_v6  ;;  %v11372_v6 = vunpack.i.h.bf16 %v8320_v35  ;;  %vm2390_vm5 = vcmp.lt.s32.totalorder %v8465_v32, %v8361_v63  ;;  %vm2398_vm6 = vcmp.lt.s32.totalorder %v8465_v32, %v8364_v31 }
 0x2ee   : > { %vm2518_vm8 = vcmp.eq.s32.totalorder %v8465_v32, %v8361_v63  ;;  %vm2526_vm10 = vcmp.eq.s32.totalorder %v8465_v32, %v8364_v31 }
 0x2ef   : > { %11820 = vst [vmem:[#allocation99_spill] sm:$0xff] %v8382_v53  ;;  %v8390_v60 = vpop.permute.xlu2 %5498  ;;  %3630 = vmatpush.bf16.msrb.mxu3 %v5397_v49  ;;  %v5607_v49 = vpack.i.bf16 %v8382_v53, %v8394_v0  ;;  %v1803_v53 = vadd.f32 %v8422_v1, %v1802_v9 }
 0x2f0   : > { %11821 = vst [vmem:[#allocation100_spill] sm:$0xff] %v8390_v60  ;;  %v11368_v36 = vunpack.i.l.bf16 %v8390_v60  ;;  %5593 = vrot.lane.b32.xlu1 %v5592_v56, %s6166_s14  ;;  %v11823_v18 = vunpack.i.h.bf16 %v8390_v60 }
 0x2f2   : > { %v2332_v4 = vsel %vm2219_vm0, %v11368_v36, %v11369_v29  ;;  %v2333_v8 = vsel %vm2219_vm0, %v11823_v18, %v11372_v6  ;;  %v11825_v18 = vld [vmem:[#allocation7_spill] sm:$0xff] }
 0x2f3   : > { %v2645_v56 = vsel %vm2517_vm1, 0.0, %v2332_v4  ;;  %v2653_v36 = vsel %vm2525_vm2, 0.0, %v2333_v8  ;;  %v8435_v6 = vmul.f32 %v8282_v33, %v11825_v18  ;;  %3631 = vmatpush.bf16.msrb.mxu3 %v5396_v41  ;;  %v11827_v4 = vld [vmem:[#allocation6_spill] sm:$0xff] }
 0x2f4   : > { %v2773_v29 = vsel %vm2389_vm3, %v7926_v3, %v2645_v56  ;;  %v2781_v60 = vsel %vm2397_vm4, %v7934_v16, %v2653_v36  ;;  %v8440_v17 = vmul.f32 %v8290_v50, %v11827_v4  ;;  %v8444_v3 = vmul.f32 %v8355_v22, %v7870_v26  ;;  %v8446_v16 = vpop.eup %6074  ;;  %v11832_v26 = vld [vmem:[#allocation18_spill] sm:$0xff]  ;;  %v11837_v56 = vld [vmem:[#allocation8_spill] sm:$0xff] }
 0x2f5   : > { %5608 = vrot.lane.b32.xlu0 %v5607_v49, %s6166_s14  ;;  %11826 = vst [vmem:[#allocation7_spill] sm:$0xff] %v8435_v6  ;;  %v2901_v0 = vpack.c.bf16 %v2781_v60, %v2773_v29  ;;  %v8455_v60 = vmul.f32 %v8366_v44, %v7836_v15  ;;  %v1804_v29 = vadd.f32 %v8446_v16, %v1803_v53  ;;  %v8458_v36 = vpop.eup %6076  ;;  %v8475_v53 = vadd.s32 256, %v8357_v45  ;;  %v11836_v8 = vld [vmem:[#allocation66_spill] sm:$0xff] }
 0x2f6   : > { %11828 = vst [vmem:[#allocation6_spill] sm:$0xff] %v8440_v17  ;;  %v5597_v9 = vpack.i.bf16 %v8435_v6, %v8440_v17  ;;  %v8462_v41 = vmul.f32 %v8355_v22, %v11832_v26  ;;  %v8477_v39 = vpop.eup %6078  ;;  %v8481_v49 = vmul.f32 %v8366_v44, %v11836_v8  ;;  %v8485_v18 = vmul.f32 %v8366_v44, %v11837_v56 }
 0x2f7   : > { %11829 = vst [vmem:[#allocation103_spill] sm:$0xff] %v8444_v3  ;;  %3485 = vmatmul.bf16.vlgmr.msra.gmra.mxu0 %v2901_v0  ;;  %v8469_v0 = vmul.f32 %v8355_v22, %v7840_v23  ;;  %v5622_v15 = vpack.i.bf16 %v8444_v3, %v8455_v60  ;;  %v1805_v23 = vadd.f32 %v8458_v36, %v1804_v29  ;;  %v8489_v4 = vpop.eup %6080 }
 0x2f8   : > { %11830 = vst [vmem:[#allocation104_spill] sm:$0xff] %v8446_v16  ;;  %v8449_v37 = vpop.permute.xlu2 %5503  ;;  %5598 = vrot.lane.b32.xlu1 %v5597_v9, %s6166_s14  ;;  %v5602_v9 = vpack.i.bf16 %v8462_v41, %v8481_v49  ;;  %vm2399_vm7 = vcmp.lt.s32.totalorder %v8475_v53, %v8364_v31  ;;  %vm2519_vm9 = vcmp.eq.s32.totalorder %v8475_v53, %v8361_v63  ;;  %v11840_v16 = vunpack.i.h.bf16 %v8320_v35 }
 0x2f9   : > { %11831 = vst [vmem:[#allocation105_spill] sm:$0xff] %v8455_v60  ;;  %v5617_v26 = vpack.i.bf16 %v8469_v0, %v8485_v18  ;;  %vm2527_vm11 = vcmp.eq.s32.totalorder %v8475_v53, %v8364_v31  ;;  %v8517_v17 = vmul.f32 %v8489_v4, %v7854_v47  ;;  %vm2391_vm12 = vcmp.lt.s32.totalorder %v8475_v53, %v8361_v63 }
 0x2fa   : > { %11833 = vst [vmem:[#allocation18_spill] sm:$0xff] %v8462_v41 }
 0x2fb   : > { %11834 = vst [vmem:[#allocation106_spill] sm:$0xff] %v8469_v0  ;;  %v11841_v0 = vunpack.i.l.bf16 %v8320_v35 }
 0x2fc   : > { %11835 = vst [vmem:[#allocation107_spill] sm:$0xff] %v8477_v39 }
 0x2fd   : > { %11838 = vst [vmem:[#allocation66_spill] sm:$0xff] %v8485_v18  ;;  %5623 = vrot.lane.b32.xlu0 %v5622_v15, %s6166_s14  ;;  %v8507_v15 = vmul.f32 %v8477_v39, %v7886_v61  ;;  %v2351_v61 = vadd.s32 16, %v8292_v46 }
 0x2fe   : > { %11839 = vst [vmem:[#allocation8_spill] sm:$0xff] %v8489_v4 }
 0x2ff   : > { %1806 = vadd.xlane.f32.xlu2 %v1805_v23  ;;  %v5479_v29 = vpop.permute.xlu0 %5478  ;;  %v5637_v35 = vpack.i.bf16 %v8507_v15, %v8517_v17 }
 0x300   : > { %v5484_v8 = vpop.permute.xlu1 %5483  ;;  %v8509_v56 = vpop.permute.xlu2 %5508  ;;  %v5481_v23 = vunpack.i.h.bf16 %v5479_v29  ;;  %v5480_v3 = vunpack.i.l.bf16 %v5479_v29  ;;  %v8529_v29 = vadd.s32 384, %v8357_v45  ;;  %5603 = vrot.lane.b32.xlu1 %v5602_v9, %s6166_s14 }
 0x301   : > { %v5486_v60 = vunpack.i.h.bf16 %v5484_v8  ;;  %v5485_v6 = vunpack.i.l.bf16 %v5484_v8  ;;  %v2352_v8 = vadd.s32 24, %v8292_v46 }
 0x302   : > { %v2317_v1 = vsel %vm2219_vm0, %v11840_v16, %v5481_v23  ;;  %v2316_v18 = vsel %vm2219_vm0, %v11841_v0, %v5480_v3  ;;  %vm2392_vm13 = vcmp.lt.s32.totalorder %v8529_v29, %v8361_v63  ;;  %vm2400_vm14 = vcmp.lt.s32.totalorder %v8529_v29, %v8364_v31 }
 0x303   : > { %v2301_v47 = vsel %vm2219_vm0, %v5481_v23, %v5486_v60  ;;  %v2654_v41 = vsel %vm2526_vm10, 0.0, %v2317_v1  ;;  %v2300_v9 = vsel %vm2219_vm0, %v5480_v3, %v5485_v6  ;;  %v2646_v23 = vsel %vm2518_vm8, 0.0, %v2316_v18 }
 0x304   : > { %v2655_v16 = vsel %vm2527_vm11, 0.0, %v2301_v47  ;;  %v2782_v0 = vsel %vm2398_vm6, %v7938_v13, %v2654_v41  ;;  %v2647_v47 = vsel %vm2519_vm9, 0.0, %v2300_v9  ;;  %v2774_v13 = vsel %vm2390_vm5, %v7930_v27, %v2646_v23 }
 0x305   : > { %v2783_v1 = vsel %vm2399_vm7, %v7946_v62, %v2655_v16  ;;  %5638 = vrot.lane.b32.xlu0 %v5637_v35, %s6166_s14  ;;  %v8564_v3 = vadd.s32 %v8324_v28, %v2351_v61  ;;  %v2775_v41 = vsel %vm2391_vm12, %v7942_v20, %v2647_v47  ;;  %v2902_v18 = vpack.c.bf16 %v2782_v0, %v2774_v13 }
 0x306   : > { %v8570_v62 = vadd.s32 %v8324_v28, %v2352_v8  ;;  %v2903_v16 = vpack.c.bf16 %v2783_v1, %v2775_v41  ;;  %vm2520_vm15 = vcmp.eq.s32.totalorder %v8529_v29, %v8361_v63  ;;  %vm2528_vm1 = vcmp.eq.s32.totalorder %v8529_v29, %v8364_v31  ;;  %v11910_v31 = vld [vmem:[#allocation27_spill] sm:$0xff] }
 0x307   : > { %11842 = vst [vmem:[#allocation108_spill] sm:$0xff] %v8564_v3  ;;  %v8578_v27 = vpop.permute.xlu0 %5493  ;;  %v5510_v20 = vunpack.i.l.bf16 %v8509_v56  ;;  %3534 = vmatmul.bf16.vlgmr.msra.gmra.mxu1 %v2902_v18  ;;  %v8587_v0 = vmul.f32 %v8477_v39, %v7896_v12  ;;  %v5511_v9 = vunpack.i.h.bf16 %v8509_v56  ;;  %vm2535_vm2 = vcmp.eq.s32.totalorder %v8475_v53, %v8564_v3 }
 0x308   : > { %11843 = vst [vmem:[#allocation109_spill] sm:$0xff] %v8570_v62  ;;  %v8581_v61 = vpop.permute.xlu2 %5513  ;;  %v11385_v35 = vunpack.i.h.bf16 %v8578_v27  ;;  %v11396_v8 = vunpack.i.l.bf16 %v8578_v27  ;;  %3583 = vmatmul.bf16.vlgmr.msrb.gmra.mxu2 %v2903_v16  ;;  %v5505_v47 = vunpack.i.l.bf16 %v8449_v37  ;;  %vm2543_vm3 = vcmp.eq.s32.totalorder %v8475_v53, %v8570_v62  ;;  %5618 = vrot.lane.b32.xlu1 %v5617_v26, %s6166_s14 }
 0x309   : > { %11844 = vst [vmem:[#allocation110_spill] sm:$0xff] %v8578_v27  ;;  %v5516_v23 = vunpack.i.h.bf16 %v8581_v61  ;;  %v5515_v1 = vunpack.i.l.bf16 %v8581_v61  ;;  %v5506_v56 = vunpack.i.h.bf16 %v8449_v37  ;;  %vm2534_vm4 = vcmp.eq.s32.totalorder %v8465_v32, %v8564_v3 }
 0x30a   : > { %v2285_v13 = vsel %vm2219_vm0, %v5486_v60, %v11385_v35  ;;  %v2284_v12 = vsel %vm2219_vm0, %v5485_v6, %v11396_v8  ;;  %v2302_v6 = vsel %vm2219_vm0, %v5505_v47, %v5510_v20  ;;  %vm2542_vm5 = vcmp.eq.s32.totalorder %v8465_v32, %v8570_v62 }
 0x30b   : > { %v2656_v41 = vsel %vm2528_vm1, 0.0, %v2285_v13  ;;  %v2648_v60 = vsel %vm2520_vm15, 0.0, %v2284_v12  ;;  %v2303_v18 = vsel %vm2219_vm0, %v5506_v56, %v5511_v9  ;;  %v2319_v16 = vsel %vm2219_vm0, %v5516_v23, %v5506_v56 }
 0x30c   : > { %v2784_v37 = vsel %vm2400_vm14, %v7965_v25, %v2656_v41  ;;  %v2776_v26 = vsel %vm2392_vm13, %v7973_v55, %v2648_v60  ;;  %v2318_v25 = vsel %vm2219_vm0, %v5515_v1, %v5505_v47  ;;  %v8639_v55 = vmul.f32 %v8489_v4, %v7866_v21 }
 0x30d   : > { %v2904_v13 = vpack.c.bf16 %v2784_v37, %v2776_v26  ;;  %vm2406_vm6 = vcmp.lt.s32.totalorder %v8465_v32, %v8564_v3  ;;  %vm2414_vm7 = vcmp.lt.s32.totalorder %v8465_v32, %v8570_v62  ;;  %vm2407_vm8 = vcmp.lt.s32.totalorder %v8475_v53, %v8564_v3 }
 0x30e   : > { %vm2415_vm9 = vcmp.lt.s32.totalorder %v8475_v53, %v8570_v62  ;;  %v2662_v21 = vsel %vm2534_vm4, 0.0, %v2318_v25  ;;  %v2670_v47 = vsel %vm2542_vm5, 0.0, %v2319_v16  ;;  %v2663_v56 = vsel %vm2535_vm2, 0.0, %v2302_v6  ;;  %v11848_v6 = vld [vmem:[#allocation3_spill] sm:$0xff] }
 0x30f   : > { %3632 = vmatmul.bf16.vlgmr.msrb.gmra.mxu3 %v2904_v13  ;;  %v2671_v41 = vsel %vm2543_vm3, 0.0, %v2303_v18  ;;  %v5632_v60 = vpack.i.bf16 %v8587_v0, %v8639_v55  ;;  %v11846_v13 = vld [vmem:[#allocation67_spill] sm:$0xff]  ;;  %v8670_v16 = vmul.f32 %v8477_v39, %v7915_v57  ;;  %v8674_v25 = vmul.f32 %v8290_v50, %v11848_v6 }
 0x310   : > { %v8649_v12 = vpop.permute.xlu2 %5518  ;;  %v8666_v35 = vmul.f32 %v8282_v33, %v11846_v13  ;;  %v2790_v18 = vsel %vm2406_vm6, %v7987_v7, %v2662_v21  ;;  %v2798_v13 = vsel %vm2414_vm7, %v7991_v54, %v2670_v47  ;;  %v2791_v57 = vsel %vm2407_vm8, %v8002_v30, %v2663_v56 }
 0x311   : > { %11845 = vst [vmem:[#allocation111_spill] sm:$0xff] %v8649_v12  ;;  %v11395_v37 = vunpack.i.h.bf16 %v8649_v12  ;;  %v11388_v26 = vunpack.i.l.bf16 %v8649_v12  ;;  %5633 = vrot.lane.b32.xlu1 %v5632_v60, %s6166_s14  ;;  %v2799_v60 = vsel %vm2415_vm9, %v7998_v52, %v2671_v41  ;;  %vm2536_vm10 = vcmp.eq.s32.totalorder %v8529_v29, %v8564_v3 }
 0x312   : > { %11847 = vst [vmem:[#allocation67_spill] sm:$0xff] %v8670_v16  ;;  %vm2544_vm11 = vcmp.eq.s32.totalorder %v8529_v29, %v8570_v62  ;;  %v5582_v30 = vpack.i.bf16 %v8666_v35, %v8674_v25  ;;  %v8709_v52 = vmul.f32 %v8489_v4, %v7898_v40  ;;  %v2910_v21 = vpack.c.bf16 %v2798_v13, %v2790_v18  ;;  %v11851_v40 = vld [vmem:[#allocation17_spill] sm:$0xff] }
 0x313   : > { %v2287_v7 = vsel %vm2219_vm0, %v5511_v9, %v11395_v37  ;;  %v2286_v54 = vsel %vm2219_vm0, %v5510_v20, %v11388_v26  ;;  %vm2408_vm12 = vcmp.lt.s32.totalorder %v8529_v29, %v8564_v3  ;;  %v2911_v20 = vpack.c.bf16 %v2799_v60, %v2791_v57 }
 0x314   : > { %11849 = vst [vmem:[#allocation3_spill] sm:$0xff] %v8709_v52  ;;  %vm2416_vm13 = vcmp.lt.s32.totalorder %v8529_v29, %v8570_v62  ;;  %v2664_v9 = vsel %vm2536_vm10, 0.0, %v2286_v54  ;;  %v2672_v47 = vsel %vm2544_vm11, 0.0, %v2287_v7  ;;  %v5647_v56 = vpack.i.bf16 %v8670_v16, %v8709_v52  ;;  %v11878_v16 = vld [vmem:[#allocation78_spill] sm:$0xff] }
 0x315   : > { %v8722_v6 = vmul.f32 %v8355_v22, %v11851_v40  ;;  %v2353_v18 = vadd.s32 32, %v8292_v46  ;;  %v2354_v13 = vadd.s32 40, %v8292_v46  ;;  %vm2533_vm14 = vcmp.eq.s32.totalorder %v8357_v45, %v8564_v3 }
 0x316   : > { %vm2541_vm15 = vcmp.eq.s32.totalorder %v8357_v45, %v8570_v62  ;;  %vm2405_vm1 = vcmp.lt.s32.totalorder %v8357_v45, %v8564_v3  ;;  %vm2413_vm2 = vcmp.lt.s32.totalorder %v8357_v45, %v8570_v62  ;;  %v2792_v7 = vsel %vm2408_vm12, %v8054_v10, %v2664_v9  ;;  %v11908_v3 = vld [vmem:[#allocation51_spill] sm:$0xff] }
 0x317   : > { %5583 = vrot.lane.b32.xlu2 %v5582_v30, %s6166_s14  ;;  %3539 = vmatmul.bf16.gmra.mxu1 %v2910_v21  ;;  %v2800_v54 = vsel %vm2416_vm13, %v8050_v5, %v2672_v47  ;;  %v11852_v21 = vld [vmem:[#allocation65_spill] sm:$0xff]  ;;  %v8763_v5 = vmul.f32 %v8477_v39, %v7889_v43  ;;  %v8769_v61 = vadd.s32 %v8324_v28, %v2354_v13 }
 0x318   : > { %v8718_v41 = vpop.permute.xlu2 %5523  ;;  %3588 = vmatmul.bf16.gmra.mxu2 %v2911_v20  ;;  %v8759_v20 = vmul.f32 %v8366_v44, %v11852_v21  ;;  %v2912_v21 = vpack.c.bf16 %v2800_v54, %v2792_v7  ;;  %v8777_v43 = vmul.f32 %v8489_v4, %v7857_v48 }
 0x319   : > { %11850 = vst [vmem:[#allocation112_spill] sm:$0xff] %v8718_v41  ;;  %v11387_v57 = vunpack.i.h.bf16 %v8718_v41  ;;  %v11386_v60 = vunpack.i.l.bf16 %v8718_v41  ;;  %5648 = vrot.lane.b32.xlu1 %v5647_v56, %s6166_s14  ;;  %v8766_v56 = vadd.s32 %v8324_v28, %v2353_v18  ;;  %vm2558_vm4 = vcmp.eq.s32.totalorder %v8465_v32, %v8769_v61  ;;  %v11891_v41 = vld [vmem:[#allocation77_spill] sm:$0xff] }
 0x31a   : > { %11854 = vst [vmem:[#allocation65_spill] sm:$0xff] %v8769_v61  ;;  %v5627_v13 = vpack.i.bf16 %v8763_v5, %v8777_v43  ;;  %vm2559_vm6 = vcmp.eq.s32.totalorder %v8475_v53, %v8769_v61  ;;  %vm2430_vm8 = vcmp.lt.s32.totalorder %v8465_v32, %v8769_v61  ;;  %vm2431_vm10 = vcmp.lt.s32.totalorder %v8475_v53, %v8769_v61 }
 0x31b   : > { %v2334_v30 = vsel %vm2219_vm0, %v11386_v60, %v5515_v1  ;;  %v2335_v10 = vsel %vm2219_vm0, %v11387_v57, %v5516_v23  ;;  %11853 = vst [vmem:[#allocation17_spill] sm:$0xff] %v8766_v56  ;;  %v5612_v1 = vpack.i.bf16 %v8722_v6, %v8759_v20  ;;  %vm2550_vm3 = vcmp.eq.s32.totalorder %v8465_v32, %v8766_v56 }
 0x31c   : > { %v2661_v9 = vsel %vm2533_vm14, 0.0, %v2334_v30  ;;  %v2669_v47 = vsel %vm2541_vm15, 0.0, %v2335_v10  ;;  %vm2551_vm5 = vcmp.eq.s32.totalorder %v8475_v53, %v8766_v56  ;;  %vm2422_vm7 = vcmp.lt.s32.totalorder %v8465_v32, %v8766_v56 }
 0x31d   : > { %v2789_v23 = vsel %vm2405_vm1, %v8017_v34, %v2661_v9  ;;  %v2797_v40 = vsel %vm2413_vm2, %v8011_v59, %v2669_v47  ;;  %vm2423_vm9 = vcmp.lt.s32.totalorder %v8475_v53, %v8766_v56  ;;  %vm2552_vm11 = vcmp.eq.s32.totalorder %v8529_v29, %v8766_v56 }
 0x31e   : > { %v2909_v60 = vpack.c.bf16 %v2797_v40, %v2789_v23  ;;  %vm2560_vm12 = vcmp.eq.s32.totalorder %v8529_v29, %v8769_v61  ;;  %vm2424_vm13 = vcmp.lt.s32.totalorder %v8529_v29, %v8766_v56  ;;  %vm2432_vm14 = vcmp.lt.s32.totalorder %v8529_v29, %v8769_v61 }
 0x31f   : > { %5613 = vrot.lane.b32.xlu2 %v5612_v1, %s6166_s14  ;;  %3637 = vmatmul.bf16.gmra.mxu3 %v2912_v21  ;;  %vm2549_vm15 = vcmp.eq.s32.totalorder %v8357_v45, %v8766_v56  ;;  %vm2557_vm1 = vcmp.eq.s32.totalorder %v8357_v45, %v8769_v61  ;;  %vm2421_vm2 = vcmp.lt.s32.totalorder %v8357_v45, %v8766_v56  ;;  %v2360_v56 = vadd.s32 88, %v8292_v46 }
 0x320   : > { %3490 = vmatmul.bf16.gmra.mxu0 %v2909_v60  ;;  %v5529_v18 = vpop.permute.xlu2 %5528  ;;  %v5534_v59 = vpop.permute.xlu1 %5533 }
 0x321   : > { %v5531_v34 = vunpack.i.h.bf16 %v5529_v18  ;;  %v5530_v7 = vunpack.i.l.bf16 %v5529_v18  ;;  %v5539_v54 = vpop.permute.xlu0 %5538  ;;  %v5536_v48 = vunpack.i.h.bf16 %v5534_v59  ;;  %v5535_v60 = vunpack.i.l.bf16 %v5534_v59 }
 0x322   : > { %v5541_v30 = vunpack.i.h.bf16 %v5539_v54  ;;  %v5540_v10 = vunpack.i.l.bf16 %v5539_v54 }
 0x323   : > { %v2305_v9 = vsel %vm2219_vm0, %v5531_v34, %v5536_v48  ;;  %v2304_v47 = vsel %vm2219_vm0, %v5530_v7, %v5535_v60 }
 0x324   : > { %v2321_v1 = vsel %vm2219_vm0, %v5541_v30, %v5531_v34  ;;  %v2320_v23 = vsel %vm2219_vm0, %v5540_v10, %v5530_v7  ;;  %v2679_v18 = vsel %vm2551_vm5, 0.0, %v2304_v47  ;;  %v2687_v59 = vsel %vm2559_vm6, 0.0, %v2305_v9 }
 0x325   : > { %v2678_v40 = vsel %vm2550_vm3, 0.0, %v2320_v23  ;;  %v2686_v21 = vsel %vm2558_vm4, 0.0, %v2321_v1  ;;  %v2807_v54 = vsel %vm2423_vm9, %v8021_v38, %v2679_v18  ;;  %v2815_v23 = vsel %vm2431_vm10, %v8025_v58, %v2687_v59 }
 0x326   : > { %v2806_v34 = vsel %vm2422_vm7, %v8112_v14, %v2678_v40  ;;  %v2814_v7 = vsel %vm2430_vm8, %v8099_v19, %v2686_v21  ;;  %v2919_v1 = vpack.c.bf16 %v2815_v23, %v2807_v54  ;;  %v8827_v47 = vmul.f32 %v8477_v39, %v7902_v11  ;;  %v11856_v21 = vld [vmem:[#allocation96_spill] sm:$0xff] }
 0x327   : > { %5628 = vrot.lane.b32.xlu2 %v5627_v13, %s6166_s14  ;;  %v2918_v57 = vpack.c.bf16 %v2814_v7, %v2806_v34  ;;  %v8849_v58 = vmul.f32 %v8489_v4, %v7874_v24  ;;  %vm2429_vm3 = vcmp.lt.s32.totalorder %v8357_v45, %v8769_v61 }
 0x328   : > { %v8823_v26 = vpop.permute.xlu2 %5543  ;;  %3593 = vmatmul.bf16.gmra.mxu2 %v2919_v1  ;;  %v11858_v1 = vld [vmem:[#allocation89_spill] sm:$0xff] }
 0x329   : > { %11855 = vst [vmem:[#allocation113_spill] sm:$0xff] %v8823_v26  ;;  %v11392_v9 = vunpack.i.h.bf16 %v8823_v26  ;;  %v11391_v14 = vunpack.i.l.bf16 %v8823_v26  ;;  %3544 = vmatmul.bf16.gmra.mxu1 %v2918_v57  ;;  %v5642_v13 = vpack.i.bf16 %v8827_v47, %v8849_v58  ;;  %v11890_v26 = vld [vmem:[#allocation37_spill] sm:$0xff] }
 0x32a   : > { %v9072_v12 = vmul.f32 %v11891_v41, %v11890_v26 }
 0x32b   : > { %v2289_v11 = vsel %vm2219_vm0, %v5536_v48, %v11392_v9  ;;  %v2288_v38 = vsel %vm2219_vm0, %v5535_v60, %v11391_v14 }
 0x32c   : > { %v2680_v19 = vsel %vm2552_vm11, 0.0, %v2288_v38  ;;  %v2688_v57 = vsel %vm2560_vm12, 0.0, %v2289_v11  ;;  %v11859_v38 = vld [vmem:[#allocation90_spill] sm:$0xff] }
 0x32d   : > { %v2808_v40 = vsel %vm2424_vm13, %v8150_v51, %v2680_v19  ;;  %v2816_v18 = vsel %vm2432_vm14, %v11856_v21, %v2688_v57  ;;  %v2355_v57 = vadd.s32 48, %v8292_v46 }
 0x32e   : > { %v2920_v59 = vpack.c.bf16 %v2816_v18, %v2808_v40 }
 0x32f   : > { %5643 = vrot.lane.b32.xlu2 %v5642_v13, %s6166_s14  ;;  %v2356_v13 = vadd.s32 56, %v8292_v46 }
 0x330   : > { %v8856_v48 = vpop.permute.xlu2 %5548  ;;  %3642 = vmatmul.bf16.gmra.mxu3 %v2920_v59 }
 0x331   : > { %11857 = vst [vmem:[#allocation96_spill] sm:$0xff] %v8856_v48  ;;  %v11390_v60 = vunpack.i.h.bf16 %v8856_v48  ;;  %v11389_v24 = vunpack.i.l.bf16 %v8856_v48  ;;  %v8884_v21 = vadd.s32 %v8324_v28, %v2356_v13 }
 0x332   : > { %v5554_v23 = vpop.permute.xlu1 %5553 }
 0x333   : > { %v2336_v51 = vsel %vm2219_vm0, %v11389_v24, %v5540_v10  ;;  %v2337_v34 = vsel %vm2219_vm0, %v11390_v60, %v5541_v30  ;;  %v8881_v10 = vadd.s32 %v8324_v28, %v2355_v57  ;;  %11861 = vst [vmem:[#allocation90_spill] sm:$0xff] %v8884_v21  ;;  %vm2575_vm5 = vcmp.eq.s32.totalorder %v8475_v53, %v8884_v21  ;;  %v11863_v57 = vld [vmem:[#allocation86_spill] sm:$0xff] }
 0x334   : > { %v2677_v7 = vsel %vm2549_vm15, 0.0, %v2336_v51  ;;  %v2685_v54 = vsel %vm2557_vm1, 0.0, %v2337_v34  ;;  %v5556_v18 = vunpack.i.h.bf16 %v5554_v23  ;;  %v5555_v59 = vunpack.i.l.bf16 %v5554_v23 }
 0x335   : > { %v2805_v11 = vsel %vm2421_vm2, %v11858_v1, %v2677_v7  ;;  %v2813_v19 = vsel %vm2429_vm3, %v11859_v38, %v2685_v54  ;;  %11860 = vst [vmem:[#allocation89_spill] sm:$0xff] %v8881_v10  ;;  %vm2567_vm4 = vcmp.eq.s32.totalorder %v8475_v53, %v8881_v10  ;;  %vm2439_vm6 = vcmp.lt.s32.totalorder %v8475_v53, %v8881_v10  ;;  %v11862_v38 = vld [vmem:[#allocation95_spill] sm:$0xff] }
 0x336   : > { %v2917_v40 = vpack.c.bf16 %v2813_v19, %v2805_v11  ;;  %vm2447_vm7 = vcmp.lt.s32.totalorder %v8475_v53, %v8884_v21  ;;  %vm2566_vm8 = vcmp.eq.s32.totalorder %v8465_v32, %v8881_v10  ;;  %vm2574_vm9 = vcmp.eq.s32.totalorder %v8465_v32, %v8884_v21 }
 0x337   : > { %vm2438_vm10 = vcmp.lt.s32.totalorder %v8465_v32, %v8881_v10  ;;  %vm2446_vm11 = vcmp.lt.s32.totalorder %v8465_v32, %v8884_v21  ;;  %vm2568_vm12 = vcmp.eq.s32.totalorder %v8529_v29, %v8881_v10  ;;  %vm2576_vm13 = vcmp.eq.s32.totalorder %v8529_v29, %v8884_v21 }
 0x338   : > { %3495 = vmatmul.bf16.gmra.mxu0 %v2917_v40  ;;  %vm2440_vm14 = vcmp.lt.s32.totalorder %v8529_v29, %v8881_v10  ;;  %vm2448_vm15 = vcmp.lt.s32.totalorder %v8529_v29, %v8884_v21  ;;  %vm2565_vm1 = vcmp.eq.s32.totalorder %v8357_v45, %v8881_v10  ;;  %vm2573_vm2 = vcmp.eq.s32.totalorder %v8357_v45, %v8884_v21 }
 0x339   : > { %vm2437_vm3 = vcmp.lt.s32.totalorder %v8357_v45, %v8881_v10 }
 0x33a   : > { %v5559_v30 = vpop.permute.xlu1 %5558 }
 0x33b   : > { %v5561_v51 = vunpack.i.h.bf16 %v5559_v30  ;;  %v5560_v34 = vunpack.i.l.bf16 %v5559_v30 }
 0x33d   : > { %v2306_v7 = vsel %vm2219_vm0, %v5555_v59, %v5560_v34  ;;  %v2307_v54 = vsel %vm2219_vm0, %v5556_v18, %v5561_v51 }
 0x33e   : > { %v2695_v1 = vsel %vm2567_vm4, 0.0, %v2306_v7  ;;  %v2703_v11 = vsel %vm2575_vm5, 0.0, %v2307_v54  ;;  %vm2445_vm4 = vcmp.lt.s32.totalorder %v8357_v45, %v8884_v21  ;;  %v11881_v21 = vld [vmem:[#allocation12_spill] sm:$0xff] }
 0x33f   : > { %v2823_v19 = vsel %vm2439_vm6, %v11862_v38, %v2695_v1  ;;  %v2831_v23 = vsel %vm2447_vm7, %v11863_v57, %v2703_v11  ;;  %v11864_v38 = vld [vmem:[#allocation92_spill] sm:$0xff]  ;;  %v11865_v57 = vld [vmem:[#allocation93_spill] sm:$0xff] }
 0x340   : > { %v2927_v13 = vpack.c.bf16 %v2831_v23, %v2823_v19 }
 0x342   : > { %v5564_v40 = vpop.permute.xlu1 %5563  ;;  %3598 = vmatmul.bf16.gmra.mxu2 %v2927_v13 }
 0x343   : > { %v5566_v30 = vunpack.i.h.bf16 %v5564_v40  ;;  %v5565_v24 = vunpack.i.l.bf16 %v5564_v40 }
 0x345   : > { %v2322_v7 = vsel %vm2219_vm0, %v5565_v24, %v5555_v59  ;;  %v2323_v54 = vsel %vm2219_vm0, %v5566_v30, %v5556_v18 }
 0x346   : > { %v2694_v1 = vsel %vm2566_vm8, 0.0, %v2322_v7  ;;  %v2702_v11 = vsel %vm2574_vm9, 0.0, %v2323_v54 }
 0x347   : > { %v2822_v19 = vsel %vm2438_vm10, %v11864_v38, %v2694_v1  ;;  %v2830_v23 = vsel %vm2446_vm11, %v11865_v57, %v2702_v11  ;;  %v11867_v1 = vld [vmem:[#allocation49_spill] sm:$0xff] }
 0x348   : > { %v2926_v13 = vpack.c.bf16 %v2830_v23, %v2822_v19  ;;  %v11868_v38 = vld [vmem:[#allocation45_spill] sm:$0xff] }
 0x34a   : > { %v8914_v40 = vpop.permute.xlu1 %5568  ;;  %3549 = vmatmul.bf16.gmra.mxu1 %v2926_v13 }
 0x34b   : > { %11866 = vst [vmem:[#allocation95_spill] sm:$0xff] %v8914_v40  ;;  %v11394_v60 = vunpack.i.h.bf16 %v8914_v40  ;;  %v11393_v14 = vunpack.i.l.bf16 %v8914_v40 }
 0x34d   : > { %v2290_v18 = vsel %vm2219_vm0, %v5560_v34, %v11393_v14  ;;  %v2291_v59 = vsel %vm2219_vm0, %v5561_v51, %v11394_v60  ;;  %v1816_v51 = vpop.xlane.xlu0 %1815  ;;  %v2357_v34 = vadd.s32 64, %v8292_v46 }
 0x34e   : > { %v2696_v7 = vsel %vm2568_vm12, 0.0, %v2290_v18  ;;  %v2704_v54 = vsel %vm2576_vm13, 0.0, %v2291_v59  ;;  %v2358_v18 = vadd.s32 72, %v8292_v46  ;;  %6082 = vrcp.f32 %v1816_v51 }
 0x34f   : > { %v2824_v11 = vsel %vm2440_vm14, %v11867_v1, %v2696_v7  ;;  %v2832_v19 = vsel %vm2448_vm15, %v11868_v38, %v2704_v54  ;;  %v8961_v60 = vadd.s32 %v8324_v28, %v2357_v34 }
 0x350   : > { %v2928_v57 = vpack.c.bf16 %v2832_v19, %v2824_v11  ;;  %v11870_v11 = vld [vmem:[#allocation48_spill] sm:$0xff]  ;;  %v11871_v19 = vld [vmem:[#allocation97_spill] sm:$0xff]  ;;  %v8964_v37 = vadd.s32 %v8324_v28, %v2358_v18 }
 0x351   : > { %11872 = vst [vmem:[#allocation92_spill] sm:$0xff] %v8961_v60  ;;  %vm2582_vm5 = vcmp.eq.s32.totalorder %v8465_v32, %v8961_v60  ;;  %vm2454_vm7 = vcmp.lt.s32.totalorder %v8465_v32, %v8961_v60  ;;  %vm2581_vm9 = vcmp.eq.s32.totalorder %v8357_v45, %v8961_v60  ;;  %vm2453_vm11 = vcmp.lt.s32.totalorder %v8357_v45, %v8961_v60 }
 0x352   : > { %v8936_v23 = vpop.permute.xlu1 %5573  ;;  %3647 = vmatmul.bf16.gmra.mxu3 %v2928_v57  ;;  %11873 = vst [vmem:[#allocation93_spill] sm:$0xff] %v8964_v37  ;;  %vm2590_vm6 = vcmp.eq.s32.totalorder %v8465_v32, %v8964_v37  ;;  %vm2462_vm8 = vcmp.lt.s32.totalorder %v8465_v32, %v8964_v37  ;;  %vm2589_vm10 = vcmp.eq.s32.totalorder %v8357_v45, %v8964_v37 }
 0x353   : > { %11869 = vst [vmem:[#allocation86_spill] sm:$0xff] %v8936_v23  ;;  %v11398_v13 = vunpack.i.h.bf16 %v8936_v23  ;;  %v11397_v9 = vunpack.i.l.bf16 %v8936_v23  ;;  %v11880_v23 = vld [vmem:[#allocation26_spill] sm:$0xff]  ;;  %vm2461_vm12 = vcmp.lt.s32.totalorder %v8357_v45, %v8964_v37  ;;  %vm2455_vm13 = vcmp.lt.s32.totalorder %v8475_v53, %v8961_v60 }
 0x354   : > { %vm2463_vm14 = vcmp.lt.s32.totalorder %v8475_v53, %v8964_v37  ;;  %vm2583_vm15 = vcmp.eq.s32.totalorder %v8475_v53, %v8961_v60 }
 0x355   : > { %v2338_v59 = vsel %vm2219_vm0, %v11397_v9, %v5565_v24  ;;  %v2339_v7 = vsel %vm2219_vm0, %v11398_v13, %v5566_v30  ;;  %v11877_v13 = vld [vmem:[#allocation28_spill] sm:$0xff] }
 0x356   : > { %v2693_v54 = vsel %vm2565_vm1, 0.0, %v2338_v59  ;;  %v2701_v1 = vsel %vm2573_vm2, 0.0, %v2339_v7  ;;  %v8992_v52 = vmul.f32 %v11878_v16, %v11877_v13  ;;  %vm2591_vm1 = vcmp.eq.s32.totalorder %v8475_v53, %v8964_v37 }
 0x357   : > { %v2821_v38 = vsel %vm2437_vm3, %v11870_v11, %v2693_v54  ;;  %v2829_v57 = vsel %vm2445_vm4, %v11871_v19, %v2701_v1  ;;  %v11874_v11 = vld [vmem:[#allocation81_spill] sm:$0xff]  ;;  %v11875_v19 = vld [vmem:[#allocation80_spill] sm:$0xff]  ;;  %vm2456_vm2 = vcmp.lt.s32.totalorder %v8529_v29, %v8961_v60  ;;  %vm2464_vm3 = vcmp.lt.s32.totalorder %v8529_v29, %v8964_v37 }
 0x358   : > { %v2925_v14 = vpack.c.bf16 %v2829_v57, %v2821_v38  ;;  %vm2584_vm4 = vcmp.eq.s32.totalorder %v8529_v29, %v8961_v60 }
 0x35a   : > { %v8966_v8 = vpop.permute.xlu1 %5578  ;;  %3500 = vmatmul.bf16.gmra.mxu0 %v2925_v14 }
 0x35b   : > { %v11401_v30 = vunpack.i.h.bf16 %v8966_v8  ;;  %v11406_v59 = vunpack.i.l.bf16 %v8966_v8 }
 0x35f   : > { %v5589_v24 = vpop.permute.xlu0 %5588 }
 0x360   : > { %v5591_v7 = vunpack.i.h.bf16 %v5589_v24  ;;  %v5590_v34 = vunpack.i.l.bf16 %v5589_v24 }
 0x362   : > { %v2325_v14 = vsel %vm2219_vm0, %v5591_v7, %v11401_v30  ;;  %v2324_v18 = vsel %vm2219_vm0, %v5590_v34, %v11406_v59  ;;  %v8988_v24 = vpop.permute.xlu1 %5593  ;;  %v8998_v59 = vmul.f32 %v11881_v21, %v11880_v23 }
 0x363   : > { %v2710_v54 = vsel %vm2582_vm5, 0.0, %v2324_v18  ;;  %v2718_v1 = vsel %vm2590_vm6, 0.0, %v2325_v14  ;;  %11876 = vst [vmem:[#allocation49_spill] sm:$0xff] %v8988_v24  ;;  %v11882_v14 = vld [vmem:[#allocation32_spill] sm:$0xff]  ;;  %vm2592_vm5 = vcmp.eq.s32.totalorder %v8529_v29, %v8964_v37 }
 0x364   : > { %v2838_v38 = vsel %vm2454_vm7, %v11874_v11, %v2710_v54  ;;  %v2846_v57 = vsel %vm2462_vm8, %v11875_v19, %v2718_v1  ;;  %v9002_v18 = vmul.f32 %v11878_v16, %v11882_v14  ;;  %v11883_v54 = vld [vmem:[#allocation29_spill] sm:$0xff]  ;;  %v11885_v14 = vld [vmem:[#allocation30_spill] sm:$0xff] }
 0x365   : > { %v2934_v9 = vpack.c.bf16 %v2846_v57, %v2838_v38  ;;  %v9006_v1 = vmul.f32 %v11878_v16, %v11883_v54  ;;  %v11884_v16 = vld [vmem:[#allocation24_spill] sm:$0xff]  ;;  %v5427_v57 = vld [vmem:[%s11159_s0 + $0x1b8] sm:$0xff]  ;;  %v9039_v54 = vmul.f32 %v11881_v21, %v11885_v14  ;;  %v11886_v19 = vld [vmem:[#allocation38_spill] sm:$0xff]  ;;  %v9056_v14 = vpop.eup %6082 }
 0x366   : > { %v9022_v23 = vmul.f32 %v11881_v21, %v11884_v16  ;;  %v5435_v16 = vld [vmem:[%s11159_s0 + $0x1f8] sm:$0xff]  ;;  %11888 = vst [vmem:[#allocation48_spill] sm:$0xff] %v9056_v14  ;;  %3771 = vmatpush.bf16.msra.mxu2 %v5427_v57 }
 0x367   : > { %3554 = vmatmul.bf16.gmra.mxu1 %v2934_v9  ;;  %v9008_v9 = vpop.permute.xlu0 %5608  ;;  %v5419_v21 = vld [vmem:[%s11159_s0 + $0x178] sm:$0xff]  ;;  %3820 = vmatpush.bf16.msra.mxu3 %v5435_v16 }
 0x368   : > { %3722 = vmatpush.bf16.msrb.mxu1 %v5419_v21  ;;  %v11898_v21 = vld [vmem:[#allocation34_spill] sm:$0xff]  ;;  %v11923_v60 = vunpack.i.l.bf16 %v9008_v9 }
 0x36a   : > { %v8994_v30 = vpop.permute.xlu1 %5598 }
 0x36b   : > { %11879 = vst [vmem:[#allocation45_spill] sm:$0xff] %v8994_v30  ;;  %v11408_v51 = vunpack.i.h.bf16 %v8994_v30  ;;  %v11407_v13 = vunpack.i.l.bf16 %v8994_v30  ;;  %v11887_v30 = vld [vmem:[#allocation79_spill] sm:$0xff] }
 0x36c   : > { %v9051_v10 = vmul.f32 %v11887_v30, %v11886_v19  ;;  %v2359_v19 = vadd.s32 80, %v8292_v46 }
 0x36d   : > { %v2340_v11 = vsel %vm2219_vm0, %v11407_v13, %v5590_v34  ;;  %v2341_v38 = vsel %vm2219_vm0, %v11408_v51, %v5591_v7  ;;  %v5411_v34 = vld [vmem:[%s11159_s0 + $0x138] sm:$0xff] }
 0x36e   : > { %v2709_v7 = vsel %vm2581_vm9, 0.0, %v2340_v11  ;;  %v2717_v13 = vsel %vm2589_vm10, 0.0, %v2341_v38  ;;  %v11889_v11 = vld [vmem:[#allocation57_spill] sm:$0xff]  ;;  %3673 = vmatpush.bf16.msrb.mxu0 %v5411_v34 }
 0x36f   : > { %v2837_v40 = vsel %vm2453_vm11, %v8330_v2, %v2709_v7  ;;  %v2845_v38 = vsel %vm2461_vm12, %v11889_v11, %v2717_v13  ;;  %v11892_v2 = vld [vmem:[#allocation33_spill] sm:$0xff]  ;;  %v11893_v7 = vld [vmem:[#allocation36_spill] sm:$0xff]  ;;  %v11894_v11 = vld [vmem:[#allocation35_spill] sm:$0xff] }
 0x370   : > { %v2933_v61 = vpack.c.bf16 %v2845_v38, %v2837_v40  ;;  %v9076_v13 = vmul.f32 %v11891_v41, %v11892_v2  ;;  %v9080_v57 = vmul.f32 %v11887_v30, %v11893_v7  ;;  %v9084_v40 = vmul.f32 %v11891_v41, %v11894_v11  ;;  %v11896_v34 = vld [vmem:[#allocation85_spill] sm:$0xff]  ;;  %v11900_v7 = vld [vmem:[#allocation16_spill] sm:$0xff] }
 0x371   : > { %v9094_v16 = vmul.f32 %v9056_v14, %v11896_v34  ;;  %v9098_v2 = vmul.f32 %v9056_v14, %v11898_v21  ;;  %v9102_v48 = vmul.f32 %v9056_v14, %v11900_v7  ;;  %v11902_v11 = vld [vmem:[#allocation52_spill] sm:$0xff]  ;;  %v9116_v21 = vadd.s32 %v8324_v28, %v2359_v19 }
 0x372   : > { %v1807_v51 = vpop.xlane.xlu2 %1806  ;;  %v9090_v26 = vpop.permute.xlu1 %5603  ;;  %3505 = vmatmul.bf16.gmra.mxu0 %v2933_v61  ;;  %v9109_v61 = vmul.f32 %v9056_v14, %v11902_v11  ;;  %v9124_v7 = vadd.s32 %v8324_v28, %v2360_v56  ;;  %v11912_v56 = vunpack.i.l.bf16 %v8988_v24 }
 0x373   : > { %6084 = vrcp.f32 %v1807_v51  ;;  %v11895_v51 = vld [vmem:[#allocation41_spill] sm:$0xff]  ;;  %11897 = vst [vmem:[#allocation97_spill] sm:$0xff] %v9094_v16  ;;  %v9126_v11 = vpop.permute.xlu0 %5623  ;;  %vm2599_vm6 = vcmp.eq.s32.totalorder %v8475_v53, %v9116_v21  ;;  %vm2597_vm7 = vcmp.eq.s32.totalorder %v8357_v45, %v9116_v21 }
 0x374   : > { %v9088_v38 = vmul.f32 %v11887_v30, %v11895_v51  ;;  %11899 = vst [vmem:[#allocation81_spill] sm:$0xff] %v9098_v2  ;;  %v11904_v51 = vld [vmem:[#allocation94_spill] sm:$0xff]  ;;  %v11906_v30 = vld [vmem:[#allocation64_spill] sm:$0xff]  ;;  %vm2607_vm8 = vcmp.eq.s32.totalorder %v8475_v53, %v9124_v7  ;;  %vm2605_vm10 = vcmp.eq.s32.totalorder %v8357_v45, %v9124_v7  ;;  %vm2477_vm12 = vcmp.lt.s32.totalorder %v8357_v45, %v9124_v7 }
 0x375   : > { %11901 = vst [vmem:[#allocation80_spill] sm:$0xff] %v9102_v48  ;;  %v9113_v34 = vmul.f32 %v9056_v14, %v11904_v51  ;;  %vm2478_vm9 = vcmp.lt.s32.totalorder %v8465_v32, %v9124_v7  ;;  %vm2606_vm11 = vcmp.eq.s32.totalorder %v8465_v32, %v9124_v7 }
 0x376   : > { %11903 = vst [vmem:[#allocation28_spill] sm:$0xff] %v9109_v61 }
 0x377   : > { %11905 = vst [vmem:[#allocation78_spill] sm:$0xff] %v9126_v11 }
 0x379   : > { %v9136_v19 = vpop.eup %6084 }
 0x37a   : > { %v5584_v41 = vpop.permute.xlu2 %5583  ;;  %v9146_v62 = vmul.f32 %v9136_v19, %v11906_v30  ;;  %v9150_v27 = vmul.f32 %v9136_v19, %v11908_v3  ;;  %v9154_v51 = vmul.f32 %v9136_v19, %v11910_v31  ;;  %v5605_v3 = vunpack.i.l.bf16 %v9090_v26 }
 0x37b   : > { %v5586_v63 = vunpack.i.h.bf16 %v5584_v41  ;;  %v5585_v14 = vunpack.i.l.bf16 %v5584_v41  ;;  %v9176_v41 = vpop.permute.xlu1 %5618 }
 0x37c   : > { %11907 = vst [vmem:[#allocation26_spill] sm:$0xff] %v9146_v62  ;;  %v5657_v30 = vpack.i.bf16 %v9094_v16, %v9146_v62  ;;  %v5652_v31 = vpack.i.bf16 %v9098_v2, %v9150_v27  ;;  %v5662_v4 = vpack.i.bf16 %v9102_v48, %v9154_v51  ;;  %v11913_v62 = vunpack.i.h.bf16 %v8988_v24 }
 0x37d   : > { %11909 = vst [vmem:[#allocation12_spill] sm:$0xff] %v9150_v27  ;;  %v2292_v16 = vsel %vm2219_vm0, %v5585_v14, %v11912_v56  ;;  %v11914_v2 = vunpack.i.l.bf16 %v8966_v8  ;;  %v11922_v37 = vunpack.i.l.bf16 %v9176_v41 }
 0x37e   : > { %11911 = vst [vmem:[#allocation32_spill] sm:$0xff] %v9154_v51  ;;  %v2293_v27 = vsel %vm2219_vm0, %v5586_v63, %v11913_v62  ;;  %v11915_v51 = vunpack.i.h.bf16 %v8966_v8  ;;  %v5606_v62 = vunpack.i.h.bf16 %v9090_v26  ;;  %5658 = vrot.lane.b32.xlu2 %v5657_v30, %s6166_s14  ;;  %5653 = vrot.lane.b32.xlu0 %v5652_v31, %s6166_s14  ;;  %v11457_v30 = vunpack.i.l.bf16 %v9126_v11 }
 0x37f   : > { %v2308_v48 = vsel %vm2219_vm0, %v11914_v2, %v5585_v14  ;;  %v5426_v14 = vld [vmem:[%s11159_s0 + $0x1b0] sm:$0xff]  ;;  %5663 = vrot.lane.b32.xlu1 %v5662_v4, %s6166_s14  ;;  %v2720_v2 = vsel %vm2592_vm5, 0.0, %v2293_v27  ;;  %v11918_v31 = vunpack.i.l.bf16 %v9008_v9  ;;  %vm2472_vm5 = vcmp.lt.s32.totalorder %v8529_v29, %v9116_v21 }
 0x380   : > { %v2309_v39 = vsel %vm2219_vm0, %v11915_v51, %v5586_v63  ;;  %v2711_v8 = vsel %vm2583_vm15, 0.0, %v2308_v48  ;;  %vm2471_vm15 = vcmp.lt.s32.totalorder %v8475_v53, %v9116_v21  ;;  %v5410_v4 = vld [vmem:[%s11159_s0 + $0x130] sm:$0xff]  ;;  %v11917_v51 = vld [vmem:[#allocation61_spill] sm:$0xff]  ;;  %3772 = vmatpush.bf16.msra.mxu2 %v5426_v14 }
 0x381   : > { %v2719_v63 = vsel %vm2591_vm1, 0.0, %v2309_v39  ;;  %v2839_v26 = vsel %vm2455_vm13, %v8674_v25, %v2711_v8  ;;  %v2712_v39 = vsel %vm2584_vm4, 0.0, %v2292_v16  ;;  %vm2479_vm1 = vcmp.lt.s32.totalorder %v8475_v53, %v9124_v7  ;;  %3674 = vmatpush.bf16.msrb.mxu0 %v5410_v4 }
 0x382   : > { %v2847_v48 = vsel %vm2463_vm14, %v8666_v35, %v2719_v63  ;;  %v5434_v35 = vld [vmem:[%s11159_s0 + $0x1f0] sm:$0xff]  ;;  %v2840_v27 = vsel %vm2456_vm2, %v8371_v42, %v2712_v39  ;;  %v9245_v16 = vmul.f32 %v9136_v19, %v8458_v36  ;;  %v9249_v56 = vmul.f32 %v9136_v19, %v11917_v51  ;;  %v11919_v63 = vld [vmem:[#allocation2_spill] sm:$0xff]  ;;  %v5614_v14 = vpop.permute.xlu2 %5613 }
 0x383   : > { %v2935_v25 = vpack.c.bf16 %v2847_v48, %v2839_v26  ;;  %v2310_v8 = vsel %vm2219_vm0, %v5605_v3, %v11918_v31  ;;  %v2848_v42 = vsel %vm2464_vm3, %v11919_v63, %v2720_v2  ;;  %vm2600_vm13 = vcmp.eq.s32.totalorder %v8529_v29, %v9116_v21  ;;  %3821 = vmatpush.bf16.msra.mxu3 %v5434_v35  ;;  %v3486_v35 = vpop.f32.mrf.mxu0 }
 0x384   : > { %11916 = vst [vmem:[#allocation29_spill] sm:$0xff] %v9245_v16  ;;  %v2936_v26 = vpack.c.bf16 %v2848_v42, %v2840_v27  ;;  %vm2608_vm14 = vcmp.eq.s32.totalorder %v8529_v29, %v9124_v7  ;;  %v2361_v48 = vadd.s32 96, %v8292_v46  ;;  %v11920_v39 = vunpack.i.h.bf16 %v9008_v9 }
 0x385   : > { %3603 = vmatmul.bf16.gmra.mxu2 %v2935_v25  ;;  %v5616_v51 = vunpack.i.h.bf16 %v5614_v14  ;;  %v5615_v31 = vunpack.i.l.bf16 %v5614_v14  ;;  %v2362_v4 = vadd.s32 104, %v8292_v46  ;;  %v5672_v25 = vpack.i.bf16 %v9109_v61, %v9245_v16  ;;  %v5418_v14 = vld [vmem:[%s11159_s0 + $0x170] sm:$0xff]  ;;  %v3535_v16 = vpop.f32.mrf.mxu1 }
 0x386   : > { %v2311_v2 = vsel %vm2219_vm0, %v5606_v62, %v11920_v39  ;;  %3652 = vmatmul.bf16.gmra.mxu3 %v2936_v26  ;;  %v5667_v27 = vpack.i.bf16 %v9113_v34, %v9249_v56  ;;  %v2727_v42 = vsel %vm2599_vm6, 0.0, %v2310_v8  ;;  %v9282_v39 = vpop.permute.xlu1 %5633  ;;  %v11921_v61 = vunpack.i.h.bf16 %v9126_v11  ;;  %3723 = vmatpush.bf16.msrb.mxu1 %v5418_v14 }
 0x387   : > { %v2327_v63 = vsel %vm2219_vm0, %v5616_v51, %v5606_v62  ;;  %v2326_v26 = vsel %vm2219_vm0, %v5615_v31, %v5605_v3  ;;  %v2342_v36 = vsel %vm2219_vm0, %v11457_v30, %v5615_v31  ;;  %v2294_v62 = vsel %vm2219_vm0, %v11923_v60, %v11922_v37  ;;  %5673 = vrot.lane.b32.xlu2 %v5672_v25, %s6166_s14 }
 0x388   : > { %v2343_v8 = vsel %vm2219_vm0, %v11921_v61, %v5616_v51  ;;  %v3536_v24 = vadd.f32 %v3535_v16, %v3486_v35  ;;  %5668 = vrot.lane.b32.xlu0 %v5667_v27, %s6166_s14  ;;  %v2725_v3 = vsel %vm2597_vm7, 0.0, %v2342_v36  ;;  %v2735_v61 = vsel %vm2607_vm8, 0.0, %v2311_v2  ;;  %v11930_v27 = vld [vmem:[#allocation18_spill] sm:$0xff] }
 0x389   : > { %v11924_v51 = vpack.i.bf16 %v8992_v52, %v8998_v59  ;;  %v2733_v37 = vsel %vm2605_vm10, 0.0, %v2343_v8  ;;  %vm11925_vm2 = vcmp.lt.s32.totalorder %v8357_v45, %v9116_v21  ;;  %vm11926_vm3 = vcmp.eq.s32.totalorder %v8465_v32, %v9116_v21  ;;  %v5639_v8 = vpop.permute.xlu0 %5638 }
 0x38a   : > { %v2853_v60 = vsel %vm11925_vm2, %v8759_v20, %v2725_v3  ;;  %v2726_v16 = vsel %vm11926_vm3, 0.0, %v2326_v26  ;;  %v2734_v36 = vsel %vm2606_vm11, 0.0, %v2327_v63  ;;  %v11927_v2 = vunpack.i.h.bf16 %v9176_v41  ;;  %v11931_v3 = vld [vmem:[#allocation101_spill] sm:$0xff] }
 0x38b   : > { %5678 = vrot.lane.b32.xlu1 %v11924_v51, %s6166_s14  ;;  %v11928_v31 = vunpack.i.h.bf16 %v9008_v9  ;;  %v2861_v20 = vsel %vm2477_vm12, %v8722_v6, %v2733_v37  ;;  %vm11929_vm4 = vcmp.lt.s32.totalorder %v8465_v32, %v9116_v21  ;;  %v2862_v63 = vsel %vm2478_vm9, %v11930_v27, %v2734_v36  ;;  %v9349_v6 = vpop.permute.xlu2 %5628  ;;  %v11932_v51 = vld [vmem:[#allocation99_spill] sm:$0xff] }
 0x38c   : > { %v2854_v25 = vsel %vm11929_vm4, %v8481_v49, %v2726_v16  ;;  %v2941_v14 = vpack.c.bf16 %v2861_v20, %v2853_v60  ;;  %v2855_v49 = vsel %vm2471_vm15, %v11931_v3, %v2727_v42  ;;  %v2863_v37 = vsel %vm2479_vm1, %v11932_v51, %v2735_v61  ;;  %v11935_v20 = vld [vmem:[#allocation40_spill] sm:$0xff]  ;;  %v11940_v51 = vld [vmem:[#allocation66_spill] sm:$0xff] }
 0x38d   : > { %v2295_v35 = vsel %vm2219_vm0, %v11928_v31, %v11927_v2  ;;  %v2942_v9 = vpack.c.bf16 %v2862_v63, %v2854_v25  ;;  %vm2480_vm6 = vcmp.lt.s32.totalorder %v8529_v29, %v9124_v7  ;;  %v2728_v60 = vsel %vm2600_vm13, 0.0, %v2294_v62  ;;  %v3584_v31 = vpop.f32.mrf.mxu2  ;;  %v11936_v25 = vld [vmem:[#allocation23_spill] sm:$0xff]  ;;  %v11937_v63 = vld [vmem:[#allocation44_spill] sm:$0xff] }
 0x38e   : > { %v11458_v16 = vunpack.i.l.bf16 %v9349_v6  ;;  %3510 = vmatmul.bf16.gmra.mxu0 %v2941_v14  ;;  %v2736_v42 = vsel %vm2608_vm14, 0.0, %v2295_v35  ;;  %v9369_v36 = vadd.s32 %v8324_v28, %v2361_v48  ;;  %v9372_v61 = vadd.s32 %v8324_v28, %v2362_v4  ;;  %v11938_v14 = vld [vmem:[#allocation88_spill] sm:$0xff]  ;;  %v9385_v3 = vpop.permute.xlu1 %5648 }
 0x38f   : > { %3559 = vmatmul.bf16.gmra.mxu1 %v2942_v9  ;;  %v5697_v62 = vpack.i.bf16 %v9088_v38, %v9084_v40  ;;  %v9379_v27 = vmul.f32 %v11936_v25, %v11935_v20  ;;  %v9383_v9 = vmul.f32 %v11938_v14, %v11937_v63  ;;  %v5641_v35 = vunpack.i.h.bf16 %v5639_v8  ;;  %11939 = vst [vmem:[#allocation38_spill] sm:$0xff] %v9385_v3 }
 0x390   : > { %11933 = vst [vmem:[#allocation24_spill] sm:$0xff] %v9369_v36  ;;  %v5640_v48 = vunpack.i.l.bf16 %v5639_v8  ;;  %v2943_v4 = vpack.c.bf16 %v2863_v37, %v2855_v49  ;;  %v2856_v30 = vsel %vm2472_vm5, %v11940_v51, %v2728_v60  ;;  %v11462_v26 = vunpack.i.h.bf16 %v9385_v3  ;;  %v11943_v49 = vld [vmem:[#allocation106_spill] sm:$0xff]  ;;  %v5425_v60 = vld [vmem:[%s11159_s0 + $0x1a8] sm:$0xff] }
 0x391   : > { %11934 = vst [vmem:[#allocation30_spill] sm:$0xff] %v9372_v61  ;;  %v11461_v2 = vunpack.i.l.bf16 %v9385_v3  ;;  %v3585_v20 = vadd.f32 %v3584_v31, %v3536_v24  ;;  %v11941_v63 = vpack.i.bf16 %v9002_v18, %v9022_v23  ;;  %v11942_v8 = vpack.i.bf16 %v9006_v1, %v9039_v54  ;;  %v5433_v51 = vld [vmem:[%s11159_s0 + $0x1e8] sm:$0xff]  ;;  %3773 = vmatpush.bf16.msra.mxu2 %v5425_v60 }
 0x392   : > { %v2864_v37 = vsel %vm2480_vm6, %v11943_v49, %v2736_v42  ;;  %v2328_v24 = vsel %vm2219_vm0, %v5640_v48, %v11458_v16  ;;  %v11944_v31 = vpack.i.bf16 %v9051_v10, %v9072_v12  ;;  %vm2613_vm7 = vcmp.eq.s32.totalorder %v8357_v45, %v9369_v36  ;;  %v5409_v42 = vld [vmem:[%s11159_s0 + $0x128] sm:$0xff]  ;;  %3822 = vmatpush.bf16.msra.mxu3 %v5433_v51 }
 0x393   : > { %5688 = vrot.lane.b32.xlu2 %v11941_v63, %s6166_s14  ;;  %5683 = vrot.lane.b32.xlu0 %v11942_v8, %s6166_s14  ;;  %vm2621_vm8 = vcmp.eq.s32.totalorder %v8357_v45, %v9372_v61  ;;  %vm2614_vm9 = vcmp.eq.s32.totalorder %v8465_v32, %v9369_v36  ;;  %v2344_v63 = vsel %vm2219_vm0, %v11461_v2, %v5640_v48  ;;  %v11945_v49 = vunpack.i.h.bf16 %v9349_v6  ;;  %v5417_v16 = vld [vmem:[%s11159_s0 + $0x168] sm:$0xff] }
 0x394   : > { %5693 = vrot.lane.b32.xlu1 %v11944_v31, %s6166_s14  ;;  %v2345_v8 = vsel %vm2219_vm0, %v11462_v26, %v5641_v35  ;;  %vm2622_vm10 = vcmp.eq.s32.totalorder %v8465_v32, %v9372_v61  ;;  %v2944_v11 = vpack.c.bf16 %v2864_v37, %v2856_v30  ;;  %vm2485_vm11 = vcmp.lt.s32.totalorder %v8357_v45, %v9369_v36  ;;  %v11946_v48 = vld [vmem:[#allocation39_spill] sm:$0xff]  ;;  %v9451_v26 = vpop.permute.xlu2 %5643  ;;  %v9462_v37 = vpop.f32.mrf.mxu1 }
 0x395   : > { %v2329_v31 = vsel %vm2219_vm0, %v5641_v35, %v11945_v49  ;;  %v9449_v2 = vmul.f32 %v11936_v25, %v11946_v48  ;;  %3675 = vmatpush.bf16.msrb.mxu0 %v5409_v42  ;;  %11947 = vst [vmem:[#allocation79_spill] sm:$0xff] %v9451_v26  ;;  %3608 = vmatmul.bf16.gmra.mxu2 %v2943_v4  ;;  %v3633_v35 = vpop.f32.mrf.mxu3  ;;  %v2742_v30 = vsel %vm2614_vm9, 0.0, %v2328_v24  ;;  %v2741_v4 = vsel %vm2613_vm7, 0.0, %v2344_v63  ;;  %v11951_v48 = vld [vmem:[#allocation46_spill] sm:$0xff] }
 0x396   : > { %vm2493_vm12 = vcmp.lt.s32.totalorder %v8357_v45, %v9372_v61  ;;  %vm2486_vm15 = vcmp.lt.s32.totalorder %v8465_v32, %v9369_v36  ;;  %vm2494_vm1 = vcmp.lt.s32.totalorder %v8465_v32, %v9372_v61  ;;  %3724 = vmatpush.bf16.msrb.mxu1 %v5417_v16  ;;  %11948 = vst [vmem:[#allocation57_spill] sm:$0xff] %v9462_v37  ;;  %v2749_v42 = vsel %vm2621_vm8, 0.0, %v2345_v8 }
 0x397   : > { %v9464_v60 = vadd.f32 %v3633_v35, %v3585_v20  ;;  %v2750_v51 = vsel %vm2622_vm10, 0.0, %v2329_v31  ;;  %v5636_v49 = vunpack.i.h.bf16 %v9282_v39  ;;  %3657 = vmatmul.bf16.gmra.mxu3 %v2944_v11  ;;  %v5707_v16 = vpack.i.bf16 %v9383_v9, %v9379_v27  ;;  %v11950_v20 = vld [vmem:[#allocation43_spill] sm:$0xff]  ;;  %v9486_v35 = vpop.f32.mrf.mxu0  ;;  %v9491_v11 = vpop.f32.mrf.mxu2 }
 0x398   : > { %v9480_v24 = vmul.f32 %v11938_v14, %v11950_v20  ;;  %v9484_v63 = vmul.f32 %v11938_v14, %v11951_v48  ;;  %11952 = vst [vmem:[#allocation77_spill] sm:$0xff] %v9486_v35  ;;  %v5635_v8 = vunpack.i.l.bf16 %v9282_v39  ;;  %v11464_v31 = vunpack.i.h.bf16 %v9451_v26  ;;  %v11964_v35 = vld [vmem:[#allocation58_spill] sm:$0xff] }
 0x399   : > { %11949 = vst [vmem:[#allocation37_spill] sm:$0xff] %v9464_v60  ;;  %v11463_v60 = vunpack.i.l.bf16 %v9451_v26  ;;  %v2870_v20 = vsel %vm2486_vm15, %v8777_v43, %v2742_v30  ;;  %v11954_v14 = vpack.i.bf16 %v9080_v57, %v9076_v13  ;;  %v2869_v39 = vsel %vm2485_vm11, %v8517_v17, %v2741_v4  ;;  %v11958_v4 = vld [vmem:[#allocation56_spill] sm:$0xff] }
 0x39a   : > { %11953 = vst [vmem:[#allocation33_spill] sm:$0xff] %v9491_v11  ;;  %v2877_v48 = vsel %vm2493_vm12, %v8507_v15, %v2749_v42  ;;  %v2878_v43 = vsel %vm2494_vm1, %v8763_v5, %v2750_v51  ;;  %v11955_v30 = vunpack.i.h.bf16 %v9349_v6  ;;  %vm2615_vm13 = vcmp.eq.s32.totalorder %v8475_v53, %v9369_v36  ;;  %v11957_v15 = vld [vmem:[#allocation42_spill] sm:$0xff] }
 0x39b   : > { %5703 = vrot.lane.b32.xlu2 %v11954_v14, %s6166_s14  ;;  %5698 = vrot.lane.b32.xlu0 %v5697_v62, %s6166_s14  ;;  %v11956_v14 = vunpack.i.l.bf16 %v9349_v6  ;;  %vm2623_vm14 = vcmp.eq.s32.totalorder %v8475_v53, %v9372_v61  ;;  %v9529_v5 = vmul.f32 %v11936_v25, %v11957_v15  ;;  %v11959_v42 = vld [vmem:[#allocation82_spill] sm:$0xff]  ;;  %vm2616_vm2 = vcmp.eq.s32.totalorder %v8529_v29, %v9369_v36 }
 0x39c   : > { %v2313_v62 = vsel %vm2219_vm0, %v11955_v30, %v5636_v49  ;;  %5708 = vrot.lane.b32.xlu1 %v5707_v16, %s6166_s14  ;;  %v9533_v51 = vmul.f32 %v11959_v42, %v11958_v4  ;;  %vm2624_vm3 = vcmp.eq.s32.totalorder %v8529_v29, %v9372_v61  ;;  %v2297_v6 = vsel %vm2219_vm0, %v5636_v49, %v11464_v31 }
 0x39d   : > { %v2312_v17 = vsel %vm2219_vm0, %v11956_v14, %v5635_v8  ;;  %v2296_v25 = vsel %vm2219_vm0, %v5635_v8, %v11463_v60  ;;  %v2949_v16 = vpack.c.bf16 %v2877_v48, %v2869_v39  ;;  %v2950_v30 = vpack.c.bf16 %v2878_v43, %v2870_v20  ;;  %v9547_v14 = vpop.f32.mrf.mxu3  ;;  %v11961_v39 = vld [vmem:[#allocation53_spill] sm:$0xff]  ;;  %v11962_v20 = vld [vmem:[#allocation91_spill] sm:$0xff] }
 0x39e   : > { %11960 = vst [vmem:[#allocation36_spill] sm:$0xff] %v9547_v14  ;;  %vm2487_vm4 = vcmp.lt.s32.totalorder %v8475_v53, %v9369_v36  ;;  %vm2495_vm5 = vcmp.lt.s32.totalorder %v8475_v53, %v9372_v61  ;;  %v2743_v15 = vsel %vm2615_vm13, 0.0, %v2312_v17  ;;  %v2751_v4 = vsel %vm2623_vm14, 0.0, %v2313_v62  ;;  %v3540_v17 = vpop.f32.mrf.mxu1 }
 0x39f   : > { %3515 = vmatmul.bf16.gmra.mxu0 %v2949_v16  ;;  %3564 = vmatmul.bf16.gmra.mxu1 %v2950_v30  ;;  %v5717_v49 = vpack.i.bf16 %v9480_v24, %v9449_v2  ;;  %v5712_v8 = vpack.i.bf16 %v9484_v63, %v9529_v5  ;;  %v9559_v48 = vmul.f32 %v11962_v20, %v11961_v39  ;;  %v2744_v43 = vsel %vm2616_vm2, 0.0, %v2296_v25  ;;  %v3491_v16 = vpop.f32.mrf.mxu0 }
 0x3a0   : > { %vm2488_vm6 = vcmp.lt.s32.totalorder %v8529_v29, %v9369_v36  ;;  %vm2496_vm7 = vcmp.lt.s32.totalorder %v8529_v29, %v9372_v61  ;;  %v2752_v62 = vsel %vm2624_vm3, 0.0, %v2297_v6  ;;  %v2871_v39 = vsel %vm2487_vm4, %v8639_v55, %v2743_v15  ;;  %v3589_v6 = vpop.f32.mrf.mxu2  ;;  %v11963_v55 = vld [vmem:[#allocation54_spill] sm:$0xff] }
 0x3a1   : > { %v5722_v30 = vpack.i.bf16 %v9533_v51, %v9559_v48  ;;  %v2879_v60 = vsel %vm2495_vm5, %v8587_v0, %v2751_v4  ;;  %v3541_v25 = vadd.f32 %v3540_v17, %v3491_v16  ;;  %v2872_v31 = vsel %vm2488_vm6, %v8849_v58, %v2744_v43  ;;  %v5424_v4 = vld [vmem:[%s11159_s0 + $0x1a0] sm:$0xff]  ;;  %v11967_v17 = vld [vmem:[#allocation55_spill] sm:$0xff] }
 0x3a2   : > { %v2880_v14 = vsel %vm2496_vm7, %v8827_v47, %v2752_v62  ;;  %v2951_v11 = vpack.c.bf16 %v2879_v60, %v2871_v39  ;;  %v9588_v15 = vmul.f32 %v11959_v42, %v11963_v55  ;;  %v9592_v0 = vmul.f32 %v11959_v42, %v11964_v35  ;;  %v5408_v58 = vld [vmem:[%s11159_s0 + $0x120] sm:$0xff]  ;;  %v11969_v39 = vld [vmem:[#allocation60_spill] sm:$0xff]  ;;  %3774 = vmatpush.bf16.msra.mxu2 %v5424_v4  ;;  %v11972_v4 = vld [vmem:[#allocation9_spill] sm:$0xff] }
 0x3a3   : > { %5718 = vrot.lane.b32.xlu2 %v5717_v49, %s6166_s14  ;;  %5713 = vrot.lane.b32.xlu0 %v5712_v8, %s6166_s14  ;;  %v3590_v37 = vadd.f32 %v3589_v6, %v3541_v25  ;;  %v5432_v47 = vld [vmem:[%s11159_s0 + $0x1e0] sm:$0xff]  ;;  %v2952_v42 = vpack.c.bf16 %v2880_v14, %v2872_v31  ;;  %v9616_v16 = vmul.f32 %v11962_v20, %v11967_v17  ;;  %v11971_v6 = vld [vmem:[#allocation69_spill] sm:$0xff] }
 0x3a4   : > { %5723 = vrot.lane.b32.xlu1 %v5722_v30, %s6166_s14  ;;  %v11965_v60 = vld [vmem:[#allocation62_spill] sm:$0xff]  ;;  %3676 = vmatpush.bf16.msrb.mxu0 %v5408_v58  ;;  %v9622_v25 = vmul.f32 %v8290_v50, %v11969_v39  ;;  %v9639_v55 = vmul.f32 %v8282_v33, %v11971_v6  ;;  %v9643_v58 = vmul.f32 %v8355_v22, %v11972_v4 }
 0x3a5   : > { %v9605_v49 = vmul.f32 %v8282_v33, %v11965_v60  ;;  %v5416_v35 = vld [vmem:[%s11159_s0 + $0x160] sm:$0xff]  ;;  %3613 = vmatmul.bf16.gmra.mxu2 %v2951_v11  ;;  %v3638_v8 = vpop.f32.mrf.mxu3  ;;  %3823 = vmatpush.bf16.msra.mxu3 %v5432_v47  ;;  %v5727_v11 = vpack.i.bf16 %v9592_v0, %v9616_v16  ;;  %v11974_v47 = vld [vmem:[#allocation59_spill] sm:$0xff] }
 0x3a6   : > { %v11966_v43 = vld [vmem:[#allocation50_spill] sm:$0xff]  ;;  %v9618_v30 = vadd.f32 %v3638_v8, %v3590_v37  ;;  %3725 = vmatpush.bf16.msrb.mxu1 %v5416_v35  ;;  %v11970_v37 = vld [vmem:[#allocation68_spill] sm:$0xff]  ;;  %11973 = vst [vmem:[#allocation41_spill] sm:$0xff] %v9643_v58  ;;  %v9647_v60 = vmul.f32 %v8290_v50, %v11974_v47  ;;  %v11975_v35 = vld [vmem:[#allocation5_spill] sm:$0xff]  ;;  %v9653_v8 = vpop.f32.mrf.mxu1 }
 0x3a7   : > { %v9612_v62 = vmul.f32 %v11962_v20, %v11966_v43  ;;  %3662 = vmatmul.bf16.gmra.mxu3 %v2952_v42  ;;  %v5737_v14 = vpack.i.bf16 %v9605_v49, %v9622_v25  ;;  %v9635_v20 = vmul.f32 %v8282_v33, %v11970_v37  ;;  %v9651_v42 = vmul.f32 %v8290_v50, %v11975_v35  ;;  %v11977_v43 = vld [vmem:[#allocation72_spill] sm:$0xff]  ;;  %v11982_v6 = vld [vmem:[#allocation10_spill] sm:$0xff]  ;;  %v11985_v35 = vld [vmem:[#allocation107_spill] sm:$0xff] }
 0x3a8   : > { %11968 = vst [vmem:[#allocation35_spill] sm:$0xff] %v9618_v30  ;;  %v9657_v17 = vmul.f32 %v8366_v44, %v11977_v43  ;;  %v9678_v4 = vmul.f32 %v8355_v22, %v11982_v6  ;;  %v11984_v47 = vld [vmem:[#allocation76_spill] sm:$0xff]  ;;  %v11987_v30 = vld [vmem:[#allocation71_spill] sm:$0xff] }
 0x3a9   : > { %v5732_v31 = vpack.i.bf16 %v9588_v15, %v9612_v62  ;;  %11976 = vst [vmem:[#allocation85_spill] sm:$0xff] %v9653_v8  ;;  %v5747_v33 = vpack.i.bf16 %v9635_v20, %v9647_v60  ;;  %v5742_v39 = vpack.i.bf16 %v9639_v55, %v9651_v42  ;;  %v9682_v43 = vmul.f32 %v11985_v35, %v11984_v47  ;;  %v11990_v6 = vld [vmem:[#allocation19_spill] sm:$0xff]  ;;  %v11991_v47 = vld [vmem:[#allocation8_spill] sm:$0xff] }
 0x3aa   : > { %11978 = vst [vmem:[#allocation34_spill] sm:$0xff] %v9657_v17  ;;  %v5752_v50 = vpack.i.bf16 %v9643_v58, %v9657_v17  ;;  %v11993_v58 = vld [vmem:[#allocation74_spill] sm:$0xff]  ;;  %v12032_v17 = vld [vmem:[#allocation12_spill] sm:$0xff] }
 0x3ab   : > { %5733 = vrot.lane.b32.xlu2 %v5732_v31, %s6166_s14  ;;  %5728 = vrot.lane.b32.xlu0 %v5727_v11, %s6166_s14  ;;  %v9663_v31 = vpop.f32.mrf.mxu2  ;;  %v9665_v11 = vpop.f32.mrf.mxu0  ;;  %11983 = vst [vmem:[#allocation94_spill] sm:$0xff] %v9678_v4 }
 0x3ac   : > { %5738 = vrot.lane.b32.xlu1 %v5737_v14, %s6166_s14  ;;  %11979 = vst [vmem:[#allocation16_spill] sm:$0xff] %v9663_v31  ;;  %v11981_v14 = vld [vmem:[#allocation73_spill] sm:$0xff]  ;;  %v9686_v31 = vmul.f32 %v8366_v44, %v11987_v30  ;;  %v9703_v30 = vmul.f32 %v11991_v47, %v11990_v6 }
 0x3ad   : > { %11980 = vst [vmem:[#allocation52_spill] sm:$0xff] %v9665_v11  ;;  %v9674_v37 = vmul.f32 %v8355_v22, %v11981_v14  ;;  %v5407_v22 = vld [vmem:[%s11159_s0 + $0x118] sm:$0xff] }
 0x3ae   : > { %11986 = vst [vmem:[#allocation64_spill] sm:$0xff] %v9682_v43  ;;  %v5431_v14 = vld [vmem:[%s11159_s0 + $0x1d8] sm:$0xff]  ;;  %3677 = vmatpush.bf16.msrb.mxu0 %v5407_v22  ;;  %v3545_v11 = vpop.f32.mrf.mxu1  ;;  %v5767_v61 = vpack.i.bf16 %v9682_v43, %v9703_v30  ;;  %v11995_v22 = vld [vmem:[#allocation11_spill] sm:$0xff]  ;;  %v11997_v43 = vld [vmem:[#allocation102_spill] sm:$0xff] }
 0x3af   : > { %11992 = vst [vmem:[#allocation27_spill] sm:$0xff] %v9703_v30  ;;  %3824 = vmatpush.bf16.msra.mxu3 %v5431_v14  ;;  %v9727_v14 = vmul.f32 %v9136_v19, %v11997_v43 }
 0x3b1   : > { %11998 = vst [vmem:[#allocation18_spill] sm:$0xff] %v9727_v14 }
 0x3b3   : > { %5748 = vrot.lane.b32.xlu2 %v5747_v33, %s6166_s14  ;;  %5743 = vrot.lane.b32.xlu0 %v5742_v39, %s6166_s14  ;;  %v11988_v33 = vld [vmem:[#allocation70_spill] sm:$0xff]  ;;  %v3594_v36 = vpop.f32.mrf.mxu2 }
 0x3b4   : > { %5753 = vrot.lane.b32.xlu1 %v5752_v50, %s6166_s14  ;;  %v9690_v39 = vmul.f32 %v8366_v44, %v11988_v33  ;;  %v5423_v50 = vld [vmem:[%s11159_s0 + $0x198] sm:$0xff]  ;;  %v5762_v33 = vpack.i.bf16 %v9674_v37, %v9686_v31 }
 0x3b5   : > { %v5415_v44 = vld [vmem:[%s11159_s0 + $0x158] sm:$0xff]  ;;  %3775 = vmatpush.bf16.msra.mxu2 %v5423_v50  ;;  %v3496_v3 = vpop.f32.mrf.mxu0  ;;  %v9719_v50 = vmul.f32 %v11985_v35, %v11993_v58 }
 0x3b6   : > { %11989 = vst [vmem:[#allocation51_spill] sm:$0xff] %v9690_v39  ;;  %v5757_v8 = vpack.i.bf16 %v9678_v4, %v9690_v39  ;;  %3726 = vmatpush.bf16.msrb.mxu1 %v5415_v44  ;;  %v3546_v6 = vadd.f32 %v3545_v11, %v3496_v3  ;;  %v9723_v4 = vmul.f32 %v11985_v35, %v11995_v22  ;;  %v11999_v3 = vld [vmem:[#allocation75_spill] sm:$0xff]  ;;  %v12004_v44 = vld [vmem:[#allocation48_spill] sm:$0xff] }
 0x3b7   : > { %11994 = vst [vmem:[#allocation61_spill] sm:$0xff] %v9719_v50  ;;  %v9731_v11 = vmul.f32 %v11991_v47, %v11999_v3  ;;  %v12009_v3 = vld [vmem:[#allocation104_spill] sm:$0xff] }
 0x3b8   : > { %v3595_v26 = vadd.f32 %v3594_v36, %v3546_v6  ;;  %11996 = vst [vmem:[#allocation2_spill] sm:$0xff] %v9723_v4  ;;  %v12003_v36 = vld [vmem:[#allocation98_spill] sm:$0xff]  ;;  %v9747_v6 = vpop.f32.mrf.mxu3  ;;  %v12030_v39 = vld [vmem:[#allocation80_spill] sm:$0xff] }
 0x3b9   : > { %12000 = vst [vmem:[#allocation101_spill] sm:$0xff] %v9731_v11  ;;  %v9739_v58 = vmul.f32 %v12004_v44, %v12003_v36  ;;  %v5777_v35 = vpack.i.bf16 %v9719_v50, %v9731_v11  ;;  %v12011_v36 = vld [vmem:[#allocation87_spill] sm:$0xff] }
 0x3ba   : > { %12006 = vst [vmem:[#allocation23_spill] sm:$0xff] %v9747_v6 }
 0x3bb   : > { %5763 = vrot.lane.b32.xlu2 %v5762_v33, %s6166_s14  ;;  %5758 = vrot.lane.b32.xlu0 %v5757_v8, %s6166_s14  ;;  %v12001_v8 = vld [vmem:[#allocation20_spill] sm:$0xff]  ;;  %12005 = vst [vmem:[#allocation40_spill] sm:$0xff] %v9739_v58  ;;  %v5782_v43 = vpack.i.bf16 %v9739_v58, %v9727_v14  ;;  %v12013_v58 = vld [vmem:[#allocation13_spill] sm:$0xff] }
 0x3bc   : > { %5768 = vrot.lane.b32.xlu1 %v5767_v61, %s6166_s14  ;;  %v9735_v61 = vmul.f32 %v11991_v47, %v12001_v8  ;;  %v12007_v47 = vld [vmem:[#allocation63_spill] sm:$0xff]  ;;  %v9758_v8 = vmul.f32 %v9136_v19, %v12009_v3  ;;  %v9766_v6 = vmul.f32 %v12004_v44, %v12013_v58 }
 0x3bd   : > { %v9754_v22 = vmul.f32 %v9136_v19, %v12007_v47  ;;  %v5406_v19 = vld [vmem:[%s11159_s0 + $0x110] sm:$0xff] }
 0x3be   : > { %12002 = vst [vmem:[#allocation99_spill] sm:$0xff] %v9735_v61  ;;  %v5772_v33 = vpack.i.bf16 %v9723_v4, %v9735_v61  ;;  %v9762_v4 = vmul.f32 %v12004_v44, %v12011_v36  ;;  %v5430_v47 = vld [vmem:[%s11159_s0 + $0x1d0] sm:$0xff]  ;;  %3678 = vmatpush.bf16.msrb.mxu0 %v5406_v19  ;;  %v9788_v36 = vpop.f32.mrf.mxu1  ;;  %v9801_v19 = vpop.f32.mrf.mxu2 }
 0x3bf   : > { %12008 = vst [vmem:[#allocation44_spill] sm:$0xff] %v9754_v22  ;;  %v5414_v44 = vld [vmem:[%s11159_s0 + $0x150] sm:$0xff]  ;;  %3825 = vmatpush.bf16.msra.mxu3 %v5430_v47 }
 0x3c0   : > { %12010 = vst [vmem:[#allocation88_spill] sm:$0xff] %v9758_v8  ;;  %v3643_v58 = vpop.f32.mrf.mxu3  ;;  %3727 = vmatpush.bf16.msrb.mxu1 %v5414_v44 }
 0x3c1   : > { %12012 = vst [vmem:[#allocation66_spill] sm:$0xff] %v9762_v4  ;;  %v9786_v3 = vadd.f32 %v3643_v58, %v3595_v26  ;;  %v5413_v26 = vld [vmem:[%s11159_s0 + $0x148] sm:$0xff] }
 0x3c2   : > { %12014 = vst [vmem:[#allocation106_spill] sm:$0xff] %v9766_v6 }
 0x3c3   : > { %5778 = vrot.lane.b32.xlu2 %v5777_v35, %s6166_s14  ;;  %5773 = vrot.lane.b32.xlu0 %v5772_v33, %s6166_s14  ;;  %v5792_v35 = vpack.i.bf16 %v9762_v4, %v9754_v22  ;;  %v5787_v33 = vpack.i.bf16 %v9766_v6, %v9758_v8  ;;  %12015 = vst [vmem:[#allocation39_spill] sm:$0xff] %v9786_v3  ;;  %v9790_v6 = vpop.f32.mrf.mxu0  ;;  %v12044_v4 = vld [vmem:[#allocation100_spill] sm:$0xff] }
 0x3c4   : > { %5783 = vrot.lane.b32.xlu1 %v5782_v43, %s6166_s14  ;;  %v5422_v43 = vld [vmem:[%s11159_s0 + $0x190] sm:$0xff]  ;;  %12016 = vst [vmem:[#allocation43_spill] sm:$0xff] %v9788_v36  ;;  %3728 = vmatpush.bf16.msrb.mxu1 %v5413_v26 }
 0x3c5   : > { %3776 = vmatpush.bf16.msra.mxu2 %v5422_v43  ;;  %12017 = vst [vmem:[#allocation46_spill] sm:$0xff] %v9790_v6  ;;  %v5429_v43 = vld [vmem:[%s11159_s0 + $0x1c8] sm:$0xff]  ;;  %v5420_v6 = vld [vmem:[%s11159_s0 + $0x180] sm:$0xff] }
 0x3c6   : > { %12018 = vst [vmem:[#allocation42_spill] sm:$0xff] %v9801_v19  ;;  %3826 = vmatpush.bf16.msra.mxu3 %v5429_v43  ;;  %v3599_v3 = vpop.f32.mrf.mxu2 }
 0x3c7   : > { %v3550_v47 = vpop.f32.mrf.mxu1 }
 0x3c8   : > { %v9817_v26 = vpop.f32.mrf.mxu3 }
 0x3c9   : > { %12019 = vst [vmem:[#allocation56_spill] sm:$0xff] %v9817_v26 }
 0x3cb   : > { %5793 = vrot.lane.b32.xlu2 %v5792_v35, %s6166_s14  ;;  %5788 = vrot.lane.b32.xlu0 %v5787_v33, %s6166_s14  ;;  %v5421_v35 = vld [vmem:[%s11159_s0 + $0x188] sm:$0xff] }
 0x3cc   : > { %v5405_v33 = vld [vmem:[%s11159_s0 + $0x108] sm:$0xff]  ;;  %3777 = vmatpush.bf16.msra.mxu2 %v5421_v35  ;;  %v5404_v35 = vld [vmem:[%s11159_s0 + $0x100] sm:$0xff] }
 0x3cd   : > { %3679 = vmatpush.bf16.msrb.mxu0 %v5405_v33  ;;  %v5428_v33 = vld [vmem:[%s11159_s0 + $0x1c0] sm:$0xff] }
 0x3ce   : > { %3827 = vmatpush.bf16.msra.mxu3 %v5428_v33 }
 0x3d0   : > { %3778 = vmatpush.bf16.msra.mxu2 %v5420_v6 }
 0x3d1   : > { %3680 = vmatpush.bf16.msrb.mxu0 %v5404_v35 }
 0x3d5   : > { %v3648_v6 = vpop.f32.mrf.mxu3 }
 0x3d7   : > { %v3501_v44 = vpop.f32.mrf.mxu0 }
 0x3d8   : > { %v3551_v58 = vadd.f32 %v3550_v47, %v3501_v44  ;;  %v9815_v43 = vpop.permute.xlu2 %5658  ;;  %v2364_v47 = vadd.s32 120, %v8292_v46  ;;  %v5412_v44 = vld [vmem:[%s11159_s0 + $0x140] sm:$0xff] }
 0x3d9   : > { %3729 = vmatpush.bf16.msrb.mxu1 %v5412_v44 }
 0x3da   : > { %v3600_v36 = vadd.f32 %v3599_v3, %v3551_v58  ;;  %v2363_v3 = vadd.s32 112, %v8292_v46  ;;  %v9824_v58 = vpop.f32.mrf.mxu1  ;;  %v9832_v33 = vadd.s32 %v8324_v28, %v2364_v47 }
 0x3db   : > { %12020 = vst [vmem:[#allocation82_spill] sm:$0xff] %v9824_v58  ;;  %v9841_v58 = vadd.s32 512, %v8357_v45 }
 0x3dc   : > { %v9829_v35 = vadd.s32 %v8324_v28, %v2363_v3  ;;  %12022 = vst [vmem:[#allocation91_spill] sm:$0xff] %v9832_v33  ;;  %v9836_v8 = vadd.f32 %v3648_v6, %v3600_v36  ;;  %vm2509_vm9 = vcmp.lt.s32.totalorder %v8357_v45, %v9832_v33  ;;  %vm2637_vm11 = vcmp.eq.s32.totalorder %v8357_v45, %v9832_v33 }
 0x3dd   : > { %vm2510_vm15 = vcmp.lt.s32.totalorder %v8465_v32, %v9832_v33  ;;  %vm2638_vm13 = vcmp.eq.s32.totalorder %v8465_v32, %v9832_v33  ;;  %vm2511_vm2 = vcmp.lt.s32.totalorder %v8475_v53, %v9832_v33  ;;  %vm2639_vm4 = vcmp.eq.s32.totalorder %v8475_v53, %v9832_v33 }
 0x3de   : > { %12024 = vst [vmem:[#allocation58_spill] sm:$0xff] %v9836_v8  ;;  %vm2501_vm8 = vcmp.lt.s32.totalorder %v8357_v45, %v9829_v35  ;;  %vm2629_vm10 = vcmp.eq.s32.totalorder %v8357_v45, %v9829_v35  ;;  %vm2502_vm12 = vcmp.lt.s32.totalorder %v8465_v32, %v9829_v35  ;;  %vm2630_vm1 = vcmp.eq.s32.totalorder %v8465_v32, %v9829_v35 }
 0x3df   : > { %v9826_v19 = vpop.f32.mrf.mxu0  ;;  %vm2503_vm14 = vcmp.lt.s32.totalorder %v8475_v53, %v9829_v35  ;;  %vm2631_vm3 = vcmp.eq.s32.totalorder %v8475_v53, %v9829_v35  ;;  %vm2640_vm5 = vcmp.eq.s32.totalorder %v8529_v29, %v9832_v33  ;;  %vm2512_vm6 = vcmp.lt.s32.totalorder %v8529_v29, %v9832_v33 }
 0x3e0   : > { %12021 = vst [vmem:[#allocation53_spill] sm:$0xff] %v9826_v19  ;;  %vm2632_vm7 = vcmp.eq.s32.totalorder %v8529_v29, %v9829_v35 }
 0x3e1   : > { %v9834_v26 = vpop.permute.xlu2 %5673 }
 0x3e2   : > { %12023 = vst [vmem:[#allocation54_spill] sm:$0xff] %v9834_v26  ;;  %v12027_v30 = vunpack.i.l.bf16 %v9834_v26 }
 0x3e4   : > { %v3555_v6 = vpop.f32.mrf.mxu1 }
 0x3ef   : > { %v3506_v14 = vpop.f32.mrf.mxu0 }
 0x3f0   : > { %v5654_v28 = vpop.permute.xlu0 %5653  ;;  %v9865_v46 = vadd.f32 %v3555_v6, %v3506_v14 }
 0x3f1   : > { %v5664_v36 = vpop.permute.xlu1 %5663  ;;  %v5656_v3 = vunpack.i.h.bf16 %v5654_v28  ;;  %v5655_v47 = vunpack.i.l.bf16 %v5654_v28  ;;  %v12025_v28 = vunpack.i.h.bf16 %v9815_v43 }
 0x3f2   : > { %v5666_v19 = vunpack.i.h.bf16 %v5664_v36  ;;  %v5665_v44 = vunpack.i.l.bf16 %v5664_v36  ;;  %v12026_v36 = vunpack.i.h.bf16 %v9834_v26 }
 0x3f3   : > { %v2315_v8 = vsel %vm2219_vm0, %v5656_v3, %v12025_v28  ;;  %v12028_v28 = vunpack.i.l.bf16 %v9815_v43 }
 0x3f4   : > { %v2347_v61 = vsel %vm2219_vm0, %v12026_v36, %v5666_v19  ;;  %v2346_v14 = vsel %vm2219_vm0, %v12027_v30, %v5665_v44  ;;  %v2331_v6 = vsel %vm2219_vm0, %v5666_v19, %v5656_v3  ;;  %v2330_v11 = vsel %vm2219_vm0, %v5665_v44, %v5655_v47  ;;  %v5689_v19 = vpop.permute.xlu2 %5688  ;;  %v12029_v3 = vld [vmem:[#allocation32_spill] sm:$0xff] }
 0x3f5   : > { %v2314_v50 = vsel %vm2219_vm0, %v5655_v47, %v12028_v28  ;;  %v2757_v36 = vsel %vm2629_vm10, 0.0, %v2346_v14  ;;  %v2765_v26 = vsel %vm2637_vm11, 0.0, %v2347_v61  ;;  %v2766_v30 = vsel %vm2638_vm13, 0.0, %v2331_v6  ;;  %v12031_v61 = vld [vmem:[#allocation81_spill] sm:$0xff] }
 0x3f6   : > { %v2885_v28 = vsel %vm2501_vm8, %v12029_v3, %v2757_v36  ;;  %v2893_v44 = vsel %vm2509_vm9, %v12030_v39, %v2765_v26  ;;  %v2758_v47 = vsel %vm2630_vm1, 0.0, %v2330_v11  ;;  %v2894_v14 = vsel %vm2510_vm15, %v12031_v61, %v2766_v30 }
 0x3f7   : > { %v2957_v6 = vpack.c.bf16 %v2893_v44, %v2885_v28  ;;  %v2886_v36 = vsel %vm2502_vm12, %v12032_v17, %v2758_v47  ;;  %v2759_v3 = vsel %vm2631_vm3, 0.0, %v2314_v50  ;;  %v2767_v39 = vsel %vm2639_vm4, 0.0, %v2315_v8  ;;  %v12033_v28 = vld [vmem:[#allocation26_spill] sm:$0xff]  ;;  %v12034_v17 = vld [vmem:[#allocation97_spill] sm:$0xff] }
 0x3f8   : > { %v9926_v11 = vadd.s32 640, %v8357_v45  ;;  %v2958_v30 = vpack.c.bf16 %v2894_v14, %v2886_v36  ;;  %v2887_v32 = vsel %vm2503_vm14, %v12033_v28, %v2759_v3  ;;  %v2895_v50 = vsel %vm2511_vm2, %v12034_v17, %v2767_v39 }
 0x3f9   : > { %v5691_v44 = vunpack.i.h.bf16 %v5689_v19  ;;  %3520 = vmatmul.bf16.gmra.mxu0 %v2957_v6  ;;  %v5690_v14 = vunpack.i.l.bf16 %v5689_v19  ;;  %v2959_v36 = vpack.c.bf16 %v2895_v50, %v2887_v32  ;;  %v12035_v6 = vunpack.i.h.bf16 %v9815_v43  ;;  %v12036_v19 = vld [vmem:[#allocation83_spill] sm:$0xff]  ;;  %v9969_v50 = vpop.f32.mrf.mxu2 }
 0x3fa   : > { %v9928_v26 = vpop.permute.xlu0 %5668  ;;  %3569 = vmatmul.bf16.gmra.mxu1 %v2958_v30  ;;  %vm2504_vm8 = vcmp.lt.s32.totalorder %v8529_v29, %v9829_v35  ;;  %vm2521_vm9 = vcmp.eq.s32.totalorder %v9841_v58, %v12036_v19  ;;  %v12037_v30 = vunpack.i.l.bf16 %v9815_v43  ;;  %v9967_v32 = vadd.s32 768, %v8357_v45  ;;  %12038 = vst [vmem:[#allocation62_spill] sm:$0xff] %v9969_v50  ;;  %v12040_v43 = vld [vmem:[#allocation110_spill] sm:$0xff]  ;;  %v9987_v50 = vpop.f32.mrf.mxu3 }
 0x3fb   : > { %v11489_v8 = vunpack.i.h.bf16 %v9928_v26  ;;  %v11490_v61 = vunpack.i.l.bf16 %v9928_v26  ;;  %3618 = vmatmul.bf16.gmra.mxu2 %v2959_v36  ;;  %vm2522_vm11 = vcmp.eq.s32.totalorder %v9926_v11, %v12036_v19  ;;  %12043 = vst [vmem:[#allocation50_spill] sm:$0xff] %v9987_v50  ;;  %vm2393_vm15 = vcmp.lt.s32.totalorder %v9841_v58, %v12036_v19 }
 0x3fc   : > { %vm2394_vm13 = vcmp.lt.s32.totalorder %v9926_v11, %v12036_v19  ;;  %vm2395_vm4 = vcmp.lt.s32.totalorder %v9967_v32, %v12036_v19 }
 0x3fd   : > { %v9938_v47 = vpop.permute.xlu1 %5678  ;;  %v2299_v39 = vsel %vm2219_vm0, %v12035_v6, %v11489_v8  ;;  %v2298_v28 = vsel %vm2219_vm0, %v12037_v30, %v11490_v61  ;;  %v12041_v8 = vunpack.i.l.bf16 %v12040_v43  ;;  %v12042_v30 = vunpack.i.h.bf16 %v12040_v43 }
 0x3fe   : > { %v5681_v53 = vunpack.i.h.bf16 %v9938_v47  ;;  %v5680_v3 = vunpack.i.l.bf16 %v9938_v47  ;;  %v2768_v17 = vsel %vm2640_vm5, 0.0, %v2299_v39  ;;  %v12039_v47 = vld [vmem:[#allocation84_spill] sm:$0xff]  ;;  %v2760_v29 = vsel %vm2632_vm7, 0.0, %v2298_v28  ;;  %v9989_v28 = vpop.f32.mrf.mxu1 }
 0x3ff   : > { %vm2529_vm10 = vcmp.eq.s32.totalorder %v9841_v58, %v12039_v47  ;;  %v2896_v6 = vsel %vm2512_vm6, %v9113_v34, %v2768_v17  ;;  %v2268_v36 = vsel %vm2219_vm0, %v12041_v8, %v5690_v14  ;;  %v2269_v39 = vsel %vm2219_vm0, %v12042_v30, %v5691_v44  ;;  %v5451_v30 = vld [vmem:[%s11163_s4 + $0x38] sm:$0xff] }
 0x400   : > { %vm2530_vm12 = vcmp.eq.s32.totalorder %v9926_v11, %v12039_v47  ;;  %v2888_v61 = vsel %vm2504_vm8, %v9249_v56, %v2760_v29  ;;  %v2253_v34 = vsel %vm2219_vm0, %v5691_v44, %v5681_v53  ;;  %v2252_v8 = vsel %vm2219_vm0, %v5690_v14, %v5680_v3  ;;  %v3508_v56 = vpop.f32.mrf.mxu0  ;;  %3957 = vmatpush.bf16.msra.mxu0 %v5451_v30  ;;  %v5443_v30 = vld [vmem:[%s11162_s3 + $0x38] sm:$0xff] }
 0x401   : > { %v9996_v17 = vadd.s32 896, %v8357_v45  ;;  %v2960_v43 = vpack.c.bf16 %v2896_v6, %v2888_v61  ;;  %vm2401_vm1 = vcmp.lt.s32.totalorder %v9841_v58, %v12039_v47  ;;  %vm2531_vm14 = vcmp.eq.s32.totalorder %v9967_v32, %v12039_v47  ;;  %4054 = vmatpush.bf16.msra.mxu1 %v5443_v30 }
 0x402   : > { %v2649_v14 = vsel %vm2521_vm9, 0.0, %v2268_v36  ;;  %v2657_v61 = vsel %vm2529_vm10, 0.0, %v2269_v39  ;;  %vm2402_vm2 = vcmp.lt.s32.totalorder %v9926_v11, %v12039_v47  ;;  %v2658_v50 = vsel %vm2530_vm12, 0.0, %v2253_v34 }
 0x403   : > { %3667 = vmatmul.bf16.gmra.mxu3 %v2960_v43  ;;  %v2650_v36 = vsel %vm2522_vm11, 0.0, %v2252_v8  ;;  %vm2403_vm3 = vcmp.lt.s32.totalorder %v9967_v32, %v12039_v47  ;;  %vm2523_vm5 = vcmp.eq.s32.totalorder %v9967_v32, %v12036_v19  ;;  %vm2524_vm6 = vcmp.eq.s32.totalorder %v9996_v17, %v12036_v19 }
 0x404   : > { %v2777_v34 = vsel %vm2393_vm15, %v9022_v23, %v2649_v14  ;;  %v2785_v8 = vsel %vm2401_vm1, %v9002_v18, %v2657_v61  ;;  %vm2532_vm7 = vcmp.eq.s32.totalorder %v9996_v17, %v12039_v47  ;;  %v2778_v23 = vsel %vm2394_vm13, %v8998_v59, %v2650_v36 }
 0x405   : > { %v5684_v44 = vpop.permute.xlu0 %5683  ;;  %v2905_v36 = vpack.c.bf16 %v2785_v8, %v2777_v34  ;;  %vm2396_vm8 = vcmp.lt.s32.totalorder %v9996_v17, %v12036_v19  ;;  %vm2404_vm9 = vcmp.lt.s32.totalorder %v9996_v17, %v12039_v47 }
 0x406   : > { %v5686_v29 = vunpack.i.h.bf16 %v5684_v44  ;;  %v5685_v6 = vunpack.i.l.bf16 %v5684_v44  ;;  %v5704_v44 = vpop.permute.xlu2 %5703 }
 0x407   : > { %v5705_v8 = vunpack.i.l.bf16 %v5704_v44 }
 0x408   : > { %v2237_v39 = vsel %vm2219_vm0, %v5681_v53, %v5686_v29  ;;  %v2786_v53 = vsel %vm2402_vm2, %v8992_v52, %v2658_v50  ;;  %v2236_v18 = vsel %vm2219_vm0, %v5680_v3, %v5685_v6  ;;  %v3604_v61 = vpop.f32.mrf.mxu2  ;;  %v12046_v50 = vunpack.i.l.bf16 %v12044_v4 }
 0x409   : > { %v2659_v43 = vsel %vm2531_vm14, 0.0, %v2237_v39  ;;  %v12045_v39 = vunpack.i.h.bf16 %v12044_v4  ;;  %v3605_v3 = vadd.f32 %v3604_v61, %v9865_v46  ;;  %3681 = vmatmul.bf16.vlgmr.msrb.gmra.mxu0 %v2905_v36  ;;  %v12051_v36 = vld [vmem:[#allocation111_spill] sm:$0xff] }
 0x40a   : > { %v2787_v14 = vsel %vm2403_vm3, %v9006_v1, %v2659_v43  ;;  %v2220_v59 = vsel %vm2219_vm0, %v5685_v6, %v12046_v50  ;;  %v2651_v1 = vsel %vm2523_vm5, 0.0, %v2236_v18  ;;  %v5694_v43 = vpop.permute.xlu1 %5693  ;;  %v5706_v6 = vunpack.i.h.bf16 %v5704_v44  ;;  %v12048_v44 = vld [vmem:[#allocation21_spill] sm:$0xff] }
 0x40b   : > { %v2221_v52 = vsel %vm2219_vm0, %v5686_v29, %v12045_v39  ;;  %v2779_v4 = vsel %vm2395_vm4, %v9039_v54, %v2651_v1  ;;  %v3653_v29 = vpop.f32.mrf.mxu3  ;;  %v2906_v39 = vpack.c.bf16 %v2786_v53, %v2778_v23  ;;  %v3511_v46 = vpop.f32.mrf.mxu0  ;;  %v2652_v22 = vsel %vm2524_vm6, 0.0, %v2220_v59  ;;  %v12047_v23 = vld [vmem:[#allocation108_spill] sm:$0xff]  ;;  %v12049_v1 = vld [vmem:[#allocation22_spill] sm:$0xff] }
 0x40c   : > { %v2907_v18 = vpack.c.bf16 %v2787_v14, %v2779_v4  ;;  %v10077_v50 = vadd.f32 %v3653_v29, %v3605_v3  ;;  %v3560_v34 = vpop.f32.mrf.mxu1  ;;  %v2660_v61 = vsel %vm2532_vm7, 0.0, %v2221_v52  ;;  %v5696_v30 = vunpack.i.h.bf16 %v5694_v43  ;;  %v12050_v3 = vld [vmem:[#allocation109_spill] sm:$0xff] }
 0x40d   : > { %v3561_v33 = vadd.f32 %v3560_v34, %v3511_v46  ;;  %v5699_v54 = vpop.permute.xlu0 %5698  ;;  %3730 = vmatmul.bf16.vlgmr.msrb.gmra.mxu1 %v2906_v39  ;;  %v5695_v53 = vunpack.i.l.bf16 %v5694_v43  ;;  %vm2537_vm10 = vcmp.eq.s32.totalorder %v9841_v58, %v12047_v23  ;;  %v3558_v14 = vadd.f32 %v9989_v28, %v3508_v56 }
 0x40e   : > { %v2788_v52 = vsel %vm2404_vm9, %v12048_v44, %v2660_v61  ;;  %v2780_v59 = vsel %vm2396_vm8, %v12049_v1, %v2652_v22  ;;  %3779 = vmatmul.bf16.vlgmr.msra.gmra.mxu2 %v2907_v18  ;;  %vm2545_vm11 = vcmp.eq.s32.totalorder %v9841_v58, %v12050_v3  ;;  %v12052_v43 = vunpack.i.h.bf16 %v12051_v36 }
 0x40f   : > { %v12053_v28 = vunpack.i.l.bf16 %v12051_v36  ;;  %v5701_v56 = vunpack.i.h.bf16 %v5699_v54  ;;  %v5700_v29 = vunpack.i.l.bf16 %v5699_v54  ;;  %vm2409_vm12 = vcmp.lt.s32.totalorder %v9841_v58, %v12047_v23 }
 0x410   : > { %v2271_v4 = vsel %vm2219_vm0, %v12052_v43, %v5706_v6  ;;  %v3606_v39 = vpop.f32.mrf.mxu2  ;;  %vm2538_vm15 = vcmp.eq.s32.totalorder %v9926_v11, %v12047_v23  ;;  %v2255_v22 = vsel %vm2219_vm0, %v5706_v6, %v5696_v30  ;;  %v2254_v19 = vsel %vm2219_vm0, %v5705_v8, %v5695_v53 }
 0x411   : > { %v2270_v47 = vsel %vm2219_vm0, %v12053_v28, %v5705_v8  ;;  %v3607_v46 = vadd.f32 %v3606_v39, %v3558_v14  ;;  %v2908_v18 = vpack.c.bf16 %v2788_v52, %v2780_v59  ;;  %vm2546_vm1 = vcmp.eq.s32.totalorder %v9926_v11, %v12050_v3  ;;  %v5450_v8 = vld [vmem:[%s11163_s4 + $0x30] sm:$0xff]  ;;  %v5719_v59 = vpop.permute.xlu2 %5718 }
 0x412   : > { %vm2417_vm13 = vcmp.lt.s32.totalorder %v9841_v58, %v12050_v3  ;;  %v2665_v44 = vsel %vm2537_vm10, 0.0, %v2270_v47  ;;  %v2673_v6 = vsel %vm2545_vm11, 0.0, %v2271_v4  ;;  %v2239_v52 = vsel %vm2219_vm0, %v5696_v30, %v5701_v56  ;;  %3958 = vmatpush.bf16.msra.mxu0 %v5450_v8  ;;  %v12054_v47 = vld [vmem:[#allocation112_spill] sm:$0xff] }
 0x413   : > { %v3655_v34 = vpop.f32.mrf.mxu3  ;;  %v3513_v54 = vpop.f32.mrf.mxu0  ;;  %v2238_v1 = vsel %vm2219_vm0, %v5695_v53, %v5700_v29  ;;  %3828 = vmatmul.bf16.vlgmr.msra.gmra.mxu3 %v2908_v18  ;;  %vm2539_vm14 = vcmp.eq.s32.totalorder %v9967_v32, %v12047_v23  ;;  %vm2547_vm2 = vcmp.eq.s32.totalorder %v9967_v32, %v12050_v3  ;;  %vm2410_vm3 = vcmp.lt.s32.totalorder %v9926_v11, %v12047_v23 }
 0x414   : > { %v10116_v61 = vadd.f32 %v3655_v34, %v3607_v46  ;;  %v3562_v14 = vpop.f32.mrf.mxu1  ;;  %vm2418_vm4 = vcmp.lt.s32.totalorder %v9926_v11, %v12050_v3  ;;  %v2666_v30 = vsel %vm2538_vm15, 0.0, %v2254_v19  ;;  %v2674_v53 = vsel %vm2546_vm1, 0.0, %v2255_v22 }
 0x415   : > { %v2793_v36 = vsel %vm2409_vm12, %v9076_v13, %v2665_v44  ;;  %v2801_v43 = vsel %vm2417_vm13, %v9080_v57, %v2673_v6  ;;  %vm2411_vm5 = vcmp.lt.s32.totalorder %v9967_v32, %v12047_v23  ;;  %vm2419_vm6 = vcmp.lt.s32.totalorder %v9967_v32, %v12050_v3  ;;  %v5442_v57 = vld [vmem:[%s11162_s3 + $0x30] sm:$0xff] }
 0x416   : > { %v2667_v4 = vsel %vm2539_vm14, 0.0, %v2238_v1  ;;  %v2675_v28 = vsel %vm2547_vm2, 0.0, %v2239_v52  ;;  %v12055_v39 = vunpack.i.h.bf16 %v12054_v47  ;;  %v2794_v13 = vsel %vm2410_vm3, %v9072_v12, %v2666_v30  ;;  %v5709_v12 = vpop.permute.xlu1 %5708  ;;  %4055 = vmatpush.bf16.msra.mxu1 %v5442_v57 }
 0x417   : > { %v2802_v19 = vsel %vm2418_vm4, %v9051_v10, %v2674_v53  ;;  %v12056_v18 = vunpack.i.l.bf16 %v12054_v47  ;;  %vm2540_vm7 = vcmp.eq.s32.totalorder %v9996_v17, %v12047_v23  ;;  %vm2548_vm8 = vcmp.eq.s32.totalorder %v9996_v17, %v12050_v3  ;;  %v12057_v47 = vld [vmem:[#allocation113_spill] sm:$0xff] }
 0x418   : > { %v2223_v46 = vsel %vm2219_vm0, %v5701_v56, %v12055_v39  ;;  %v3609_v22 = vpop.f32.mrf.mxu2  ;;  %v5721_v56 = vunpack.i.h.bf16 %v5719_v59  ;;  %v2913_v10 = vpack.c.bf16 %v2801_v43, %v2793_v36  ;;  %v2795_v8 = vsel %vm2411_vm5, %v9084_v40, %v2667_v4  ;;  %v5714_v4 = vpop.permute.xlu0 %5713 }
 0x419   : > { %v2222_v34 = vsel %vm2219_vm0, %v5700_v29, %v12056_v18  ;;  %v3610_v44 = vadd.f32 %v3609_v22, %v3561_v33  ;;  %v2803_v33 = vsel %vm2419_vm6, %v9088_v38, %v2675_v28  ;;  %v5720_v29 = vunpack.i.l.bf16 %v5719_v59  ;;  %v10204_v57 = vpop.permute.xlu2 %5733 }
 0x41a   : > { %v2914_v53 = vpack.c.bf16 %v2802_v19, %v2794_v13  ;;  %vm2412_vm9 = vcmp.lt.s32.totalorder %v9996_v17, %v12047_v23  ;;  %3686 = vmatmul.bf16.gmra.mxu0 %v2913_v10  ;;  %vm2420_vm10 = vcmp.lt.s32.totalorder %v9996_v17, %v12050_v3  ;;  %v2668_v40 = vsel %vm2540_vm7, 0.0, %v2222_v34  ;;  %v12060_v3 = vld [vmem:[#allocation31_spill] sm:$0xff] }
 0x41b   : > { %v3658_v6 = vpop.f32.mrf.mxu3  ;;  %v2676_v38 = vsel %vm2548_vm8, 0.0, %v2223_v46  ;;  %v5711_v59 = vunpack.i.h.bf16 %v5709_v12  ;;  %v5710_v43 = vunpack.i.l.bf16 %v5709_v12  ;;  %v2915_v28 = vpack.c.bf16 %v2803_v33, %v2795_v8  ;;  %v12061_v34 = vld [vmem:[#allocation15_spill] sm:$0xff]  ;;  %v12062_v8 = vld [vmem:[#allocation17_spill] sm:$0xff] }
 0x41c   : > { %v10184_v52 = vadd.f32 %v3658_v6, %v3610_v44  ;;  %v3516_v1 = vpop.f32.mrf.mxu0  ;;  %v3565_v30 = vpop.f32.mrf.mxu1  ;;  %v12058_v39 = vunpack.i.h.bf16 %v12057_v47  ;;  %v12059_v13 = vunpack.i.l.bf16 %v12057_v47  ;;  %v3563_v18 = vadd.f32 %v3562_v14, %v3513_v54  ;;  %v12063_v33 = vld [vmem:[#allocation65_spill] sm:$0xff] }
 0x41d   : > { %v3566_v36 = vadd.f32 %v3565_v30, %v3516_v1  ;;  %3735 = vmatmul.bf16.gmra.mxu1 %v2914_v53  ;;  %v2796_v46 = vsel %vm2412_vm9, %v12060_v3, %v2668_v40  ;;  %v2804_v44 = vsel %vm2420_vm10, %v12061_v34, %v2676_v38  ;;  %v5716_v12 = vunpack.i.h.bf16 %v5714_v4 }
 0x41e   : > { %v2273_v22 = vsel %vm2219_vm0, %v12058_v39, %v5721_v56  ;;  %v2272_v19 = vsel %vm2219_vm0, %v12059_v13, %v5720_v29  ;;  %3784 = vmatmul.bf16.gmra.mxu2 %v2915_v28  ;;  %v5715_v6 = vunpack.i.l.bf16 %v5714_v4  ;;  %vm2553_vm11 = vcmp.eq.s32.totalorder %v9841_v58, %v12062_v8  ;;  %v5449_v4 = vld [vmem:[%s11163_s4 + $0x28] sm:$0xff] }
 0x41f   : > { %vm2561_vm12 = vcmp.eq.s32.totalorder %v9841_v58, %v12063_v33  ;;  %v2257_v54 = vsel %vm2219_vm0, %v5721_v56, %v5711_v59  ;;  %v2256_v14 = vsel %vm2219_vm0, %v5720_v29, %v5710_v43  ;;  %v2916_v30 = vpack.c.bf16 %v2804_v44, %v2796_v46  ;;  %v5441_v28 = vld [vmem:[%s11162_s3 + $0x28] sm:$0xff]  ;;  %3959 = vmatpush.bf16.msra.mxu0 %v5449_v4 }
 0x420   : > { %v3611_v10 = vpop.f32.mrf.mxu2  ;;  %vm2425_vm15 = vcmp.lt.s32.totalorder %v9841_v58, %v12062_v8  ;;  %vm2554_vm1 = vcmp.eq.s32.totalorder %v9926_v11, %v12062_v8  ;;  %vm2562_vm13 = vcmp.eq.s32.totalorder %v9926_v11, %v12063_v33  ;;  %vm2433_vm14 = vcmp.lt.s32.totalorder %v9841_v58, %v12063_v33  ;;  %4056 = vmatpush.bf16.msra.mxu1 %v5441_v28  ;;  %v12067_v4 = vld [vmem:[#allocation95_spill] sm:$0xff] }
 0x421   : > { %v3612_v1 = vadd.f32 %v3611_v10, %v3563_v18  ;;  %v2681_v56 = vsel %vm2553_vm11, 0.0, %v2272_v19  ;;  %v2689_v40 = vsel %vm2561_vm12, 0.0, %v2273_v22  ;;  %v2241_v29 = vsel %vm2219_vm0, %v5711_v59, %v5716_v12  ;;  %v12064_v19 = vld [vmem:[#allocation96_spill] sm:$0xff]  ;;  %v10262_v34 = vpop.permute.xlu2 %5748 }
 0x422   : > { %v2240_v38 = vsel %vm2219_vm0, %v5710_v43, %v5715_v6  ;;  %vm2555_vm2 = vcmp.eq.s32.totalorder %v9967_v32, %v12062_v8  ;;  %vm2563_vm3 = vcmp.eq.s32.totalorder %v9967_v32, %v12063_v33  ;;  %vm2426_vm4 = vcmp.lt.s32.totalorder %v9926_v11, %v12062_v8 }
 0x423   : > { %v3660_v23 = vpop.f32.mrf.mxu3  ;;  %3833 = vmatmul.bf16.gmra.mxu3 %v2916_v30  ;;  %vm2434_vm5 = vcmp.lt.s32.totalorder %v9926_v11, %v12063_v33  ;;  %v2682_v59 = vsel %vm2554_vm1, 0.0, %v2256_v14  ;;  %v2690_v43 = vsel %vm2562_vm13, 0.0, %v2257_v54  ;;  %v2809_v47 = vsel %vm2425_vm15, %v9449_v2, %v2681_v56 }
 0x424   : > { %v10225_v53 = vadd.f32 %v3660_v23, %v3612_v1  ;;  %v2817_v39 = vsel %vm2433_vm14, %v9480_v24, %v2689_v40  ;;  %vm2427_vm6 = vcmp.lt.s32.totalorder %v9967_v32, %v12062_v8  ;;  %vm2435_vm7 = vcmp.lt.s32.totalorder %v9967_v32, %v12063_v33 }
 0x425   : > { %v2683_v22 = vsel %vm2555_vm2, 0.0, %v2240_v38  ;;  %v2691_v13 = vsel %vm2563_vm3, 0.0, %v2241_v29  ;;  %v12065_v18 = vunpack.i.h.bf16 %v12064_v19  ;;  %v2810_v2 = vsel %vm2426_vm4, %v9379_v27, %v2682_v59  ;;  %v5729_v29 = vpop.permute.xlu0 %5728 }
 0x426   : > { %v2818_v24 = vsel %vm2434_vm5, %v9383_v9, %v2690_v43  ;;  %v12066_v44 = vunpack.i.l.bf16 %v12064_v19  ;;  %vm2556_vm8 = vcmp.eq.s32.totalorder %v9996_v17, %v12062_v8  ;;  %vm2564_vm9 = vcmp.eq.s32.totalorder %v9996_v17, %v12063_v33  ;;  %v12070_v43 = vld [vmem:[#allocation14_spill] sm:$0xff]  ;;  %v12072_v19 = vld [vmem:[#allocation89_spill] sm:$0xff] }
 0x427   : > { %v2225_v3 = vsel %vm2219_vm0, %v5716_v12, %v12065_v18  ;;  %v5724_v12 = vpop.permute.xlu1 %5723  ;;  %v2921_v1 = vpack.c.bf16 %v2817_v39, %v2809_v47  ;;  %v2811_v27 = vsel %vm2427_vm6, %v9529_v5, %v2683_v22  ;;  %v2819_v9 = vsel %vm2435_vm7, %v9484_v63, %v2691_v13  ;;  %v12071_v47 = vld [vmem:[#allocation47_spill] sm:$0xff]  ;;  %v12073_v18 = vld [vmem:[#allocation90_spill] sm:$0xff] }
 0x428   : > { %v3614_v46 = vpop.f32.mrf.mxu2  ;;  %v2224_v10 = vsel %vm2219_vm0, %v5715_v6, %v12066_v44  ;;  %v5735_v6 = vunpack.i.l.bf16 %v10204_v57  ;;  %v2922_v30 = vpack.c.bf16 %v2818_v24, %v2810_v2  ;;  %vm2428_vm10 = vcmp.lt.s32.totalorder %v9996_v17, %v12062_v8 }
 0x429   : > { %v3615_v54 = vadd.f32 %v3614_v46, %v3566_v36  ;;  %v5736_v36 = vunpack.i.h.bf16 %v10204_v57  ;;  %vm2436_vm11 = vcmp.lt.s32.totalorder %v9996_v17, %v12063_v33  ;;  %v2684_v5 = vsel %vm2556_vm8, 0.0, %v2224_v10  ;;  %v10310_v24 = vpop.permute.xlu2 %5763 }
 0x42a   : > { %3691 = vmatmul.bf16.gmra.mxu0 %v2921_v1  ;;  %v2692_v56 = vsel %vm2564_vm9, 0.0, %v2225_v3  ;;  %v5726_v40 = vunpack.i.h.bf16 %v5724_v12  ;;  %v2923_v63 = vpack.c.bf16 %v2819_v9, %v2811_v27  ;;  %v5725_v38 = vunpack.i.l.bf16 %v5724_v12  ;;  %v5440_v1 = vld [vmem:[%s11162_s3 + $0x20] sm:$0xff] }
 0x42b   : > { %v3663_v14 = vpop.f32.mrf.mxu3  ;;  %v12068_v28 = vunpack.i.h.bf16 %v12067_v4  ;;  %v12069_v59 = vunpack.i.l.bf16 %v12067_v4  ;;  %v2812_v33 = vsel %vm2428_vm10, %v12070_v43, %v2684_v5  ;;  %v2820_v39 = vsel %vm2436_vm11, %v12071_v47, %v2692_v56  ;;  %4057 = vmatpush.bf16.msra.mxu1 %v5440_v1  ;;  %v12083_v1 = vld [vmem:[#allocation93_spill] sm:$0xff] }
 0x42c   : > { %v10282_v23 = vadd.f32 %v3663_v14, %v3615_v54  ;;  %v5731_v22 = vunpack.i.h.bf16 %v5729_v29  ;;  %v5730_v13 = vunpack.i.l.bf16 %v5729_v29  ;;  %vm2569_vm12 = vcmp.eq.s32.totalorder %v9841_v58, %v12072_v19  ;;  %v5448_v14 = vld [vmem:[%s11163_s4 + $0x20] sm:$0xff] }
 0x42d   : > { %3740 = vmatmul.bf16.gmra.mxu1 %v2922_v30  ;;  %v2275_v57 = vsel %vm2219_vm0, %v12068_v28, %v5736_v36  ;;  %v2274_v8 = vsel %vm2219_vm0, %v12069_v59, %v5735_v6  ;;  %vm2577_vm15 = vcmp.eq.s32.totalorder %v9841_v58, %v12073_v18  ;;  %v2259_v3 = vsel %vm2219_vm0, %v5736_v36, %v5726_v40  ;;  %v12074_v29 = vld [vmem:[#allocation86_spill] sm:$0xff] }
 0x42e   : > { %3789 = vmatmul.bf16.gmra.mxu2 %v2923_v63  ;;  %v2258_v46 = vsel %vm2219_vm0, %v5735_v6, %v5725_v38  ;;  %v2924_v2 = vpack.c.bf16 %v2820_v39, %v2812_v33  ;;  %vm2570_vm1 = vcmp.eq.s32.totalorder %v9926_v11, %v12072_v19  ;;  %vm2578_vm13 = vcmp.eq.s32.totalorder %v9926_v11, %v12073_v18 }
 0x42f   : > { %vm2441_vm14 = vcmp.lt.s32.totalorder %v9841_v58, %v12072_v19  ;;  %vm2449_vm2 = vcmp.lt.s32.totalorder %v9841_v58, %v12073_v18  ;;  %v2697_v44 = vsel %vm2569_vm12, 0.0, %v2274_v8  ;;  %v2705_v10 = vsel %vm2577_vm15, 0.0, %v2275_v57  ;;  %3960 = vmatpush.bf16.msra.mxu0 %v5448_v14  ;;  %v5739_v4 = vpop.permute.xlu1 %5738  ;;  %v12082_v14 = vld [vmem:[#allocation92_spill] sm:$0xff] }
 0x430   : > { %v2243_v54 = vsel %vm2219_vm0, %v5726_v40, %v5731_v22  ;;  %v2242_v12 = vsel %vm2219_vm0, %v5725_v38, %v5730_v13  ;;  %vm2571_vm3 = vcmp.eq.s32.totalorder %v9967_v32, %v12072_v19  ;;  %vm2579_vm4 = vcmp.eq.s32.totalorder %v9967_v32, %v12073_v18 }
 0x431   : > { %vm2442_vm5 = vcmp.lt.s32.totalorder %v9926_v11, %v12072_v19  ;;  %vm2450_vm6 = vcmp.lt.s32.totalorder %v9926_v11, %v12073_v18  ;;  %v2698_v27 = vsel %vm2570_vm1, 0.0, %v2258_v46  ;;  %v2706_v9 = vsel %vm2578_vm13, 0.0, %v2259_v3  ;;  %v10368_v47 = vpop.permute.xlu2 %5778 }
 0x432   : > { %v2825_v36 = vsel %vm2441_vm14, %v9612_v62, %v2697_v44  ;;  %v2833_v6 = vsel %vm2449_vm2, %v9588_v15, %v2705_v10  ;;  %vm2443_vm7 = vcmp.lt.s32.totalorder %v9967_v32, %v12072_v19  ;;  %vm2451_vm8 = vcmp.lt.s32.totalorder %v9967_v32, %v12073_v18  ;;  %v12081_v44 = vld [vmem:[#allocation25_spill] sm:$0xff] }
 0x433   : > { %3838 = vmatmul.bf16.gmra.mxu3 %v2924_v2  ;;  %v2699_v30 = vsel %vm2571_vm3, 0.0, %v2242_v12  ;;  %v2707_v5 = vsel %vm2579_vm4, 0.0, %v2243_v54  ;;  %v2826_v56 = vsel %vm2442_vm5, %v9559_v48, %v2698_v27  ;;  %v2834_v40 = vsel %vm2450_vm6, %v9533_v51, %v2706_v9 }
 0x434   : > { %v12075_v63 = vunpack.i.h.bf16 %v12074_v29  ;;  %v12076_v15 = vunpack.i.l.bf16 %v12074_v29  ;;  %vm2572_vm9 = vcmp.eq.s32.totalorder %v9996_v17, %v12072_v19  ;;  %vm2580_vm10 = vcmp.eq.s32.totalorder %v9996_v17, %v12073_v18 }
 0x435   : > { %v2929_v48 = vpack.c.bf16 %v2833_v6, %v2825_v36  ;;  %v2827_v51 = vsel %vm2443_vm7, %v9616_v16, %v2699_v30  ;;  %v2835_v28 = vsel %vm2451_vm8, %v9592_v0, %v2707_v5  ;;  %v5751_v57 = vunpack.i.h.bf16 %v10262_v34  ;;  %v5744_v16 = vpop.permute.xlu0 %5743 }
 0x436   : > { %v2227_v62 = vsel %vm2219_vm0, %v5731_v22, %v12075_v63  ;;  %v2226_v38 = vsel %vm2219_vm0, %v5730_v13, %v12076_v15  ;;  %v5750_v59 = vunpack.i.l.bf16 %v10262_v34  ;;  %v2930_v8 = vpack.c.bf16 %v2834_v40, %v2826_v56  ;;  %v12077_v13 = vld [vmem:[#allocation49_spill] sm:$0xff] }
 0x437   : > { %vm2444_vm11 = vcmp.lt.s32.totalorder %v9996_v17, %v12072_v19  ;;  %vm2452_vm12 = vcmp.lt.s32.totalorder %v9996_v17, %v12073_v18  ;;  %v2700_v43 = vsel %vm2572_vm9, 0.0, %v2226_v38  ;;  %v2708_v33 = vsel %vm2580_vm10, 0.0, %v2227_v62  ;;  %v12080_v18 = vld [vmem:[#allocation4_spill] sm:$0xff]  ;;  %v5447_v63 = vld [vmem:[%s11163_s4 + $0x18] sm:$0xff] }
 0x438   : > { %v5741_v39 = vunpack.i.h.bf16 %v5739_v4  ;;  %v2931_v0 = vpack.c.bf16 %v2835_v28, %v2827_v51  ;;  %v5740_v22 = vunpack.i.l.bf16 %v5739_v4  ;;  %v12078_v3 = vunpack.i.h.bf16 %v12077_v13  ;;  %v5439_v62 = vld [vmem:[%s11162_s3 + $0x18] sm:$0xff]  ;;  %3961 = vmatpush.bf16.msra.mxu0 %v5447_v63 }
 0x439   : > { %v12079_v46 = vunpack.i.l.bf16 %v12077_v13  ;;  %v2828_v2 = vsel %vm2444_vm11, %v12080_v18, %v2700_v43  ;;  %v2836_v10 = vsel %vm2452_vm12, %v12081_v44, %v2708_v33  ;;  %v5746_v54 = vunpack.i.h.bf16 %v5744_v16  ;;  %4058 = vmatpush.bf16.msra.mxu1 %v5439_v62  ;;  %v10418_v51 = vpop.permute.xlu2 %5793  ;;  %v5754_v43 = vpop.permute.xlu1 %5753 }
 0x43a   : > { %3696 = vmatmul.bf16.gmra.mxu0 %v2929_v48  ;;  %v2277_v34 = vsel %vm2219_vm0, %v12078_v3, %v5751_v57  ;;  %v5745_v12 = vunpack.i.l.bf16 %v5744_v16  ;;  %vm2585_vm15 = vcmp.eq.s32.totalorder %v9841_v58, %v12082_v14  ;;  %vm2593_vm1 = vcmp.eq.s32.totalorder %v9841_v58, %v12083_v1  ;;  %v12086_v16 = vld [vmem:[#allocation45_spill] sm:$0xff] }
 0x43b   : > { %v2276_v19 = vsel %vm2219_vm0, %v12079_v46, %v5750_v59  ;;  %v5766_v27 = vunpack.i.h.bf16 %v10310_v24  ;;  %v5765_v9 = vunpack.i.l.bf16 %v10310_v24  ;;  %v2261_v36 = vsel %vm2219_vm0, %v5751_v57, %v5741_v39 }
 0x43c   : > { %v2260_v6 = vsel %vm2219_vm0, %v5750_v59, %v5740_v22  ;;  %v2932_v30 = vpack.c.bf16 %v2836_v10, %v2828_v2  ;;  %vm2586_vm13 = vcmp.eq.s32.totalorder %v9926_v11, %v12082_v14  ;;  %vm2594_vm14 = vcmp.eq.s32.totalorder %v9926_v11, %v12083_v1 }
 0x43d   : > { %3745 = vmatmul.bf16.gmra.mxu1 %v2930_v8  ;;  %vm2457_vm2 = vcmp.lt.s32.totalorder %v9841_v58, %v12082_v14  ;;  %vm2465_vm3 = vcmp.lt.s32.totalorder %v9841_v58, %v12083_v1  ;;  %v2713_v5 = vsel %vm2585_vm15, 0.0, %v2276_v19  ;;  %v2721_v56 = vsel %vm2593_vm1, 0.0, %v2277_v34  ;;  %v10457_v3 = vpop.permute.xlu0 %5758 }
 0x43e   : > { %3794 = vmatmul.bf16.gmra.mxu2 %v2931_v0  ;;  %v2245_v40 = vsel %vm2219_vm0, %v5741_v39, %v5746_v54  ;;  %v2244_v29 = vsel %vm2219_vm0, %v5740_v22, %v5745_v12  ;;  %vm2587_vm4 = vcmp.eq.s32.totalorder %v9967_v32, %v12082_v14  ;;  %vm2595_vm5 = vcmp.eq.s32.totalorder %v9967_v32, %v12083_v1 }
 0x43f   : > { %vm2458_vm6 = vcmp.lt.s32.totalorder %v9926_v11, %v12082_v14  ;;  %vm2466_vm7 = vcmp.lt.s32.totalorder %v9926_v11, %v12083_v1  ;;  %v2714_v15 = vsel %vm2586_vm13, 0.0, %v2260_v6  ;;  %v2722_v38 = vsel %vm2594_vm14, 0.0, %v2261_v36  ;;  %v12090_v36 = vld [vmem:[#allocation6_spill] sm:$0xff] }
 0x440   : > { %v2841_v4 = vsel %vm2457_vm2, %v9647_v60, %v2713_v5  ;;  %v2849_v48 = vsel %vm2465_vm3, %v9635_v20, %v2721_v56  ;;  %vm2459_vm8 = vcmp.lt.s32.totalorder %v9967_v32, %v12082_v14  ;;  %vm2467_vm9 = vcmp.lt.s32.totalorder %v9967_v32, %v12083_v1 }
 0x441   : > { %v2715_v28 = vsel %vm2587_vm4, 0.0, %v2244_v29  ;;  %v2723_v57 = vsel %vm2595_vm5, 0.0, %v2245_v40  ;;  %v12084_v59 = vunpack.i.h.bf16 %v9176_v41  ;;  %v12085_v20 = vunpack.i.l.bf16 %v9176_v41 }
 0x442   : > { %v2842_v33 = vsel %vm2458_vm6, %v9622_v25, %v2714_v15  ;;  %v2850_v39 = vsel %vm2466_vm7, %v9605_v49, %v2722_v38  ;;  %v12087_v0 = vunpack.i.h.bf16 %v12086_v16  ;;  %v12088_v41 = vunpack.i.l.bf16 %v12086_v16  ;;  %v12096_v16 = vld [vmem:[#allocation34_spill] sm:$0xff] }
 0x443   : > { %3843 = vmatmul.bf16.gmra.mxu3 %v2932_v30  ;;  %v2279_v60 = vsel %vm2219_vm0, %v12084_v59, %v5766_v27  ;;  %v2278_v8 = vsel %vm2219_vm0, %v12085_v20, %v5765_v9  ;;  %vm2588_vm10 = vcmp.eq.s32.totalorder %v9996_v17, %v12082_v14  ;;  %vm2596_vm11 = vcmp.eq.s32.totalorder %v9996_v17, %v12083_v1  ;;  %v12091_v30 = vld [vmem:[#allocation7_spill] sm:$0xff] }
 0x444   : > { %v2229_v22 = vsel %vm2219_vm0, %v5746_v54, %v12087_v0  ;;  %v2228_v13 = vsel %vm2219_vm0, %v5745_v12, %v12088_v41  ;;  %v5796_v25 = vunpack.i.h.bf16 %v10418_v51  ;;  %v2937_v49 = vpack.c.bf16 %v2849_v48, %v2841_v4 }
 0x445   : > { %v2843_v34 = vsel %vm2459_vm8, %v9651_v42, %v2715_v28  ;;  %v2851_v46 = vsel %vm2467_vm9, %v9639_v55, %v2723_v57  ;;  %v5795_v19 = vunpack.i.l.bf16 %v10418_v51  ;;  %v5756_v18 = vunpack.i.h.bf16 %v5754_v43  ;;  %v5444_v51 = vld [vmem:[%s11163_s4] sm:$0xff] }
 0x446   : > { %v5755_v2 = vunpack.i.l.bf16 %v5754_v43  ;;  %v2938_v44 = vpack.c.bf16 %v2850_v39, %v2842_v33  ;;  %vm2460_vm12 = vcmp.lt.s32.totalorder %v9996_v17, %v12082_v14  ;;  %vm2468_vm15 = vcmp.lt.s32.totalorder %v9996_v17, %v12083_v1  ;;  %v12095_v33 = vld [vmem:[#allocation66_spill] sm:$0xff] }
 0x447   : > { %v2716_v10 = vsel %vm2588_vm10, 0.0, %v2228_v13  ;;  %v2724_v54 = vsel %vm2596_vm11, 0.0, %v2229_v22  ;;  %v5761_v42 = vunpack.i.h.bf16 %v10457_v3  ;;  %v2939_v12 = vpack.c.bf16 %v2851_v46, %v2843_v34  ;;  %v12097_v22 = vld [vmem:[#allocation41_spill] sm:$0xff] }
 0x448   : > { %vm2601_vm1 = vcmp.eq.s32.totalorder %v9841_v58, %v9116_v21  ;;  %vm2609_vm13 = vcmp.eq.s32.totalorder %v9841_v58, %v9124_v7  ;;  %v5760_v55 = vunpack.i.l.bf16 %v10457_v3  ;;  %v12089_v14 = vunpack.i.l.bf16 %v9928_v26  ;;  %v12098_v3 = vld [vmem:[#allocation78_spill] sm:$0xff] }
 0x449   : > { %v2844_v6 = vsel %vm2460_vm12, %v12090_v36, %v2716_v10  ;;  %v2852_v5 = vsel %vm2468_vm15, %v12091_v30, %v2724_v54  ;;  %vm2473_vm14 = vcmp.lt.s32.totalorder %v9841_v58, %v9116_v21  ;;  %vm2481_vm2 = vcmp.lt.s32.totalorder %v9841_v58, %v9124_v7  ;;  %v12101_v10 = vld [vmem:[#allocation51_spill] sm:$0xff] }
 0x44a   : > { %3701 = vmatmul.bf16.gmra.mxu0 %v2937_v49  ;;  %v2282_v1 = vsel %vm2219_vm0, %v12089_v14, %v5795_v19  ;;  %v2729_v56 = vsel %vm2601_vm1, 0.0, %v2278_v8  ;;  %v2737_v40 = vsel %vm2609_vm13, 0.0, %v2279_v60  ;;  %v12092_v29 = vunpack.i.h.bf16 %v9928_v26  ;;  %v12094_v8 = vld [vmem:[#allocation44_spill] sm:$0xff] }
 0x44b   : > { %v2263_v62 = vsel %vm2219_vm0, %v5766_v27, %v5756_v18  ;;  %v2262_v15 = vsel %vm2219_vm0, %v5765_v9, %v5755_v2  ;;  %v2247_v38 = vsel %vm2219_vm0, %v5756_v18, %v5761_v42  ;;  %v2246_v4 = vsel %vm2219_vm0, %v5755_v2, %v5760_v55  ;;  %v5446_v9 = vld [vmem:[%s11163_s4 + $0x10] sm:$0xff]  ;;  %v5769_v2 = vpop.permute.xlu1 %5768 }
 0x44c   : > { %v2283_v63 = vsel %vm2219_vm0, %v12092_v29, %v5796_v25  ;;  %v2940_v26 = vpack.c.bf16 %v2852_v5, %v2844_v6  ;;  %vm2602_vm3 = vcmp.eq.s32.totalorder %v9926_v11, %v9116_v21  ;;  %vm2610_vm4 = vcmp.eq.s32.totalorder %v9926_v11, %v9124_v7  ;;  %3962 = vmatpush.bf16.msra.mxu0 %v5446_v9  ;;  %v5774_v5 = vpop.permute.xlu0 %5773  ;;  %v12103_v29 = vld [vmem:[#allocation79_spill] sm:$0xff]  ;;  %v12109_v9 = vld [vmem:[#allocation30_spill] sm:$0xff] }
 0x44d   : > { %3750 = vmatmul.bf16.gmra.mxu1 %v2938_v44  ;;  %v2857_v27 = vsel %vm2473_vm14, %v9686_v31, %v2729_v56  ;;  %v2865_v24 = vsel %vm2481_vm2, %v9674_v37, %v2737_v40  ;;  %vm2474_vm5 = vcmp.lt.s32.totalorder %v9926_v11, %v9116_v21  ;;  %vm2482_vm6 = vcmp.lt.s32.totalorder %v9926_v11, %v9124_v7  ;;  %v5438_v31 = vld [vmem:[%s11162_s3 + $0x10] sm:$0xff]  ;;  %v12093_v37 = vld [vmem:[#allocation91_spill] sm:$0xff] }
 0x44e   : > { %3799 = vmatmul.bf16.gmra.mxu2 %v2939_v12  ;;  %vm2603_vm7 = vcmp.eq.s32.totalorder %v9967_v32, %v9116_v21  ;;  %vm2611_vm8 = vcmp.eq.s32.totalorder %v9967_v32, %v9124_v7  ;;  %vm2505_vm9 = vcmp.lt.s32.totalorder %v9841_v58, %v9829_v35  ;;  %vm2513_vm10 = vcmp.lt.s32.totalorder %v9841_v58, %v12093_v37  ;;  %v12102_v12 = vld [vmem:[#allocation94_spill] sm:$0xff] }
 0x44f   : > { %v2730_v48 = vsel %vm2602_vm3, 0.0, %v2262_v15  ;;  %v2738_v28 = vsel %vm2610_vm4, 0.0, %v2263_v62  ;;  %vm2633_vm11 = vcmp.eq.s32.totalorder %v9841_v58, %v9829_v35  ;;  %vm2641_vm12 = vcmp.eq.s32.totalorder %v9841_v58, %v12093_v37  ;;  %4059 = vmatpush.bf16.msra.mxu1 %v5438_v31  ;;  %v12106_v15 = vld [vmem:[#allocation105_spill] sm:$0xff] }
 0x450   : > { %vm2475_vm15 = vcmp.lt.s32.totalorder %v9967_v32, %v9116_v21  ;;  %vm2483_vm1 = vcmp.lt.s32.totalorder %v9967_v32, %v9124_v7  ;;  %v2761_v57 = vsel %vm2633_vm11, 0.0, %v2282_v1  ;;  %v2769_v59 = vsel %vm2641_vm12, 0.0, %v2283_v63 }
 0x451   : > { %v2731_v60 = vsel %vm2603_vm7, 0.0, %v2246_v4  ;;  %v2739_v20 = vsel %vm2611_vm8, 0.0, %v2247_v38  ;;  %v10547_v43 = vsel %vm2505_vm9, %v12094_v8, %v2761_v57  ;;  %v10550_v39 = vsel %vm2513_vm10, %v12095_v33, %v2769_v59  ;;  %v12107_v38 = vld [vmem:[#allocation103_spill] sm:$0xff] }
 0x452   : > { %v2858_v0 = vsel %vm2474_vm5, %v12096_v16, %v2730_v48  ;;  %v2866_v41 = vsel %vm2482_vm6, %v12097_v22, %v2738_v28  ;;  %v2961_v13 = vpack.c.bf16 %v10550_v39, %v10547_v43  ;;  %v12099_v49 = vunpack.i.l.bf16 %v12098_v3  ;;  %v5445_v8 = vld [vmem:[%s11163_s4 + $0x8] sm:$0xff] }
 0x453   : > { %3848 = vmatmul.bf16.gmra.mxu3 %v2940_v26  ;;  %v12100_v46 = vunpack.i.h.bf16 %v12098_v3  ;;  %vm2604_vm13 = vcmp.eq.s32.totalorder %v9996_v17, %v9116_v21  ;;  %vm2612_vm14 = vcmp.eq.s32.totalorder %v9996_v17, %v9124_v7  ;;  %v2945_v44 = vpack.c.bf16 %v2865_v24, %v2857_v27  ;;  %v12108_v24 = vld [vmem:[#allocation24_spill] sm:$0xff]  ;;  %3963 = vmatpush.bf16.msra.mxu0 %v5445_v8 }
 0x454   : > { %v2230_v34 = vsel %vm2219_vm0, %v5760_v55, %v12099_v49  ;;  %v2859_v54 = vsel %vm2475_vm15, %v12101_v10, %v2731_v60  ;;  %v2867_v55 = vsel %vm2483_vm1, %v12102_v12, %v2739_v20  ;;  %v5780_v14 = vunpack.i.l.bf16 %v10368_v47  ;;  %v12114_v10 = vld [vmem:[#allocation38_spill] sm:$0xff] }
 0x455   : > { %v2231_v18 = vsel %vm2219_vm0, %v5761_v42, %v12100_v46  ;;  %v5781_v42 = vunpack.i.h.bf16 %v10368_v47  ;;  %v2946_v1 = vpack.c.bf16 %v2866_v41, %v2858_v0  ;;  %vm2476_vm2 = vcmp.lt.s32.totalorder %v9996_v17, %v9116_v21  ;;  %v12110_v0 = vld [vmem:[#allocation101_spill] sm:$0xff]  ;;  %v12112_v46 = vld [vmem:[#allocation27_spill] sm:$0xff] }
 0x456   : > { %vm2484_vm3 = vcmp.lt.s32.totalorder %v9996_v17, %v9124_v7  ;;  %v2732_v36 = vsel %vm2604_vm13, 0.0, %v2230_v34  ;;  %v2740_v6 = vsel %vm2612_vm14, 0.0, %v2231_v18  ;;  %v5771_v30 = vunpack.i.h.bf16 %v5769_v2  ;;  %v12111_v41 = vld [vmem:[#allocation61_spill] sm:$0xff] }
 0x457   : > { %v2947_v56 = vpack.c.bf16 %v2867_v55, %v2859_v54  ;;  %v5770_v40 = vunpack.i.l.bf16 %v5769_v2  ;;  %v12104_v63 = vunpack.i.h.bf16 %v12103_v29  ;;  %v12105_v62 = vunpack.i.l.bf16 %v12103_v29  ;;  %v12113_v2 = vld [vmem:[#allocation64_spill] sm:$0xff]  ;;  %3964 = vmatpush.bf16.msra.mxu0 %v5444_v51 }
 0x458   : > { %v2860_v7 = vsel %vm2476_vm2, %v12106_v15, %v2732_v36  ;;  %v2868_v4 = vsel %vm2484_vm3, %v12107_v38, %v2740_v6  ;;  %v5776_v26 = vunpack.i.h.bf16 %v5774_v5  ;;  %v5775_v27 = vunpack.i.l.bf16 %v5774_v5  ;;  %v12117_v36 = vld [vmem:[#allocation99_spill] sm:$0xff] }
 0x459   : > { %v2281_v47 = vsel %vm2219_vm0, %v12104_v63, %v5781_v42  ;;  %v2280_v21 = vsel %vm2219_vm0, %v12105_v62, %v5780_v14  ;;  %vm2617_vm4 = vcmp.eq.s32.totalorder %v9841_v58, %v12108_v24  ;;  %vm2625_vm5 = vcmp.eq.s32.totalorder %v9841_v58, %v12109_v9  ;;  %v12119_v15 = vld [vmem:[#allocation3_spill] sm:$0xff] }
 0x45a   : > { %3706 = vmatmul.bf16.gmra.mxu0 %v2945_v44  ;;  %v2265_v31 = vsel %vm2219_vm0, %v5781_v42, %v5771_v30  ;;  %v2264_v48 = vsel %vm2219_vm0, %v5780_v14, %v5770_v40  ;;  %v2948_v28 = vpack.c.bf16 %v2868_v4, %v2860_v7  ;;  %vm2618_vm6 = vcmp.eq.s32.totalorder %v9926_v11, %v12108_v24  ;;  %v5784_v14 = vpop.permute.xlu1 %5783  ;;  %v12120_v38 = vld [vmem:[#allocation67_spill] sm:$0xff] }
 0x45b   : > { %vm2626_vm7 = vcmp.eq.s32.totalorder %v9926_v11, %v12109_v9  ;;  %vm2489_vm8 = vcmp.lt.s32.totalorder %v9841_v58, %v12108_v24  ;;  %vm2497_vm9 = vcmp.lt.s32.totalorder %v9841_v58, %v12109_v9  ;;  %v2745_v57 = vsel %vm2617_vm4, 0.0, %v2280_v21  ;;  %v5437_v58 = vld [vmem:[%s11162_s3 + $0x8] sm:$0xff] }
 0x45c   : > { %v2753_v59 = vsel %vm2625_vm5, 0.0, %v2281_v47  ;;  %v2249_v60 = vsel %vm2219_vm0, %v5771_v30, %v5776_v26  ;;  %v2248_v20 = vsel %vm2219_vm0, %v5770_v40, %v5775_v27  ;;  %vm2619_vm10 = vcmp.eq.s32.totalorder %v9967_v32, %v12108_v24  ;;  %4060 = vmatpush.bf16.msra.mxu1 %v5437_v58  ;;  %v12118_v30 = vld [vmem:[#allocation2_spill] sm:$0xff]  ;;  %v5789_v47 = vpop.permute.xlu0 %5788 }
 0x45d   : > { %3755 = vmatmul.bf16.gmra.mxu1 %v2946_v1  ;;  %vm2627_vm11 = vcmp.eq.s32.totalorder %v9967_v32, %v12109_v9  ;;  %vm2490_vm12 = vcmp.lt.s32.totalorder %v9926_v11, %v12108_v24  ;;  %vm2498_vm15 = vcmp.lt.s32.totalorder %v9926_v11, %v12109_v9  ;;  %v2746_v33 = vsel %vm2618_vm6, 0.0, %v2264_v48  ;;  %v12121_v58 = vld [vmem:[#allocation18_spill] sm:$0xff] }
 0x45e   : > { %3804 = vmatmul.bf16.gmra.mxu2 %v2947_v56  ;;  %v2754_v16 = vsel %vm2626_vm7, 0.0, %v2265_v31  ;;  %v2873_v22 = vsel %vm2489_vm8, %v12110_v0, %v2745_v57  ;;  %v2881_v3 = vsel %vm2497_vm9, %v12111_v41, %v2753_v59  ;;  %vm2491_vm1 = vcmp.lt.s32.totalorder %v9967_v32, %v12108_v24  ;;  %v10660_v31 = vpop.f32.mrf.mxu0 }
 0x45f   : > { %vm2499_vm13 = vcmp.lt.s32.totalorder %v9967_v32, %v12109_v9  ;;  %v2747_v49 = vsel %vm2619_vm10, 0.0, %v2248_v20  ;;  %v2755_v34 = vsel %vm2627_vm11, 0.0, %v2249_v60  ;;  %v2874_v18 = vsel %vm2490_vm12, %v12112_v46, %v2746_v33 }
 0x460   : > { %v2882_v44 = vsel %vm2498_vm15, %v12113_v2, %v2754_v16  ;;  %v12115_v54 = vunpack.i.h.bf16 %v12114_v10  ;;  %v12116_v55 = vunpack.i.l.bf16 %v12114_v10  ;;  %vm2620_vm14 = vcmp.eq.s32.totalorder %v9996_v17, %v12108_v24  ;;  %v12122_v16 = vld [vmem:[#allocation40_spill] sm:$0xff] }
 0x461   : > { %vm2628_vm2 = vcmp.eq.s32.totalorder %v9996_v17, %v12109_v9  ;;  %v2953_v1 = vpack.c.bf16 %v2881_v3, %v2873_v22  ;;  %v2875_v6 = vsel %vm2491_vm1, %v12117_v36, %v2747_v49  ;;  %v2883_v5 = vsel %vm2499_vm13, %v12118_v30, %v2755_v34  ;;  %v12123_v22 = vld [vmem:[#allocation54_spill] sm:$0xff]  ;;  %v12128_v36 = vld [vmem:[#allocation29_spill] sm:$0xff]  ;;  %v12129_v30 = vld [vmem:[#allocation28_spill] sm:$0xff] }
 0x462   : > { %v2233_v12 = vsel %vm2219_vm0, %v5776_v26, %v12115_v54  ;;  %v2232_v42 = vsel %vm2219_vm0, %v5775_v27, %v12116_v55  ;;  %v2954_v56 = vpack.c.bf16 %v2882_v44, %v2874_v18  ;;  %vm2492_vm3 = vcmp.lt.s32.totalorder %v9996_v17, %v12108_v24  ;;  %v12126_v18 = vld [vmem:[#allocation88_spill] sm:$0xff]  ;;  %v12127_v44 = vld [vmem:[#allocation106_spill] sm:$0xff] }
 0x463   : > { %3853 = vmatmul.bf16.gmra.mxu3 %v2948_v28  ;;  %vm2500_vm4 = vcmp.lt.s32.totalorder %v9996_v17, %v12109_v9  ;;  %v2748_v40 = vsel %vm2620_vm14, 0.0, %v2232_v42  ;;  %v2756_v29 = vsel %vm2628_vm2, 0.0, %v2233_v12  ;;  %v5786_v63 = vunpack.i.h.bf16 %v5784_v14  ;;  %v10666_v9 = vpop.f32.mrf.mxu1 }
 0x464   : > { %v2955_v62 = vpack.c.bf16 %v2883_v5, %v2875_v6  ;;  %v5785_v21 = vunpack.i.l.bf16 %v5784_v14  ;;  %v2876_v7 = vsel %vm2492_vm3, %v12119_v15, %v2748_v40  ;;  %v2884_v4 = vsel %vm2500_vm4, %v12120_v38, %v2756_v29 }
 0x465   : > { %v5791_v26 = vunpack.i.h.bf16 %v5789_v47  ;;  %v5790_v27 = vunpack.i.l.bf16 %v5789_v47  ;;  %v2267_v24 = vsel %vm2219_vm0, %v5796_v25, %v5786_v63  ;;  %v2956_v28 = vpack.c.bf16 %v2884_v4, %v2876_v7  ;;  %v12130_v4 = vld [vmem:[#allocation77_spill] sm:$0xff] }
 0x466   : > { %v2266_v48 = vsel %vm2219_vm0, %v5795_v19, %v5785_v21  ;;  %vm2634_vm5 = vcmp.eq.s32.totalorder %v9926_v11, %v9829_v35  ;;  %vm2642_vm6 = vcmp.eq.s32.totalorder %v9926_v11, %v12093_v37  ;;  %vm2635_vm7 = vcmp.eq.s32.totalorder %v9967_v32, %v9829_v35  ;;  %v5436_v19 = vld [vmem:[%s11162_s3] sm:$0xff] }
 0x467   : > { %v2251_v57 = vsel %vm2219_vm0, %v5786_v63, %v5791_v26  ;;  %v2250_v25 = vsel %vm2219_vm0, %v5785_v21, %v5790_v27  ;;  %vm2643_vm8 = vcmp.eq.s32.totalorder %v9967_v32, %v12093_v37  ;;  %vm2506_vm9 = vcmp.lt.s32.totalorder %v9926_v11, %v9829_v35  ;;  %4061 = vmatpush.bf16.msra.mxu1 %v5436_v19  ;;  %v6150_v21 = vld [vmem:[%s6331_s18] sm:$0xff] }
 0x468   : > { %vm2514_vm10 = vcmp.lt.s32.totalorder %v9926_v11, %v12093_v37  ;;  %v2762_v59 = vsel %vm2634_vm5, 0.0, %v2266_v48  ;;  %v2770_v60 = vsel %vm2642_vm6, 0.0, %v2267_v24  ;;  %vm2507_vm11 = vcmp.lt.s32.totalorder %v9967_v32, %v9829_v35 }
 0x469   : > { %vm2515_vm12 = vcmp.lt.s32.totalorder %v9967_v32, %v12093_v37  ;;  %v2763_v20 = vsel %vm2635_vm7, 0.0, %v2250_v25  ;;  %v2771_v8 = vsel %vm2643_vm8, 0.0, %v2251_v57  ;;  %v2890_v33 = vsel %vm2506_vm9, %v12121_v58, %v2762_v59  ;;  %v10712_v32 = vpop.f32.mrf.mxu2  ;;  %v12133_v25 = vld [vmem:[#allocation36_spill] sm:$0xff]  ;;  %v12134_v59 = vld [vmem:[#allocation37_spill] sm:$0xff] }
 0x46a   : > { %3711 = vmatmul.bf16.gmra.mxu0 %v2953_v1  ;;  %v2898_v0 = vsel %vm2514_vm10, %v12122_v16, %v2770_v60  ;;  %v12124_v41 = vunpack.i.h.bf16 %v12123_v22  ;;  %v12125_v3 = vunpack.i.l.bf16 %v12123_v22  ;;  %vm2636_vm15 = vcmp.eq.s32.totalorder %v9996_v17, %v9829_v35  ;;  %v10723_v1 = vpop.f32.mrf.mxu3  ;;  %v6151_v22 = vld [vmem:[%s6331_s18 + $0x8] sm:$0xff] }
 0x46b   : > { %vm2644_vm1 = vcmp.eq.s32.totalorder %v9996_v17, %v12093_v37  ;;  %v2891_v2 = vsel %vm2507_vm11, %v12126_v18, %v2763_v20  ;;  %v2899_v10 = vsel %vm2515_vm12, %v12127_v44, %v2771_v8  ;;  %v2962_v12 = vpack.c.bf16 %v2898_v0, %v2890_v33 }
 0x46c   : > { %v2235_v11 = vsel %vm2219_vm0, %v5791_v26, %v12124_v41  ;;  %v2234_v49 = vsel %vm2219_vm0, %v5790_v27, %v12125_v3  ;;  %vm2508_vm0 = vcmp.lt.s32.totalorder %v9996_v17, %v9829_v35  ;;  %vm2516_vm13 = vcmp.lt.s32.totalorder %v9996_v17, %v12093_v37  ;;  %v12131_v26 = vld [vmem:[#allocation57_spill] sm:$0xff] }
 0x46d   : > { %3760 = vmatmul.bf16.gmra.mxu1 %v2954_v56  ;;  %v2764_v55 = vsel %vm2636_vm15, 0.0, %v2234_v49  ;;  %v2772_v42 = vsel %vm2644_vm1, 0.0, %v2235_v11  ;;  %v2963_v14 = vpack.c.bf16 %v2899_v10, %v2891_v2  ;;  %v3538_v27 = vadd.f32 %v12131_v26, %v12130_v4  ;;  %v12135_v49 = vld [vmem:[#allocation52_spill] sm:$0xff] }
 0x46e   : > { %3809 = vmatmul.bf16.gmra.mxu2 %v2955_v62  ;;  %v2892_v6 = vsel %vm2508_vm0, %v12128_v36, %v2764_v55  ;;  %v2900_v5 = vsel %vm2516_vm13, %v12129_v30, %v2772_v42  ;;  %v12137_v55 = vld [vmem:[#allocation16_spill] sm:$0xff]  ;;  %v12139_v30 = vld [vmem:[#allocation35_spill] sm:$0xff]  ;;  %vm4123_vm14 = vcmp.lt.s32.totalorder %v8357_v45, 2  ;;  %vm4140_vm2 = vcmask 334848  }
 0x46f   : > { %v2964_v56 = vpack.c.bf16 %v2900_v5, %v2892_v6 }
 0x473   : > { %3858 = vmatmul.bf16.gmra.mxu3 %v2956_v28  ;;  %v12132_v28 = vld [vmem:[#allocation33_spill] sm:$0xff] }
 0x474   : > { %v3587_v57 = vadd.f32 %v12132_v28, %v3538_v27  ;;  %v12142_v27 = vld [vmem:[#allocation42_spill] sm:$0xff] }
 0x476   : > { %v3521_v34 = vpop.f32.mrf.mxu0  ;;  %v3636_v51 = vadd.f32 %v12133_v25, %v3587_v57  ;;  %v12143_v25 = vld [vmem:[#allocation56_spill] sm:$0xff] }
 0x477   : > { %v3570_v46 = vpop.f32.mrf.mxu1 }
 0x478   : > { %v3571_v54 = vadd.f32 %v3570_v46, %v3521_v34  ;;  %v12136_v34 = vld [vmem:[#allocation85_spill] sm:$0xff] }
 0x479   : > { %v3543_v46 = vadd.f32 %v12136_v34, %v12135_v49 }
 0x47a   : > { %3716 = vmatmul.bf16.gmra.mxu0 %v2961_v13 }
 0x47b   : > { %v3592_v42 = vadd.f32 %v12137_v55, %v3543_v46 }
 0x47d   : > { %3765 = vmatmul.bf16.gmra.mxu1 %v2962_v12 }
 0x47e   : > { %3814 = vmatmul.bf16.gmra.mxu2 %v2963_v14  ;;  %v3523_v43 = vpop.f32.mrf.mxu0  ;;  %v3619_v39 = vpop.f32.mrf.mxu2  ;;  %v12138_v14 = vld [vmem:[#allocation23_spill] sm:$0xff] }
 0x47f   : > { %v3572_v13 = vpop.f32.mrf.mxu1  ;;  %v3620_v35 = vadd.f32 %v3619_v39, %v3571_v54  ;;  %v3641_v36 = vadd.f32 %v12138_v14, %v3592_v42  ;;  %v12148_v14 = vld [vmem:[#allocation50_spill] sm:$0xff] }
 0x480   : > { %v3573_v37 = vadd.f32 %v3572_v13, %v3523_v43 }
 0x483   : > { %3863 = vmatmul.bf16.gmra.mxu3 %v2964_v56 }
 0x486   : > { %v3668_v40 = vpop.f32.mrf.mxu3  ;;  %v3682_v29 = vpop.f32.mrf.mxu0 }
 0x487   : > { %v10727_v17 = vadd.f32 %v3668_v40, %v3620_v35  ;;  %v3621_v63 = vpop.f32.mrf.mxu2  ;;  %v3683_v60 = vadd.f32 %v3682_v29, %v12134_v59  ;;  %v12140_v29 = vld [vmem:[#allocation46_spill] sm:$0xff]  ;;  %v12144_v59 = vld [vmem:[#allocation39_spill] sm:$0xff] }
 0x488   : > { %v3622_v62 = vadd.f32 %v3621_v63, %v3573_v37  ;;  %v6152_v37 = vld [vmem:[%s6331_s18 + $0x10] sm:$0xff]  ;;  %v12141_v63 = vld [vmem:[#allocation43_spill] sm:$0xff] }
 0x48a   : > { %v3731_v47 = vpop.f32.mrf.mxu1  ;;  %3965 = vmatmul.bf16.vlgmr.msra.gmra.mxu0 %v6150_v21 }
 0x48b   : > { %v3732_v16 = vadd.f32 %v3731_v47, %v3683_v60  ;;  %v3548_v47 = vadd.f32 %v12141_v63, %v12140_v29 }
 0x48e   : > { %v3670_v15 = vpop.f32.mrf.mxu3  ;;  %v3684_v38 = vpop.f32.mrf.mxu0 }
 0x48f   : > { %v10730_v7 = vadd.f32 %v3670_v15, %v3622_v62  ;;  %v3685_v20 = vadd.f32 %v3684_v38, %v3636_v51 }
 0x491   : > { %v3780_v24 = vpop.f32.mrf.mxu2 }
 0x492   : > { %v3733_v48 = vpop.f32.mrf.mxu1  ;;  %v3781_v41 = vadd.f32 %v3780_v24, %v3732_v16  ;;  %v3597_v24 = vadd.f32 %v12142_v27, %v3548_v47 }
 0x493   : > { %v3734_v0 = vadd.f32 %v3733_v48, %v3685_v20 }
 0x494   : > { %v3646_v51 = vadd.f32 %v12143_v25, %v3597_v24 }
 0x496   : > { %v3829_v19 = vpop.f32.mrf.mxu3 }
 0x497   : > { %v3687_v8 = vpop.f32.mrf.mxu0  ;;  %v3830_v18 = vadd.f32 %v3829_v19, %v3781_v41  ;;  %v12145_v41 = vld [vmem:[#allocation53_spill] sm:$0xff] }
 0x498   : > { %v3688_v5 = vadd.f32 %v3687_v8, %v12139_v30  ;;  %v12149_v30 = vld [vmem:[#allocation58_spill] sm:$0xff] }
 0x499   : > { %v3782_v58 = vpop.f32.mrf.mxu2 }
 0x49a   : > { %v3736_v33 = vpop.f32.mrf.mxu1  ;;  %3970 = vmatmul.bf16.gmra.mxu0 %v6151_v22  ;;  %v3783_v11 = vadd.f32 %v3782_v58, %v3734_v0  ;;  %v6153_v22 = vld [vmem:[%s6331_s18 + $0x18] sm:$0xff] }
 0x49b   : > { %v3737_v35 = vadd.f32 %v3736_v33, %v3688_v5 }
 0x49e   : > { %v3831_v3 = vpop.f32.mrf.mxu3 }
 0x49f   : > { %v3832_v2 = vadd.f32 %v3831_v3, %v3783_v11  ;;  %v3689_v44 = vpop.f32.mrf.mxu0  ;;  %v12146_v11 = vld [vmem:[#allocation82_spill] sm:$0xff] }
 0x4a0   : > { %v3690_v43 = vadd.f32 %v3689_v44, %v3641_v36  ;;  %v3553_v3 = vadd.f32 %v12146_v11, %v12145_v41 }
 0x4a1   : > { %v3785_v10 = vpop.f32.mrf.mxu2  ;;  %v3869_v54 = vpack.c.bf16 %v3832_v2, %v3830_v18 }
 0x4a2   : > { %v3738_v12 = vpop.f32.mrf.mxu1  ;;  %v3786_v62 = vadd.f32 %v3785_v10, %v3737_v35  ;;  %v12147_v10 = vld [vmem:[#allocation62_spill] sm:$0xff] }
 0x4a3   : > { %4062 = vmatmul.bf16.vlgmr.msra.gmra.mxu1 %v3869_v54  ;;  %v3739_v40 = vadd.f32 %v3738_v12, %v3690_v43  ;;  %v3602_v54 = vadd.f32 %v12147_v10, %v3553_v3 }
 0x4a5   : > { %v3651_v36 = vadd.f32 %v12148_v14, %v3602_v54 }
 0x4a6   : > { %v3834_v6 = vpop.f32.mrf.mxu3 }
 0x4a7   : > { %v3692_v39 = vpop.f32.mrf.mxu0  ;;  %v3835_v38 = vadd.f32 %v3834_v6, %v3786_v62 }
 0x4a8   : > { %v3693_v60 = vadd.f32 %v3692_v39, %v12144_v59  ;;  %v6155_v59 = vld [vmem:[%s6331_s18 + $0x28] sm:$0xff] }
 0x4a9   : > { %v3787_v13 = vpop.f32.mrf.mxu2 }
 0x4aa   : > { %v3741_v56 = vpop.f32.mrf.mxu1  ;;  %3975 = vmatmul.bf16.gmra.mxu0 %v6152_v37  ;;  %v3788_v21 = vadd.f32 %v3787_v13, %v3739_v40  ;;  %v6154_v37 = vld [vmem:[%s6331_s18 + $0x20] sm:$0xff] }
 0x4ab   : > { %v3742_v16 = vadd.f32 %v3741_v56, %v3693_v60 }
 0x4ae   : > { %v3836_v15 = vpop.f32.mrf.mxu3 }
 0x4af   : > { %v3837_v4 = vadd.f32 %v3836_v15, %v3788_v21  ;;  %v3694_v26 = vpop.f32.mrf.mxu0 }
 0x4b0   : > { %v3695_v20 = vadd.f32 %v3694_v26, %v3646_v51 }
 0x4b1   : > { %v3790_v48 = vpop.f32.mrf.mxu2  ;;  %v3870_v28 = vpack.c.bf16 %v3837_v4, %v3835_v38 }
 0x4b2   : > { %v3743_v57 = vpop.f32.mrf.mxu1  ;;  %v3791_v49 = vadd.f32 %v3790_v48, %v3742_v16 }
 0x4b3   : > { %4067 = vmatmul.bf16.gmra.mxu1 %v3870_v28  ;;  %v3744_v0 = vadd.f32 %v3743_v57, %v3695_v20 }
 0x4b6   : > { %v3839_v19 = vpop.f32.mrf.mxu3 }
 0x4b7   : > { %v3697_v8 = vpop.f32.mrf.mxu0  ;;  %v3840_v18 = vadd.f32 %v3839_v19, %v3791_v49 }
 0x4b8   : > { %v3698_v5 = vadd.f32 %v3697_v8, %v12149_v30 }
 0x4b9   : > { %v3792_v58 = vpop.f32.mrf.mxu2 }
 0x4ba   : > { %v3746_v33 = vpop.f32.mrf.mxu1  ;;  %3980 = vmatmul.bf16.gmra.mxu0 %v6153_v22  ;;  %v3793_v34 = vadd.f32 %v3792_v58, %v3744_v0 }
 0x4bb   : > { %v3747_v35 = vadd.f32 %v3746_v33, %v3698_v5 }
 0x4be   : > { %v3841_v46 = vpop.f32.mrf.mxu3 }
 0x4bf   : > { %v3842_v2 = vadd.f32 %v3841_v46, %v3793_v34  ;;  %v3699_v44 = vpop.f32.mrf.mxu0 }
 0x4c0   : > { %v3700_v43 = vadd.f32 %v3699_v44, %v3651_v36 }
 0x4c1   : > { %v3795_v12 = vpop.f32.mrf.mxu2  ;;  %v3871_v55 = vpack.c.bf16 %v3842_v2, %v3840_v18  ;;  %v6156_v18 = vld [vmem:[%s6331_s18 + $0x30] sm:$0xff] }
 0x4c2   : > { %v3748_v42 = vpop.f32.mrf.mxu1  ;;  %v3796_v29 = vadd.f32 %v3795_v12, %v3747_v35  ;;  %v3568_v12 = vadd.f32 %v10666_v9, %v10660_v31  ;;  %v6157_v9 = vld [vmem:[%s6331_s18 + $0x38] sm:$0xff] }
 0x4c3   : > { %4072 = vmatmul.bf16.gmra.mxu1 %v3871_v55  ;;  %v3749_v40 = vadd.f32 %v3748_v42, %v3700_v43 }
 0x4c6   : > { %v3844_v6 = vpop.f32.mrf.mxu3 }
 0x4c7   : > { %v3702_v39 = vpop.f32.mrf.mxu0  ;;  %v3845_v62 = vadd.f32 %v3844_v6, %v3796_v29 }
 0x4c8   : > { %v3703_v24 = vadd.f32 %v3702_v39, %v10077_v50 }
 0x4c9   : > { %v3797_v13 = vpop.f32.mrf.mxu2 }
 0x4ca   : > { %v3751_v56 = vpop.f32.mrf.mxu1  ;;  %3985 = vmatmul.bf16.gmra.mxu0 %v6154_v37  ;;  %v3798_v63 = vadd.f32 %v3797_v13, %v3749_v40 }
 0x4cb   : > { %v3752_v51 = vadd.f32 %v3751_v56, %v3703_v24 }
 0x4ce   : > { %v3846_v47 = vpop.f32.mrf.mxu3 }
 0x4cf   : > { %v3847_v21 = vadd.f32 %v3846_v47, %v3798_v63  ;;  %v3704_v15 = vpop.f32.mrf.mxu0 }
 0x4d0   : > { %v3705_v48 = vadd.f32 %v3704_v15, %v10116_v61 }
 0x4d1   : > { %v3800_v38 = vpop.f32.mrf.mxu2  ;;  %v3872_v4 = vpack.c.bf16 %v3847_v21, %v3845_v62 }
 0x4d2   : > { %v3753_v26 = vpop.f32.mrf.mxu1  ;;  %v3801_v60 = vadd.f32 %v3800_v38, %v3752_v51 }
 0x4d3   : > { %4077 = vmatmul.bf16.gmra.mxu1 %v3872_v4  ;;  %v3754_v19 = vadd.f32 %v3753_v26, %v3705_v48 }
 0x4d6   : > { %v3849_v27 = vpop.f32.mrf.mxu3 }
 0x4d7   : > { %v3707_v28 = vpop.f32.mrf.mxu0  ;;  %v3850_v58 = vadd.f32 %v3849_v27, %v3801_v60 }
 0x4d8   : > { %v3708_v61 = vadd.f32 %v3707_v28, %v10184_v52  ;;  %v3617_v52 = vadd.f32 %v10712_v32, %v3568_v12 }
 0x4d9   : > { %v3802_v57 = vpop.f32.mrf.mxu2 }
 0x4da   : > { %v3756_v25 = vpop.f32.mrf.mxu1  ;;  %3990 = vmatmul.bf16.gmra.mxu0 %v6155_v59  ;;  %v3803_v20 = vadd.f32 %v3802_v57, %v3754_v19  ;;  %v3666_v6 = vadd.f32 %v10723_v1, %v3617_v52 }
 0x4db   : > { %v3757_v34 = vadd.f32 %v3756_v25, %v3708_v61 }
 0x4de   : > { %v3851_v8 = vpop.f32.mrf.mxu3 }
 0x4df   : > { %v3852_v33 = vadd.f32 %v3851_v8, %v3803_v20  ;;  %v3709_v16 = vpop.f32.mrf.mxu0 }
 0x4e0   : > { %v3710_v11 = vadd.f32 %v3709_v16, %v10225_v53 }
 0x4e1   : > { %v3805_v0 = vpop.f32.mrf.mxu2  ;;  %v3873_v22 = vpack.c.bf16 %v3852_v33, %v3850_v58 }
 0x4e2   : > { %v3758_v41 = vpop.f32.mrf.mxu1  ;;  %v3806_v44 = vadd.f32 %v3805_v0, %v3757_v34 }
 0x4e3   : > { %4082 = vmatmul.bf16.gmra.mxu1 %v3873_v22  ;;  %v3759_v46 = vadd.f32 %v3758_v41, %v3710_v11 }
 0x4e6   : > { %v3854_v50 = vpop.f32.mrf.mxu3 }
 0x4e7   : > { %v3712_v3 = vpop.f32.mrf.mxu0  ;;  %v3855_v55 = vadd.f32 %v3854_v50, %v3806_v44 }
 0x4e8   : > { %v3713_v43 = vadd.f32 %v3712_v3, %v10282_v23 }
 0x4e9   : > { %v3807_v49 = vpop.f32.mrf.mxu2 }
 0x4ea   : > { %3995 = vmatmul.bf16.gmra.mxu0 %v6156_v18  ;;  %v3761_v2 = vpop.f32.mrf.mxu1  ;;  %v3808_v10 = vadd.f32 %v3807_v49, %v3759_v46 }
 0x4eb   : > { %v3762_v35 = vadd.f32 %v3761_v2, %v3713_v43 }
 0x4ee   : > { %v3856_v54 = vpop.f32.mrf.mxu3 }
 0x4ef   : > { %v3857_v42 = vadd.f32 %v3856_v54, %v3808_v10  ;;  %v3714_v14 = vpop.f32.mrf.mxu0 }
 0x4f0   : > { %v3715_v39 = vadd.f32 %v3714_v14, %v3666_v6 }
 0x4f1   : > { %v3810_v53 = vpop.f32.mrf.mxu2  ;;  %v3874_v36 = vpack.c.bf16 %v3857_v42, %v3855_v55 }
 0x4f2   : > { %v3763_v30 = vpop.f32.mrf.mxu1  ;;  %v3811_v40 = vadd.f32 %v3810_v53, %v3762_v35 }
 0x4f3   : > { %4087 = vmatmul.bf16.gmra.mxu1 %v3874_v36  ;;  %v3764_v31 = vadd.f32 %v3763_v30, %v3715_v39 }
 0x4f6   : > { %v3859_v5 = vpop.f32.mrf.mxu3 }
 0x4f7   : > { %v3717_v13 = vpop.f32.mrf.mxu0  ;;  %v3860_v32 = vadd.f32 %v3859_v5, %v3811_v40 }
 0x4f8   : > { %v3718_v23 = vadd.f32 %v3717_v13, %v10727_v17  ;;  %v10773_v17 = vld [vmem:[%s11164_s5] ss:$0 sm:$0xff] }
 0x4f9   : > { %v3812_v56 = vpop.f32.mrf.mxu2 }
 0x4fa   : > { %4000 = vmatmul.bf16.gmra.mxu0 %v6157_v9  ;;  %v3813_v37 = vadd.f32 %v3812_v56, %v3764_v31  ;;  %v3766_v47 = vpop.f32.mrf.mxu1 }
 0x4fb   : > { %v3767_v24 = vadd.f32 %v3766_v47, %v3718_v23 }
 0x4fe   : > { %v3861_v29 = vpop.f32.mrf.mxu3 }
 0x4ff   : > { %v3862_v63 = vadd.f32 %v3861_v29, %v3813_v37  ;;  %v3719_v62 = vpop.f32.mrf.mxu0 }
 0x500   : > { %v3720_v38 = vadd.f32 %v3719_v62, %v10730_v7 }
 0x501   : > { %v3815_v21 = vpop.f32.mrf.mxu2  ;;  %v3875_v1 = vpack.c.bf16 %v3862_v63, %v3860_v32 }
 0x502   : > { %v3768_v26 = vpop.f32.mrf.mxu1  ;;  %v3816_v28 = vadd.f32 %v3815_v21, %v3767_v24 }
 0x503   : > { %4092 = vmatmul.bf16.gmra.mxu1 %v3875_v1  ;;  %v3769_v48 = vadd.f32 %v3768_v26, %v3720_v38 }
 0x506   : > { %v3864_v15 = vpop.f32.mrf.mxu3 }
 0x507   : > { %v3966_v4 = vpop.f32.mrf.mxu0  ;;  %v3865_v51 = vadd.f32 %v3864_v15, %v3816_v28 }
 0x509   : > { %v3817_v27 = vpop.f32.mrf.mxu2 }
 0x50a   : > { %v3818_v57 = vadd.f32 %v3817_v27, %v3769_v48 }
 0x50e   : > { %v3866_v25 = vpop.f32.mrf.mxu3 }
 0x50f   : > { %v3867_v19 = vadd.f32 %v3866_v25, %v3818_v57  ;;  %v3968_v59 = vpop.f32.mrf.mxu0 }
 0x511   : > { %v3876_v60 = vpack.c.bf16 %v3867_v19, %v3865_v51 }
 0x513   : > { %4097 = vmatmul.bf16.gmra.mxu1 %v3876_v60 }
 0x517   : > { %v3971_v20 = vpop.f32.mrf.mxu0 }
 0x51f   : > { %v3973_v8 = vpop.f32.mrf.mxu0 }
 0x520   : > { %v4063_v7 = vpop.f32.mrf.mxu1 }
 0x521   : > { %v4064_v58 = vadd.f32 %v4063_v7, %v3966_v4 }
 0x523   : > { %v10777_v33 = vadd.f32 %v10773_v17, %v4064_v58 }
 0x525   : > { %v4124_v16 = vsel %vm4123_vm14, %v10777_v33, -1e+30 }
 0x526   : > { %v4141_v0 = vsel %vm4140_vm2, %v4124_v16, -inf }
 0x527   : > { %4142 = vmax.xlane.f32.xlu1 %v4141_v0  ;;  %v3976_v50 = vpop.f32.mrf.mxu0 }
 0x528   : > { %v4065_v22 = vpop.f32.mrf.mxu1 }
 0x529   : > { %v4066_v41 = vadd.f32 %v4065_v22, %v3968_v59 }
 0x52b   : > { %v10784_v61 = vadd.f32 %v10773_v17, %v4066_v41 }
 0x52d   : > { %v4125_v11 = vsel %vm4123_vm14, %v10784_v61, -1e+30 }
 0x52e   : > { %v4144_v3 = vsel %vm4140_vm2, %v4125_v11, -inf }
 0x52f   : > { %4145 = vmax.xlane.f32.xlu0 %v4144_v3  ;;  %v3978_v18 = vpop.f32.mrf.mxu0 }
 0x530   : > { %v4068_v49 = vpop.f32.mrf.mxu1 }
 0x531   : > { %v4069_v34 = vadd.f32 %v4068_v49, %v3971_v20 }
 0x533   : > { %v10791_v46 = vadd.f32 %v10773_v17, %v4069_v34 }
 0x535   : > { %v4126_v2 = vsel %vm4123_vm14, %v10791_v46, -1e+30 }
 0x536   : > { %v4147_v44 = vsel %vm4140_vm2, %v4126_v2, -inf }
 0x537   : > { %4148 = vmax.xlane.f32.xlu2 %v4147_v44  ;;  %v3981_v14 = vpop.f32.mrf.mxu0 }
 0x538   : > { %v4070_v10 = vpop.f32.mrf.mxu1 }
 0x539   : > { %v4071_v54 = vadd.f32 %v4070_v10, %v3973_v8 }
 0x53b   : > { %v10798_v12 = vadd.f32 %v10773_v17, %v4071_v54 }
 0x53d   : > { %v4127_v55 = vsel %vm4123_vm14, %v10798_v12, -1e+30 }
 0x53e   : > { %v4150_v42 = vsel %vm4140_vm2, %v4127_v55, -inf }
 0x53f   : > { %4151 = vmax.xlane.f32.xlu1 %v4150_v42  ;;  %v3983_v43 = vpop.f32.mrf.mxu0 }
 0x540   : > { %v4073_v52 = vpop.f32.mrf.mxu1 }
 0x541   : > { %v4074_v53 = vadd.f32 %v4073_v52, %v3976_v50 }
 0x543   : > { %v10805_v36 = vadd.f32 %v10773_v17, %v4074_v53 }
 0x545   : > { %v4128_v6 = vsel %vm4123_vm14, %v10805_v36, -1e+30 }
 0x546   : > { %v4153_v30 = vsel %vm4140_vm2, %v4128_v6, -inf }
 0x547   : > { %4154 = vmax.xlane.f32.xlu0 %v4153_v30  ;;  %v3986_v40 = vpop.f32.mrf.mxu0 }
 0x548   : > { %v4075_v5 = vpop.f32.mrf.mxu1 }
 0x549   : > { %v4076_v39 = vadd.f32 %v4075_v5, %v3978_v18 }
 0x54b   : > { %v10812_v13 = vadd.f32 %v10773_v17, %v4076_v39 }
 0x54d   : > { %v4129_v56 = vsel %vm4123_vm14, %v10812_v13, -1e+30 }
 0x54e   : > { %v4156_v35 = vsel %vm4140_vm2, %v4129_v56, -inf }
 0x54f   : > { %4157 = vmax.xlane.f32.xlu2 %v4156_v35  ;;  %v3988_v21 = vpop.f32.mrf.mxu0 }
 0x550   : > { %v4078_v31 = vpop.f32.mrf.mxu1 }
 0x551   : > { %v4079_v9 = vadd.f32 %v4078_v31, %v3981_v14 }
 0x553   : > { %v10819_v37 = vadd.f32 %v10773_v17, %v4079_v9 }
 0x555   : > { %v4130_v29 = vsel %vm4123_vm14, %v10819_v37, -1e+30 }
 0x556   : > { %v4159_v32 = vsel %vm4140_vm2, %v4130_v29, -inf }
 0x557   : > { %4160 = vmax.xlane.f32.xlu1 %v4159_v32  ;;  %v3991_v24 = vpop.f32.mrf.mxu0 }
 0x558   : > { %v4080_v63 = vpop.f32.mrf.mxu1 }
 0x559   : > { %v4081_v47 = vadd.f32 %v4080_v63, %v3983_v43 }
 0x55b   : > { %v10826_v62 = vadd.f32 %v10773_v17, %v4081_v47 }
 0x55d   : > { %v4131_v1 = vsel %vm4123_vm14, %v10826_v62, -1e+30 }
 0x55e   : > { %v4162_v15 = vsel %vm4140_vm2, %v4131_v1, -inf }
 0x55f   : > { %4163 = vmax.xlane.f32.xlu0 %v4162_v15  ;;  %v3993_v19 = vpop.f32.mrf.mxu0 }
 0x560   : > { %v4083_v23 = vpop.f32.mrf.mxu1 }
 0x561   : > { %v4084_v38 = vadd.f32 %v4083_v23, %v3986_v40 }
 0x563   : > { %v10833_v4 = vadd.f32 %v10773_v17, %v4084_v38 }
 0x565   : > { %v4132_v26 = vsel %vm4123_vm14, %v10833_v4, -1e+30 }
 0x566   : > { %v4165_v27 = vsel %vm4140_vm2, %v4132_v26, -inf }
 0x567   : > { %4166 = vmax.xlane.f32.xlu2 %v4165_v27  ;;  %v3996_v0 = vpop.f32.mrf.mxu0 }
 0x568   : > { %v4085_v48 = vpop.f32.mrf.mxu1 }
 0x569   : > { %v4086_v28 = vadd.f32 %v4085_v48, %v3988_v21 }
 0x56b   : > { %v10840_v57 = vadd.f32 %v10773_v17, %v4086_v28 }
 0x56d   : > { %v4133_v25 = vsel %vm4123_vm14, %v10840_v57, -1e+30 }
 0x56e   : > { %v4168_v51 = vsel %vm4140_vm2, %v4133_v25, -inf }
 0x56f   : > { %4169 = vmax.xlane.f32.xlu1 %v4168_v51  ;;  %v3998_v34 = vpop.f32.mrf.mxu0 }
 0x570   : > { %v4088_v59 = vpop.f32.mrf.mxu1 }
 0x571   : > { %v4089_v60 = vadd.f32 %v4088_v59, %v3991_v24 }
 0x573   : > { %v10847_v20 = vadd.f32 %v10773_v17, %v4089_v60 }
 0x575   : > { %v4134_v7 = vsel %vm4123_vm14, %v10847_v20, -1e+30 }
 0x576   : > { %v4171_v8 = vsel %vm4140_vm2, %v4134_v7, -inf }
 0x577   : > { %4172 = vmax.xlane.f32.xlu0 %v4171_v8  ;;  %v4001_v42 = vpop.f32.mrf.mxu0 }
 0x578   : > { %v4090_v58 = vpop.f32.mrf.mxu1 }
 0x579   : > { %v4091_v16 = vadd.f32 %v4090_v58, %v3993_v19 }
 0x57b   : > { %v10854_v22 = vadd.f32 %v10773_v17, %v4091_v16 }
 0x57d   : > { %v4135_v41 = vsel %vm4123_vm14, %v10854_v22, -1e+30 }
 0x57e   : > { %v4174_v50 = vsel %vm4140_vm2, %v4135_v41, -inf }
 0x57f   : > { %4175 = vmax.xlane.f32.xlu2 %v4174_v50  ;;  %v4003_v43 = vpop.f32.mrf.mxu0 }
 0x580   : > { %v4093_v11 = vpop.f32.mrf.mxu1 }
 0x581   : > { %v4094_v3 = vadd.f32 %v4093_v11, %v3996_v0 }
 0x583   : > { %v10861_v49 = vadd.f32 %v10773_v17, %v4094_v3 }
 0x585   : > { %v4136_v18 = vsel %vm4123_vm14, %v10861_v49, -1e+30 }
 0x586   : > { %v4177_v2 = vsel %vm4140_vm2, %v4136_v18, -inf }
 0x587   : > { %4178 = vmax.xlane.f32.xlu1 %v4177_v2 }
 0x588   : > { %v4095_v44 = vpop.f32.mrf.mxu1 }
 0x589   : > { %v4096_v10 = vadd.f32 %v4095_v44, %v3998_v34 }
 0x58b   : > { %v10868_v54 = vadd.f32 %v10773_v17, %v4096_v10 }
 0x58d   : > { %v4137_v55 = vsel %vm4123_vm14, %v10868_v54, -1e+30 }
 0x58e   : > { %v4180_v14 = vsel %vm4140_vm2, %v4137_v55, -inf }
 0x58f   : > { %4181 = vmax.xlane.f32.xlu0 %v4180_v14 }
 0x590   : > { %v4098_v52 = vpop.f32.mrf.mxu1 }
 0x591   : > { %v4099_v53 = vadd.f32 %v4098_v52, %v4001_v42 }
 0x593   : > { %v10875_v6 = vadd.f32 %v10773_v17, %v4099_v53 }
 0x595   : > { %v4138_v30 = vsel %vm4123_vm14, %v10875_v6, -1e+30 }
 0x596   : > { %v4183_v5 = vsel %vm4140_vm2, %v4138_v30, -inf }
 0x597   : > { %4184 = vmax.xlane.f32.xlu2 %v4183_v5 }
 0x598   : > { %v4100_v39 = vpop.f32.mrf.mxu1 }
 0x599   : > { %v4101_v56 = vadd.f32 %v4100_v39, %v4003_v43 }
 0x59a   : > { %v4143_v35 = vpop.xlane.xlu1 %4142 }
 0x59b   : > { %v10882_v31 = vadd.f32 %v10773_v17, %v4101_v56  ;;  %v4189_v9 = vsel %vm4123_vm14, %v10777_v33, %v4143_v35 }
 0x59c   : > { %v4205_v40 = vsub.f32 %v4189_v9, %v4143_v35 }
 0x59d   : > { %v4139_v29 = vsel %vm4123_vm14, %v10882_v31, -1e+30 }
 0x59e   : > { %v4221_v32 = vmul.f32 1.442695, %v4205_v40  ;;  %v4186_v63 = vsel %vm4140_vm2, %v4139_v29, -inf }
 0x59f   : > { %4187 = vmax.xlane.f32.xlu1 %v4186_v63 }
 0x5a0   : > { %6086 = vpow2.f32 %v4221_v32 }
 0x5a2   : > { %v4146_v47 = vpop.xlane.xlu0 %4145 }
 0x5a3   : > { %v4190_v17 = vsel %vm4123_vm14, %v10784_v61, %v4146_v47 }
 0x5a4   : > { %v4206_v21 = vsub.f32 %v4190_v17, %v4146_v47 }
 0x5a6   : > { %v10894_v1 = vpop.eup %6086  ;;  %v4223_v15 = vmul.f32 1.442695, %v4206_v21 }
 0x5a7   : > { %v4253_v23 = vsel %vm4123_vm14, %v10894_v1, 0.0 }
 0x5a8   : > { %6088 = vpow2.f32 %v4223_v15  ;;  %v4269_v38 = vsel %vm4140_vm2, %v4253_v23, 0.0 }
 0x5a9   : > { %4270 = vadd.xlane.f32.xlu0 %v4269_v38 }
 0x5aa   : > { %v4149_v26 = vpop.xlane.xlu2 %4148 }
 0x5ab   : > { %v4191_v27 = vsel %vm4123_vm14, %v10791_v46, %v4149_v26 }
 0x5ac   : > { %v4207_v24 = vsub.f32 %v4191_v27, %v4149_v26 }
 0x5ae   : > { %v10903_v48 = vpop.eup %6088  ;;  %v4225_v28 = vmul.f32 1.442695, %v4207_v24 }
 0x5af   : > { %v4254_v25 = vsel %vm4123_vm14, %v10903_v48, 0.0 }
 0x5b0   : > { %6090 = vpow2.f32 %v4225_v28  ;;  %v4272_v51 = vsel %vm4140_vm2, %v4254_v25, 0.0 }
 0x5b1   : > { %4273 = vadd.xlane.f32.xlu2 %v4272_v51 }
 0x5b2   : > { %v4152_v19 = vpop.xlane.xlu1 %4151 }
 0x5b3   : > { %v4192_v59 = vsel %vm4123_vm14, %v10798_v12, %v4152_v19 }
 0x5b4   : > { %v4208_v60 = vsub.f32 %v4192_v59, %v4152_v19 }
 0x5b6   : > { %v10912_v7 = vpop.eup %6090  ;;  %v4227_v8 = vmul.f32 1.442695, %v4208_v60 }
 0x5b7   : > { %v4255_v58 = vsel %vm4123_vm14, %v10912_v7, 0.0 }
 0x5b8   : > { %6092 = vpow2.f32 %v4227_v8  ;;  %v4275_v16 = vsel %vm4140_vm2, %v4255_v58, 0.0 }
 0x5b9   : > { %4276 = vadd.xlane.f32.xlu1 %v4275_v16 }
 0x5ba   : > { %v4155_v0 = vpop.xlane.xlu0 %4154 }
 0x5bb   : > { %v4193_v41 = vsel %vm4123_vm14, %v10805_v36, %v4155_v0 }
 0x5bc   : > { %v4209_v50 = vsub.f32 %v4193_v41, %v4155_v0 }
 0x5be   : > { %v10921_v11 = vpop.eup %6092  ;;  %v4229_v3 = vmul.f32 1.442695, %v4209_v50 }
 0x5bf   : > { %v4256_v34 = vsel %vm4123_vm14, %v10921_v11, 0.0 }
 0x5c0   : > { %6094 = vpow2.f32 %v4229_v3  ;;  %v4278_v18 = vsel %vm4140_vm2, %v4256_v34, 0.0 }
 0x5c1   : > { %4279 = vadd.xlane.f32.xlu0 %v4278_v18 }
 0x5c2   : > { %v4158_v2 = vpop.xlane.xlu2 %4157 }
 0x5c3   : > { %v4194_v44 = vsel %vm4123_vm14, %v10812_v13, %v4158_v2 }
 0x5c4   : > { %v4210_v10 = vsub.f32 %v4194_v44, %v4158_v2 }
 0x5c6   : > { %v10930_v55 = vpop.eup %6094  ;;  %v4231_v42 = vmul.f32 1.442695, %v4210_v10 }
 0x5c7   : > { %v4257_v14 = vsel %vm4123_vm14, %v10930_v55, 0.0 }
 0x5c8   : > { %6096 = vpow2.f32 %v4231_v42  ;;  %v4281_v52 = vsel %vm4140_vm2, %v4257_v14, 0.0 }
 0x5c9   : > { %4282 = vadd.xlane.f32.xlu2 %v4281_v52 }
 0x5ca   : > { %v4161_v53 = vpop.xlane.xlu1 %4160 }
 0x5cb   : > { %v4195_v30 = vsel %vm4123_vm14, %v10819_v37, %v4161_v53 }
 0x5cc   : > { %v4211_v5 = vsub.f32 %v4195_v30, %v4161_v53 }
 0x5ce   : > { %v10939_v43 = vpop.eup %6096  ;;  %v4233_v39 = vmul.f32 1.442695, %v4211_v5 }
 0x5cf   : > { %v4258_v56 = vsel %vm4123_vm14, %v10939_v43, 0.0 }
 0x5d0   : > { %6098 = vpow2.f32 %v4233_v39  ;;  %v4284_v35 = vsel %vm4140_vm2, %v4258_v56, 0.0 }
 0x5d1   : > { %4285 = vadd.xlane.f32.xlu1 %v4284_v35 }
 0x5d2   : > { %v4164_v9 = vpop.xlane.xlu0 %4163 }
 0x5d3   : > { %v4196_v40 = vsel %vm4123_vm14, %v10826_v62, %v4164_v9 }
 0x5d4   : > { %v4212_v29 = vsub.f32 %v4196_v40, %v4164_v9 }
 0x5d6   : > { %v10948_v32 = vpop.eup %6098  ;;  %v4235_v63 = vmul.f32 1.442695, %v4212_v29 }
 0x5d7   : > { %v4259_v47 = vsel %vm4123_vm14, %v10948_v32, 0.0 }
 0x5d8   : > { %6100 = vpow2.f32 %v4235_v63  ;;  %v4287_v17 = vsel %vm4140_vm2, %v4259_v47, 0.0 }
 0x5d9   : > { %4288 = vadd.xlane.f32.xlu0 %v4287_v17 }
 0x5da   : > { %v4167_v21 = vpop.xlane.xlu2 %4166 }
 0x5db   : > { %v4197_v15 = vsel %vm4123_vm14, %v10833_v4, %v4167_v21 }
 0x5dc   : > { %v4213_v23 = vsub.f32 %v4197_v15, %v4167_v21 }
 0x5de   : > { %v10957_v38 = vpop.eup %6100  ;;  %v4237_v26 = vmul.f32 1.442695, %v4213_v23 }
 0x5df   : > { %v4260_v27 = vsel %vm4123_vm14, %v10957_v38, 0.0 }
 0x5e0   : > { %6102 = vpow2.f32 %v4237_v26  ;;  %v4290_v24 = vsel %vm4140_vm2, %v4260_v27, 0.0 }
 0x5e1   : > { %4291 = vadd.xlane.f32.xlu2 %v4290_v24 }
 0x5e2   : > { %v4170_v28 = vpop.xlane.xlu1 %4169 }
 0x5e3   : > { %v4198_v25 = vsel %vm4123_vm14, %v10840_v57, %v4170_v28 }
 0x5e4   : > { %v4214_v51 = vsub.f32 %v4198_v25, %v4170_v28 }
 0x5e6   : > { %v10966_v19 = vpop.eup %6102  ;;  %v4239_v59 = vmul.f32 1.442695, %v4214_v51 }
 0x5e7   : > { %v4261_v60 = vsel %vm4123_vm14, %v10966_v19, 0.0 }
 0x5e8   : > { %6104 = vpow2.f32 %v4239_v59  ;;  %v4293_v8 = vsel %vm4140_vm2, %v4261_v60, 0.0 }
 0x5e9   : > { %4294 = vadd.xlane.f32.xlu1 %v4293_v8 }
 0x5ea   : > { %v4173_v58 = vpop.xlane.xlu0 %4172 }
 0x5eb   : > { %v4199_v16 = vsel %vm4123_vm14, %v10847_v20, %v4173_v58 }
 0x5ec   : > { %v4215_v0 = vsub.f32 %v4199_v16, %v4173_v58 }
 0x5ee   : > { %v10975_v41 = vpop.eup %6104  ;;  %v4241_v50 = vmul.f32 1.442695, %v4215_v0 }
 0x5ef   : > { %v4262_v3 = vsel %vm4123_vm14, %v10975_v41, 0.0 }
 0x5f0   : > { %6106 = vpow2.f32 %v4241_v50  ;;  %v4296_v34 = vsel %vm4140_vm2, %v4262_v3, 0.0 }
 0x5f1   : > { %4297 = vadd.xlane.f32.xlu0 %v4296_v34 }
 0x5f2   : > { %v4176_v18 = vpop.xlane.xlu2 %4175 }
 0x5f3   : > { %v4200_v2 = vsel %vm4123_vm14, %v10854_v22, %v4176_v18 }
 0x5f4   : > { %v4216_v44 = vsub.f32 %v4200_v2, %v4176_v18 }
 0x5f6   : > { %v10984_v10 = vpop.eup %6106  ;;  %v4243_v42 = vmul.f32 1.442695, %v4216_v44 }
 0x5f7   : > { %v4263_v14 = vsel %vm4123_vm14, %v10984_v10, 0.0 }
 0x5f8   : > { %6108 = vpow2.f32 %v4243_v42  ;;  %v4299_v52 = vsel %vm4140_vm2, %v4263_v14, 0.0 }
 0x5f9   : > { %4300 = vadd.xlane.f32.xlu2 %v4299_v52 }
 0x5fa   : > { %v4179_v53 = vpop.xlane.xlu1 %4178 }
 0x5fb   : > { %v4201_v30 = vsel %vm4123_vm14, %v10861_v49, %v4179_v53 }
 0x5fc   : > { %v4217_v5 = vsub.f32 %v4201_v30, %v4179_v53 }
 0x5fe   : > { %v10993_v39 = vpop.eup %6108  ;;  %v4245_v56 = vmul.f32 1.442695, %v4217_v5 }
 0x5ff   : > { %v4264_v35 = vsel %vm4123_vm14, %v10993_v39, 0.0 }
 0x600   : > { %6110 = vpow2.f32 %v4245_v56  ;;  %v4302_v9 = vsel %vm4140_vm2, %v4264_v35, 0.0 }
 0x601   : > { %4303 = vadd.xlane.f32.xlu1 %v4302_v9  ;;  %v4557_v9 = vld [vmem:[%s11037_s29] sm:$0xff] }
 0x602   : > { %v4182_v40 = vpop.xlane.xlu0 %4181 }
 0x603   : > { %v4202_v29 = vsel %vm4123_vm14, %v10868_v54, %v4182_v40 }
 0x604   : > { %v4218_v63 = vsub.f32 %v4202_v29, %v4182_v40 }
 0x606   : > { %v11002_v47 = vpop.eup %6110  ;;  %v4247_v17 = vmul.f32 1.442695, %v4218_v63 }
 0x607   : > { %v4265_v21 = vsel %vm4123_vm14, %v11002_v47, 0.0 }
 0x608   : > { %6112 = vpow2.f32 %v4247_v17  ;;  %v4305_v15 = vsel %vm4140_vm2, %v4265_v21, 0.0 }
 0x609   : > { %4306 = vadd.xlane.f32.xlu0 %v4305_v15  ;;  %v4573_v15 = vadd.f32 %v4557_v9, %v10777_v33 }
 0x60a   : > { %v4185_v23 = vpop.xlane.xlu2 %4184 }
 0x60b   : > { %v4203_v26 = vsel %vm4123_vm14, %v10875_v6, %v4185_v23 }
 0x60c   : > { %v4219_v27 = vsub.f32 %v4203_v26, %v4185_v23 }
 0x60e   : > { %v11011_v24 = vpop.eup %6112  ;;  %v4249_v28 = vmul.f32 1.442695, %v4219_v27 }
 0x60f   : > { %v4266_v25 = vsel %vm4123_vm14, %v11011_v24, 0.0 }
 0x610   : > { %6114 = vpow2.f32 %v4249_v28  ;;  %v4308_v51 = vsel %vm4140_vm2, %v4266_v25, 0.0 }
 0x611   : > { %4309 = vadd.xlane.f32.xlu2 %v4308_v51 }
 0x612   : > { %v4188_v59 = vpop.xlane.xlu1 %4187 }
 0x613   : > { %v4204_v60 = vsel %vm4123_vm14, %v10882_v31, %v4188_v59 }
 0x614   : > { %v4220_v8 = vsub.f32 %v4204_v60, %v4188_v59  ;;  %v4558_v60 = vld [vmem:[%s11037_s29 + $0x8] sm:$0xff] }
 0x616   : > { %v11020_v58 = vpop.eup %6114  ;;  %v4251_v16 = vmul.f32 1.442695, %v4220_v8 }
 0x617   : > { %v4267_v0 = vsel %vm4123_vm14, %v11020_v58, 0.0 }
 0x618   : > { %6116 = vpow2.f32 %v4251_v16  ;;  %v4311_v50 = vsel %vm4140_vm2, %v4267_v0, 0.0 }
 0x619   : > { %4312 = vadd.xlane.f32.xlu1 %v4311_v50 }
 0x61c   : > { %v4271_v3 = vpop.xlane.xlu0 %4270 }
 0x61d   : > { %6118 = vrcp.f32 %v4271_v3  ;;  %v4328_v53 = vand.u32 2147483648, %v4271_v3  ;;  %v4326_v5 = vand.u32 2147483647, %v4271_v3  ;;  %vm4322_vm4 = vweird.f32 %v4271_v3 }
 0x61e   : > { %v11028_v34 = vpop.eup %6116 }
 0x61f   : > { %v4268_v18 = vsel %vm4123_vm14, %v11028_v34, 0.0  ;;  %v4329_v40 = vor.u32 1.1754944e-38, %v4328_v53  ;;  %vm4327_vm6 = vcmp.eq.f32.partialorder %v4326_v5, 8.507059e+37  ;;  %v4559_v5 = vld [vmem:[%s11037_s29 + $0x10] sm:$0xff] }
 0x620   : > { %v4314_v2 = vsel %vm4140_vm2, %v4268_v18, 0.0 }
 0x621   : > { %4315 = vadd.xlane.f32.xlu0 %v4314_v2 }
 0x623   : > { %v6119_v44 = vpop.eup %6118 }
 0x624   : > { %v4318_v42 = vmul.f32 %v6119_v44, %v4271_v3  ;;  %v4274_v14 = vpop.xlane.xlu2 %4273  ;;  %vm4323_vm3 = vweird.f32 %v6119_v44  ;;  %v4574_v3 = vadd.f32 %v4558_v60, %v10784_v61 }
 0x625   : > { %6120 = vrcp.f32 %v4274_v14  ;;  %vm4324_vm5 = vmor %vm4322_vm4, %vm4323_vm3  ;;  %v4343_v27 = vand.u32 2147483648, %v4274_v14  ;;  %v4341_v51 = vand.u32 2147483647, %v4274_v14  ;;  %vm4337_vm8 = vweird.f32 %v4274_v14 }
 0x626   : > { %v4319_v52 = vsub.f32 1.0, %v4318_v42 }
 0x627   : > { %v4344_v8 = vor.u32 1.1754944e-38, %v4343_v27  ;;  %vm4342_vm10 = vcmp.eq.f32.partialorder %v4341_v51, 8.507059e+37 }
 0x628   : > { %v4320_v30 = vmul.f32 %v6119_v44, %v4319_v52 }
 0x62a   : > { %v4321_v56 = vadd.f32 %v6119_v44, %v4320_v30 }
 0x62b   : > { %v6121_v35 = vpop.eup %6120 }
 0x62c   : > { %v4325_v29 = vsel %vm4324_vm5, %v6119_v44, %v4321_v56  ;;  %v4333_v63 = vmul.f32 %v6121_v35, %v4274_v14  ;;  %v4277_v17 = vpop.xlane.xlu1 %4276  ;;  %vm4338_vm7 = vweird.f32 %v6121_v35 }
 0x62d   : > { %v4330_v21 = vsel %vm4327_vm6, %v4329_v40, %v4325_v29  ;;  %6122 = vrcp.f32 %v4277_v17  ;;  %vm4339_vm9 = vmor %vm4337_vm8, %vm4338_vm7  ;;  %v4358_v44 = vand.u32 2147483648, %v4277_v17  ;;  %v4356_v52 = vand.u32 2147483647, %v4277_v17 }
 0x62e   : > { %v4331_v23 = vmul.f32 %v10894_v1, %v4330_v21  ;;  %v4334_v26 = vsub.f32 1.0, %v4333_v63  ;;  %vm4352_vm12 = vweird.f32 %v4277_v17  ;;  %v4575_v40 = vadd.f32 %v4559_v5, %v10791_v46 }
 0x62f   : > { %v4359_v56 = vor.u32 1.1754944e-38, %v4358_v44  ;;  %vm4357_vm1 = vcmp.eq.f32.partialorder %v4356_v52, 8.507059e+37 }
 0x630   : > { %v4589_v28 = vsel %vm4123_vm14, %v4331_v23, %v4573_v15  ;;  %v4335_v25 = vmul.f32 %v6121_v35, %v4334_v26 }
 0x631   : > { %4605 = vst.msk [vmem:[%s11044_s10] sm:$0xff] %vm4140_vm2, %v4589_v28  ;;  %v4560_v28 = vld [vmem:[%s11037_s29 + $0x18] sm:$0xff] }
 0x632   : > { %v4336_v59 = vadd.f32 %v6121_v35, %v4335_v25 }
 0x633   : > { %v6123_v33 = vpop.eup %6122 }
 0x634   : > { %v4340_v16 = vsel %vm4339_vm9, %v6121_v35, %v4336_v59  ;;  %v4348_v1 = vmul.f32 %v6123_v33, %v4277_v17  ;;  %v4280_v0 = vpop.xlane.xlu0 %4279  ;;  %vm4353_vm11 = vweird.f32 %v6123_v33 }
 0x635   : > { %v4345_v50 = vsel %vm4342_vm10, %v4344_v8, %v4340_v16  ;;  %6124 = vrcp.f32 %v4280_v0  ;;  %vm4354_vm15 = vmor %vm4352_vm12, %vm4353_vm11  ;;  %v4373_v21 = vand.u32 2147483648, %v4280_v0  ;;  %v4371_v23 = vand.u32 2147483647, %v4280_v0 }
 0x636   : > { %v4346_v18 = vmul.f32 %v10903_v48, %v4345_v50  ;;  %v4349_v2 = vsub.f32 1.0, %v4348_v1  ;;  %vm4367_vm13 = vweird.f32 %v4280_v0 }
 0x637   : > { %v4374_v25 = vor.u32 1.1754944e-38, %v4373_v21  ;;  %vm4372_vm4 = vcmp.eq.f32.partialorder %v4371_v23, 8.507059e+37 }
 0x638   : > { %v4590_v42 = vsel %vm4123_vm14, %v4346_v18, %v4574_v3  ;;  %v4350_v14 = vmul.f32 %v6123_v33, %v4349_v2  ;;  %v4561_v2 = vld [vmem:[%s11037_s29 + $0x20] sm:$0xff] }
 0x639   : > { %4606 = vst.msk [vmem:[%s11044_s10 + $0x8] sm:$0xff] %vm4140_vm2, %v4590_v42  ;;  %v4577_v52 = vadd.f32 %v4561_v2, %v10805_v36 }
 0x63a   : > { %v4351_v53 = vadd.f32 %v6123_v33, %v4350_v14 }
 0x63b   : > { %v6125_v30 = vpop.eup %6124 }
 0x63c   : > { %v4355_v61 = vsel %vm4354_vm15, %v6123_v33, %v4351_v53  ;;  %v4363_v48 = vmul.f32 %v6125_v30, %v4280_v0  ;;  %v4283_v35 = vpop.xlane.xlu2 %4282  ;;  %vm4368_vm0 = vweird.f32 %v6125_v30  ;;  %v4576_v33 = vadd.f32 %v4560_v28, %v10798_v12 }
 0x63d   : > { %v4360_v9 = vsel %vm4357_vm1, %v4359_v56, %v4355_v61  ;;  %6126 = vrcp.f32 %v4283_v35  ;;  %vm4369_vm3 = vmor %vm4367_vm13, %vm4368_vm0  ;;  %v4388_v16 = vand.u32 2147483648, %v4283_v35  ;;  %v4386_v50 = vand.u32 2147483647, %v4283_v35 }
 0x63e   : > { %v4361_v29 = vmul.f32 %v10912_v7, %v4360_v9  ;;  %v4364_v63 = vsub.f32 1.0, %v4363_v48  ;;  %vm4382_vm6 = vweird.f32 %v4283_v35 }
 0x63f   : > { %v4389_v44 = vor.u32 1.1754944e-38, %v4388_v16  ;;  %vm4387_vm8 = vcmp.eq.f32.partialorder %v4386_v50, 8.507059e+37 }
 0x640   : > { %v4591_v17 = vsel %vm4123_vm14, %v4361_v29, %v4575_v40  ;;  %v4365_v15 = vmul.f32 %v6125_v30, %v4364_v63  ;;  %v4562_v40 = vld [vmem:[%s11037_s29 + $0x28] sm:$0xff] }
 0x641   : > { %4607 = vst.msk [vmem:[%s11044_s10 + $0x10] sm:$0xff] %vm4140_vm2, %v4591_v17  ;;  %v4578_v17 = vadd.f32 %v4562_v40, %v10812_v13  ;;  %v4565_v40 = vld [vmem:[%s11037_s29 + $0x40] sm:$0xff] }
 0x642   : > { %v4366_v26 = vadd.f32 %v6125_v30, %v4365_v15 }
 0x643   : > { %v6127_v27 = vpop.eup %6126 }
 0x644   : > { %v4370_v46 = vsel %vm4369_vm3, %v6125_v30, %v4366_v26  ;;  %v4378_v7 = vmul.f32 %v6127_v27, %v4283_v35  ;;  %v4286_v51 = vpop.xlane.xlu1 %4285  ;;  %vm4383_vm5 = vweird.f32 %v6127_v27 }
 0x645   : > { %v4375_v59 = vsel %vm4372_vm4, %v4374_v25, %v4370_v46  ;;  %6128 = vrcp.f32 %v4286_v51  ;;  %vm4384_vm7 = vmor %vm4382_vm6, %vm4383_vm5  ;;  %v4403_v5 = vand.u32 2147483648, %v4286_v51  ;;  %v4401_v48 = vand.u32 2147483647, %v4286_v51 }
 0x646   : > { %v4376_v60 = vmul.f32 %v10921_v11, %v4375_v59  ;;  %v4379_v8 = vsub.f32 1.0, %v4378_v7  ;;  %vm4397_vm10 = vweird.f32 %v4286_v51 }
 0x647   : > { %v4404_v29 = vor.u32 1.1754944e-38, %v4403_v5  ;;  %vm4402_vm12 = vcmp.eq.f32.partialorder %v4401_v48, 8.507059e+37 }
 0x648   : > { %v4592_v1 = vsel %vm4123_vm14, %v4376_v60, %v4576_v33  ;;  %v4380_v0 = vmul.f32 %v6127_v27, %v4379_v8 }
 0x649   : > { %4608 = vst.msk [vmem:[%s11044_s10 + $0x18] sm:$0xff] %vm4140_vm2, %v4592_v1 }
 0x64a   : > { %v4381_v3 = vadd.f32 %v6127_v27, %v4380_v0 }
 0x64b   : > { %v6129_v18 = vpop.eup %6128 }
 0x64c   : > { %v4385_v12 = vsel %vm4384_vm7, %v6127_v27, %v4381_v3  ;;  %v4393_v11 = vmul.f32 %v6129_v18, %v4286_v51  ;;  %v4289_v42 = vpop.xlane.xlu0 %4288  ;;  %vm4398_vm9 = vweird.f32 %v6129_v18  ;;  %v4563_v51 = vld [vmem:[%s11037_s29 + $0x30] sm:$0xff] }
 0x64d   : > { %v4390_v14 = vsel %vm4387_vm8, %v4389_v44, %v4385_v12  ;;  %6130 = vrcp.f32 %v4289_v42  ;;  %vm4399_vm11 = vmor %vm4397_vm10, %vm4398_vm9  ;;  %v4418_v26 = vand.u32 2147483648, %v4289_v42  ;;  %v4416_v25 = vand.u32 2147483647, %v4289_v42  ;;  %v4564_v12 = vld [vmem:[%s11037_s29 + $0x38] sm:$0xff] }
 0x64e   : > { %v4391_v53 = vmul.f32 %v10930_v55, %v4390_v14  ;;  %v4394_v30 = vsub.f32 1.0, %v4393_v11  ;;  %vm4412_vm1 = vweird.f32 %v4289_v42  ;;  %v4579_v8 = vadd.f32 %v4563_v51, %v10819_v37 }
 0x64f   : > { %v4419_v59 = vor.u32 1.1754944e-38, %v4418_v26  ;;  %vm4417_vm13 = vcmp.eq.f32.partialorder %v4416_v25, 8.507059e+37 }
 0x650   : > { %v4593_v56 = vsel %vm4123_vm14, %v4391_v53, %v4577_v52  ;;  %v4395_v61 = vmul.f32 %v6129_v18, %v4394_v30  ;;  %v4580_v52 = vadd.f32 %v4564_v12, %v10826_v62 }
 0x651   : > { %4609 = vst.msk [vmem:[%s11044_s10 + $0x20] sm:$0xff] %vm4140_vm2, %v4593_v56 }
 0x652   : > { %v4396_v35 = vadd.f32 %v6129_v18, %v4395_v61 }
 0x653   : > { %v6131_v9 = vpop.eup %6130 }
 0x654   : > { %v4400_v36 = vsel %vm4399_vm11, %v6129_v18, %v4396_v35  ;;  %v4408_v55 = vmul.f32 %v6131_v9, %v4289_v42  ;;  %v4292_v63 = vpop.xlane.xlu2 %4291  ;;  %vm4413_vm15 = vweird.f32 %v6131_v9 }
 0x655   : > { %v4405_v21 = vsel %vm4402_vm12, %v4404_v29, %v4400_v36  ;;  %6132 = vrcp.f32 %v4292_v63  ;;  %vm4414_vm0 = vmor %vm4412_vm1, %vm4413_vm15  ;;  %v4433_v0 = vand.u32 2147483648, %v4292_v63  ;;  %v4431_v18 = vand.u32 2147483647, %v4292_v63 }
 0x656   : > { %v4406_v15 = vmul.f32 %v10939_v43, %v4405_v21  ;;  %v4409_v23 = vsub.f32 1.0, %v4408_v55  ;;  %vm4427_vm4 = vweird.f32 %v4292_v63 }
 0x657   : > { %v4434_v11 = vor.u32 1.1754944e-38, %v4433_v0  ;;  %vm4432_vm6 = vcmp.eq.f32.partialorder %v4431_v18, 8.507059e+37 }
 0x658   : > { %v4594_v27 = vsel %vm4123_vm14, %v4406_v15, %v4578_v17  ;;  %v4410_v28 = vmul.f32 %v6131_v9, %v4409_v23 }
 0x659   : > { %4610 = vst.msk [vmem:[%s11044_s10 + $0x28] sm:$0xff] %vm4140_vm2, %v4594_v27 }
 0x65a   : > { %v4411_v46 = vadd.f32 %v6131_v9, %v4410_v28 }
 0x65b   : > { %v6133_v7 = vpop.eup %6132 }
 0x65c   : > { %v4415_v13 = vsel %vm4414_vm0, %v6131_v9, %v4411_v46  ;;  %v4423_v43 = vmul.f32 %v6133_v7, %v4292_v63  ;;  %v4295_v33 = vpop.xlane.xlu1 %4294  ;;  %vm4428_vm3 = vweird.f32 %v6133_v7  ;;  %v4581_v63 = vadd.f32 %v4565_v40, %v10833_v4  ;;  %v4566_v46 = vld [vmem:[%s11037_s29 + $0x48] sm:$0xff] }
 0x65d   : > { %v4420_v60 = vsel %vm4417_vm13, %v4419_v59, %v4415_v13  ;;  %6134 = vrcp.f32 %v4295_v33  ;;  %vm4429_vm5 = vmor %vm4427_vm4, %vm4428_vm3  ;;  %v4448_v5 = vand.u32 2147483648, %v4295_v33  ;;  %v4446_v48 = vand.u32 2147483647, %v4295_v33 }
 0x65e   : > { %v4421_v16 = vmul.f32 %v10948_v32, %v4420_v60  ;;  %v4424_v1 = vsub.f32 1.0, %v4423_v43  ;;  %vm4442_vm8 = vweird.f32 %v4295_v33  ;;  %v4582_v13 = vadd.f32 %v4566_v46, %v10840_v57 }
 0x65f   : > { %v4449_v29 = vor.u32 1.1754944e-38, %v4448_v5  ;;  %vm4447_vm10 = vcmp.eq.f32.partialorder %v4446_v48, 8.507059e+37  ;;  %v4568_v5 = vld [vmem:[%s11037_s29 + $0x58] sm:$0xff] }
 0x660   : > { %v4595_v50 = vsel %vm4123_vm14, %v4421_v16, %v4579_v8  ;;  %v4425_v3 = vmul.f32 %v6133_v7, %v4424_v1 }
 0x661   : > { %4611 = vst.msk [vmem:[%s11044_s10 + $0x30] sm:$0xff] %vm4140_vm2, %v4595_v50 }
 0x662   : > { %v4426_v2 = vadd.f32 %v6133_v7, %v4425_v3  ;;  %v4567_v3 = vld [vmem:[%s11037_s29 + $0x50] sm:$0xff] }
 0x663   : > { %v6135_v44 = vpop.eup %6134  ;;  %v4583_v12 = vadd.f32 %v4567_v3, %v10847_v20 }
 0x664   : > { %v4430_v37 = vsel %vm4429_vm5, %v6133_v7, %v4426_v2  ;;  %v4438_v32 = vmul.f32 %v6135_v44, %v4295_v33  ;;  %v4298_v42 = vpop.xlane.xlu0 %4297  ;;  %vm4443_vm7 = vweird.f32 %v6135_v44 }
 0x665   : > { %v4435_v14 = vsel %vm4432_vm6, %v4434_v11, %v4430_v37  ;;  %6136 = vrcp.f32 %v4298_v42  ;;  %vm4444_vm9 = vmor %vm4442_vm8, %vm4443_vm7  ;;  %v4463_v15 = vand.u32 2147483648, %v4298_v42  ;;  %v4461_v27 = vand.u32 2147483647, %v4298_v42 }
 0x666   : > { %v4436_v53 = vmul.f32 %v10957_v38, %v4435_v14  ;;  %v4439_v30 = vsub.f32 1.0, %v4438_v32  ;;  %vm4457_vm12 = vweird.f32 %v4298_v42 }
 0x667   : > { %v4464_v7 = vor.u32 1.1754944e-38, %v4463_v15  ;;  %vm4462_vm1 = vcmp.eq.f32.partialorder %v4461_v27, 8.507059e+37 }
 0x668   : > { %v4596_v56 = vsel %vm4123_vm14, %v4436_v53, %v4580_v52  ;;  %v4440_v61 = vmul.f32 %v6135_v44, %v4439_v30 }
 0x669   : > { %4612 = vst.msk [vmem:[%s11044_s10 + $0x38] sm:$0xff] %vm4140_vm2, %v4596_v56 }
 0x66a   : > { %v4441_v35 = vadd.f32 %v6135_v44, %v4440_v61 }
 0x66b   : > { %v6137_v9 = vpop.eup %6136 }
 0x66c   : > { %v4445_v62 = vsel %vm4444_vm9, %v6135_v44, %v4441_v35  ;;  %v4453_v38 = vmul.f32 %v6137_v9, %v4298_v42  ;;  %v4301_v36 = vpop.xlane.xlu2 %4300  ;;  %vm4458_vm11 = vweird.f32 %v6137_v9  ;;  %v4584_v35 = vadd.f32 %v4568_v5, %v10854_v22 }
 0x66d   : > { %v4450_v55 = vsel %vm4447_vm10, %v4449_v29, %v4445_v62  ;;  %6138 = vrcp.f32 %v4301_v36  ;;  %vm4459_vm15 = vmor %vm4457_vm12, %vm4458_vm11  ;;  %v4478_v60 = vand.u32 2147483648, %v4301_v36  ;;  %v4476_v1 = vand.u32 2147483647, %v4301_v36 }
 0x66e   : > { %v4451_v21 = vmul.f32 %v10966_v19, %v4450_v55  ;;  %v4454_v17 = vsub.f32 1.0, %v4453_v38  ;;  %vm4472_vm13 = vweird.f32 %v4301_v36 }
 0x66f   : > { %v4479_v18 = vor.u32 1.1754944e-38, %v4478_v60  ;;  %vm4477_vm4 = vcmp.eq.f32.partialorder %v4476_v1, 8.507059e+37 }
 0x670   : > { %v4597_v23 = vsel %vm4123_vm14, %v4451_v21, %v4581_v63  ;;  %v4455_v26 = vmul.f32 %v6137_v9, %v4454_v17  ;;  %v4569_v21 = vld [vmem:[%s11037_s29 + $0x60] sm:$0xff] }
 0x671   : > { %4613 = vst.msk [vmem:[%s11044_s10 + $0x40] sm:$0xff] %vm4140_vm2, %v4597_v23 }
 0x672   : > { %v4456_v28 = vadd.f32 %v6137_v9, %v4455_v26  ;;  %v4585_v26 = vadd.f32 %v4569_v21, %v10861_v49 }
 0x673   : > { %v6139_v25 = vpop.eup %6138 }
 0x674   : > { %v4460_v4 = vsel %vm4459_vm15, %v6137_v9, %v4456_v28  ;;  %v4468_v19 = vmul.f32 %v6139_v25, %v4301_v36  ;;  %v4304_v51 = vpop.xlane.xlu1 %4303  ;;  %vm4473_vm0 = vweird.f32 %v6139_v25 }
 0x675   : > { %v4465_v59 = vsel %vm4462_vm1, %v4464_v7, %v4460_v4  ;;  %6140 = vrcp.f32 %v4304_v51  ;;  %vm4474_vm3 = vmor %vm4472_vm13, %vm4473_vm0  ;;  %v4493_v32 = vand.u32 2147483648, %v4304_v51  ;;  %v4491_v52 = vand.u32 2147483647, %v4304_v51 }
 0x676   : > { %v4466_v43 = vmul.f32 %v10975_v41, %v4465_v59  ;;  %v4469_v33 = vsub.f32 1.0, %v4468_v19  ;;  %vm4487_vm6 = vweird.f32 %v4304_v51  ;;  %v4570_v59 = vld [vmem:[%s11037_s29 + $0x68] sm:$0xff] }
 0x677   : > { %v4494_v56 = vor.u32 1.1754944e-38, %v4493_v32  ;;  %vm4492_vm8 = vcmp.eq.f32.partialorder %v4491_v52, 8.507059e+37  ;;  %v4586_v60 = vadd.f32 %v4570_v59, %v10868_v54 }
 0x678   : > { %v4598_v8 = vsel %vm4123_vm14, %v4466_v43, %v4582_v13  ;;  %v4470_v16 = vmul.f32 %v6139_v25, %v4469_v33 }
 0x679   : > { %4614 = vst.msk [vmem:[%s11044_s10 + $0x48] sm:$0xff] %vm4140_vm2, %v4598_v8 }
 0x67a   : > { %v4471_v0 = vadd.f32 %v6139_v25, %v4470_v16 }
 0x67b   : > { %v6141_v50 = vpop.eup %6140 }
 0x67c   : > { %v4475_v57 = vsel %vm4474_vm3, %v6139_v25, %v4471_v0  ;;  %v4483_v41 = vmul.f32 %v6141_v50, %v4304_v51  ;;  %v4307_v2 = vpop.xlane.xlu0 %4306  ;;  %vm4488_vm5 = vweird.f32 %v6141_v50 }
 0x67d   : > { %v4480_v44 = vsel %vm4477_vm4, %v4479_v18, %v4475_v57  ;;  %6142 = vrcp.f32 %v4307_v2  ;;  %vm4489_vm7 = vmor %vm4487_vm6, %vm4488_vm5  ;;  %v4508_v29 = vand.u32 2147483648, %v4307_v2  ;;  %v4506_v36 = vand.u32 2147483647, %v4307_v2 }
 0x67e   : > { %v4481_v11 = vmul.f32 %v10984_v10, %v4480_v44  ;;  %v4484_v37 = vsub.f32 1.0, %v4483_v41  ;;  %vm4502_vm10 = vweird.f32 %v4307_v2  ;;  %v4571_v41 = vld [vmem:[%s11037_s29 + $0x70] sm:$0xff] }
 0x67f   : > { %v4509_v17 = vor.u32 1.1754944e-38, %v4508_v29  ;;  %vm4507_vm12 = vcmp.eq.f32.partialorder %v4506_v36, 8.507059e+37 }
 0x680   : > { %v4599_v42 = vsel %vm4123_vm14, %v4481_v11, %v4583_v12  ;;  %v4485_v14 = vmul.f32 %v6141_v50, %v4484_v37  ;;  %v4587_v12 = vadd.f32 %v4571_v41, %v10875_v6 }
 0x681   : > { %4615 = vst.msk [vmem:[%s11044_s10 + $0x50] sm:$0xff] %vm4140_vm2, %v4599_v42 }
 0x682   : > { %v4486_v53 = vadd.f32 %v6141_v50, %v4485_v14 }
 0x683   : > { %v6143_v30 = vpop.eup %6142 }
 0x684   : > { %v4490_v20 = vsel %vm4489_vm7, %v6141_v50, %v4486_v53  ;;  %v4498_v10 = vmul.f32 %v6143_v30, %v4307_v2  ;;  %v4310_v61 = vpop.xlane.xlu2 %4309  ;;  %vm4503_vm9 = vweird.f32 %v6143_v30 }
 0x685   : > { %v4495_v48 = vsel %vm4492_vm8, %v4494_v56, %v4490_v20  ;;  %6144 = vrcp.f32 %v4310_v61  ;;  %vm4504_vm11 = vmor %vm4502_vm10, %vm4503_vm9  ;;  %v4523_v25 = vand.u32 2147483648, %v4310_v61  ;;  %v4521_v4 = vand.u32 2147483647, %v4310_v61 }
 0x686   : > { %v4496_v9 = vmul.f32 %v10993_v39, %v4495_v48  ;;  %v4499_v40 = vsub.f32 1.0, %v4498_v10  ;;  %vm4517_vm1 = vweird.f32 %v4310_v61 }
 0x687   : > { %v4524_v13 = vor.u32 1.1754944e-38, %v4523_v25  ;;  %vm4522_vm13 = vcmp.eq.f32.partialorder %v4521_v4, 8.507059e+37 }
 0x688   : > { %v4600_v62 = vsel %vm4123_vm14, %v4496_v9, %v4584_v35  ;;  %v4500_v38 = vmul.f32 %v6143_v30, %v4499_v40 }
 0x689   : > { %4616 = vst.msk [vmem:[%s11044_s10 + $0x58] sm:$0xff] %vm4140_vm2, %v4600_v62 }
 0x68a   : > { %v4501_v55 = vadd.f32 %v6143_v30, %v4500_v38 }
 0x68b   : > { %v6145_v63 = vpop.eup %6144 }
 0x68c   : > { %v4505_v22 = vsel %vm4504_vm11, %v6143_v30, %v4501_v55  ;;  %v4513_v39 = vmul.f32 %v6145_v63, %v4310_v61  ;;  %v4313_v15 = vpop.xlane.xlu1 %4312  ;;  %vm4518_vm15 = vweird.f32 %v6145_v63  ;;  %v4572_v30 = vld [vmem:[%s11037_s29 + $0x78] sm:$0xff] }
 0x68d   : > { %v4510_v23 = vsel %vm4507_vm12, %v4509_v17, %v4505_v22  ;;  %6146 = vrcp.f32 %v4313_v15  ;;  %vm4519_vm0 = vmor %vm4517_vm1, %vm4518_vm15  ;;  %v4538_v1 = vand.u32 2147483648, %v4313_v15  ;;  %v4536_v3 = vand.u32 2147483647, %v4313_v15 }
 0x68e   : > { %v4511_v27 = vmul.f32 %v11002_v47, %v4510_v23  ;;  %v4514_v28 = vsub.f32 1.0, %v4513_v39  ;;  %vm4532_vm4 = vweird.f32 %v4313_v15 }
 0x68f   : > { %v4539_v2 = vor.u32 1.1754944e-38, %v4538_v1  ;;  %vm4537_vm6 = vcmp.eq.f32.partialorder %v4536_v3, 8.507059e+37 }
 0x690   : > { %v4601_v46 = vsel %vm4123_vm14, %v4511_v27, %v4585_v26  ;;  %v4515_v7 = vmul.f32 %v6145_v63, %v4514_v28 }
 0x691   : > { %4617 = vst.msk [vmem:[%s11044_s10 + $0x60] sm:$0xff] %vm4140_vm2, %v4601_v46 }
 0x692   : > { %v4516_v19 = vadd.f32 %v6145_v63, %v4515_v7 }
 0x693   : > { %v6147_v51 = vpop.eup %6146 }
 0x694   : > { %v4520_v49 = vsel %vm4519_vm0, %v6145_v63, %v4516_v19  ;;  %v4528_v47 = vmul.f32 %v6147_v51, %v4313_v15  ;;  %v4316_v43 = vpop.xlane.xlu0 %4315  ;;  %vm4533_vm3 = vweird.f32 %v6147_v51 }
 0x695   : > { %v4525_v33 = vsel %vm4522_vm13, %v4524_v13, %v4520_v49  ;;  %6148 = vrcp.f32 %v4316_v43  ;;  %vm4534_vm5 = vmor %vm4532_vm4, %vm4533_vm3  ;;  %v4553_v32 = vand.u32 2147483648, %v4316_v43  ;;  %v4551_v52 = vand.u32 2147483647, %v4316_v43 }
 0x696   : > { %v4526_v8 = vmul.f32 %v11011_v24, %v4525_v33  ;;  %v4529_v16 = vsub.f32 1.0, %v4528_v47  ;;  %vm4547_vm8 = vweird.f32 %v4316_v43 }
 0x697   : > { %v4554_v5 = vor.u32 1.1754944e-38, %v4553_v32  ;;  %vm4552_vm10 = vcmp.eq.f32.partialorder %v4551_v52, 8.507059e+37 }
 0x698   : > { %v4602_v0 = vsel %vm4123_vm14, %v4526_v8, %v4586_v60  ;;  %v4530_v50 = vmul.f32 %v6147_v51, %v4529_v16 }
 0x699   : > { %4618 = vst.msk [vmem:[%s11044_s10 + $0x68] sm:$0xff] %vm4140_vm2, %v4602_v0 }
 0x69a   : > { %v4531_v18 = vadd.f32 %v6147_v51, %v4530_v50 }
 0x69b   : > { %v6149_v57 = vpop.eup %6148 }
 0x69c   : > { %v4535_v54 = vsel %vm4534_vm5, %v6147_v51, %v4531_v18  ;;  %v4543_v24 = vmul.f32 %v6149_v57, %v4316_v43  ;;  %vm4548_vm7 = vweird.f32 %v6149_v57 }
 0x69d   : > { %v4540_v44 = vsel %vm4537_vm6, %v4539_v2, %v4535_v54  ;;  %vm4549_vm9 = vmor %vm4547_vm8, %vm4548_vm7 }
 0x69e   : > { %v4541_v11 = vmul.f32 %v11020_v58, %v4540_v44  ;;  %v4544_v37 = vsub.f32 1.0, %v4543_v24  ;;  %v4588_v58 = vadd.f32 %v4572_v30, %v10882_v31 }
 0x6a0   : > { %v4603_v42 = vsel %vm4123_vm14, %v4541_v11, %v4587_v12  ;;  %v4545_v14 = vmul.f32 %v6149_v57, %v4544_v37 }
 0x6a1   : > { %4619 = vst.msk [vmem:[%s11044_s10 + $0x70] sm:$0xff] %vm4140_vm2, %v4603_v42 }
 0x6a2   : > { %v4546_v53 = vadd.f32 %v6149_v57, %v4545_v14 }
 0x6a4   : > { %v4550_v56 = vsel %vm4549_vm9, %v6149_v57, %v4546_v53 }
 0x6a5   : > { %v4555_v6 = vsel %vm4552_vm10, %v4554_v5, %v4550_v56 }
 0x6a6   : > { %v4556_v20 = vmul.f32 %v11028_v34, %v4555_v6 }
 0x6a8   : > { %v4604_v10 = vsel %vm4123_vm14, %v4556_v20, %v4588_v58 }
 0x6a9   : > { %4620 = vst.msk [vmem:[%s11044_s10 + $0x78] sm:$0xff] %vm4140_vm2, %v4604_v10 }
 0x6aa PF: > { %s17_s24 = sadd.s32 1, %s6164_s24  }
 0x6ab   : > { %p14_p4 = scmp.ge.s32.totalorder %s17_s24, 10  }
 0x6ad   :  { %16 = sbr.rel (!%p14_p4) target bundleno = 1 (0x1), region = 79 }

</bundles_post_ra>
